<compile_context>
chip_gen: v5e
topology: v5e:2x2
jax: 0.10.0
libtpu: 0.0.40
codegen_flags: <defaults>
</compile_context>

<pallas_src>
import jax
import jax.numpy as jnp
from jax.experimental import pallas as pl
from jax.experimental.pallas import tpu as pltpu

IN_DIM = 2048      # classifier1 in_features  (1024 RGB + 1024 EMG)
HID_DIM = 1024     # classifier1 out_features / classifier2 in_features


def _fusion_classifier_kernel(rgb_ref, emg_ref, w1a_ref, w1b_ref, b1_ref,
                              w2_ref, b2_ref, out_ref):
    """Single grid step; everything resident in VMEM.

    rgb_ref : [B, 1024]  f32   RGB features
    emg_ref : [B, 1024]  f32   EMG features
    w1a_ref : [1024, 1024] bf16  W1 rows multiplying RGB
    w1b_ref : [1024, 1024] bf16  W1 rows multiplying EMG
    b1_ref  : [1, 1024]  f32
    w2_ref  : [1024, CP] bf16   (CP = class dim padded to 128)
    b2_ref  : [1, CP]    f32
    out_ref : [B, CP]    f32    padded logits
    """
    # Layer 1: fused @ W1 == RGB @ W1a + EMG @ W1b, f32 MXU accumulation.
    h = jnp.dot(rgb_ref[...].astype(jnp.bfloat16), w1a_ref[...],
                preferred_element_type=jnp.float32)
    h = h + jnp.dot(emg_ref[...].astype(jnp.bfloat16), w1b_ref[...],
                    preferred_element_type=jnp.float32)
    h = h + b1_ref[...]

    # Layer 2: full logits in one shot, bias added unconditionally.
    logits = jnp.dot(h.astype(jnp.bfloat16), w2_ref[...],
                     preferred_element_type=jnp.float32)
    out_ref[...] = (logits + b2_ref[...]).astype(out_ref.dtype)


def fusion_classifier_forward(rgb, emg, params, n_classes):
    """rgb, emg: [B, 1024] float32.  Returns logits [B, n_classes] float32."""
    w1a, w1b, b1, w2p, b2p = params
    B = rgb.shape[0]
    CP = w2p.shape[1]                      # padded (lane-dense) class dim

    grid_spec = pltpu.PrefetchScalarGridSpec(
        num_scalar_prefetch=0,
        grid=(1,),
        in_specs=[
            pl.BlockSpec((B, HID_DIM), lambda i: (0, 0)),          # RGB
            pl.BlockSpec((B, HID_DIM), lambda i: (0, 0)),          # EMG
            pl.BlockSpec((HID_DIM, HID_DIM), lambda i: (0, 0)),    # W1 (RGB rows)
            pl.BlockSpec((HID_DIM, HID_DIM), lambda i: (0, 0)),    # W1 (EMG rows)
            pl.BlockSpec((1, HID_DIM), lambda i: (0, 0)),          # b1
            pl.BlockSpec((HID_DIM, CP), lambda i: (0, 0)),         # W2
            pl.BlockSpec((1, CP), lambda i: (0, 0)),               # b2
        ],
        out_specs=pl.BlockSpec((B, CP), lambda i: (0, 0)),         # padded logits
    )

    # Kernel is HBM-bound: bytes dominate, flops are trivial at B=8.
    flops = 2 * B * (IN_DIM * HID_DIM + HID_DIM * CP)
    bytes_accessed = (
        (w1a.size + w1b.size + w2p.size) * 2          # bf16 weights
        + (b1.size + b2p.size) * 4                    # f32 biases
        + (rgb.size + emg.size) * 4                   # f32 activations in
        + B * CP * 4                                  # f32 logits out
    )
    cost = pl.CostEstimate(flops=flops, transcendentals=0,
                           bytes_accessed=bytes_accessed)

    logits_padded = pl.pallas_call(
        _fusion_classifier_kernel,
        out_shape=jax.ShapeDtypeStruct((B, CP), jnp.float32),
        grid_spec=grid_spec,
        compiler_params=pltpu.CompilerParams(
            dimension_semantics=("arbitrary",),
            vmem_limit_bytes=32 << 20,
        ),
        cost_estimate=cost,
    )(rgb, emg, w1a, w1b, b1, w2p, b2p)

    # Drop the class-dim padding (tiny slice, fuses with the consumer).
    return logits_padded[:, :n_classes]


def init_params(key, n_classes):
    """Deterministic parameter init (same math as PyTorch nn.Linear init).

    W1 is stored transposed [in, out] and pre-split into RGB/EMG row blocks;
    W2/b2 are zero-padded to a lane-dense class dim (multiple of 128).
    Weight matrices are stored in bf16 (streaming dtype); biases stay f32.
    """
    k1, k2, k3, k4 = jax.random.split(key, 4)
    s1 = 1.0 / jnp.sqrt(IN_DIM)
    s2 = 1.0 / jnp.sqrt(HID_DIM)
    w1 = jax.random.uniform(k1, (IN_DIM, HID_DIM), jnp.float32, -s1, s1)
    b1 = jax.random.uniform(k2, (1, HID_DIM), jnp.float32, -s1, s1)
    w2 = jax.random.uniform(k3, (HID_DIM, n_classes), jnp.float32, -s2, s2)
    b2 = jax.random.uniform(k4, (1, n_classes), jnp.float32, -s2, s2)

    cp = ((n_classes + 127) // 128) * 128
    w2p = jnp.zeros((HID_DIM, cp), jnp.float32).at[:, :n_classes].set(w2)
    b2p = jnp.zeros((1, cp), jnp.float32).at[:, :n_classes].set(b2)

    w1a = w1[:HID_DIM].astype(jnp.bfloat16)   # rows multiplying RGB features
    w1b = w1[HID_DIM:].astype(jnp.bfloat16)   # rows multiplying EMG features
    w2p = w2p.astype(jnp.bfloat16)
    return w1a, w1b, b1, w2p, b2p


def reference_forward(rgb, emg, params, n_classes):
    """Pure-JAX reference using the same bf16-weight / f32-accumulate math."""
    w1a, w1b, b1, w2p, b2p = params
    h = (jnp.dot(rgb.astype(jnp.bfloat16), w1a, preferred_element_type=jnp.float32)
         + jnp.dot(emg.astype(jnp.bfloat16), w1b, preferred_element_type=jnp.float32)
         + b1)
    logits = jnp.dot(h.astype(jnp.bfloat16), w2p,
                     preferred_element_type=jnp.float32) + b2p
    return logits[:, :n_classes]


if __name__ == "__main__":
    B = 8
    N_CLASSES = 10

    key = jax.random.PRNGKey(0)
    k_rgb, k_emg, k_params = jax.random.split(key, 3)

    rgb = jax.random.normal(k_rgb, (B, HID_DIM), jnp.float32)   # data['RGB']
    emg = jax.random.normal(k_emg, (B, HID_DIM), jnp.float32)   # data['EMG']
    params = init_params(k_params, N_CLASSES)

    logits = fusion_classifier_forward(rgb, emg, params, N_CLASSES)
    logits = jax.block_until_ready(logits)

    ref = reference_forward(rgb, emg, params, N_CLASSES)
    assert logits.shape == (B, N_CLASSES)
    assert jnp.allclose(logits, ref, atol=2e-3, rtol=2e-3), "mismatch vs reference"

    print("KERNEL_OK")
</pallas_src>

<mosaic_0001>
module attributes {stable_mosaic.version = 11 : i64} {
  func.func @_fusion_classifier_kernel(%arg0: i32, %arg1: memref<8x1024xf32, #tpu.memory_space<vmem>>, %arg2: memref<8x1024xf32, #tpu.memory_space<vmem>>, %arg3: memref<1024x1024xbf16, #tpu.memory_space<vmem>>, %arg4: memref<1024x1024xbf16, #tpu.memory_space<vmem>>, %arg5: memref<1x1024xf32, #tpu.memory_space<vmem>>, %arg6: memref<1024x128xbf16, #tpu.memory_space<vmem>>, %arg7: memref<1x128xf32, #tpu.memory_space<vmem>>, %arg8: memref<8x128xf32, #tpu.memory_space<vmem>>) attributes {dimension_semantics = [#tpu.dimension_semantics<arbitrary>], iteration_bounds = array<i64: 1>, scalar_prefetch = 0 : i64, scratch_operands = 0 : i64, tpu.core_type = #tpu.core_type<tc>, window_params = [{pipeline_mode = #tpu.pipeline_mode<synchronous>, transform_indices = @transform_0, window_bounds = array<i64: 8, 1024>}, {pipeline_mode = #tpu.pipeline_mode<synchronous>, transform_indices = @transform_1, window_bounds = array<i64: 8, 1024>}, {pipeline_mode = #tpu.pipeline_mode<synchronous>, transform_indices = @transform_2, window_bounds = array<i64: 1024, 1024>}, {pipeline_mode = #tpu.pipeline_mode<synchronous>, transform_indices = @transform_3, window_bounds = array<i64: 1024, 1024>}, {pipeline_mode = #tpu.pipeline_mode<synchronous>, transform_indices = @transform_4, window_bounds = array<i64: 1, 1024>}, {pipeline_mode = #tpu.pipeline_mode<synchronous>, transform_indices = @transform_5, window_bounds = array<i64: 1024, 128>}, {pipeline_mode = #tpu.pipeline_mode<synchronous>, transform_indices = @transform_6, window_bounds = array<i64: 1, 128>}, {pipeline_mode = #tpu.pipeline_mode<synchronous>, transform_indices = @transform_7, window_bounds = array<i64: 8, 128>}]} {
    %c0 = arith.constant 0 : index
    %c0_0 = arith.constant 0 : index
    %0 = vector.load %arg1[%c0, %c0_0] : memref<8x1024xf32, #tpu.memory_space<vmem>>, vector<8x1024xf32>
    %1 = arith.truncf %0 : vector<8x1024xf32> to vector<8x1024xbf16>
    %c0_1 = arith.constant 0 : index
    %c0_2 = arith.constant 0 : index
    %2 = vector.load %arg3[%c0_1, %c0_2] : memref<1024x1024xbf16, #tpu.memory_space<vmem>>, vector<1024x1024xbf16>
    %cst = arith.constant dense<0.000000e+00> : vector<8x1024xf32>
    %3 = tpu.matmul %1, %2, %cst {dimension_numbers = #tpu.dot_dimension_numbers<[1], [0], [0], [1], [0, 0, 1, 1], [], []>} : vector<8x1024xbf16>, vector<1024x1024xbf16>, vector<8x1024xf32> -> vector<8x1024xf32>
    %c0_3 = arith.constant 0 : index
    %c0_4 = arith.constant 0 : index
    %4 = vector.load %arg2[%c0_3, %c0_4] : memref<8x1024xf32, #tpu.memory_space<vmem>>, vector<8x1024xf32>
    %5 = arith.truncf %4 : vector<8x1024xf32> to vector<8x1024xbf16>
    %c0_5 = arith.constant 0 : index
    %c0_6 = arith.constant 0 : index
    %6 = vector.load %arg4[%c0_5, %c0_6] : memref<1024x1024xbf16, #tpu.memory_space<vmem>>, vector<1024x1024xbf16>
    %cst_7 = arith.constant dense<0.000000e+00> : vector<8x1024xf32>
    %7 = tpu.matmul %5, %6, %cst_7 {dimension_numbers = #tpu.dot_dimension_numbers<[1], [0], [0], [1], [0, 0, 1, 1], [], []>} : vector<8x1024xbf16>, vector<1024x1024xbf16>, vector<8x1024xf32> -> vector<8x1024xf32>
    %8 = arith.addf %3, %7 : vector<8x1024xf32>
    %c0_8 = arith.constant 0 : index
    %c0_9 = arith.constant 0 : index
    %9 = vector.load %arg5[%c0_8, %c0_9] : memref<1x1024xf32, #tpu.memory_space<vmem>>, vector<1x1024xf32>
    %10 = vector.broadcast %9 : vector<1x1024xf32> to vector<8x1024xf32>
    %11 = arith.addf %8, %10 : vector<8x1024xf32>
    %12 = arith.truncf %11 : vector<8x1024xf32> to vector<8x1024xbf16>
    %c0_10 = arith.constant 0 : index
    %c0_11 = arith.constant 0 : index
    %13 = vector.load %arg6[%c0_10, %c0_11] : memref<1024x128xbf16, #tpu.memory_space<vmem>>, vector<1024x128xbf16>
    %cst_12 = arith.constant dense<0.000000e+00> : vector<8x128xf32>
    %14 = tpu.matmul %12, %13, %cst_12 {dimension_numbers = #tpu.dot_dimension_numbers<[1], [0], [0], [1], [0, 0, 1, 1], [], []>} : vector<8x1024xbf16>, vector<1024x128xbf16>, vector<8x128xf32> -> vector<8x128xf32>
    %c0_13 = arith.constant 0 : index
    %c0_14 = arith.constant 0 : index
    %15 = vector.load %arg7[%c0_13, %c0_14] : memref<1x128xf32, #tpu.memory_space<vmem>>, vector<1x128xf32>
    %16 = vector.broadcast %15 : vector<1x128xf32> to vector<8x128xf32>
    %17 = arith.addf %14, %16 : vector<8x128xf32>
    %c0_15 = arith.constant 0 : index
    %c0_16 = arith.constant 0 : index
    %18 = vector.load %arg8[%c0_15, %c0_16] : memref<8x128xf32, #tpu.memory_space<vmem>>, vector<8x128xf32>
    tpu.vector_store %arg8[%c0_15, %c0_16], %17 {strides = array<i32>} : memref<8x128xf32, #tpu.memory_space<vmem>>, vector<8x128xf32>,
    return
  }
  func.func @transform_0(%arg0: i32) -> (i32, i32) {
    %c0_i32 = arith.constant 0 : i32
    %c0_i32_0 = arith.constant 0 : i32
    %c0_i32_1 = arith.constant 0 : i32
    return %c0_i32, %c0_i32_0 : i32, i32
  }
  func.func @transform_1(%arg0: i32) -> (i32, i32) {
    %c0_i32 = arith.constant 0 : i32
    %c0_i32_0 = arith.constant 0 : i32
    %c0_i32_1 = arith.constant 0 : i32
    return %c0_i32, %c0_i32_0 : i32, i32
  }
  func.func @transform_2(%arg0: i32) -> (i32, i32) {
    %c0_i32 = arith.constant 0 : i32
    %c0_i32_0 = arith.constant 0 : i32
    %c0_i32_1 = arith.constant 0 : i32
    return %c0_i32, %c0_i32_0 : i32, i32
  }
  func.func @transform_3(%arg0: i32) -> (i32, i32) {
    %c0_i32 = arith.constant 0 : i32
    %c0_i32_0 = arith.constant 0 : i32
    %c0_i32_1 = arith.constant 0 : i32
    return %c0_i32, %c0_i32_0 : i32, i32
  }
  func.func @transform_4(%arg0: i32) -> (i32, i32) {
    %c0_i32 = arith.constant 0 : i32
    %c0_i32_0 = arith.constant 0 : i32
    %c0_i32_1 = arith.constant 0 : i32
    return %c0_i32, %c0_i32_0 : i32, i32
  }
  func.func @transform_5(%arg0: i32) -> (i32, i32) {
    %c0_i32 = arith.constant 0 : i32
    %c0_i32_0 = arith.constant 0 : i32
    %c0_i32_1 = arith.constant 0 : i32
    return %c0_i32, %c0_i32_0 : i32, i32
  }
  func.func @transform_6(%arg0: i32) -> (i32, i32) {
    %c0_i32 = arith.constant 0 : i32
    %c0_i32_0 = arith.constant 0 : i32
    %c0_i32_1 = arith.constant 0 : i32
    return %c0_i32, %c0_i32_0 : i32, i32
  }
  func.func @transform_7(%arg0: i32) -> (i32, i32) {
    %c0_i32 = arith.constant 0 : i32
    %c0_i32_0 = arith.constant 0 : i32
    %c0_i32_1 = arith.constant 0 : i32
    return %c0_i32, %c0_i32_0 : i32, i32
  }
}

</mosaic_0001>

<bundles_post_ra>
// kernel: tpu_custom_call.1
= control target key start
LH: loop header
LB: loop body
LE: loop exit
PB: predicated region body
PF: predicated region fallthrough
CT: control target
= control target key end

     0   :  { %12 = vsyncpa [#allocation3], 0  ;;  %s14643_s0 = inlined_call_operand.hbm [shape: f32[8,1024], index: 0, kind: input, shape index: {}]   ;;  %s14644_s1 = inlined_call_operand.hbm [shape: f32[8,1024], index: 1, kind: input, shape index: {}]   ;;  %s14645_s2 = inlined_call_operand.hbm [shape: bf16[1024,1024], index: 2, kind: input, shape index: {}]   ;;  %s14646_s3 = inlined_call_operand.hbm [shape: bf16[1024,1024], index: 3, kind: input, shape index: {}]   ;;  %s14647_s4 = inlined_call_operand.hbm [shape: f32[1,1024], index: 4, kind: input, shape index: {}]   ;;  %s14648_s5 = inlined_call_operand.hbm [shape: bf16[1024,128], index: 5, kind: input, shape index: {}]   ;;  %s14649_s6 = inlined_call_operand.hbm [shape: f32[1,128], index: 6, kind: input, shape index: {}]   ;;  %s14650_s7 = inlined_call_operand.hbm [shape: f32[8,128], index: 7, kind: output, shape index: {}]  }
   0x1   :  { %13 = vsyncpa [#allocation6], 0 }
   0x2   :  { %14 = vsyncpa [#allocation9], 0 }
   0x3   :  { %15 = vsyncpa [#allocation12], 0  ;;  %s33_s26 = sshll.u32 %s14644_s1, 4  ;;  %s34_s26 = int_to_ptr.hbm [resolvable:$true] %s33_s26 }
   0x4   :  { %16 = vsyncpa [#allocation4], 0  ;;  %s14298_s27 = smov [#allocation5]   ;;  %s56_s8 = sshll.u32 %s14646_s3, 4  ;;  %s57_s8 = int_to_ptr.hbm [resolvable:$true] %s56_s8 }
   0x5   :  { %s35_s28 = sshll.u32 %s14298_s27, 4  ;;  %s14299_s9 = smov [#allocation8]   ;;  %s36_s28 = int_to_ptr.vmem [resolvable:$true] %s35_s28 }
   0x6   :  { %38 = dma.hbm_to_vmem [thread:$0]  %s34_s26, 1024, %s36_s28, [#allocation6]  }
   0x7   :  { %s58_s10 = sshll.u32 %s14299_s9, 4  ;;  %s80_s13 = sshll.u32 %s14648_s5, 4  ;;  %s59_s10 = int_to_ptr.vmem [resolvable:$true] %s58_s10  ;;  %s81_s13 = int_to_ptr.hbm [resolvable:$true] %s80_s13 }
   0x8   :  { %s14300_s1 = smov 512   ;;  %s14301_s14 = smov 32  }
   0x9   :  { %64 = dma.hbm_to_vmem [thread:$0]  %s57_s8, 65536, %s59_s10, [#allocation9], %s14300_s1, %s14300_s1, %s14301_s14  }
   0xa   :  { %s14302_s15 = smov [#allocation11]   ;;  %s22_s19 = sshll.u32 %s14643_s0, 4  ;;  %s23_s19 = int_to_ptr.hbm [resolvable:$true] %s22_s19 }
   0xb   :  { %s82_s16 = sshll.u32 %s14302_s15, 4  ;;  %s14303_s3 = smov 64   ;;  %s83_s16 = int_to_ptr.vmem [resolvable:$true] %s82_s16 }
   0xc   :  { %s14304_s20 = smov 4   ;;  %s14305_s21 = smov [#allocation2]  }
   0xd   :  { %88 = dma.hbm_to_vmem [thread:$0]  %s81_s13, 8192, %s83_s16, [#allocation12], %s14303_s3, %s14303_s3, %s14304_s20  }
   0xe   :  { %s24_s22 = sshll.u32 %s14305_s21, 4  ;;  %s43_s24 = sshll.u32 %s14645_s2, 4  ;;  %s25_s22 = int_to_ptr.vmem [resolvable:$true] %s24_s22  ;;  %s44_s24 = int_to_ptr.hbm [resolvable:$true] %s43_s24 }
   0xf   :  { %27 = dma.hbm_to_vmem [thread:$0]  %s23_s19, 1024, %s25_s22, [#allocation3]  }
  0x10   :  { %s70_s27 = sshll.u32 %s14647_s4, 4  ;;  %s14306_s28 = smov [#allocation7]   ;;  %s71_s27 = int_to_ptr.hbm [resolvable:$true] %s70_s27 }
  0x11   :  { %s45_s29 = sshll.u32 %s14306_s28, 4  ;;  %s14307_s0 = smov [#allocation10]   ;;  %s46_s29 = int_to_ptr.vmem [resolvable:$true] %s45_s29 }
  0x12   :  { %51 = dma.hbm_to_vmem [thread:$0]  %s44_s24, 65536, %s46_s29, [#allocation6], %s14300_s1, %s14300_s1, %s14301_s14  }
  0x13   :  { %s72_s30 = sshll.u32 %s14307_s0, 4  ;;  %s94_s10 = sshll.u32 %s14649_s6, 4  ;;  %s73_s30 = int_to_ptr.vmem [resolvable:$true] %s72_s30  ;;  %s95_s10 = int_to_ptr.hbm [resolvable:$true] %s94_s10 }
  0x14   :  { %75 = dma.hbm_to_vmem [thread:$0]  %s71_s27, 128, %s73_s30, [#allocation9]  }
  0x15   :  { %s14308_s2 = smov [#allocation13]  }
  0x16   :  { %s96_s11 = sshll.u32 %s14308_s2, 4  ;;  %s97_s11 = int_to_ptr.vmem [resolvable:$true] %s96_s11 }
  0x17   :  { %99 = dma.hbm_to_vmem [thread:$0]  %s95_s10, 16, %s97_s11, [#allocation12]  }
  0x18   :  { %14288 = dma.done.wait [#allocation3], 1024  }
  0x19   :  { %14289 = vsyncadd [#allocation3], 4294966272 }
  0x1a   :  { %14290 = dma.done.wait [#allocation6], 66560  }
  0x1b   :  { %14291 = vsyncadd [#allocation6], 4294900736 }
  0x1c   :  { %14292 = dma.done.wait [#allocation9], 65664  }
  0x1d   :  { %14293 = vsyncadd [#allocation9], 4294901632 }
  0x1e   :  { %14294 = dma.done.wait [#allocation12], 8208  }
  0x1f   :  { %14295 = vsyncadd [#allocation12], 4294959088  ;;  %v8869_v0 = vld [vmem:[#allocation8 + $0x1c0] sm:$0xf]  ;;  %s14309_s4 = smov [#allocation14]   ;;  %s8630_s1 = sshll.u32 %s14650_s7, 4  ;;  %s8631_s1 = int_to_ptr.hbm [resolvable:$true] %s8630_s1 }
  0x20   :  { %v13567_v1 = vld [vmem:[#allocation8 + $0x1dc] sm:$0xf0]  ;;  %s8628_s6 = sshll.u32 %s14309_s4, 4  ;;  %s8629_s6 = int_to_ptr.vmem [resolvable:$true] %s8628_s6 }
  0x21   :  { %v9125_v2 = vld [vmem:[#allocation8 + $0x3c0] sm:$0xf]  ;;  %v8870_v3 = vor.u32 %v13567_v1, %v8869_v0 }
  0x22   :  { %v13631_v4 = vld [vmem:[#allocation8 + $0x3dc] sm:$0xf0] }
  0x23   :  { %v9381_v5 = vld [vmem:[#allocation8 + $0x5c0] sm:$0xf]  ;;  %v9126_v7 = vor.u32 %v13631_v4, %v9125_v2  ;;  %3744 = vmatpush.bf16.msra.mxu0 %v8870_v3 }
  0x24   :  { %v13695_v6 = vld [vmem:[#allocation8 + $0x5dc] sm:$0xf0] }
  0x25   :  { %v9382_v8 = vor.u32 %v13695_v6, %v9381_v5  ;;  %v9637_v9 = vld [vmem:[#allocation8 + $0x7c0] sm:$0xf]  ;;  %3757 = vmatpush.bf16.msra.mxu1 %v9126_v7 }
  0x26   :  { %v13759_v10 = vld [vmem:[#allocation8 + $0x7dc] sm:$0xf0] }
  0x27   :  { %v8837_v11 = vld [vmem:[#allocation8 + $0x180] sm:$0xf]  ;;  %v9638_v12 = vor.u32 %v13759_v10, %v9637_v9  ;;  %3770 = vmatpush.bf16.msra.mxu2 %v9382_v8 }
  0x28   :  { %v13559_v13 = vld [vmem:[#allocation8 + $0x19c] sm:$0xf0] }
  0x29   :  { %v9093_v14 = vld [vmem:[#allocation8 + $0x380] sm:$0xf]  ;;  %v8838_v16 = vor.u32 %v13559_v13, %v8837_v11  ;;  %3783 = vmatpush.bf16.msra.mxu3 %v9638_v12 }
  0x2a   :  { %v13623_v15 = vld [vmem:[#allocation8 + $0x39c] sm:$0xf0] }
  0x2b   :  { %v9094_v17 = vor.u32 %v13623_v15, %v9093_v14  ;;  %v9349_v18 = vld [vmem:[#allocation8 + $0x580] sm:$0xf]  ;;  %3745 = vmatpush.bf16.msra.mxu0 %v8838_v16 }
  0x2c   :  { %v13687_v19 = vld [vmem:[#allocation8 + $0x59c] sm:$0xf0] }
  0x2d   :  { %v9605_v20 = vld [vmem:[#allocation8 + $0x780] sm:$0xf]  ;;  %v9350_v21 = vor.u32 %v13687_v19, %v9349_v18  ;;  %3758 = vmatpush.bf16.msra.mxu1 %v9094_v17 }
  0x2e   :  { %v13751_v22 = vld [vmem:[#allocation8 + $0x79c] sm:$0xf0] }
  0x2f   :  { %v8805_v23 = vld [vmem:[#allocation8 + $0x140] sm:$0xf]  ;;  %v9606_v25 = vor.u32 %v13751_v22, %v9605_v20  ;;  %3771 = vmatpush.bf16.msra.mxu2 %v9350_v21 }
  0x30   :  { %v13551_v24 = vld [vmem:[#allocation8 + $0x15c] sm:$0xf0] }
  0x31   :  { %v9061_v26 = vld [vmem:[#allocation8 + $0x340] sm:$0xf]  ;;  %v8806_v29 = vor.u32 %v13551_v24, %v8805_v23  ;;  %3784 = vmatpush.bf16.msra.mxu3 %v9606_v25 }
  0x32   :  { %v13615_v27 = vld [vmem:[#allocation8 + $0x35c] sm:$0xf0] }
  0x33   :  { %v9317_v28 = vld [vmem:[#allocation8 + $0x540] sm:$0xf]  ;;  %v9062_v33 = vor.u32 %v13615_v27, %v9061_v26  ;;  %3746 = vmatpush.bf16.msra.mxu0 %v8806_v29 }
  0x34   :  { %v13679_v30 = vld [vmem:[#allocation8 + $0x55c] sm:$0xf0] }
  0x35   :  { %v9573_v31 = vld [vmem:[#allocation8 + $0x740] sm:$0xf]  ;;  %v9318_v34 = vor.u32 %v13679_v30, %v9317_v28  ;;  %3759 = vmatpush.bf16.msra.mxu1 %v9062_v33 }
  0x36   :  { %v13743_v32 = vld [vmem:[#allocation8 + $0x75c] sm:$0xf0] }
  0x37   :  { %v8773_v35 = vld [vmem:[#allocation8 + $0x100] sm:$0xf]  ;;  %v9574_v38 = vor.u32 %v13743_v32, %v9573_v31  ;;  %3772 = vmatpush.bf16.msra.mxu2 %v9318_v34 }
  0x38   :  { %v13543_v36 = vld [vmem:[#allocation8 + $0x11c] sm:$0xf0] }
  0x39   :  { %v9029_v37 = vld [vmem:[#allocation8 + $0x300] sm:$0xf]  ;;  %v8774_v44 = vor.u32 %v13543_v36, %v8773_v35  ;;  %3785 = vmatpush.bf16.msra.mxu3 %v9574_v38 }
  0x3a   :  { %v13607_v39 = vld [vmem:[#allocation8 + $0x31c] sm:$0xf0] }
  0x3b   :  { %v9285_v40 = vld [vmem:[#allocation8 + $0x500] sm:$0xf]  ;;  %v9030_v45 = vor.u32 %v13607_v39, %v9029_v37  ;;  %3747 = vmatpush.bf16.msra.mxu0 %v8774_v44 }
  0x3c   :  { %v13671_v41 = vld [vmem:[#allocation8 + $0x51c] sm:$0xf0] }
  0x3d   :  { %v9541_v42 = vld [vmem:[#allocation8 + $0x700] sm:$0xf]  ;;  %v9286_v46 = vor.u32 %v13671_v41, %v9285_v40  ;;  %3760 = vmatpush.bf16.msra.mxu1 %v9030_v45 }
  0x3e   :  { %v13735_v43 = vld [vmem:[#allocation8 + $0x71c] sm:$0xf0] }
  0x3f   :  { %v8741_v47 = vld [vmem:[#allocation8 + $0xc0] sm:$0xf]  ;;  %v9542_v50 = vor.u32 %v13735_v43, %v9541_v42  ;;  %3773 = vmatpush.bf16.msra.mxu2 %v9286_v46 }
  0x40   :  { %v13535_v48 = vld [vmem:[#allocation8 + $0xdc] sm:$0xf0] }
  0x41   :  { %v8997_v49 = vld [vmem:[#allocation8 + $0x2c0] sm:$0xf]  ;;  %v8742_v56 = vor.u32 %v13535_v48, %v8741_v47  ;;  %3786 = vmatpush.bf16.msra.mxu3 %v9542_v50 }
  0x42   :  { %v13599_v51 = vld [vmem:[#allocation8 + $0x2dc] sm:$0xf0] }
  0x43   :  { %v9253_v52 = vld [vmem:[#allocation8 + $0x4c0] sm:$0xf]  ;;  %v8998_v57 = vor.u32 %v13599_v51, %v8997_v49  ;;  %3748 = vmatpush.bf16.msra.mxu0 %v8742_v56 }
  0x44   :  { %v13663_v53 = vld [vmem:[#allocation8 + $0x4dc] sm:$0xf0] }
  0x45   :  { %v9509_v54 = vld [vmem:[#allocation8 + $0x6c0] sm:$0xf]  ;;  %v9254_v58 = vor.u32 %v13663_v53, %v9253_v52  ;;  %3761 = vmatpush.bf16.msra.mxu1 %v8998_v57 }
  0x46   :  { %v13727_v55 = vld [vmem:[#allocation8 + $0x6dc] sm:$0xf0] }
  0x47   :  { %v8709_v59 = vld [vmem:[#allocation8 + $0x80] sm:$0xf]  ;;  %v9510_v62 = vor.u32 %v13727_v55, %v9509_v54  ;;  %3774 = vmatpush.bf16.msra.mxu2 %v9254_v58  ;;  %v658_v58 = vld [vmem:[#allocation5 + $0x10] sm:$0xff] }
  0x48   :  { %v13527_v60 = vld [vmem:[#allocation8 + $0x9c] sm:$0xf0] }
  0x49   :  { %v8965_v61 = vld [vmem:[#allocation8 + $0x280] sm:$0xf]  ;;  %v8710_v4 = vor.u32 %v13527_v60, %v8709_v59  ;;  %3787 = vmatpush.bf16.msra.mxu3 %v9510_v62 }
  0x4a   :  { %v13591_v63 = vld [vmem:[#allocation8 + $0x29c] sm:$0xf0] }
  0x4b   :  { %v9221_v0 = vld [vmem:[#allocation8 + $0x480] sm:$0xf]  ;;  %v8966_v5 = vor.u32 %v13591_v63, %v8965_v61  ;;  %3749 = vmatpush.bf16.msra.mxu0 %v8710_v4  ;;  %v14371_v63 = vpack.c.bf16 %v658_v58, %v658_v58 }
  0x4c   :  { %v13655_v1 = vld [vmem:[#allocation8 + $0x49c] sm:$0xf0] }
  0x4d   :  { %v9477_v2 = vld [vmem:[#allocation8 + $0x680] sm:$0xf]  ;;  %v9222_v6 = vor.u32 %v13655_v1, %v9221_v0  ;;  %3762 = vmatpush.bf16.msra.mxu1 %v8966_v5 }
  0x4e   :  { %v13719_v3 = vld [vmem:[#allocation8 + $0x69c] sm:$0xf0] }
  0x4f   :  { %v8677_v7 = vld [vmem:[#allocation8 + $0x40] sm:$0xf]  ;;  %v9478_v10 = vor.u32 %v13719_v3, %v9477_v2  ;;  %3775 = vmatpush.bf16.msra.mxu2 %v9222_v6 }
  0x50   :  { %v13519_v8 = vld [vmem:[#allocation8 + $0x5c] sm:$0xf0] }
  0x51   :  { %v8933_v9 = vld [vmem:[#allocation8 + $0x240] sm:$0xf]  ;;  %v8678_v16 = vor.u32 %v13519_v8, %v8677_v7  ;;  %3788 = vmatpush.bf16.msra.mxu3 %v9478_v10  ;;  %v659_v10 = vld [vmem:[#allocation5 + $0x18] sm:$0xff] }
  0x52   :  { %v13583_v11 = vld [vmem:[#allocation8 + $0x25c] sm:$0xf0] }
  0x53   :  { %v9189_v12 = vld [vmem:[#allocation8 + $0x440] sm:$0xf]  ;;  %v8934_v19 = vor.u32 %v13583_v11, %v8933_v9  ;;  %3750 = vmatpush.bf16.msra.mxu0 %v8678_v16  ;;  %v657_v11 = vld [vmem:[#allocation5 + $0x8] sm:$0xff]  ;;  %v14376_v16 = vpack.c.bf16 %v659_v10, %v659_v10  ;;  %v9127_v10 = vld [vmem:[#allocation8 + $0x3e0] sm:$0xf0] }
  0x54   :  { %v13647_v13 = vld [vmem:[#allocation8 + $0x45c] sm:$0xf0] }
  0x55   :  { %v9445_v14 = vld [vmem:[#allocation8 + $0x640] sm:$0xf]  ;;  %v9190_v20 = vor.u32 %v13647_v13, %v9189_v12  ;;  %3763 = vmatpush.bf16.msra.mxu1 %v8934_v19 }
  0x56   :  { %v13711_v15 = vld [vmem:[#allocation8 + $0x65c] sm:$0xf0] }
  0x57   :  { %v8645_v17 = vld [vmem:[#allocation8] sm:$0xf]  ;;  %v9446_v24 = vor.u32 %v13711_v15, %v9445_v14  ;;  %3776 = vmatpush.bf16.msra.mxu2 %v9190_v20 }
  0x58   :  { %v13511_v18 = vld [vmem:[#allocation8 + $0x1c] sm:$0xf0] }
  0x59   :  { %v8901_v21 = vld [vmem:[#allocation8 + $0x200] sm:$0xf]  ;;  %v8646_v31 = vor.u32 %v13511_v18, %v8645_v17  ;;  %3789 = vmatpush.bf16.msra.mxu3 %v9446_v24  ;;  %v14378_v17 = vpack.c.bf16 %v657_v11, %v657_v11  ;;  %v13691_v11 = vld [vmem:[#allocation8 + $0x5c4] sm:$0xf] }
  0x5a   :  { %v13575_v22 = vld [vmem:[#allocation8 + $0x21c] sm:$0xf0] }
  0x5b   :  { %v9157_v23 = vld [vmem:[#allocation8 + $0x400] sm:$0xf]  ;;  %v8902_v35 = vor.u32 %v13575_v22, %v8901_v21  ;;  %3751 = vmatpush.bf16.msra.mxu0 %v8646_v31 }
  0x5c   :  { %v13639_v25 = vld [vmem:[#allocation8 + $0x41c] sm:$0xf0] }
  0x5d   :  { %v9413_v26 = vld [vmem:[#allocation8 + $0x600] sm:$0xf]  ;;  %v9158_v36 = vor.u32 %v13639_v25, %v9157_v23  ;;  %3764 = vmatpush.bf16.msra.mxu1 %v8902_v35 }
  0x5e   :  { %v13703_v27 = vld [vmem:[#allocation8 + $0x61c] sm:$0xf0] }
  0x5f   :  { %v9893_v28 = vld [vmem:[#allocation8 + $0x9c0] sm:$0xf]  ;;  %v9414_v39 = vor.u32 %v13703_v27, %v9413_v26  ;;  %3777 = vmatpush.bf16.msra.mxu2 %v9158_v36 }
  0x60   :  { %v13823_v29 = vld [vmem:[#allocation8 + $0x9dc] sm:$0xf0]  ;;  %3765 = vmatmul.bf16.vlgmr.msra.gmra.mxu1 %v14378_v17 }
  0x61   :  { %v10149_v30 = vld [vmem:[#allocation8 + $0xbc0] sm:$0xf]  ;;  %v9894_v40 = vor.u32 %v13823_v29, %v9893_v28  ;;  %3790 = vmatpush.bf16.msra.mxu3 %v9414_v39 }
  0x62   :  { %v13887_v32 = vld [vmem:[#allocation8 + $0xbdc] sm:$0xf0]  ;;  %3778 = vmatmul.bf16.vlgmr.msra.gmra.mxu2 %v14371_v63 }
  0x63   :  { %v10405_v33 = vld [vmem:[#allocation8 + $0xdc0] sm:$0xf]  ;;  %v10150_v41 = vor.u32 %v13887_v32, %v10149_v30  ;;  %3796 = vmatpush.bf16.msrb.mxu0 %v9894_v40 }
  0x64   :  { %v13951_v34 = vld [vmem:[#allocation8 + $0xddc] sm:$0xf0]  ;;  %3791 = vmatmul.bf16.vlgmr.msra.gmra.mxu3 %v14376_v16 }
  0x65   :  { %v10661_v37 = vld [vmem:[#allocation8 + $0xfc0] sm:$0xf]  ;;  %v10406_v42 = vor.u32 %v13951_v34, %v10405_v33  ;;  %3809 = vmatpush.bf16.msrb.mxu1 %v10150_v41 }
  0x66   :  { %v14015_v38 = vld [vmem:[#allocation8 + $0xfdc] sm:$0xf0] }
  0x67   :  { %v9861_v43 = vld [vmem:[#allocation8 + $0x980] sm:$0xf]  ;;  %v10662_v46 = vor.u32 %v14015_v38, %v10661_v37  ;;  %3822 = vmatpush.bf16.msrb.mxu2 %v10406_v42 }
  0x68   :  { %v13815_v44 = vld [vmem:[#allocation8 + $0x99c] sm:$0xf0] }
  0x69   :  { %v10117_v45 = vld [vmem:[#allocation8 + $0xb80] sm:$0xf]  ;;  %v9862_v52 = vor.u32 %v13815_v44, %v9861_v43  ;;  %3835 = vmatpush.bf16.msrb.mxu3 %v10662_v46 }
  0x6a   :  { %v13879_v47 = vld [vmem:[#allocation8 + $0xb9c] sm:$0xf0] }
  0x6b   :  { %v10373_v48 = vld [vmem:[#allocation8 + $0xd80] sm:$0xf]  ;;  %v10118_v54 = vor.u32 %v13879_v47, %v10117_v45  ;;  %3797 = vmatpush.bf16.msrb.mxu0 %v9862_v52 }
  0x6c   :  { %v13943_v49 = vld [vmem:[#allocation8 + $0xd9c] sm:$0xf0] }
  0x6d   :  { %v10629_v50 = vld [vmem:[#allocation8 + $0xf80] sm:$0xf]  ;;  %v10374_v55 = vor.u32 %v13943_v49, %v10373_v48  ;;  %3810 = vmatpush.bf16.msrb.mxu1 %v10118_v54 }
  0x6e   :  { %v14007_v51 = vld [vmem:[#allocation8 + $0xf9c] sm:$0xf0] }
  0x6f   :  { %v9829_v53 = vld [vmem:[#allocation8 + $0x940] sm:$0xf]  ;;  %v10630_v59 = vor.u32 %v14007_v51, %v10629_v50  ;;  %3823 = vmatpush.bf16.msrb.mxu2 %v10374_v55 }
  0x70   :  { %v13807_v56 = vld [vmem:[#allocation8 + $0x95c] sm:$0xf0] }
  0x71   :  { %v10085_v57 = vld [vmem:[#allocation8 + $0xb40] sm:$0xf]  ;;  %v9830_v2 = vor.u32 %v13807_v56, %v9829_v53  ;;  %3836 = vmatpush.bf16.msrb.mxu3 %v10630_v59 }
  0x72   :  { %v13871_v60 = vld [vmem:[#allocation8 + $0xb5c] sm:$0xf0] }
  0x73   :  { %v10341_v61 = vld [vmem:[#allocation8 + $0xd40] sm:$0xf]  ;;  %v10086_v6 = vor.u32 %v13871_v60, %v10085_v57  ;;  %3798 = vmatpush.bf16.msrb.mxu0 %v9830_v2 }
  0x74   :  { %v13935_v62 = vld [vmem:[#allocation8 + $0xd5c] sm:$0xf0] }
  0x75   :  { %v10597_v0 = vld [vmem:[#allocation8 + $0xf40] sm:$0xf]  ;;  %v10342_v7 = vor.u32 %v13935_v62, %v10341_v61  ;;  %3811 = vmatpush.bf16.msrb.mxu1 %v10086_v6  ;;  %v8871_v6 = vld [vmem:[#allocation8 + $0x1e0] sm:$0xf0] }
  0x76   :  { %v13999_v1 = vld [vmem:[#allocation8 + $0xf5c] sm:$0xf0] }
  0x77   :  { %v9797_v3 = vld [vmem:[#allocation8 + $0x900] sm:$0xf]  ;;  %v10598_v12 = vor.u32 %v13999_v1, %v10597_v0  ;;  %3824 = vmatpush.bf16.msrb.mxu2 %v10342_v7  ;;  %v13627_v7 = vld [vmem:[#allocation8 + $0x3c4] sm:$0xf] }
  0x78   :  { %v13799_v4 = vld [vmem:[#allocation8 + $0x91c] sm:$0xf0] }
  0x79   :  { %v656_v5 = vld [vmem:[#allocation5] sm:$0xff]  ;;  %v9798_v20 = vor.u32 %v13799_v4, %v9797_v3  ;;  %3837 = vmatpush.bf16.msrb.mxu3 %v10598_v12 }
  0x7a   :  { %v10053_v8 = vld [vmem:[#allocation8 + $0xb00] sm:$0xf]  ;;  %v14374_v9 = vpack.c.bf16 %v656_v5, %v656_v5  ;;  %v13563_v5 = vld [vmem:[#allocation8 + $0x1c4] sm:$0xf] }
  0x7b   :  { %v13863_v13 = vld [vmem:[#allocation8 + $0xb1c] sm:$0xf0]  ;;  %3799 = vmatpush.bf16.msrb.mxu0 %v9798_v20  ;;  %v9383_v12 = vld [vmem:[#allocation8 + $0x5e0] sm:$0xf0] }
  0x7c   :  { %v10309_v14 = vld [vmem:[#allocation8 + $0xd00] sm:$0xf]  ;;  %3752 = vmatmul.bf16.vlgmr.msra.gmra.mxu0 %v14374_v9  ;;  %v10054_v21 = vor.u32 %v13863_v13, %v10053_v8 }
  0x7d   :  { %v13927_v15 = vld [vmem:[#allocation8 + $0xd1c] sm:$0xf0] }
  0x7e   :  { %v10565_v18 = vld [vmem:[#allocation8 + $0xf00] sm:$0xf]  ;;  %v10310_v22 = vor.u32 %v13927_v15, %v10309_v14  ;;  %3812 = vmatpush.bf16.msrb.mxu1 %v10054_v21  ;;  %v13755_v15 = vld [vmem:[#allocation8 + $0x7c4] sm:$0xf]  ;;  %v8874_v21 = vor.u32 %v13563_v5, %v8871_v6 }
  0x7f   :  { %v13991_v19 = vld [vmem:[#allocation8 + $0xf1c] sm:$0xf0]  ;;  %v8743_v5 = vld [vmem:[#allocation8 + $0xe0] sm:$0xf0] }
  0x80   :  { %v9765_v23 = vld [vmem:[#allocation8 + $0x8c0] sm:$0xf]  ;;  %v10566_v26 = vor.u32 %v13991_v19, %v10565_v18  ;;  %3825 = vmatpush.bf16.msrb.mxu2 %v10310_v22  ;;  %v9639_v18 = vld [vmem:[#allocation8 + $0x7e0] sm:$0xf0]  ;;  %v662_v19 = vld [vmem:[#allocation5 + $0x30] sm:$0xff] }
  0x81   :  { %v13791_v24 = vld [vmem:[#allocation8 + $0x8dc] sm:$0xf0]  ;;  %v13555_v22 = vld [vmem:[#allocation8 + $0x184] sm:$0xf] }
  0x82   :  { %v10021_v25 = vld [vmem:[#allocation8 + $0xac0] sm:$0xf]  ;;  %v9766_v32 = vor.u32 %v13791_v24, %v9765_v23  ;;  %3838 = vmatpush.bf16.msrb.mxu3 %v10566_v26  ;;  %v663_v24 = vld [vmem:[#allocation5 + $0x38] sm:$0xff]  ;;  %v9386_v26 = vor.u32 %v13691_v11, %v9383_v12  ;;  %v13595_v6 = vld [vmem:[#allocation8 + $0x2c4] sm:$0xf] }
  0x83   :  { %v13855_v27 = vld [vmem:[#allocation8 + $0xadc] sm:$0xf0]  ;;  %v9255_v11 = vld [vmem:[#allocation8 + $0x4e0] sm:$0xf0] }
  0x84   :  { %v10277_v28 = vld [vmem:[#allocation8 + $0xcc0] sm:$0xf]  ;;  %v10022_v33 = vor.u32 %v13855_v27, %v10021_v25  ;;  %3800 = vmatpush.bf16.msrb.mxu0 %v9766_v32  ;;  %v9130_v25 = vor.u32 %v13627_v7, %v9127_v10  ;;  %v8839_v27 = vld [vmem:[#allocation8 + $0x1a0] sm:$0xf0] }
  0x85   :  { %v13919_v29 = vld [vmem:[#allocation8 + $0xcdc] sm:$0xf0]  ;;  %v13683_v32 = vld [vmem:[#allocation8 + $0x584] sm:$0xf] }
  0x86   :  { %v10533_v30 = vld [vmem:[#allocation8 + $0xec0] sm:$0xf]  ;;  %v10278_v34 = vor.u32 %v13919_v29, %v10277_v28  ;;  %3813 = vmatpush.bf16.msrb.mxu1 %v10022_v33  ;;  %v13619_v28 = vld [vmem:[#allocation8 + $0x384] sm:$0xf]  ;;  %v661_v29 = vld [vmem:[#allocation5 + $0x28] sm:$0xff] }
  0x87   :  { %v13983_v31 = vld [vmem:[#allocation8 + $0xedc] sm:$0xf0]  ;;  %v9351_v33 = vld [vmem:[#allocation8 + $0x5a0] sm:$0xf0] }
  0x88   :  { %v9733_v35 = vld [vmem:[#allocation8 + $0x880] sm:$0xf]  ;;  %v10534_v38 = vor.u32 %v13983_v31, %v10533_v30  ;;  %3826 = vmatpush.bf16.msrb.mxu2 %v10278_v34  ;;  %v9642_v30 = vor.u32 %v13755_v15, %v9639_v18  ;;  %v9095_v31 = vld [vmem:[#allocation8 + $0x3a0] sm:$0xf0]  ;;  %v14383_v34 = vpack.c.bf16 %v662_v19, %v662_v19 }
  0x89   :  { %v13783_v36 = vld [vmem:[#allocation8 + $0x89c] sm:$0xf0]  ;;  %v13659_v10 = vld [vmem:[#allocation8 + $0x4c4] sm:$0xf] }
  0x8a   :  { %v9989_v37 = vld [vmem:[#allocation8 + $0xa80] sm:$0xf]  ;;  %v9734_v44 = vor.u32 %v13783_v36, %v9733_v35  ;;  %3839 = vmatpush.bf16.msrb.mxu3 %v10534_v38  ;;  %v13747_v35 = vld [vmem:[#allocation8 + $0x784] sm:$0xf]  ;;  %v14387_v38 = vpack.c.bf16 %v663_v24, %v663_v24  ;;  %v9258_v18 = vor.u32 %v13659_v10, %v9255_v11 }
  0x8b   :  { %v13847_v39 = vld [vmem:[#allocation8 + $0xa9c] sm:$0xf0]  ;;  %v9607_v36 = vld [vmem:[#allocation8 + $0x7a0] sm:$0xf0] }
  0x8c   :  { %v10245_v40 = vld [vmem:[#allocation8 + $0xc80] sm:$0xf]  ;;  %v9990_v45 = vor.u32 %v13847_v39, %v9989_v37  ;;  %3801 = vmatpush.bf16.msrb.mxu0 %v9734_v44  ;;  %v8842_v39 = vor.u32 %v13555_v22, %v8839_v27  ;;  %v8807_v44 = vld [vmem:[#allocation8 + $0x160] sm:$0xf0] }
  0x8d   :  { %v13911_v41 = vld [vmem:[#allocation8 + $0xc9c] sm:$0xf0]  ;;  %v13723_v12 = vld [vmem:[#allocation8 + $0x6c4] sm:$0xf] }
  0x8e   :  { %v10501_v42 = vld [vmem:[#allocation8 + $0xe80] sm:$0xf]  ;;  %v10246_v46 = vor.u32 %v13911_v41, %v10245_v40  ;;  %3814 = vmatpush.bf16.msrb.mxu1 %v9990_v45  ;;  %v14389_v40 = vpack.c.bf16 %v661_v29, %v661_v29  ;;  %v9098_v41 = vor.u32 %v13619_v28, %v9095_v31  ;;  %v13611_v45 = vld [vmem:[#allocation8 + $0x344] sm:$0xf] }
  0x8f   :  { %v13975_v43 = vld [vmem:[#allocation8 + $0xe9c] sm:$0xf0]  ;;  %v13523_v19 = vld [vmem:[#allocation8 + $0x84] sm:$0xf] }
  0x90   :  { %v9701_v47 = vld [vmem:[#allocation8 + $0x840] sm:$0xf]  ;;  %v10502_v50 = vor.u32 %v13975_v43, %v10501_v42  ;;  %3827 = vmatpush.bf16.msrb.mxu2 %v10246_v46  ;;  %v9354_v42 = vor.u32 %v13683_v32, %v9351_v33  ;;  %v13547_v43 = vld [vmem:[#allocation8 + $0x144] sm:$0xf]  ;;  %v9610_v46 = vor.u32 %v13747_v35, %v9607_v36 }
  0x91   :  { %v13775_v48 = vld [vmem:[#allocation8 + $0x85c] sm:$0xf0]  ;;  %v13651_v24 = vld [vmem:[#allocation8 + $0x484] sm:$0xf] }
  0x92   :  { %v9957_v49 = vld [vmem:[#allocation8 + $0xa40] sm:$0xf]  ;;  %v9702_v56 = vor.u32 %v13775_v48, %v9701_v47  ;;  %3840 = vmatpush.bf16.msrb.mxu3 %v10502_v50  ;;  %v9063_v47 = vld [vmem:[#allocation8 + $0x360] sm:$0xf0] }
  0x93   :  { %v13839_v51 = vld [vmem:[#allocation8 + $0xa5c] sm:$0xf0]  ;;  %v13675_v48 = vld [vmem:[#allocation8 + $0x544] sm:$0xf] }
  0x94   :  { %v10213_v52 = vld [vmem:[#allocation8 + $0xc40] sm:$0xf]  ;;  %v9958_v59 = vor.u32 %v13839_v51, %v9957_v49  ;;  %3802 = vmatpush.bf16.msrb.mxu0 %v9702_v56  ;;  %v9319_v49 = vld [vmem:[#allocation8 + $0x560] sm:$0xf0] }
  0x95   :  { %v13903_v53 = vld [vmem:[#allocation8 + $0xc5c] sm:$0xf0]  ;;  %v13739_v50 = vld [vmem:[#allocation8 + $0x744] sm:$0xf] }
  0x96   :  { %v10469_v54 = vld [vmem:[#allocation8 + $0xe40] sm:$0xf]  ;;  %v10214_v60 = vor.u32 %v13903_v53, %v10213_v52  ;;  %3815 = vmatpush.bf16.msrb.mxu1 %v9958_v59  ;;  %v9575_v51 = vld [vmem:[#allocation8 + $0x760] sm:$0xf0]  ;;  %v8810_v52 = vor.u32 %v13547_v43, %v8807_v44  ;;  %v9066_v53 = vor.u32 %v13611_v45, %v9063_v47 }
  0x97   :  { %v13967_v55 = vld [vmem:[#allocation8 + $0xe5c] sm:$0xf0]  ;;  %v8775_v56 = vld [vmem:[#allocation8 + $0x120] sm:$0xf0] }
  0x98   :  { %v9669_v57 = vld [vmem:[#allocation8 + $0x800] sm:$0xf]  ;;  %v10470_v1 = vor.u32 %v13967_v55, %v10469_v54  ;;  %3828 = vmatpush.bf16.msrb.mxu2 %v10214_v60  ;;  %v9322_v54 = vor.u32 %v13675_v48, %v9319_v49  ;;  %v13539_v55 = vld [vmem:[#allocation8 + $0x104] sm:$0xf] }
  0x99   :  { %v13767_v58 = vld [vmem:[#allocation8 + $0x81c] sm:$0xf0]  ;;  %v9031_v59 = vld [vmem:[#allocation8 + $0x320] sm:$0xf0] }
  0x9a   :  { %v9925_v61 = vld [vmem:[#allocation8 + $0xa00] sm:$0xf]  ;;  %v9670_v8 = vor.u32 %v13767_v58, %v9669_v57  ;;  %3841 = vmatpush.bf16.msrb.mxu3 %v10470_v1  ;;  %v13603_v57 = vld [vmem:[#allocation8 + $0x304] sm:$0xf]  ;;  %v9578_v58 = vor.u32 %v13739_v50, %v9575_v51  ;;  %v8778_v1 = vor.u32 %v13539_v55, %v8775_v56 }
  0x9b   :  { %v13831_v62 = vld [vmem:[#allocation8 + $0xa1c] sm:$0xf0]  ;;  %v13667_v60 = vld [vmem:[#allocation8 + $0x504] sm:$0xf] }
  0x9c   :  { %v10181_v0 = vld [vmem:[#allocation8 + $0xc00] sm:$0xf]  ;;  %v9926_v13 = vor.u32 %v13831_v62, %v9925_v61  ;;  %3803 = vmatpush.bf16.msrb.mxu0 %v9670_v8  ;;  %v9287_v61 = vld [vmem:[#allocation8 + $0x520] sm:$0xf0] }
  0x9d   :  { %v13895_v2 = vld [vmem:[#allocation8 + $0xc1c] sm:$0xf0]  ;;  %v13731_v62 = vld [vmem:[#allocation8 + $0x704] sm:$0xf] }
  0x9e   :  { %v10437_v3 = vld [vmem:[#allocation8 + $0xe00] sm:$0xf]  ;;  %v10182_v14 = vor.u32 %v13895_v2, %v10181_v0  ;;  %3816 = vmatpush.bf16.msrb.mxu1 %v9926_v13  ;;  %v9543_v0 = vld [vmem:[#allocation8 + $0x720] sm:$0xf0]  ;;  %v9034_v2 = vor.u32 %v13603_v57, %v9031_v59 }
  0x9f   :  { %v13959_v4 = vld [vmem:[#allocation8 + $0xe1c] sm:$0xf0]  ;;  %v9546_v7 = vor.u32 %v13731_v62, %v9543_v0  ;;  %v8999_v8 = vld [vmem:[#allocation8 + $0x2e0] sm:$0xf0] }
  0xa0   :  { %v10438_v20 = vor.u32 %v13959_v4, %v10437_v3  ;;  %v660_v23 = vld [vmem:[#allocation5 + $0x20] sm:$0xff]  ;;  %3829 = vmatpush.bf16.msrb.mxu2 %v10182_v14  ;;  %3848 = vmatpush.bf16.msra.mxu0 %v8874_v21  ;;  %v9290_v3 = vor.u32 %v13667_v60, %v9287_v61  ;;  %v9002_v15 = vor.u32 %v13595_v6, %v8999_v8 }
  0xa1   :  { %v14385_v37 = vpack.c.bf16 %v660_v23, %v660_v23  ;;  %3817 = vmatmul.bf16.vlgmr.msrb.gmra.mxu1 %v14389_v40  ;;  %v13531_v4 = vld [vmem:[#allocation8 + $0xc4] sm:$0xf] }
  0xa2   :  { %3842 = vmatpush.bf16.msrb.mxu3 %v10438_v20  ;;  %3861 = vmatpush.bf16.msra.mxu1 %v9130_v25  ;;  %v9511_v13 = vld [vmem:[#allocation8 + $0x6e0] sm:$0xf0]  ;;  %v8746_v14 = vor.u32 %v13531_v4, %v8743_v5 }
  0xa3   :  { %3830 = vmatmul.bf16.vlgmr.msrb.gmra.mxu2 %v14383_v34  ;;  %3804 = vmatmul.bf16.vlgmr.msrb.gmra.mxu0 %v14385_v37  ;;  %v8711_v20 = vld [vmem:[#allocation8 + $0xa0] sm:$0xf0]  ;;  %v9514_v22 = vor.u32 %v13723_v12, %v9511_v13 }
  0xa4   :  { %3874 = vmatpush.bf16.msra.mxu2 %v9386_v26  ;;  %3849 = vmatpush.bf16.msra.mxu0 %v8842_v39  ;;  %v13587_v21 = vld [vmem:[#allocation8 + $0x284] sm:$0xf]  ;;  %v8714_v28 = vor.u32 %v13523_v19, %v8711_v20 }
  0xa5   :  { %3843 = vmatmul.bf16.vlgmr.msrb.gmra.mxu3 %v14387_v38  ;;  %v8967_v23 = vld [vmem:[#allocation8 + $0x2a0] sm:$0xf0] }
  0xa6   :  { %3887 = vmatpush.bf16.msra.mxu3 %v9642_v30  ;;  %3862 = vmatpush.bf16.msra.mxu1 %v9098_v41  ;;  %v9223_v25 = vld [vmem:[#allocation8 + $0x4a0] sm:$0xf0]  ;;  %v8970_v29 = vor.u32 %v13587_v21, %v8967_v23 }
  0xa7   :  { %v13715_v26 = vld [vmem:[#allocation8 + $0x684] sm:$0xf]  ;;  %v9226_v30 = vor.u32 %v13651_v24, %v9223_v25 }
  0xa8   :  { %3875 = vmatpush.bf16.msra.mxu2 %v9354_v42  ;;  %3850 = vmatpush.bf16.msra.mxu0 %v8810_v52  ;;  %v9479_v27 = vld [vmem:[#allocation8 + $0x6a0] sm:$0xf0] }
  0xa9   :  { %v13515_v31 = vld [vmem:[#allocation8 + $0x44] sm:$0xf]  ;;  %v9482_v35 = vor.u32 %v13715_v26, %v9479_v27 }
  0xaa   :  { %3888 = vmatpush.bf16.msra.mxu3 %v9610_v46  ;;  %3863 = vmatpush.bf16.msra.mxu1 %v9066_v53  ;;  %v8679_v32 = vld [vmem:[#allocation8 + $0x60] sm:$0xf0] }
  0xab   :  { %v13579_v33 = vld [vmem:[#allocation8 + $0x244] sm:$0xf]  ;;  %v8682_v44 = vor.u32 %v13515_v31, %v8679_v32 }
  0xac   :  { %3876 = vmatpush.bf16.msra.mxu2 %v9322_v54  ;;  %3851 = vmatpush.bf16.msra.mxu0 %v8778_v1  ;;  %v8935_v36 = vld [vmem:[#allocation8 + $0x260] sm:$0xf0] }
  0xad   :  { %v13643_v39 = vld [vmem:[#allocation8 + $0x444] sm:$0xf]  ;;  %v8938_v47 = vor.u32 %v13579_v33, %v8935_v36 }
  0xae   :  { %3889 = vmatpush.bf16.msra.mxu3 %v9578_v58  ;;  %3864 = vmatpush.bf16.msra.mxu1 %v9034_v2  ;;  %v9191_v41 = vld [vmem:[#allocation8 + $0x460] sm:$0xf0] }
  0xaf   :  { %v13707_v42 = vld [vmem:[#allocation8 + $0x644] sm:$0xf]  ;;  %v9194_v48 = vor.u32 %v13643_v39, %v9191_v41 }
  0xb0   :  { %3877 = vmatpush.bf16.msra.mxu2 %v9290_v3  ;;  %3852 = vmatpush.bf16.msra.mxu0 %v8746_v14  ;;  %v9447_v43 = vld [vmem:[#allocation8 + $0x660] sm:$0xf0] }
  0xb1   :  { %v13507_v45 = vld [vmem:[#allocation8 + $0x4] sm:$0xf]  ;;  %v9450_v52 = vor.u32 %v13707_v42, %v9447_v43 }
  0xb2   :  { %3890 = vmatpush.bf16.msra.mxu3 %v9546_v7  ;;  %3865 = vmatpush.bf16.msra.mxu1 %v9002_v15  ;;  %v8647_v46 = vld [vmem:[#allocation8 + $0x20] sm:$0xf0] }
  0xb3   :  { %v13571_v49 = vld [vmem:[#allocation8 + $0x204] sm:$0xf]  ;;  %v8650_v59 = vor.u32 %v13507_v45, %v8647_v46 }
  0xb4   :  { %3878 = vmatpush.bf16.msra.mxu2 %v9258_v18  ;;  %3853 = vmatpush.bf16.msra.mxu0 %v8714_v28  ;;  %v8903_v50 = vld [vmem:[#allocation8 + $0x220] sm:$0xf0] }
  0xb5   :  { %v13635_v51 = vld [vmem:[#allocation8 + $0x404] sm:$0xf]  ;;  %v8906_v0 = vor.u32 %v13571_v49, %v8903_v50 }
  0xb6   :  { %3891 = vmatpush.bf16.msra.mxu3 %v9514_v22  ;;  %3866 = vmatpush.bf16.msra.mxu1 %v8970_v29  ;;  %v9159_v53 = vld [vmem:[#allocation8 + $0x420] sm:$0xf0] }
  0xb7   :  { %v13699_v54 = vld [vmem:[#allocation8 + $0x604] sm:$0xf]  ;;  %v9162_v1 = vor.u32 %v13635_v51, %v9159_v53 }
  0xb8   :  { %3879 = vmatpush.bf16.msra.mxu2 %v9226_v30  ;;  %v9415_v55 = vld [vmem:[#allocation8 + $0x620] sm:$0xf0]  ;;  %3854 = vmatpush.bf16.msra.mxu0 %v8682_v44 }
  0xb9   :  { %v13819_v56 = vld [vmem:[#allocation8 + $0x9c4] sm:$0xf]  ;;  %v9418_v4 = vor.u32 %v13699_v54, %v9415_v55 }
  0xba   :  { %3892 = vmatpush.bf16.msra.mxu3 %v9482_v35  ;;  %v9895_v57 = vld [vmem:[#allocation8 + $0x9e0] sm:$0xf0]  ;;  %3867 = vmatpush.bf16.msra.mxu1 %v8938_v47 }
  0xbb   :  { %v13883_v58 = vld [vmem:[#allocation8 + $0xbc4] sm:$0xf]  ;;  %v9898_v5 = vor.u32 %v13819_v56, %v9895_v57 }
  0xbc   :  { %v10151_v60 = vld [vmem:[#allocation8 + $0xbe0] sm:$0xf0]  ;;  %3880 = vmatpush.bf16.msra.mxu2 %v9194_v48  ;;  %3855 = vmatpush.bf16.msra.mxu0 %v8650_v59 }
  0xbd   :  { %v13947_v61 = vld [vmem:[#allocation8 + $0xdc4] sm:$0xf]  ;;  %v10154_v6 = vor.u32 %v13883_v58, %v10151_v60 }
  0xbe   :  { %v10407_v62 = vld [vmem:[#allocation8 + $0xde0] sm:$0xf0]  ;;  %3893 = vmatpush.bf16.msra.mxu3 %v9450_v52  ;;  %3868 = vmatpush.bf16.msra.mxu1 %v8906_v0 }
  0xbf   :  { %v14011_v2 = vld [vmem:[#allocation8 + $0xfc4] sm:$0xf]  ;;  %v10410_v7 = vor.u32 %v13947_v61, %v10407_v62  ;;  %3856 = vmatmul.bf16.vlgmr.msra.gmra.mxu0 %v14374_v9 }
  0xc0   :  { %v10663_v3 = vld [vmem:[#allocation8 + $0xfe0] sm:$0xf0]  ;;  %3881 = vmatpush.bf16.msra.mxu2 %v9162_v1  ;;  %3900 = vmatpush.bf16.msrb.mxu0 %v9898_v5 }
  0xc1   :  { %v13811_v8 = vld [vmem:[#allocation8 + $0x984] sm:$0xf]  ;;  %v10666_v12 = vor.u32 %v14011_v2, %v10663_v3  ;;  %3869 = vmatmul.bf16.vlgmr.msra.gmra.mxu1 %v14378_v17 }
  0xc2   :  { %v9863_v10 = vld [vmem:[#allocation8 + $0x9a0] sm:$0xf0]  ;;  %3894 = vmatpush.bf16.msra.mxu3 %v9418_v4  ;;  %3913 = vmatpush.bf16.msrb.mxu1 %v10154_v6 }
  0xc3   :  { %v13875_v11 = vld [vmem:[#allocation8 + $0xb84] sm:$0xf]  ;;  %v9866_v20 = vor.u32 %v13811_v8, %v9863_v10  ;;  %3882 = vmatmul.bf16.vlgmr.msra.gmra.mxu2 %v14371_v63 }
  0xc4   :  { %v10119_v13 = vld [vmem:[#allocation8 + $0xba0] sm:$0xf0]  ;;  %3926 = vmatpush.bf16.msrb.mxu2 %v10410_v7 }
  0xc5   :  { %v13939_v14 = vld [vmem:[#allocation8 + $0xd84] sm:$0xf]  ;;  %v10122_v21 = vor.u32 %v13875_v11, %v10119_v13  ;;  %3895 = vmatmul.bf16.vlgmr.msra.gmra.mxu3 %v14376_v16  ;;  %3901 = vmatpush.bf16.msrb.mxu0 %v9866_v20 }
  0xc6   :  { %v10375_v15 = vld [vmem:[#allocation8 + $0xda0] sm:$0xf0]  ;;  %3939 = vmatpush.bf16.msrb.mxu3 %v10666_v12 }
  0xc7   :  { %v14003_v18 = vld [vmem:[#allocation8 + $0xf84] sm:$0xf]  ;;  %v10378_v22 = vor.u32 %v13939_v14, %v10375_v15  ;;  %3914 = vmatpush.bf16.msrb.mxu1 %v10122_v21 }
  0xc8   :  { %v10631_v19 = vld [vmem:[#allocation8 + $0xfa0] sm:$0xf0] }
  0xc9   :  { %v13803_v23 = vld [vmem:[#allocation8 + $0x944] sm:$0xf]  ;;  %v10634_v26 = vor.u32 %v14003_v18, %v10631_v19  ;;  %3927 = vmatpush.bf16.msrb.mxu2 %v10378_v22 }
  0xca   :  { %v9831_v24 = vld [vmem:[#allocation8 + $0x960] sm:$0xf0] }
  0xcb   :  { %v13867_v25 = vld [vmem:[#allocation8 + $0xb44] sm:$0xf]  ;;  %v9834_v32 = vor.u32 %v13803_v23, %v9831_v24  ;;  %3940 = vmatpush.bf16.msrb.mxu3 %v10634_v26 }
  0xcc   :  { %v10087_v27 = vld [vmem:[#allocation8 + $0xb60] sm:$0xf0] }
  0xcd   :  { %v13931_v28 = vld [vmem:[#allocation8 + $0xd44] sm:$0xf]  ;;  %v10090_v33 = vor.u32 %v13867_v25, %v10087_v27  ;;  %3902 = vmatpush.bf16.msrb.mxu0 %v9834_v32 }
  0xce   :  { %v10343_v29 = vld [vmem:[#allocation8 + $0xd60] sm:$0xf0] }
  0xcf   :  { %v13995_v30 = vld [vmem:[#allocation8 + $0xf44] sm:$0xf]  ;;  %v10346_v35 = vor.u32 %v13931_v28, %v10343_v29  ;;  %3915 = vmatpush.bf16.msrb.mxu1 %v10090_v33 }
  0xd0   :  { %v10599_v31 = vld [vmem:[#allocation8 + $0xf60] sm:$0xf0] }
  0xd1   :  { %v13795_v36 = vld [vmem:[#allocation8 + $0x904] sm:$0xf]  ;;  %v10602_v42 = vor.u32 %v13995_v30, %v10599_v31  ;;  %3928 = vmatpush.bf16.msrb.mxu2 %v10346_v35 }
  0xd2   :  { %v9799_v39 = vld [vmem:[#allocation8 + $0x920] sm:$0xf0] }
  0xd3   :  { %v13859_v41 = vld [vmem:[#allocation8 + $0xb04] sm:$0xf]  ;;  %v9802_v48 = vor.u32 %v13795_v36, %v9799_v39  ;;  %3941 = vmatpush.bf16.msrb.mxu3 %v10602_v42  ;;  %v8877_v39 = vld [vmem:[#allocation8 + $0x1c8] sm:$0xf] }
  0xd4   :  { %v10055_v43 = vld [vmem:[#allocation8 + $0xb20] sm:$0xf0]  ;;  %v9133_v42 = vld [vmem:[#allocation8 + $0x3c8] sm:$0xf] }
  0xd5   :  { %v13923_v44 = vld [vmem:[#allocation8 + $0xd04] sm:$0xf]  ;;  %v10058_v49 = vor.u32 %v13859_v41, %v10055_v43  ;;  %3903 = vmatpush.bf16.msrb.mxu0 %v9802_v48  ;;  %v13568_v41 = vld [vmem:[#allocation8 + $0x1e4] sm:$0xf0] }
  0xd6   :  { %v10311_v45 = vld [vmem:[#allocation8 + $0xd20] sm:$0xf0] }
  0xd7   :  { %v13987_v46 = vld [vmem:[#allocation8 + $0xf04] sm:$0xf]  ;;  %v10314_v50 = vor.u32 %v13923_v44, %v10311_v45  ;;  %3916 = vmatpush.bf16.msrb.mxu1 %v10058_v49  ;;  %v13632_v44 = vld [vmem:[#allocation8 + $0x3e4] sm:$0xf0] }
  0xd8   :  { %v10567_v47 = vld [vmem:[#allocation8 + $0xf20] sm:$0xf0]  ;;  %v9389_v45 = vld [vmem:[#allocation8 + $0x5c8] sm:$0xf] }
  0xd9   :  { %v13787_v51 = vld [vmem:[#allocation8 + $0x8c4] sm:$0xf]  ;;  %v10570_v54 = vor.u32 %v13987_v46, %v10567_v47  ;;  %3929 = vmatpush.bf16.msrb.mxu2 %v10314_v50  ;;  %v13696_v46 = vld [vmem:[#allocation8 + $0x5e4] sm:$0xf0] }
  0xda   :  { %v9767_v52 = vld [vmem:[#allocation8 + $0x8e0] sm:$0xf0]  ;;  %v9645_v49 = vld [vmem:[#allocation8 + $0x7c8] sm:$0xf] }
  0xdb   :  { %v13851_v53 = vld [vmem:[#allocation8 + $0xac4] sm:$0xf]  ;;  %v9770_v60 = vor.u32 %v13787_v51, %v9767_v52  ;;  %3942 = vmatpush.bf16.msrb.mxu3 %v10570_v54  ;;  %v13760_v50 = vld [vmem:[#allocation8 + $0x7e4] sm:$0xf0]  ;;  %v8878_v52 = vor.u32 %v13568_v41, %v8877_v39  ;;  %v9390_v54 = vor.u32 %v13696_v46, %v9389_v45 }
  0xdc   :  { %v10023_v55 = vld [vmem:[#allocation8 + $0xae0] sm:$0xf0]  ;;  %v9261_v39 = vld [vmem:[#allocation8 + $0x4c8] sm:$0xf] }
  0xdd   :  { %v13915_v56 = vld [vmem:[#allocation8 + $0xcc4] sm:$0xf]  ;;  %v10026_v61 = vor.u32 %v13851_v53, %v10023_v55  ;;  %3904 = vmatpush.bf16.msrb.mxu0 %v9770_v60  ;;  %v9134_v53 = vor.u32 %v13632_v44, %v9133_v42  ;;  %v8845_v55 = vld [vmem:[#allocation8 + $0x188] sm:$0xf] }
  0xde   :  { %v10279_v57 = vld [vmem:[#allocation8 + $0xce0] sm:$0xf0]  ;;  %v9357_v60 = vld [vmem:[#allocation8 + $0x588] sm:$0xf] }
  0xdf   :  { %v13979_v58 = vld [vmem:[#allocation8 + $0xec4] sm:$0xf]  ;;  %v10282_v62 = vor.u32 %v13915_v56, %v10279_v57  ;;  %3917 = vmatpush.bf16.msrb.mxu1 %v10026_v61  ;;  %v13560_v56 = vld [vmem:[#allocation8 + $0x1a4] sm:$0xf0] }
  0xe0   :  { %v10535_v59 = vld [vmem:[#allocation8 + $0xee0] sm:$0xf0]  ;;  %v9101_v57 = vld [vmem:[#allocation8 + $0x388] sm:$0xf] }
  0xe1   :  { %v13779_v0 = vld [vmem:[#allocation8 + $0x884] sm:$0xf]  ;;  %v10538_v3 = vor.u32 %v13979_v58, %v10535_v59  ;;  %3930 = vmatpush.bf16.msrb.mxu2 %v10282_v62  ;;  %v9646_v58 = vor.u32 %v13760_v50, %v9645_v49  ;;  %v13624_v59 = vld [vmem:[#allocation8 + $0x3a4] sm:$0xf0] }
  0xe2   :  { %v9735_v1 = vld [vmem:[#allocation8 + $0x8a0] sm:$0xf0]  ;;  %v13688_v61 = vld [vmem:[#allocation8 + $0x5a4] sm:$0xf0] }
  0xe3   :  { %v13843_v2 = vld [vmem:[#allocation8 + $0xa84] sm:$0xf]  ;;  %v9738_v10 = vor.u32 %v13779_v0, %v9735_v1  ;;  %3943 = vmatpush.bf16.msrb.mxu3 %v10538_v3  ;;  %v9613_v62 = vld [vmem:[#allocation8 + $0x788] sm:$0xf]  ;;  %v8846_v1 = vor.u32 %v13560_v56, %v8845_v55  ;;  %v9358_v3 = vor.u32 %v13688_v61, %v9357_v60 }
  0xe4   :  { %v9991_v4 = vld [vmem:[#allocation8 + $0xaa0] sm:$0xf0]  ;;  %v13752_v0 = vld [vmem:[#allocation8 + $0x7a4] sm:$0xf0] }
  0xe5   :  { %v13907_v5 = vld [vmem:[#allocation8 + $0xc84] sm:$0xf]  ;;  %v9994_v11 = vor.u32 %v13843_v2, %v9991_v4  ;;  %3905 = vmatpush.bf16.msrb.mxu0 %v9738_v10  ;;  %v9102_v2 = vor.u32 %v13624_v59, %v9101_v57  ;;  %v8813_v4 = vld [vmem:[#allocation8 + $0x148] sm:$0xf] }
  0xe6   :  { %v10247_v6 = vld [vmem:[#allocation8 + $0xca0] sm:$0xf0]  ;;  %v9325_v10 = vld [vmem:[#allocation8 + $0x548] sm:$0xf] }
  0xe7   :  { %v13971_v7 = vld [vmem:[#allocation8 + $0xe84] sm:$0xf]  ;;  %v10250_v12 = vor.u32 %v13907_v5, %v10247_v6  ;;  %3918 = vmatpush.bf16.msrb.mxu1 %v9994_v11  ;;  %v13552_v5 = vld [vmem:[#allocation8 + $0x164] sm:$0xf0] }
  0xe8   :  { %v10503_v8 = vld [vmem:[#allocation8 + $0xea0] sm:$0xf0]  ;;  %v9069_v6 = vld [vmem:[#allocation8 + $0x348] sm:$0xf] }
  0xe9   :  { %v13771_v13 = vld [vmem:[#allocation8 + $0x844] sm:$0xf]  ;;  %v10506_v18 = vor.u32 %v13971_v7, %v10503_v8  ;;  %3931 = vmatpush.bf16.msrb.mxu2 %v10250_v12  ;;  %v9614_v7 = vor.u32 %v13752_v0, %v9613_v62  ;;  %v13616_v8 = vld [vmem:[#allocation8 + $0x364] sm:$0xf0] }
  0xea   :  { %v9703_v14 = vld [vmem:[#allocation8 + $0x860] sm:$0xf0]  ;;  %v13680_v11 = vld [vmem:[#allocation8 + $0x564] sm:$0xf0] }
  0xeb   :  { %v13835_v15 = vld [vmem:[#allocation8 + $0xa44] sm:$0xf]  ;;  %v9706_v24 = vor.u32 %v13771_v13, %v9703_v14  ;;  %3944 = vmatpush.bf16.msrb.mxu3 %v10506_v18  ;;  %v9581_v12 = vld [vmem:[#allocation8 + $0x748] sm:$0xf]  ;;  %v8814_v14 = vor.u32 %v13552_v5, %v8813_v4  ;;  %v9326_v18 = vor.u32 %v13680_v11, %v9325_v10 }
  0xec   :  { %v9959_v19 = vld [vmem:[#allocation8 + $0xa60] sm:$0xf0]  ;;  %v13744_v13 = vld [vmem:[#allocation8 + $0x764] sm:$0xf0] }
  0xed   :  { %v13899_v20 = vld [vmem:[#allocation8 + $0xc44] sm:$0xf]  ;;  %v9962_v27 = vor.u32 %v13835_v15, %v9959_v19  ;;  %3906 = vmatpush.bf16.msrb.mxu0 %v9706_v24  ;;  %v9070_v15 = vor.u32 %v13616_v8, %v9069_v6  ;;  %v8781_v19 = vld [vmem:[#allocation8 + $0x108] sm:$0xf] }
  0xee   :  { %v10215_v21 = vld [vmem:[#allocation8 + $0xc60] sm:$0xf0]  ;;  %v9293_v24 = vld [vmem:[#allocation8 + $0x508] sm:$0xf] }
  0xef   :  { %v13963_v22 = vld [vmem:[#allocation8 + $0xe44] sm:$0xf]  ;;  %v10218_v28 = vor.u32 %v13899_v20, %v10215_v21  ;;  %3919 = vmatpush.bf16.msrb.mxu1 %v9962_v27  ;;  %v13544_v20 = vld [vmem:[#allocation8 + $0x124] sm:$0xf0] }
  0xf0   :  { %v10471_v23 = vld [vmem:[#allocation8 + $0xe60] sm:$0xf0]  ;;  %v9037_v21 = vld [vmem:[#allocation8 + $0x308] sm:$0xf] }
  0xf1   :  { %v13763_v25 = vld [vmem:[#allocation8 + $0x804] sm:$0xf]  ;;  %v10474_v32 = vor.u32 %v13963_v22, %v10471_v23  ;;  %3932 = vmatpush.bf16.msrb.mxu2 %v10218_v28  ;;  %v9582_v22 = vor.u32 %v13744_v13, %v9581_v12  ;;  %v13608_v23 = vld [vmem:[#allocation8 + $0x324] sm:$0xf0]  ;;  %v8782_v28 = vor.u32 %v13544_v20, %v8781_v19 }
  0xf2   :  { %v9671_v26 = vld [vmem:[#allocation8 + $0x820] sm:$0xf0]  ;;  %v13736_v27 = vld [vmem:[#allocation8 + $0x724] sm:$0xf0] }
  0xf3   :  { %v13827_v29 = vld [vmem:[#allocation8 + $0xa04] sm:$0xf]  ;;  %v9674_v43 = vor.u32 %v13763_v25, %v9671_v26  ;;  %3945 = vmatpush.bf16.msrb.mxu3 %v10474_v32  ;;  %v13672_v25 = vld [vmem:[#allocation8 + $0x524] sm:$0xf0] }
  0xf4   :  { %v9927_v30 = vld [vmem:[#allocation8 + $0xa20] sm:$0xf0]  ;;  %v9549_v26 = vld [vmem:[#allocation8 + $0x708] sm:$0xf] }
  0xf5   :  { %v13891_v31 = vld [vmem:[#allocation8 + $0xc04] sm:$0xf]  ;;  %v9930_v47 = vor.u32 %v13827_v29, %v9927_v30  ;;  %3907 = vmatpush.bf16.msrb.mxu0 %v9674_v43  ;;  %v9038_v29 = vor.u32 %v13608_v23, %v9037_v21  ;;  %v9294_v30 = vor.u32 %v13672_v25, %v9293_v24  ;;  %v13536_v32 = vld [vmem:[#allocation8 + $0xe4] sm:$0xf0] }
  0xf6   :  { %v10183_v33 = vld [vmem:[#allocation8 + $0xc20] sm:$0xf0]  ;;  %v13664_v41 = vld [vmem:[#allocation8 + $0x4e4] sm:$0xf0] }
  0xf7   :  { %v13955_v35 = vld [vmem:[#allocation8 + $0xe04] sm:$0xf]  ;;  %v10186_v48 = vor.u32 %v13891_v31, %v10183_v33  ;;  %3920 = vmatpush.bf16.msrb.mxu1 %v9930_v47  ;;  %v8749_v31 = vld [vmem:[#allocation8 + $0xc8] sm:$0xf]  ;;  %v9262_v46 = vor.u32 %v13664_v41, %v9261_v39 }
  0xf8   :  { %v10439_v36 = vld [vmem:[#allocation8 + $0xe20] sm:$0xf0]  ;;  %3908 = vmatmul.bf16.vlgmr.msrb.gmra.mxu0 %v14385_v37  ;;  %v9005_v33 = vld [vmem:[#allocation8 + $0x2c8] sm:$0xf]  ;;  %v8750_v44 = vor.u32 %v13536_v32, %v8749_v31 }
  0xf9   :  { %v10442_v51 = vor.u32 %v13955_v35, %v10439_v36  ;;  %3933 = vmatpush.bf16.msrb.mxu2 %v10186_v48  ;;  %3952 = vmatpush.bf16.msra.mxu0 %v8878_v52  ;;  %v9550_v35 = vor.u32 %v13736_v27, %v9549_v26  ;;  %v13600_v36 = vld [vmem:[#allocation8 + $0x2e4] sm:$0xf0] }
  0xfa   :  { %3921 = vmatmul.bf16.vlgmr.msrb.gmra.mxu1 %v14389_v40  ;;  %v9517_v42 = vld [vmem:[#allocation8 + $0x6c8] sm:$0xf]  ;;  %v9006_v45 = vor.u32 %v13600_v36, %v9005_v33 }
  0xfb   :  { %3946 = vmatpush.bf16.msrb.mxu3 %v10442_v51  ;;  %3965 = vmatpush.bf16.msra.mxu1 %v9134_v53  ;;  %v13728_v43 = vld [vmem:[#allocation8 + $0x6e4] sm:$0xf0] }
  0xfc   :  { %3934 = vmatmul.bf16.vlgmr.msrb.gmra.mxu2 %v14383_v34  ;;  %v8717_v47 = vld [vmem:[#allocation8 + $0x88] sm:$0xf]  ;;  %v9518_v50 = vor.u32 %v13728_v43, %v9517_v42 }
  0xfd   :  { %3978 = vmatpush.bf16.msra.mxu2 %v9390_v54  ;;  %3953 = vmatpush.bf16.msra.mxu0 %v8846_v1  ;;  %v13528_v48 = vld [vmem:[#allocation8 + $0xa4] sm:$0xf0] }
  0xfe   :  { %3947 = vmatmul.bf16.vlgmr.msrb.gmra.mxu3 %v14387_v38  ;;  %v8973_v49 = vld [vmem:[#allocation8 + $0x288] sm:$0xf]  ;;  %v8718_v56 = vor.u32 %v13528_v48, %v8717_v47 }
  0xff   :  { %3991 = vmatpush.bf16.msra.mxu3 %v9646_v58  ;;  %3966 = vmatpush.bf16.msra.mxu1 %v9102_v2  ;;  %v13592_v51 = vld [vmem:[#allocation8 + $0x2a4] sm:$0xf0] }
 0x100   :  { %v9229_v52 = vld [vmem:[#allocation8 + $0x488] sm:$0xf]  ;;  %v8974_v57 = vor.u32 %v13592_v51, %v8973_v49 }
 0x101   :  { %3979 = vmatpush.bf16.msra.mxu2 %v9358_v3  ;;  %3954 = vmatpush.bf16.msra.mxu0 %v8814_v14  ;;  %v13656_v53 = vld [vmem:[#allocation8 + $0x4a4] sm:$0xf0] }
 0x102   :  { %v9485_v54 = vld [vmem:[#allocation8 + $0x688] sm:$0xf]  ;;  %v9230_v58 = vor.u32 %v13656_v53, %v9229_v52 }
 0x103   :  { %3992 = vmatpush.bf16.msra.mxu3 %v9614_v7  ;;  %3967 = vmatpush.bf16.msra.mxu1 %v9070_v15  ;;  %v13720_v55 = vld [vmem:[#allocation8 + $0x6a4] sm:$0xf0] }
 0x104   :  { %v8685_v59 = vld [vmem:[#allocation8 + $0x48] sm:$0xf]  ;;  %v9486_v62 = vor.u32 %v13720_v55, %v9485_v54 }
 0x105   :  { %3980 = vmatpush.bf16.msra.mxu2 %v9326_v18  ;;  %3955 = vmatpush.bf16.msra.mxu0 %v8782_v28  ;;  %v13520_v60 = vld [vmem:[#allocation8 + $0x64] sm:$0xf0] }
 0x106   :  { %v8941_v61 = vld [vmem:[#allocation8 + $0x248] sm:$0xf]  ;;  %v8686_v5 = vor.u32 %v13520_v60, %v8685_v59 }
 0x107   :  { %3993 = vmatpush.bf16.msra.mxu3 %v9582_v22  ;;  %3968 = vmatpush.bf16.msra.mxu1 %v9038_v29  ;;  %v13584_v0 = vld [vmem:[#allocation8 + $0x264] sm:$0xf0] }
 0x108   :  { %v9197_v1 = vld [vmem:[#allocation8 + $0x448] sm:$0xf]  ;;  %v8942_v8 = vor.u32 %v13584_v0, %v8941_v61 }
 0x109   :  { %3981 = vmatpush.bf16.msra.mxu2 %v9294_v30  ;;  %3956 = vmatpush.bf16.msra.mxu0 %v8750_v44  ;;  %v13648_v2 = vld [vmem:[#allocation8 + $0x464] sm:$0xf0] }
 0x10a   :  { %v9453_v3 = vld [vmem:[#allocation8 + $0x648] sm:$0xf]  ;;  %v9198_v10 = vor.u32 %v13648_v2, %v9197_v1 }
 0x10b   :  { %3994 = vmatpush.bf16.msra.mxu3 %v9550_v35  ;;  %3969 = vmatpush.bf16.msra.mxu1 %v9006_v45  ;;  %v13712_v4 = vld [vmem:[#allocation8 + $0x664] sm:$0xf0] }
 0x10c   :  { %v8653_v6 = vld [vmem:[#allocation8 + $0x8] sm:$0xf]  ;;  %v9454_v14 = vor.u32 %v13712_v4, %v9453_v3 }
 0x10d   :  { %3982 = vmatpush.bf16.msra.mxu2 %v9262_v46  ;;  %3957 = vmatpush.bf16.msra.mxu0 %v8718_v56  ;;  %v13512_v7 = vld [vmem:[#allocation8 + $0x24] sm:$0xf0] }
 0x10e   :  { %v8909_v11 = vld [vmem:[#allocation8 + $0x208] sm:$0xf]  ;;  %v8654_v23 = vor.u32 %v13512_v7, %v8653_v6 }
 0x10f   :  { %3995 = vmatpush.bf16.msra.mxu3 %v9518_v50  ;;  %3970 = vmatpush.bf16.msra.mxu1 %v8974_v57  ;;  %v13576_v12 = vld [vmem:[#allocation8 + $0x224] sm:$0xf0] }
 0x110   :  { %v9165_v13 = vld [vmem:[#allocation8 + $0x408] sm:$0xf]  ;;  %v8910_v27 = vor.u32 %v13576_v12, %v8909_v11 }
 0x111   :  { %3983 = vmatpush.bf16.msra.mxu2 %v9230_v58  ;;  %v13640_v15 = vld [vmem:[#allocation8 + $0x424] sm:$0xf0]  ;;  %3958 = vmatpush.bf16.msra.mxu0 %v8686_v5 }
 0x112   :  { %v9421_v18 = vld [vmem:[#allocation8 + $0x608] sm:$0xf]  ;;  %v9166_v28 = vor.u32 %v13640_v15, %v9165_v13 }
 0x113   :  { %3996 = vmatpush.bf16.msra.mxu3 %v9486_v62  ;;  %v13704_v19 = vld [vmem:[#allocation8 + $0x624] sm:$0xf0]  ;;  %3971 = vmatpush.bf16.msra.mxu1 %v8942_v8 }
 0x114   :  { %v9901_v20 = vld [vmem:[#allocation8 + $0x9c8] sm:$0xf]  ;;  %v9422_v31 = vor.u32 %v13704_v19, %v9421_v18 }
 0x115   :  { %v13824_v21 = vld [vmem:[#allocation8 + $0x9e4] sm:$0xf0]  ;;  %3984 = vmatpush.bf16.msra.mxu2 %v9198_v10  ;;  %3959 = vmatpush.bf16.msra.mxu0 %v8654_v23 }
 0x116   :  { %v10157_v22 = vld [vmem:[#allocation8 + $0xbc8] sm:$0xf]  ;;  %v9902_v32 = vor.u32 %v13824_v21, %v9901_v20 }
 0x117   :  { %v13888_v24 = vld [vmem:[#allocation8 + $0xbe4] sm:$0xf0]  ;;  %3997 = vmatpush.bf16.msra.mxu3 %v9454_v14  ;;  %3972 = vmatpush.bf16.msra.mxu1 %v8910_v27 }
 0x118   :  { %v10413_v25 = vld [vmem:[#allocation8 + $0xdc8] sm:$0xf]  ;;  %v10158_v33 = vor.u32 %v13888_v24, %v10157_v22  ;;  %3960 = vmatmul.bf16.vlgmr.msra.gmra.mxu0 %v14374_v9 }
 0x119   :  { %v13952_v26 = vld [vmem:[#allocation8 + $0xde4] sm:$0xf0]  ;;  %3985 = vmatpush.bf16.msra.mxu2 %v9166_v28  ;;  %4004 = vmatpush.bf16.msrb.mxu0 %v9902_v32 }
 0x11a   :  { %v10669_v29 = vld [vmem:[#allocation8 + $0xfc8] sm:$0xf]  ;;  %v10414_v35 = vor.u32 %v13952_v26, %v10413_v25  ;;  %3973 = vmatmul.bf16.vlgmr.msra.gmra.mxu1 %v14378_v17  ;;  %v3753_v25 = vpop.f32.mrf.mxu0 }
 0x11b   :  { %v14016_v30 = vld [vmem:[#allocation8 + $0xfe4] sm:$0xf0]  ;;  %3998 = vmatpush.bf16.msra.mxu3 %v9422_v31  ;;  %4017 = vmatpush.bf16.msrb.mxu1 %v10158_v33 }
 0x11c   :  { %v9869_v36 = vld [vmem:[#allocation8 + $0x988] sm:$0xf]  ;;  %v10670_v42 = vor.u32 %v14016_v30, %v10669_v29  ;;  %3986 = vmatmul.bf16.vlgmr.msra.gmra.mxu2 %v14371_v63 }
 0x11d   :  { %v13816_v39 = vld [vmem:[#allocation8 + $0x9a4] sm:$0xf0]  ;;  %4030 = vmatpush.bf16.msrb.mxu2 %v10414_v35 }
 0x11e   :  { %v10125_v41 = vld [vmem:[#allocation8 + $0xb88] sm:$0xf]  ;;  %v9870_v48 = vor.u32 %v13816_v39, %v9869_v36  ;;  %3999 = vmatmul.bf16.vlgmr.msra.gmra.mxu3 %v14376_v16 }
 0x11f   :  { %v13880_v43 = vld [vmem:[#allocation8 + $0xba4] sm:$0xf0]  ;;  %4043 = vmatpush.bf16.msrb.mxu3 %v10670_v42  ;;  %v3779_v42 = vpop.f32.mrf.mxu2 }
 0x120   :  { %v10381_v44 = vld [vmem:[#allocation8 + $0xd88] sm:$0xf]  ;;  %v10126_v49 = vor.u32 %v13880_v43, %v10125_v41  ;;  %4005 = vmatpush.bf16.msrb.mxu0 %v9870_v48  ;;  %v3766_v41 = vpop.f32.mrf.mxu1 }
 0x121   :  { %v13944_v45 = vld [vmem:[#allocation8 + $0xda4] sm:$0xf0] }
 0x122   :  { %v10637_v46 = vld [vmem:[#allocation8 + $0xf88] sm:$0xf]  ;;  %v10382_v50 = vor.u32 %v13944_v45, %v10381_v44  ;;  %4018 = vmatpush.bf16.msrb.mxu1 %v10126_v49  ;;  %v3767_v44 = vadd.f32 %v3766_v41, %v3753_v25  ;;  %v13748_v41 = vld [vmem:[#allocation8 + $0x78c] sm:$0xf] }
 0x123   :  { %v14008_v47 = vld [vmem:[#allocation8 + $0xfa4] sm:$0xf0] }
 0x124   :  { %v9837_v51 = vld [vmem:[#allocation8 + $0x948] sm:$0xf]  ;;  %v10638_v54 = vor.u32 %v14008_v47, %v10637_v46  ;;  %4031 = vmatpush.bf16.msrb.mxu2 %v10382_v50 }
 0x125   :  { %v13808_v52 = vld [vmem:[#allocation8 + $0x964] sm:$0xf0] }
 0x126   :  { %v10093_v53 = vld [vmem:[#allocation8 + $0xb48] sm:$0xf]  ;;  %v9838_v60 = vor.u32 %v13808_v52, %v9837_v51  ;;  %4044 = vmatpush.bf16.msrb.mxu3 %v10638_v54  ;;  %v3780_v54 = vadd.f32 %v3779_v42, %v3767_v44  ;;  %v9615_v42 = vld [vmem:[#allocation8 + $0x7a8] sm:$0xf0] }
 0x127   :  { %v13872_v55 = vld [vmem:[#allocation8 + $0xb64] sm:$0xf0] }
 0x128   :  { %v10349_v56 = vld [vmem:[#allocation8 + $0xd48] sm:$0xf]  ;;  %v10094_v61 = vor.u32 %v13872_v55, %v10093_v53  ;;  %4006 = vmatpush.bf16.msrb.mxu0 %v9838_v60 }
 0x129   :  { %v13936_v57 = vld [vmem:[#allocation8 + $0xd64] sm:$0xf0] }
 0x12a   :  { %v10605_v58 = vld [vmem:[#allocation8 + $0xf48] sm:$0xf]  ;;  %v10350_v62 = vor.u32 %v13936_v57, %v10349_v56  ;;  %4019 = vmatpush.bf16.msrb.mxu1 %v10094_v61  ;;  %v3792_v57 = vpop.f32.mrf.mxu3 }
 0x12b   :  { %v14000_v59 = vld [vmem:[#allocation8 + $0xf64] sm:$0xf0]  ;;  %v14407_v61 = vadd.f32 %v3792_v57, %v3780_v54  ;;  %v9583_v54 = vld [vmem:[#allocation8 + $0x768] sm:$0xf0] }
 0x12c   :  { %v9805_v0 = vld [vmem:[#allocation8 + $0x908] sm:$0xf]  ;;  %v10606_v3 = vor.u32 %v14000_v59, %v10605_v58  ;;  %4032 = vmatpush.bf16.msrb.mxu2 %v10350_v62  ;;  %v3755_v62 = vpop.f32.mrf.mxu0 }
 0x12d   :  { %v13800_v1 = vld [vmem:[#allocation8 + $0x924] sm:$0xf0] }
 0x12e   :  { %v10061_v2 = vld [vmem:[#allocation8 + $0xb08] sm:$0xf]  ;;  %v9806_v10 = vor.u32 %v13800_v1, %v9805_v0  ;;  %4045 = vmatpush.bf16.msrb.mxu3 %v10606_v3 }
 0x12f   :  { %v13864_v4 = vld [vmem:[#allocation8 + $0xb24] sm:$0xf0] }
 0x130   :  { %v10317_v5 = vld [vmem:[#allocation8 + $0xd08] sm:$0xf]  ;;  %v10062_v11 = vor.u32 %v13864_v4, %v10061_v2  ;;  %4007 = vmatpush.bf16.msrb.mxu0 %v9806_v10  ;;  %v13564_v10 = vld [vmem:[#allocation8 + $0x1cc] sm:$0xf] }
 0x131   :  { %v13928_v6 = vld [vmem:[#allocation8 + $0xd24] sm:$0xf0] }
 0x132   :  { %v10573_v7 = vld [vmem:[#allocation8 + $0xf08] sm:$0xf]  ;;  %v10318_v12 = vor.u32 %v13928_v6, %v10317_v5  ;;  %4020 = vmatpush.bf16.msrb.mxu1 %v10062_v11  ;;  %v8879_v11 = vld [vmem:[#allocation8 + $0x1e8] sm:$0xf0] }
 0x133   :  { %v13992_v8 = vld [vmem:[#allocation8 + $0xf24] sm:$0xf0] }
 0x134   :  { %v9773_v13 = vld [vmem:[#allocation8 + $0x8c8] sm:$0xf]  ;;  %v10574_v18 = vor.u32 %v13992_v8, %v10573_v7  ;;  %4033 = vmatpush.bf16.msrb.mxu2 %v10318_v12  ;;  %v13628_v12 = vld [vmem:[#allocation8 + $0x3cc] sm:$0xf] }
 0x135   :  { %v13792_v14 = vld [vmem:[#allocation8 + $0x8e4] sm:$0xf0] }
 0x136   :  { %v10029_v15 = vld [vmem:[#allocation8 + $0xac8] sm:$0xf]  ;;  %v9774_v24 = vor.u32 %v13792_v14, %v9773_v13  ;;  %4046 = vmatpush.bf16.msrb.mxu3 %v10574_v18  ;;  %v3768_v13 = vpop.f32.mrf.mxu1  ;;  %v3781_v14 = vpop.f32.mrf.mxu2  ;;  %v9135_v18 = vld [vmem:[#allocation8 + $0x3e8] sm:$0xf0] }
 0x137   :  { %v13856_v19 = vld [vmem:[#allocation8 + $0xae4] sm:$0xf0] }
 0x138   :  { %v10285_v20 = vld [vmem:[#allocation8 + $0xcc8] sm:$0xf]  ;;  %v10030_v26 = vor.u32 %v13856_v19, %v10029_v15  ;;  %4008 = vmatpush.bf16.msrb.mxu0 %v9774_v24  ;;  %v13692_v19 = vld [vmem:[#allocation8 + $0x5cc] sm:$0xf] }
 0x139   :  { %v13920_v21 = vld [vmem:[#allocation8 + $0xce4] sm:$0xf0]  ;;  %v9647_v24 = vld [vmem:[#allocation8 + $0x7e8] sm:$0xf0] }
 0x13a   :  { %v10541_v22 = vld [vmem:[#allocation8 + $0xec8] sm:$0xf]  ;;  %v10286_v27 = vor.u32 %v13920_v21, %v10285_v20  ;;  %4021 = vmatpush.bf16.msrb.mxu1 %v10030_v26  ;;  %v9391_v20 = vld [vmem:[#allocation8 + $0x5e8] sm:$0xf0]  ;;  %v8882_v26 = vor.u32 %v13564_v10, %v8879_v11 }
 0x13b   :  { %v13984_v23 = vld [vmem:[#allocation8 + $0xee4] sm:$0xf0]  ;;  %v13532_v10 = vld [vmem:[#allocation8 + $0xcc] sm:$0xf] }
 0x13c   :  { %v9741_v28 = vld [vmem:[#allocation8 + $0x888] sm:$0xf]  ;;  %v10542_v31 = vor.u32 %v13984_v23, %v10541_v22  ;;  %4034 = vmatpush.bf16.msrb.mxu2 %v10286_v27  ;;  %v13756_v23 = vld [vmem:[#allocation8 + $0x7cc] sm:$0xf]  ;;  %v9138_v27 = vor.u32 %v13628_v12, %v9135_v18 }
 0x13d   :  { %v13784_v29 = vld [vmem:[#allocation8 + $0x8a4] sm:$0xf0]  ;;  %v8751_v11 = vld [vmem:[#allocation8 + $0xe8] sm:$0xf0] }
 0x13e   :  { %v9997_v30 = vld [vmem:[#allocation8 + $0xa88] sm:$0xf]  ;;  %v9742_v43 = vor.u32 %v13784_v29, %v9741_v28  ;;  %4047 = vmatpush.bf16.msrb.mxu3 %v10542_v31  ;;  %v9394_v28 = vor.u32 %v13692_v19, %v9391_v20  ;;  %v13556_v29 = vld [vmem:[#allocation8 + $0x18c] sm:$0xf]  ;;  %v3818_v14 = vpop.f32.mrf.mxu1 }
 0x13f   :  { %v13848_v32 = vld [vmem:[#allocation8 + $0xaa4] sm:$0xf0]  ;;  %v13620_v31 = vld [vmem:[#allocation8 + $0x38c] sm:$0xf] }
 0x140   :  { %v10253_v33 = vld [vmem:[#allocation8 + $0xc88] sm:$0xf]  ;;  %v9998_v45 = vor.u32 %v13848_v32, %v9997_v30  ;;  %4009 = vmatpush.bf16.msrb.mxu0 %v9742_v43  ;;  %v8847_v30 = vld [vmem:[#allocation8 + $0x1a8] sm:$0xf0]  ;;  %v3794_v32 = vpop.f32.mrf.mxu3 }
 0x141   :  { %v13912_v35 = vld [vmem:[#allocation8 + $0xca4] sm:$0xf0]  ;;  %v8850_v43 = vor.u32 %v13556_v29, %v8847_v30  ;;  %v13596_v12 = vld [vmem:[#allocation8 + $0x2cc] sm:$0xf]  ;;  %v3831_v30 = vpop.f32.mrf.mxu2 }
 0x142   :  { %v10509_v36 = vld [vmem:[#allocation8 + $0xe88] sm:$0xf]  ;;  %v10254_v46 = vor.u32 %v13912_v35, %v10253_v33  ;;  %4022 = vmatpush.bf16.msrb.mxu1 %v9998_v45  ;;  %v9650_v33 = vor.u32 %v13756_v23, %v9647_v24  ;;  %v9103_v35 = vld [vmem:[#allocation8 + $0x3a8] sm:$0xf0]  ;;  %v8754_v24 = vor.u32 %v13532_v10, %v8751_v11 }
 0x143   :  { %v13976_v39 = vld [vmem:[#allocation8 + $0xea4] sm:$0xf0]  ;;  %v9106_v44 = vor.u32 %v13620_v31, %v9103_v35  ;;  %v9007_v18 = vld [vmem:[#allocation8 + $0x2e8] sm:$0xf0] }
 0x144   :  { %v9709_v47 = vld [vmem:[#allocation8 + $0x848] sm:$0xf]  ;;  %v10510_v50 = vor.u32 %v13976_v39, %v10509_v36  ;;  %4035 = vmatpush.bf16.msrb.mxu2 %v10254_v46  ;;  %v13684_v36 = vld [vmem:[#allocation8 + $0x58c] sm:$0xf] }
 0x145   :  { %v13776_v48 = vld [vmem:[#allocation8 + $0x864] sm:$0xf0]  ;;  %v9359_v39 = vld [vmem:[#allocation8 + $0x5a8] sm:$0xf0] }
 0x146   :  { %v9965_v49 = vld [vmem:[#allocation8 + $0xa48] sm:$0xf]  ;;  %v9710_v58 = vor.u32 %v13776_v48, %v9709_v47  ;;  %4048 = vmatpush.bf16.msrb.mxu3 %v10510_v50  ;;  %v9362_v45 = vor.u32 %v13684_v36, %v9359_v39  ;;  %v13548_v46 = vld [vmem:[#allocation8 + $0x14c] sm:$0xf] }
 0x147   :  { %v13840_v51 = vld [vmem:[#allocation8 + $0xa64] sm:$0xf0]  ;;  %v8815_v47 = vld [vmem:[#allocation8 + $0x168] sm:$0xf0] }
 0x148   :  { %v10221_v52 = vld [vmem:[#allocation8 + $0xc48] sm:$0xf]  ;;  %v9966_v0 = vor.u32 %v13840_v51, %v9965_v49  ;;  %4010 = vmatpush.bf16.msrb.mxu0 %v9710_v58  ;;  %v13612_v48 = vld [vmem:[#allocation8 + $0x34c] sm:$0xf]  ;;  %v9618_v49 = vor.u32 %v13748_v41, %v9615_v42  ;;  %v3844_v36 = vpop.f32.mrf.mxu3 }
 0x149   :  { %v13904_v53 = vld [vmem:[#allocation8 + $0xc64] sm:$0xf0]  ;;  %v9071_v50 = vld [vmem:[#allocation8 + $0x368] sm:$0xf0] }
 0x14a   :  { %v10477_v55 = vld [vmem:[#allocation8 + $0xe48] sm:$0xf]  ;;  %v10222_v1 = vor.u32 %v13904_v53, %v10221_v52  ;;  %4023 = vmatpush.bf16.msrb.mxu1 %v9966_v0  ;;  %v13676_v51 = vld [vmem:[#allocation8 + $0x54c] sm:$0xf] }
 0x14b   :  { %v13968_v56 = vld [vmem:[#allocation8 + $0xe64] sm:$0xf0]  ;;  %v9327_v52 = vld [vmem:[#allocation8 + $0x568] sm:$0xf0] }
 0x14c   :  { %v9677_v59 = vld [vmem:[#allocation8 + $0x808] sm:$0xf]  ;;  %v10478_v5 = vor.u32 %v13968_v56, %v10477_v55  ;;  %4036 = vmatpush.bf16.msrb.mxu2 %v10222_v1  ;;  %v13740_v53 = vld [vmem:[#allocation8 + $0x74c] sm:$0xf]  ;;  %v8818_v55 = vor.u32 %v13548_v46, %v8815_v47  ;;  %v9074_v56 = vor.u32 %v13612_v48, %v9071_v50  ;;  %v9330_v57 = vor.u32 %v13676_v51, %v9327_v52  ;;  %v3820_v50 = vpop.f32.mrf.mxu1 }
 0x14d   :  { %v13768_v60 = vld [vmem:[#allocation8 + $0x824] sm:$0xf0]  ;;  %v13540_v58 = vld [vmem:[#allocation8 + $0x10c] sm:$0xf]  ;;  %v9586_v62 = vor.u32 %v13740_v53, %v9583_v54 }
 0x14e   :  { %v9933_v2 = vld [vmem:[#allocation8 + $0xa08] sm:$0xf]  ;;  %v9678_v15 = vor.u32 %v13768_v60, %v9677_v59  ;;  %4049 = vmatpush.bf16.msrb.mxu3 %v10478_v5  ;;  %v8783_v59 = vld [vmem:[#allocation8 + $0x128] sm:$0xf0] }
 0x14f   :  { %v13832_v3 = vld [vmem:[#allocation8 + $0xa24] sm:$0xf0]  ;;  %v13604_v60 = vld [vmem:[#allocation8 + $0x30c] sm:$0xf]  ;;  %v8786_v5 = vor.u32 %v13540_v58, %v8783_v59 }
 0x150   :  { %v10189_v4 = vld [vmem:[#allocation8 + $0xc08] sm:$0xf]  ;;  %v9934_v21 = vor.u32 %v13832_v3, %v9933_v2  ;;  %4011 = vmatpush.bf16.msrb.mxu0 %v9678_v15  ;;  %v9039_v0 = vld [vmem:[#allocation8 + $0x328] sm:$0xf0] }
 0x151   :  { %v13896_v6 = vld [vmem:[#allocation8 + $0xc24] sm:$0xf0]  ;;  %v13668_v1 = vld [vmem:[#allocation8 + $0x50c] sm:$0xf] }
 0x152   :  { %v10445_v7 = vld [vmem:[#allocation8 + $0xe08] sm:$0xf]  ;;  %v10190_v22 = vor.u32 %v13896_v6, %v10189_v4  ;;  %4024 = vmatpush.bf16.msrb.mxu1 %v9934_v21  ;;  %v9295_v2 = vld [vmem:[#allocation8 + $0x528] sm:$0xf0]  ;;  %v3805_v6 = vpop.f32.mrf.mxu0 }
 0x153   :  { %v13960_v8 = vld [vmem:[#allocation8 + $0xe24] sm:$0xf0]  ;;  %4012 = vmatmul.bf16.vlgmr.msrb.gmra.mxu0 %v14385_v37  ;;  %v13732_v3 = vld [vmem:[#allocation8 + $0x70c] sm:$0xf]  ;;  %v3806_v13 = vadd.f32 %v3805_v6, %v14407_v61 }
 0x154   :  { %v10446_v25 = vor.u32 %v13960_v8, %v10445_v7  ;;  %4037 = vmatpush.bf16.msrb.mxu2 %v10190_v22  ;;  %4056 = vmatpush.bf16.msra.mxu0 %v8882_v26  ;;  %v9551_v4 = vld [vmem:[#allocation8 + $0x728] sm:$0xf0]  ;;  %v9042_v7 = vor.u32 %v13604_v60, %v9039_v0  ;;  %v9298_v8 = vor.u32 %v13668_v1, %v9295_v2 }
 0x155   :  { %4025 = vmatmul.bf16.vlgmr.msrb.gmra.mxu1 %v14389_v40  ;;  %v9554_v15 = vor.u32 %v13732_v3, %v9551_v4  ;;  %v13660_v19 = vld [vmem:[#allocation8 + $0x4cc] sm:$0xf]  ;;  %v3819_v23 = vadd.f32 %v3818_v14, %v3806_v13  ;;  %v3833_v3 = vpop.f32.mrf.mxu2 }
 0x156   :  { %4050 = vmatpush.bf16.msrb.mxu3 %v10446_v25  ;;  %4069 = vmatpush.bf16.msra.mxu1 %v9138_v27  ;;  %v9263_v20 = vld [vmem:[#allocation8 + $0x4e8] sm:$0xf0]  ;;  %v9010_v25 = vor.u32 %v13596_v12, %v9007_v18 }
 0x157   :  { %4038 = vmatmul.bf16.vlgmr.msrb.gmra.mxu2 %v14383_v34  ;;  %v13724_v21 = vld [vmem:[#allocation8 + $0x6cc] sm:$0xf]  ;;  %v9266_v26 = vor.u32 %v13660_v19, %v9263_v20  ;;  %v3832_v35 = vadd.f32 %v3831_v30, %v3819_v23 }
 0x158   :  { %4082 = vmatpush.bf16.msra.mxu2 %v9394_v28  ;;  %4057 = vmatpush.bf16.msra.mxu0 %v8850_v43  ;;  %v9519_v22 = vld [vmem:[#allocation8 + $0x6e8] sm:$0xf0] }
 0x159   :  { %4051 = vmatmul.bf16.vlgmr.msrb.gmra.mxu3 %v14387_v38  ;;  %v13524_v27 = vld [vmem:[#allocation8 + $0x8c] sm:$0xf]  ;;  %v9522_v61 = vor.u32 %v13724_v21, %v9519_v22  ;;  %v14414_v43 = vadd.f32 %v3844_v36, %v3832_v35 }
 0x15a   :  { %4095 = vmatpush.bf16.msra.mxu3 %v9650_v33  ;;  %4070 = vmatpush.bf16.msra.mxu1 %v9106_v44  ;;  %v8719_v28 = vld [vmem:[#allocation8 + $0xa8] sm:$0xf0]  ;;  %v3807_v44 = vpop.f32.mrf.mxu0 }
 0x15b   :  { %v13588_v29 = vld [vmem:[#allocation8 + $0x28c] sm:$0xf]  ;;  %v8722_v42 = vor.u32 %v13524_v27, %v8719_v28 }
 0x15c   :  { %4083 = vmatpush.bf16.msra.mxu2 %v9362_v45  ;;  %4058 = vmatpush.bf16.msra.mxu0 %v8818_v55  ;;  %v8975_v31 = vld [vmem:[#allocation8 + $0x2a8] sm:$0xf0] }
 0x15d   :  { %v13652_v32 = vld [vmem:[#allocation8 + $0x48c] sm:$0xf]  ;;  %v8978_v45 = vor.u32 %v13588_v29, %v8975_v31 }
 0x15e   :  { %4096 = vmatpush.bf16.msra.mxu3 %v9618_v49  ;;  %4071 = vmatpush.bf16.msra.mxu1 %v9074_v56  ;;  %v9231_v33 = vld [vmem:[#allocation8 + $0x4a8] sm:$0xf0] }
 0x15f   :  { %v13716_v39 = vld [vmem:[#allocation8 + $0x68c] sm:$0xf]  ;;  %v9234_v46 = vor.u32 %v13652_v32, %v9231_v33 }
 0x160   :  { %4084 = vmatpush.bf16.msra.mxu2 %v9330_v57  ;;  %4059 = vmatpush.bf16.msra.mxu0 %v8786_v5  ;;  %v9487_v41 = vld [vmem:[#allocation8 + $0x6a8] sm:$0xf0] }
 0x161   :  { %v13516_v47 = vld [vmem:[#allocation8 + $0x4c] sm:$0xf]  ;;  %v9490_v51 = vor.u32 %v13716_v39, %v9487_v41 }
 0x162   :  { %4097 = vmatpush.bf16.msra.mxu3 %v9586_v62  ;;  %4072 = vmatpush.bf16.msra.mxu1 %v9042_v7  ;;  %v8687_v48 = vld [vmem:[#allocation8 + $0x68] sm:$0xf0]  ;;  %v3857_v3 = vpop.f32.mrf.mxu0 }
 0x163   :  { %v13580_v49 = vld [vmem:[#allocation8 + $0x24c] sm:$0xf]  ;;  %v8690_v57 = vor.u32 %v13516_v47, %v8687_v48 }
 0x164   :  { %4085 = vmatpush.bf16.msra.mxu2 %v9298_v8  ;;  %4060 = vmatpush.bf16.msra.mxu0 %v8754_v24  ;;  %v8943_v52 = vld [vmem:[#allocation8 + $0x268] sm:$0xf0]  ;;  %v3846_v8 = vpop.f32.mrf.mxu3 }
 0x165   :  { %v13644_v53 = vld [vmem:[#allocation8 + $0x44c] sm:$0xf]  ;;  %v8946_v60 = vor.u32 %v13580_v49, %v8943_v52 }
 0x166   :  { %4098 = vmatpush.bf16.msra.mxu3 %v9554_v15  ;;  %4073 = vmatpush.bf16.msra.mxu1 %v9010_v25  ;;  %v9199_v54 = vld [vmem:[#allocation8 + $0x468] sm:$0xf0] }
 0x167   :  { %v13708_v55 = vld [vmem:[#allocation8 + $0x64c] sm:$0xf]  ;;  %v9202_v62 = vor.u32 %v13644_v53, %v9199_v54 }
 0x168   :  { %4086 = vmatpush.bf16.msra.mxu2 %v9266_v26  ;;  %v9455_v56 = vld [vmem:[#allocation8 + $0x668] sm:$0xf0]  ;;  %4061 = vmatpush.bf16.msra.mxu0 %v8722_v42 }
 0x169   :  { %v13508_v58 = vld [vmem:[#allocation8 + $0xc] sm:$0xf]  ;;  %v9458_v4 = vor.u32 %v13708_v55, %v9455_v56 }
 0x16a   :  { %4099 = vmatpush.bf16.msra.mxu3 %v9522_v61  ;;  %v8655_v59 = vld [vmem:[#allocation8 + $0x28] sm:$0xf0]  ;;  %4074 = vmatpush.bf16.msra.mxu1 %v8978_v45 }
 0x16b   :  { %v13572_v0 = vld [vmem:[#allocation8 + $0x20c] sm:$0xf]  ;;  %v8658_v13 = vor.u32 %v13508_v58, %v8655_v59 }
 0x16c   :  { %4087 = vmatpush.bf16.msra.mxu2 %v9234_v46  ;;  %v8911_v1 = vld [vmem:[#allocation8 + $0x228] sm:$0xf0]  ;;  %4062 = vmatpush.bf16.msra.mxu0 %v8690_v57 }
 0x16d   :  { %v13636_v2 = vld [vmem:[#allocation8 + $0x40c] sm:$0xf]  ;;  %v8914_v19 = vor.u32 %v13572_v0, %v8911_v1 }
 0x16e   :  { %4100 = vmatpush.bf16.msra.mxu3 %v9490_v51  ;;  %v9167_v5 = vld [vmem:[#allocation8 + $0x428] sm:$0xf0]  ;;  %4075 = vmatpush.bf16.msra.mxu1 %v8946_v60 }
 0x16f   :  { %v13700_v6 = vld [vmem:[#allocation8 + $0x60c] sm:$0xf]  ;;  %v9170_v20 = vor.u32 %v13636_v2, %v9167_v5 }
 0x170   :  { %v9423_v7 = vld [vmem:[#allocation8 + $0x628] sm:$0xf0]  ;;  %4088 = vmatpush.bf16.msra.mxu2 %v9202_v62  ;;  %4063 = vmatpush.bf16.msra.mxu0 %v8658_v13 }
 0x171   :  { %v13820_v10 = vld [vmem:[#allocation8 + $0x9cc] sm:$0xf]  ;;  %v9426_v23 = vor.u32 %v13700_v6, %v9423_v7 }
 0x172   :  { %v9903_v11 = vld [vmem:[#allocation8 + $0x9e8] sm:$0xf0]  ;;  %4101 = vmatpush.bf16.msra.mxu3 %v9458_v4  ;;  %4076 = vmatpush.bf16.msra.mxu1 %v8914_v19 }
 0x173   :  { %v13884_v12 = vld [vmem:[#allocation8 + $0xbcc] sm:$0xf]  ;;  %v9906_v24 = vor.u32 %v13820_v10, %v9903_v11  ;;  %4064 = vmatmul.bf16.vlgmr.msra.gmra.mxu0 %v14374_v9  ;;  %v3870_v10 = vpop.f32.mrf.mxu1 }
 0x174   :  { %v10159_v14 = vld [vmem:[#allocation8 + $0xbe8] sm:$0xf0]  ;;  %4089 = vmatpush.bf16.msra.mxu2 %v9170_v20 }
 0x175   :  { %v13948_v15 = vld [vmem:[#allocation8 + $0xdcc] sm:$0xf]  ;;  %v10162_v25 = vor.u32 %v13884_v12, %v10159_v14  ;;  %4108 = vmatpush.bf16.msrb.mxu0 %v9906_v24  ;;  %4077 = vmatmul.bf16.vlgmr.msra.gmra.mxu1 %v14378_v17 }
 0x176   :  { %v10415_v18 = vld [vmem:[#allocation8 + $0xde8] sm:$0xf0]  ;;  %4102 = vmatpush.bf16.msra.mxu3 %v9426_v23 }
 0x177   :  { %v14012_v21 = vld [vmem:[#allocation8 + $0xfcc] sm:$0xf]  ;;  %v10418_v26 = vor.u32 %v13948_v15, %v10415_v18  ;;  %4121 = vmatpush.bf16.msrb.mxu1 %v10162_v25  ;;  %4090 = vmatmul.bf16.vlgmr.msra.gmra.mxu2 %v14371_v63  ;;  %v3871_v15 = vadd.f32 %v3870_v10, %v3857_v3 }
 0x178   :  { %v10671_v22 = vld [vmem:[#allocation8 + $0xfe8] sm:$0xf0] }
 0x179   :  { %v13812_v27 = vld [vmem:[#allocation8 + $0x98c] sm:$0xf]  ;;  %v10674_v30 = vor.u32 %v14012_v21, %v10671_v22  ;;  %4134 = vmatpush.bf16.msrb.mxu2 %v10418_v26  ;;  %4103 = vmatmul.bf16.vlgmr.msra.gmra.mxu3 %v14376_v16  ;;  %v3883_v26 = vpop.f32.mrf.mxu2 }
 0x17a   :  { %v9871_v28 = vld [vmem:[#allocation8 + $0x9a8] sm:$0xf0] }
 0x17b   :  { %v13876_v29 = vld [vmem:[#allocation8 + $0xb8c] sm:$0xf]  ;;  %v9874_v36 = vor.u32 %v13812_v27, %v9871_v28  ;;  %4147 = vmatpush.bf16.msrb.mxu3 %v10674_v30 }
 0x17c   :  { %v10127_v61 = vld [vmem:[#allocation8 + $0xba8] sm:$0xf0] }
 0x17d   :  { %v13940_v31 = vld [vmem:[#allocation8 + $0xd8c] sm:$0xf]  ;;  %v10130_v39 = vor.u32 %v13876_v29, %v10127_v61  ;;  %4109 = vmatpush.bf16.msrb.mxu0 %v9874_v36  ;;  %v3884_v61 = vadd.f32 %v3883_v26, %v3871_v15  ;;  %v9109_v26 = vld [vmem:[#allocation8 + $0x390] sm:$0xf] }
 0x17e   :  { %v10383_v32 = vld [vmem:[#allocation8 + $0xda8] sm:$0xf0] }
 0x17f   :  { %v14004_v33 = vld [vmem:[#allocation8 + $0xf8c] sm:$0xf]  ;;  %v10386_v41 = vor.u32 %v13940_v31, %v10383_v32  ;;  %4122 = vmatpush.bf16.msrb.mxu1 %v10130_v39  ;;  %v3896_v31 = vpop.f32.mrf.mxu3  ;;  %v3859_v39 = vpop.f32.mrf.mxu0 }
 0x180   :  { %v10639_v35 = vld [vmem:[#allocation8 + $0xfa8] sm:$0xf0]  ;;  %v14420_v36 = vadd.f32 %v3896_v31, %v3884_v61  ;;  %v9621_v61 = vld [vmem:[#allocation8 + $0x790] sm:$0xf] }
 0x181   :  { %v13804_v42 = vld [vmem:[#allocation8 + $0x94c] sm:$0xf]  ;;  %v10642_v46 = vor.u32 %v14004_v33, %v10639_v35  ;;  %4135 = vmatpush.bf16.msrb.mxu2 %v10386_v41  ;;  %v13753_v31 = vld [vmem:[#allocation8 + $0x7ac] sm:$0xf0] }
 0x182   :  { %v9839_v44 = vld [vmem:[#allocation8 + $0x968] sm:$0xf0]  ;;  %v8821_v39 = vld [vmem:[#allocation8 + $0x150] sm:$0xf] }
 0x183   :  { %v13868_v45 = vld [vmem:[#allocation8 + $0xb4c] sm:$0xf]  ;;  %v9842_v52 = vor.u32 %v13804_v42, %v9839_v44  ;;  %4148 = vmatpush.bf16.msrb.mxu3 %v10642_v46 }
 0x184   :  { %v10095_v47 = vld [vmem:[#allocation8 + $0xb68] sm:$0xf0] }
 0x185   :  { %v13932_v48 = vld [vmem:[#allocation8 + $0xd4c] sm:$0xf]  ;;  %v10098_v53 = vor.u32 %v13868_v45, %v10095_v47  ;;  %4110 = vmatpush.bf16.msrb.mxu0 %v9842_v52  ;;  %v3872_v47 = vpop.f32.mrf.mxu1 }
 0x186   :  { %v10351_v49 = vld [vmem:[#allocation8 + $0xd68] sm:$0xf0]  ;;  %v13681_v47 = vld [vmem:[#allocation8 + $0x56c] sm:$0xf0] }
 0x187   :  { %v13996_v50 = vld [vmem:[#allocation8 + $0xf4c] sm:$0xf]  ;;  %v10354_v54 = vor.u32 %v13932_v48, %v10351_v49  ;;  %4123 = vmatpush.bf16.msrb.mxu1 %v10098_v53 }
 0x188   :  { %v10607_v51 = vld [vmem:[#allocation8 + $0xf68] sm:$0xf0] }
 0x189   :  { %v13796_v55 = vld [vmem:[#allocation8 + $0x90c] sm:$0xf]  ;;  %v10610_v58 = vor.u32 %v13996_v50, %v10607_v51  ;;  %4136 = vmatpush.bf16.msrb.mxu2 %v10354_v54 }
 0x18a   :  { %v9807_v56 = vld [vmem:[#allocation8 + $0x928] sm:$0xf0] }
 0x18b   :  { %v13860_v57 = vld [vmem:[#allocation8 + $0xb0c] sm:$0xf]  ;;  %v9810_v2 = vor.u32 %v13796_v55, %v9807_v56  ;;  %4149 = vmatpush.bf16.msrb.mxu3 %v10610_v58 }
 0x18c   :  { %v10063_v59 = vld [vmem:[#allocation8 + $0xb28] sm:$0xf0] }
 0x18d   :  { %v13924_v60 = vld [vmem:[#allocation8 + $0xd0c] sm:$0xf]  ;;  %v10066_v4 = vor.u32 %v13860_v57, %v10063_v59  ;;  %4111 = vmatpush.bf16.msrb.mxu0 %v9810_v2 }
 0x18e   :  { %v10319_v62 = vld [vmem:[#allocation8 + $0xd28] sm:$0xf0] }
 0x18f   :  { %v13988_v0 = vld [vmem:[#allocation8 + $0xf0c] sm:$0xf]  ;;  %v10322_v5 = vor.u32 %v13924_v60, %v10319_v62  ;;  %4124 = vmatpush.bf16.msrb.mxu1 %v10066_v4 }
 0x190   :  { %v10575_v1 = vld [vmem:[#allocation8 + $0xf28] sm:$0xf0] }
 0x191   :  { %v13788_v6 = vld [vmem:[#allocation8 + $0x8cc] sm:$0xf]  ;;  %v10578_v11 = vor.u32 %v13988_v0, %v10575_v1  ;;  %4137 = vmatpush.bf16.msrb.mxu2 %v10322_v5  ;;  %v3885_v0 = vpop.f32.mrf.mxu2  ;;  %v3898_v5 = vpop.f32.mrf.mxu3 }
 0x192   :  { %v9775_v7 = vld [vmem:[#allocation8 + $0x8e8] sm:$0xf0]  ;;  %v13537_v5 = vld [vmem:[#allocation8 + $0xec] sm:$0xf0] }
 0x193   :  { %v13852_v8 = vld [vmem:[#allocation8 + $0xacc] sm:$0xf]  ;;  %v9778_v20 = vor.u32 %v13788_v6, %v9775_v7  ;;  %4150 = vmatpush.bf16.msrb.mxu3 %v10578_v11  ;;  %v8885_v6 = vld [vmem:[#allocation8 + $0x1d0] sm:$0xf] }
 0x194   :  { %v10031_v12 = vld [vmem:[#allocation8 + $0xae8] sm:$0xf0]  ;;  %v13569_v7 = vld [vmem:[#allocation8 + $0x1ec] sm:$0xf0] }
 0x195   :  { %v13916_v13 = vld [vmem:[#allocation8 + $0xccc] sm:$0xf]  ;;  %v10034_v21 = vor.u32 %v13852_v8, %v10031_v12  ;;  %4112 = vmatpush.bf16.msrb.mxu0 %v9778_v20  ;;  %v9141_v8 = vld [vmem:[#allocation8 + $0x3d0] sm:$0xf] }
 0x196   :  { %v10287_v14 = vld [vmem:[#allocation8 + $0xce8] sm:$0xf0]  ;;  %v13633_v11 = vld [vmem:[#allocation8 + $0x3ec] sm:$0xf0] }
 0x197   :  { %v13980_v18 = vld [vmem:[#allocation8 + $0xecc] sm:$0xf]  ;;  %v10290_v22 = vor.u32 %v13916_v13, %v10287_v14  ;;  %4125 = vmatpush.bf16.msrb.mxu1 %v10034_v21  ;;  %v9397_v12 = vld [vmem:[#allocation8 + $0x5d0] sm:$0xf]  ;;  %v8886_v21 = vor.u32 %v13569_v7, %v8885_v6 }
 0x198   :  { %v10543_v19 = vld [vmem:[#allocation8 + $0xee8] sm:$0xf0]  ;;  %v13697_v13 = vld [vmem:[#allocation8 + $0x5ec] sm:$0xf0] }
 0x199   :  { %v13780_v23 = vld [vmem:[#allocation8 + $0x88c] sm:$0xf]  ;;  %v10546_v27 = vor.u32 %v13980_v18, %v10543_v19  ;;  %4138 = vmatpush.bf16.msrb.mxu2 %v10290_v22  ;;  %v9653_v18 = vld [vmem:[#allocation8 + $0x7d0] sm:$0xf]  ;;  %v9142_v22 = vor.u32 %v13633_v11, %v9141_v8  ;;  %v3922_v8 = vpop.f32.mrf.mxu1 }
 0x19a   :  { %v9743_v24 = vld [vmem:[#allocation8 + $0x8a8] sm:$0xf0]  ;;  %v13761_v19 = vld [vmem:[#allocation8 + $0x7ec] sm:$0xf0] }
 0x19b   :  { %v13844_v25 = vld [vmem:[#allocation8 + $0xa8c] sm:$0xf]  ;;  %v9746_v35 = vor.u32 %v13780_v23, %v9743_v24  ;;  %4151 = vmatpush.bf16.msrb.mxu3 %v10546_v27  ;;  %v9398_v23 = vor.u32 %v13697_v13, %v9397_v12  ;;  %v8853_v24 = vld [vmem:[#allocation8 + $0x190] sm:$0xf]  ;;  %v9654_v27 = vor.u32 %v13761_v19, %v9653_v18 }
 0x19c   :  { %v9999_v28 = vld [vmem:[#allocation8 + $0xaa8] sm:$0xf0]  ;;  %v9013_v6 = vld [vmem:[#allocation8 + $0x2d0] sm:$0xf] }
 0x19d   :  { %v13908_v29 = vld [vmem:[#allocation8 + $0xc8c] sm:$0xf]  ;;  %v10002_v41 = vor.u32 %v13844_v25, %v9999_v28  ;;  %4113 = vmatpush.bf16.msrb.mxu0 %v9746_v35  ;;  %v13561_v25 = vld [vmem:[#allocation8 + $0x1ac] sm:$0xf0] }
 0x19e   :  { %v10255_v30 = vld [vmem:[#allocation8 + $0xca8] sm:$0xf0]  ;;  %v13625_v28 = vld [vmem:[#allocation8 + $0x3ac] sm:$0xf0] }
 0x19f   :  { %v13972_v32 = vld [vmem:[#allocation8 + $0xe8c] sm:$0xf]  ;;  %v10258_v42 = vor.u32 %v13908_v29, %v10255_v30  ;;  %4126 = vmatpush.bf16.msrb.mxu1 %v10002_v41  ;;  %v9365_v29 = vld [vmem:[#allocation8 + $0x590] sm:$0xf] }
 0x1a0   :  { %v10511_v33 = vld [vmem:[#allocation8 + $0xea8] sm:$0xf0]  ;;  %v13689_v30 = vld [vmem:[#allocation8 + $0x5ac] sm:$0xf0] }
 0x1a1   :  { %v13772_v44 = vld [vmem:[#allocation8 + $0x84c] sm:$0xf]  ;;  %v10514_v48 = vor.u32 %v13972_v32, %v10511_v33  ;;  %4139 = vmatpush.bf16.msrb.mxu2 %v10258_v42  ;;  %v8854_v32 = vor.u32 %v13561_v25, %v8853_v24  ;;  %v9110_v33 = vor.u32 %v13625_v28, %v9109_v26  ;;  %v9366_v35 = vor.u32 %v13689_v30, %v9365_v29  ;;  %v13553_v41 = vld [vmem:[#allocation8 + $0x16c] sm:$0xf0]  ;;  %v3935_v25 = vpop.f32.mrf.mxu2  ;;  %v3948_v30 = vpop.f32.mrf.mxu3 }
 0x1a2   :  { %v9711_v45 = vld [vmem:[#allocation8 + $0x868] sm:$0xf0]  ;;  %v9077_v42 = vld [vmem:[#allocation8 + $0x350] sm:$0xf] }
 0x1a3   :  { %v13836_v46 = vld [vmem:[#allocation8 + $0xa4c] sm:$0xf]  ;;  %v9714_v54 = vor.u32 %v13772_v44, %v9711_v45  ;;  %4152 = vmatpush.bf16.msrb.mxu3 %v10514_v48  ;;  %v9622_v44 = vor.u32 %v13753_v31, %v9621_v61  ;;  %v13617_v45 = vld [vmem:[#allocation8 + $0x36c] sm:$0xf0] }
 0x1a4   :  { %v9967_v49 = vld [vmem:[#allocation8 + $0xa68] sm:$0xf0]  ;;  %v9589_v48 = vld [vmem:[#allocation8 + $0x750] sm:$0xf] }
 0x1a5   :  { %v13900_v50 = vld [vmem:[#allocation8 + $0xc4c] sm:$0xf]  ;;  %v9970_v57 = vor.u32 %v13836_v46, %v9967_v49  ;;  %4114 = vmatpush.bf16.msrb.mxu0 %v9714_v54  ;;  %v9333_v46 = vld [vmem:[#allocation8 + $0x550] sm:$0xf] }
 0x1a6   :  { %v10223_v51 = vld [vmem:[#allocation8 + $0xc68] sm:$0xf0]  ;;  %v13745_v49 = vld [vmem:[#allocation8 + $0x76c] sm:$0xf0] }
 0x1a7   :  { %v13964_v52 = vld [vmem:[#allocation8 + $0xe4c] sm:$0xf]  ;;  %v10226_v58 = vor.u32 %v13900_v50, %v10223_v51  ;;  %4127 = vmatpush.bf16.msrb.mxu1 %v9970_v57  ;;  %v8822_v50 = vor.u32 %v13553_v41, %v8821_v39  ;;  %v9078_v51 = vor.u32 %v13617_v45, %v9077_v42  ;;  %v13545_v54 = vld [vmem:[#allocation8 + $0x12c] sm:$0xf0] }
 0x1a8   :  { %v10479_v53 = vld [vmem:[#allocation8 + $0xe68] sm:$0xf0]  ;;  %v13609_v57 = vld [vmem:[#allocation8 + $0x32c] sm:$0xf0] }
 0x1a9   :  { %v13764_v55 = vld [vmem:[#allocation8 + $0x80c] sm:$0xf]  ;;  %v10482_v1 = vor.u32 %v13964_v52, %v10479_v53  ;;  %4140 = vmatpush.bf16.msrb.mxu2 %v10226_v58  ;;  %v9334_v52 = vor.u32 %v13681_v47, %v9333_v46  ;;  %v8789_v53 = vld [vmem:[#allocation8 + $0x110] sm:$0xf]  ;;  %v3924_v46 = vpop.f32.mrf.mxu1 }
 0x1aa   :  { %v9679_v56 = vld [vmem:[#allocation8 + $0x828] sm:$0xf0]  ;;  %v9301_v58 = vld [vmem:[#allocation8 + $0x510] sm:$0xf]  ;;  %v8790_v0 = vor.u32 %v13545_v54, %v8789_v53 }
 0x1ab   :  { %v13828_v59 = vld [vmem:[#allocation8 + $0xa0c] sm:$0xf]  ;;  %v9682_v10 = vor.u32 %v13764_v55, %v9679_v56  ;;  %4153 = vmatpush.bf16.msrb.mxu3 %v10482_v1  ;;  %v9045_v55 = vld [vmem:[#allocation8 + $0x310] sm:$0xf]  ;;  %v9590_v56 = vor.u32 %v13745_v49, %v9589_v48  ;;  %v3909_v1 = vpop.f32.mrf.mxu0 }
 0x1ac   :  { %v9935_v60 = vld [vmem:[#allocation8 + $0xa28] sm:$0xf0]  ;;  %v3910_v7 = vadd.f32 %v3909_v1, %v14420_v36  ;;  %v13601_v11 = vld [vmem:[#allocation8 + $0x2ec] sm:$0xf0] }
 0x1ad   :  { %v13892_v62 = vld [vmem:[#allocation8 + $0xc0c] sm:$0xf]  ;;  %v9938_v14 = vor.u32 %v13828_v59, %v9935_v60  ;;  %4115 = vmatpush.bf16.msrb.mxu0 %v9682_v10  ;;  %v13673_v59 = vld [vmem:[#allocation8 + $0x52c] sm:$0xf0] }
 0x1ae   :  { %v10191_v2 = vld [vmem:[#allocation8 + $0xc28] sm:$0xf0]  ;;  %v9557_v60 = vld [vmem:[#allocation8 + $0x710] sm:$0xf]  ;;  %v3923_v18 = vadd.f32 %v3922_v8, %v3910_v7 }
 0x1af   :  { %v13956_v3 = vld [vmem:[#allocation8 + $0xe0c] sm:$0xf]  ;;  %v10194_v15 = vor.u32 %v13892_v62, %v10191_v2  ;;  %4128 = vmatpush.bf16.msrb.mxu1 %v9938_v14  ;;  %v13737_v62 = vld [vmem:[#allocation8 + $0x72c] sm:$0xf0]  ;;  %v9046_v2 = vor.u32 %v13609_v57, %v9045_v55 }
 0x1b0   :  { %v10447_v4 = vld [vmem:[#allocation8 + $0xe28] sm:$0xf0]  ;;  %4116 = vmatmul.bf16.vlgmr.msrb.gmra.mxu0 %v14385_v37  ;;  %v9558_v10 = vor.u32 %v13737_v62, %v9557_v60  ;;  %v9269_v12 = vld [vmem:[#allocation8 + $0x4d0] sm:$0xf]  ;;  %v3936_v29 = vadd.f32 %v3935_v25, %v3923_v18  ;;  %v3937_v62 = vpop.f32.mrf.mxu2 }
 0x1b1   :  { %v10450_v20 = vor.u32 %v13956_v3, %v10447_v4  ;;  %4141 = vmatpush.bf16.msrb.mxu2 %v10194_v15  ;;  %4160 = vmatpush.bf16.msra.mxu0 %v8886_v21  ;;  %v9302_v3 = vor.u32 %v13673_v59, %v9301_v58  ;;  %v8757_v4 = vld [vmem:[#allocation8 + $0xd0] sm:$0xf] }
 0x1b2   :  { %4129 = vmatmul.bf16.vlgmr.msrb.gmra.mxu1 %v14389_v40  ;;  %v13665_v13 = vld [vmem:[#allocation8 + $0x4ec] sm:$0xf0]  ;;  %v8758_v19 = vor.u32 %v13537_v5, %v8757_v4  ;;  %v3950_v4 = vpop.f32.mrf.mxu3 }
 0x1b3   :  { %4154 = vmatpush.bf16.msrb.mxu3 %v10450_v20  ;;  %4173 = vmatpush.bf16.msra.mxu1 %v9142_v22  ;;  %v9525_v14 = vld [vmem:[#allocation8 + $0x6d0] sm:$0xf]  ;;  %v9014_v20 = vor.u32 %v13601_v11, %v9013_v6  ;;  %v9270_v21 = vor.u32 %v13665_v13, %v9269_v12 }
 0x1b4   :  { %4142 = vmatmul.bf16.vlgmr.msrb.gmra.mxu2 %v14383_v34  ;;  %v13729_v15 = vld [vmem:[#allocation8 + $0x6ec] sm:$0xf0] }
 0x1b5   :  { %4186 = vmatpush.bf16.msra.mxu2 %v9398_v23  ;;  %4161 = vmatpush.bf16.msra.mxu0 %v8854_v32  ;;  %v8725_v22 = vld [vmem:[#allocation8 + $0x90] sm:$0xf]  ;;  %v9526_v36 = vor.u32 %v13729_v15, %v9525_v14 }
 0x1b6   :  { %4155 = vmatmul.bf16.vlgmr.msrb.gmra.mxu3 %v14387_v38  ;;  %v13529_v23 = vld [vmem:[#allocation8 + $0xac] sm:$0xf0] }
 0x1b7   :  { %4199 = vmatpush.bf16.msra.mxu3 %v9654_v27  ;;  %4174 = vmatpush.bf16.msra.mxu1 %v9110_v33  ;;  %v8981_v24 = vld [vmem:[#allocation8 + $0x290] sm:$0xf]  ;;  %v8726_v32 = vor.u32 %v13529_v23, %v8725_v22  ;;  %v14427_v33 = vadd.f32 %v3948_v30, %v3936_v29 }
 0x1b8   :  { %v13593_v26 = vld [vmem:[#allocation8 + $0x2ac] sm:$0xf0] }
 0x1b9   :  { %4187 = vmatpush.bf16.msra.mxu2 %v9366_v35  ;;  %4162 = vmatpush.bf16.msra.mxu0 %v8822_v50  ;;  %v9237_v27 = vld [vmem:[#allocation8 + $0x490] sm:$0xf]  ;;  %v3911_v35 = vpop.f32.mrf.mxu0  ;;  %v8982_v39 = vor.u32 %v13593_v26, %v8981_v24 }
 0x1ba   :  { %v13657_v28 = vld [vmem:[#allocation8 + $0x4ac] sm:$0xf0] }
 0x1bb   :  { %4200 = vmatpush.bf16.msra.mxu3 %v9622_v44  ;;  %4175 = vmatpush.bf16.msra.mxu1 %v9078_v51  ;;  %v9493_v61 = vld [vmem:[#allocation8 + $0x690] sm:$0xf]  ;;  %v9238_v41 = vor.u32 %v13657_v28, %v9237_v27 }
 0x1bc   :  { %v13721_v31 = vld [vmem:[#allocation8 + $0x6ac] sm:$0xf0] }
 0x1bd   :  { %4188 = vmatpush.bf16.msra.mxu2 %v9334_v52  ;;  %4163 = vmatpush.bf16.msra.mxu0 %v8790_v0  ;;  %v8693_v42 = vld [vmem:[#allocation8 + $0x50] sm:$0xf]  ;;  %v9494_v47 = vor.u32 %v13721_v31, %v9493_v61 }
 0x1be   :  { %v13521_v44 = vld [vmem:[#allocation8 + $0x6c] sm:$0xf0] }
 0x1bf   :  { %4201 = vmatpush.bf16.msra.mxu3 %v9590_v56  ;;  %4176 = vmatpush.bf16.msra.mxu1 %v9046_v2  ;;  %v8949_v45 = vld [vmem:[#allocation8 + $0x250] sm:$0xf]  ;;  %v8694_v53 = vor.u32 %v13521_v44, %v8693_v42 }
 0x1c0   :  { %v13585_v48 = vld [vmem:[#allocation8 + $0x26c] sm:$0xf0] }
 0x1c1   :  { %4189 = vmatpush.bf16.msra.mxu2 %v9302_v3  ;;  %4164 = vmatpush.bf16.msra.mxu0 %v8758_v19  ;;  %v9205_v49 = vld [vmem:[#allocation8 + $0x450] sm:$0xf]  ;;  %v8950_v56 = vor.u32 %v13585_v48, %v8949_v45 }
 0x1c2   :  { %v13649_v50 = vld [vmem:[#allocation8 + $0x46c] sm:$0xf0] }
 0x1c3   :  { %4202 = vmatpush.bf16.msra.mxu3 %v9558_v10  ;;  %4177 = vmatpush.bf16.msra.mxu1 %v9014_v20  ;;  %v9461_v51 = vld [vmem:[#allocation8 + $0x650] sm:$0xf]  ;;  %v9206_v57 = vor.u32 %v13649_v50, %v9205_v49 }
 0x1c4   :  { %v13713_v52 = vld [vmem:[#allocation8 + $0x66c] sm:$0xf0] }
 0x1c5   :  { %4190 = vmatpush.bf16.msra.mxu2 %v9270_v21  ;;  %4165 = vmatpush.bf16.msra.mxu0 %v8726_v32  ;;  %v8661_v54 = vld [vmem:[#allocation8 + $0x10] sm:$0xf]  ;;  %v9462_v0 = vor.u32 %v13713_v52, %v9461_v51 }
 0x1c6   :  { %v13513_v55 = vld [vmem:[#allocation8 + $0x2c] sm:$0xf0] }
 0x1c7   :  { %4203 = vmatpush.bf16.msra.mxu3 %v9526_v36  ;;  %4178 = vmatpush.bf16.msra.mxu1 %v8982_v39  ;;  %v8917_v58 = vld [vmem:[#allocation8 + $0x210] sm:$0xf]  ;;  %v8662_v8 = vor.u32 %v13513_v55, %v8661_v54 }
 0x1c8   :  { %v13577_v59 = vld [vmem:[#allocation8 + $0x22c] sm:$0xf0] }
 0x1c9   :  { %4191 = vmatpush.bf16.msra.mxu2 %v9238_v41  ;;  %v9173_v60 = vld [vmem:[#allocation8 + $0x410] sm:$0xf]  ;;  %4166 = vmatpush.bf16.msra.mxu0 %v8694_v53  ;;  %v8918_v13 = vor.u32 %v13577_v59, %v8917_v58 }
 0x1ca   :  { %v13641_v1 = vld [vmem:[#allocation8 + $0x42c] sm:$0xf0] }
 0x1cb   :  { %4204 = vmatpush.bf16.msra.mxu3 %v9494_v47  ;;  %v9429_v2 = vld [vmem:[#allocation8 + $0x610] sm:$0xf]  ;;  %4179 = vmatpush.bf16.msra.mxu1 %v8950_v56  ;;  %v9174_v14 = vor.u32 %v13641_v1, %v9173_v60 }
 0x1cc   :  { %v13705_v3 = vld [vmem:[#allocation8 + $0x62c] sm:$0xf0] }
 0x1cd   :  { %v9909_v5 = vld [vmem:[#allocation8 + $0x9d0] sm:$0xf]  ;;  %4192 = vmatpush.bf16.msra.mxu2 %v9206_v57  ;;  %v9430_v19 = vor.u32 %v13705_v3, %v9429_v2  ;;  %4167 = vmatpush.bf16.msra.mxu0 %v8662_v8 }
 0x1ce   :  { %v13825_v6 = vld [vmem:[#allocation8 + $0x9ec] sm:$0xf0] }
 0x1cf   :  { %v10165_v7 = vld [vmem:[#allocation8 + $0xbd0] sm:$0xf]  ;;  %4205 = vmatpush.bf16.msra.mxu3 %v9462_v0  ;;  %v9910_v20 = vor.u32 %v13825_v6, %v9909_v5  ;;  %4180 = vmatpush.bf16.msra.mxu1 %v8918_v13  ;;  %v3961_v0 = vpop.f32.mrf.mxu0  ;;  %v3974_v6 = vpop.f32.mrf.mxu1 }
 0x1d0   :  { %v13889_v10 = vld [vmem:[#allocation8 + $0xbec] sm:$0xf0]  ;;  %4168 = vmatmul.bf16.vlgmr.msra.gmra.mxu0 %v14374_v9 }
 0x1d1   :  { %v10421_v11 = vld [vmem:[#allocation8 + $0xdd0] sm:$0xf]  ;;  %v10166_v21 = vor.u32 %v13889_v10, %v10165_v7  ;;  %4193 = vmatpush.bf16.msra.mxu2 %v9174_v14  ;;  %4212 = vmatpush.bf16.msrb.mxu0 %v9910_v20 }
 0x1d2   :  { %v13953_v12 = vld [vmem:[#allocation8 + $0xdec] sm:$0xf0]  ;;  %4181 = vmatmul.bf16.vlgmr.msra.gmra.mxu1 %v14378_v17 }
 0x1d3   :  { %v10677_v15 = vld [vmem:[#allocation8 + $0xfd0] sm:$0xf]  ;;  %v10422_v22 = vor.u32 %v13953_v12, %v10421_v11  ;;  %4206 = vmatpush.bf16.msra.mxu3 %v9430_v19  ;;  %4225 = vmatpush.bf16.msrb.mxu1 %v10166_v21  ;;  %v3975_v12 = vadd.f32 %v3974_v6, %v3961_v0  ;;  %v13629_v6 = vld [vmem:[#allocation8 + $0x3d4] sm:$0xf] }
 0x1d4   :  { %v14017_v18 = vld [vmem:[#allocation8 + $0xfec] sm:$0xf0]  ;;  %4194 = vmatmul.bf16.vlgmr.msra.gmra.mxu2 %v14371_v63 }
 0x1d5   :  { %v9877_v23 = vld [vmem:[#allocation8 + $0x990] sm:$0xf]  ;;  %v10678_v36 = vor.u32 %v14017_v18, %v10677_v15  ;;  %4238 = vmatpush.bf16.msrb.mxu2 %v10422_v22 }
 0x1d6   :  { %v13817_v24 = vld [vmem:[#allocation8 + $0x9ac] sm:$0xf0]  ;;  %4207 = vmatmul.bf16.vlgmr.msra.gmra.mxu3 %v14376_v16 }
 0x1d7   :  { %v10133_v25 = vld [vmem:[#allocation8 + $0xb90] sm:$0xf]  ;;  %v9878_v61 = vor.u32 %v13817_v24, %v9877_v23  ;;  %4251 = vmatpush.bf16.msrb.mxu3 %v10678_v36  ;;  %v3987_v23 = vpop.f32.mrf.mxu2 }
 0x1d8   :  { %v13881_v26 = vld [vmem:[#allocation8 + $0xbac] sm:$0xf0] }
 0x1d9   :  { %v10389_v27 = vld [vmem:[#allocation8 + $0xd90] sm:$0xf]  ;;  %v10134_v31 = vor.u32 %v13881_v26, %v10133_v25  ;;  %4213 = vmatpush.bf16.msrb.mxu0 %v9878_v61 }
 0x1da   :  { %v13945_v28 = vld [vmem:[#allocation8 + $0xdac] sm:$0xf0] }
 0x1db   :  { %v10645_v29 = vld [vmem:[#allocation8 + $0xf90] sm:$0xf]  ;;  %v10390_v32 = vor.u32 %v13945_v28, %v10389_v27  ;;  %4226 = vmatpush.bf16.msrb.mxu1 %v10134_v31  ;;  %v3988_v27 = vadd.f32 %v3987_v23, %v3975_v12  ;;  %v4000_v28 = vpop.f32.mrf.mxu3  ;;  %v8855_v23 = vld [vmem:[#allocation8 + $0x1b0] sm:$0xf0] }
 0x1dc   :  { %v14009_v30 = vld [vmem:[#allocation8 + $0xfac] sm:$0xf0] }
 0x1dd   :  { %v9845_v35 = vld [vmem:[#allocation8 + $0x950] sm:$0xf]  ;;  %v10646_v42 = vor.u32 %v14009_v30, %v10645_v29  ;;  %4239 = vmatpush.bf16.msrb.mxu2 %v10390_v32  ;;  %v14433_v31 = vadd.f32 %v4000_v28, %v3988_v27  ;;  %v3963_v32 = vpop.f32.mrf.mxu0  ;;  %v9367_v27 = vld [vmem:[#allocation8 + $0x5b0] sm:$0xf0] }
 0x1de   :  { %v13809_v39 = vld [vmem:[#allocation8 + $0x96c] sm:$0xf0]  ;;  %v13749_v28 = vld [vmem:[#allocation8 + $0x794] sm:$0xf] }
 0x1df   :  { %v10101_v41 = vld [vmem:[#allocation8 + $0xb50] sm:$0xf]  ;;  %v9846_v49 = vor.u32 %v13809_v39, %v9845_v35  ;;  %4252 = vmatpush.bf16.msrb.mxu3 %v10646_v42 }
 0x1e0   :  { %v13873_v44 = vld [vmem:[#allocation8 + $0xb6c] sm:$0xf0] }
 0x1e1   :  { %v10357_v45 = vld [vmem:[#allocation8 + $0xd50] sm:$0xf]  ;;  %v10102_v50 = vor.u32 %v13873_v44, %v10101_v41  ;;  %4214 = vmatpush.bf16.msrb.mxu0 %v9846_v49 }
 0x1e2   :  { %v13937_v46 = vld [vmem:[#allocation8 + $0xd6c] sm:$0xf0] }
 0x1e3   :  { %v10613_v47 = vld [vmem:[#allocation8 + $0xf50] sm:$0xf]  ;;  %v10358_v51 = vor.u32 %v13937_v46, %v10357_v45  ;;  %4227 = vmatpush.bf16.msrb.mxu1 %v10102_v50  ;;  %v3976_v45 = vpop.f32.mrf.mxu1 }
 0x1e4   :  { %v14001_v48 = vld [vmem:[#allocation8 + $0xf6c] sm:$0xf0]  ;;  %v13677_v45 = vld [vmem:[#allocation8 + $0x554] sm:$0xf] }
 0x1e5   :  { %v9813_v52 = vld [vmem:[#allocation8 + $0x910] sm:$0xf]  ;;  %v10614_v55 = vor.u32 %v14001_v48, %v10613_v47  ;;  %4240 = vmatpush.bf16.msrb.mxu2 %v10358_v51 }
 0x1e6   :  { %v13801_v53 = vld [vmem:[#allocation8 + $0x92c] sm:$0xf0] }
 0x1e7   :  { %v10069_v54 = vld [vmem:[#allocation8 + $0xb10] sm:$0xf]  ;;  %v9814_v62 = vor.u32 %v13801_v53, %v9813_v52  ;;  %4253 = vmatpush.bf16.msrb.mxu3 %v10614_v55 }
 0x1e8   :  { %v13865_v56 = vld [vmem:[#allocation8 + $0xb2c] sm:$0xf0] }
 0x1e9   :  { %v10325_v57 = vld [vmem:[#allocation8 + $0xd10] sm:$0xf]  ;;  %v10070_v1 = vor.u32 %v13865_v56, %v10069_v54  ;;  %4215 = vmatpush.bf16.msrb.mxu0 %v9814_v62 }
 0x1ea   :  { %v13929_v58 = vld [vmem:[#allocation8 + $0xd2c] sm:$0xf0] }
 0x1eb   :  { %v10581_v59 = vld [vmem:[#allocation8 + $0xf10] sm:$0xf]  ;;  %v10326_v2 = vor.u32 %v13929_v58, %v10325_v57  ;;  %4228 = vmatpush.bf16.msrb.mxu1 %v10070_v1 }
 0x1ec   :  { %v13993_v60 = vld [vmem:[#allocation8 + $0xf2c] sm:$0xf0] }
 0x1ed   :  { %v9781_v3 = vld [vmem:[#allocation8 + $0x8d0] sm:$0xf]  ;;  %v10582_v7 = vor.u32 %v13993_v60, %v10581_v59  ;;  %4241 = vmatpush.bf16.msrb.mxu2 %v10326_v2  ;;  %v3989_v60 = vpop.f32.mrf.mxu2 }
 0x1ee   :  { %v13793_v4 = vld [vmem:[#allocation8 + $0x8ec] sm:$0xf0]  ;;  %v9559_v60 = vld [vmem:[#allocation8 + $0x730] sm:$0xf0] }
 0x1ef   :  { %v10037_v5 = vld [vmem:[#allocation8 + $0xad0] sm:$0xf]  ;;  %v9782_v15 = vor.u32 %v13793_v4, %v9781_v3  ;;  %4254 = vmatpush.bf16.msrb.mxu3 %v10582_v7  ;;  %v4002_v3 = vpop.f32.mrf.mxu3  ;;  %v13565_v4 = vld [vmem:[#allocation8 + $0x1d4] sm:$0xf] }
 0x1f0   :  { %v13857_v8 = vld [vmem:[#allocation8 + $0xaec] sm:$0xf0]  ;;  %v13533_v3 = vld [vmem:[#allocation8 + $0xd4] sm:$0xf] }
 0x1f1   :  { %v10293_v10 = vld [vmem:[#allocation8 + $0xcd0] sm:$0xf]  ;;  %v10038_v18 = vor.u32 %v13857_v8, %v10037_v5  ;;  %4216 = vmatpush.bf16.msrb.mxu0 %v9782_v15  ;;  %v8887_v5 = vld [vmem:[#allocation8 + $0x1f0] sm:$0xf0] }
 0x1f2   :  { %v13921_v11 = vld [vmem:[#allocation8 + $0xcec] sm:$0xf0]  ;;  %v9143_v8 = vld [vmem:[#allocation8 + $0x3f0] sm:$0xf0] }
 0x1f3   :  { %v10549_v13 = vld [vmem:[#allocation8 + $0xed0] sm:$0xf]  ;;  %v10294_v19 = vor.u32 %v13921_v11, %v10293_v10  ;;  %4229 = vmatpush.bf16.msrb.mxu1 %v10038_v18  ;;  %v13693_v10 = vld [vmem:[#allocation8 + $0x5d4] sm:$0xf] }
 0x1f4   :  { %v13985_v14 = vld [vmem:[#allocation8 + $0xeec] sm:$0xf0]  ;;  %v9399_v11 = vld [vmem:[#allocation8 + $0x5f0] sm:$0xf0] }
 0x1f5   :  { %v9749_v20 = vld [vmem:[#allocation8 + $0x890] sm:$0xf]  ;;  %v10550_v24 = vor.u32 %v13985_v14, %v10549_v13  ;;  %4242 = vmatpush.bf16.msrb.mxu2 %v10294_v19  ;;  %v13757_v14 = vld [vmem:[#allocation8 + $0x7d4] sm:$0xf]  ;;  %v8890_v19 = vor.u32 %v13565_v4, %v8887_v5 }
 0x1f6   :  { %v13785_v21 = vld [vmem:[#allocation8 + $0x8ac] sm:$0xf0]  ;;  %v9655_v15 = vld [vmem:[#allocation8 + $0x7f0] sm:$0xf0] }
 0x1f7   :  { %v10005_v22 = vld [vmem:[#allocation8 + $0xa90] sm:$0xf]  ;;  %v9750_v61 = vor.u32 %v13785_v21, %v9749_v20  ;;  %4255 = vmatpush.bf16.msrb.mxu3 %v10550_v24  ;;  %v9146_v20 = vor.u32 %v13629_v6, %v9143_v8  ;;  %v9402_v21 = vor.u32 %v13693_v10, %v9399_v11  ;;  %v13621_v24 = vld [vmem:[#allocation8 + $0x394] sm:$0xf] }
 0x1f8   :  { %v13849_v25 = vld [vmem:[#allocation8 + $0xaac] sm:$0xf0]  ;;  %v8759_v4 = vld [vmem:[#allocation8 + $0xf0] sm:$0xf0] }
 0x1f9   :  { %v10261_v36 = vld [vmem:[#allocation8 + $0xc90] sm:$0xf]  ;;  %v10006_v35 = vor.u32 %v13849_v25, %v10005_v22  ;;  %4217 = vmatpush.bf16.msrb.mxu0 %v9750_v61  ;;  %v13557_v22 = vld [vmem:[#allocation8 + $0x194] sm:$0xf]  ;;  %v9658_v25 = vor.u32 %v13757_v14, %v9655_v15 }
 0x1fa   :  { %v13913_v26 = vld [vmem:[#allocation8 + $0xcac] sm:$0xf0]  ;;  %v13597_v5 = vld [vmem:[#allocation8 + $0x2d4] sm:$0xf] }
 0x1fb   :  { %v10517_v29 = vld [vmem:[#allocation8 + $0xe90] sm:$0xf]  ;;  %v10262_v39 = vor.u32 %v13913_v26, %v10261_v36  ;;  %4230 = vmatpush.bf16.msrb.mxu1 %v10006_v35  ;;  %v9111_v36 = vld [vmem:[#allocation8 + $0x3b0] sm:$0xf0] }
 0x1fc   :  { %v13977_v30 = vld [vmem:[#allocation8 + $0xeac] sm:$0xf0]  ;;  %v13685_v26 = vld [vmem:[#allocation8 + $0x594] sm:$0xf]  ;;  %v9114_v61 = vor.u32 %v13621_v24, %v9111_v36  ;;  %v4039_v24 = vpop.f32.mrf.mxu2 }
 0x1fd   :  { %v9717_v41 = vld [vmem:[#allocation8 + $0x850] sm:$0xf]  ;;  %v10518_v46 = vor.u32 %v13977_v30, %v10517_v29  ;;  %4243 = vmatpush.bf16.msrb.mxu2 %v10262_v39  ;;  %v9623_v29 = vld [vmem:[#allocation8 + $0x7b0] sm:$0xf0]  ;;  %v8858_v30 = vor.u32 %v13557_v22, %v8855_v23  ;;  %v9370_v32 = vor.u32 %v13685_v26, %v9367_v27 }
 0x1fe   :  { %v13777_v42 = vld [vmem:[#allocation8 + $0x86c] sm:$0xf0]  ;;  %v13549_v35 = vld [vmem:[#allocation8 + $0x154] sm:$0xf] }
 0x1ff   :  { %v9973_v44 = vld [vmem:[#allocation8 + $0xa50] sm:$0xf]  ;;  %v9718_v52 = vor.u32 %v13777_v42, %v9717_v41  ;;  %4256 = vmatpush.bf16.msrb.mxu3 %v10518_v46  ;;  %v8823_v39 = vld [vmem:[#allocation8 + $0x170] sm:$0xf0]  ;;  %v9626_v42 = vor.u32 %v13749_v28, %v9623_v29  ;;  %v4052_v28 = vpop.f32.mrf.mxu3 }
 0x200   :  { %v13841_v47 = vld [vmem:[#allocation8 + $0xa6c] sm:$0xf0]  ;;  %v13613_v41 = vld [vmem:[#allocation8 + $0x354] sm:$0xf] }
 0x201   :  { %v10229_v48 = vld [vmem:[#allocation8 + $0xc50] sm:$0xf]  ;;  %v9974_v55 = vor.u32 %v13841_v47, %v9973_v44  ;;  %4218 = vmatpush.bf16.msrb.mxu0 %v9718_v52  ;;  %v9079_v44 = vld [vmem:[#allocation8 + $0x370] sm:$0xf0] }
 0x202   :  { %v13905_v49 = vld [vmem:[#allocation8 + $0xc6c] sm:$0xf0]  ;;  %v9335_v46 = vld [vmem:[#allocation8 + $0x570] sm:$0xf0] }
 0x203   :  { %v10485_v50 = vld [vmem:[#allocation8 + $0xe50] sm:$0xf]  ;;  %v10230_v56 = vor.u32 %v13905_v49, %v10229_v48  ;;  %4231 = vmatpush.bf16.msrb.mxu1 %v9974_v55  ;;  %v13741_v47 = vld [vmem:[#allocation8 + $0x754] sm:$0xf]  ;;  %v8826_v49 = vor.u32 %v13549_v35, %v8823_v39 }
 0x204   :  { %v13969_v51 = vld [vmem:[#allocation8 + $0xe6c] sm:$0xf0]  ;;  %v9591_v48 = vld [vmem:[#allocation8 + $0x770] sm:$0xf0] }
 0x205   :  { %v9685_v53 = vld [vmem:[#allocation8 + $0x810] sm:$0xf]  ;;  %v10486_v62 = vor.u32 %v13969_v51, %v10485_v50  ;;  %4244 = vmatpush.bf16.msrb.mxu2 %v10230_v56  ;;  %v9082_v50 = vor.u32 %v13613_v41, %v9079_v44  ;;  %v9338_v51 = vor.u32 %v13677_v45, %v9335_v46  ;;  %v13541_v52 = vld [vmem:[#allocation8 + $0x114] sm:$0xf]  ;;  %v9594_v55 = vor.u32 %v13741_v47, %v9591_v48 }
 0x206   :  { %v13769_v54 = vld [vmem:[#allocation8 + $0x82c] sm:$0xf0]  ;;  %v9047_v56 = vld [vmem:[#allocation8 + $0x330] sm:$0xf0] }
 0x207   :  { %v9941_v57 = vld [vmem:[#allocation8 + $0xa10] sm:$0xf]  ;;  %v9686_v7 = vor.u32 %v13769_v54, %v9685_v53  ;;  %4257 = vmatpush.bf16.msrb.mxu3 %v10486_v62  ;;  %v8791_v53 = vld [vmem:[#allocation8 + $0x130] sm:$0xf0] }
 0x208   :  { %v13833_v58 = vld [vmem:[#allocation8 + $0xa2c] sm:$0xf0]  ;;  %v13605_v54 = vld [vmem:[#allocation8 + $0x314] sm:$0xf]  ;;  %v8794_v62 = vor.u32 %v13541_v52, %v8791_v53 }
 0x209   :  { %v10197_v59 = vld [vmem:[#allocation8 + $0xc10] sm:$0xf]  ;;  %v9942_v12 = vor.u32 %v13833_v58, %v9941_v57  ;;  %4219 = vmatpush.bf16.msrb.mxu0 %v9686_v7  ;;  %v13669_v57 = vld [vmem:[#allocation8 + $0x514] sm:$0xf]  ;;  %v4026_v7 = vpop.f32.mrf.mxu1 }
 0x20a   :  { %v13897_v0 = vld [vmem:[#allocation8 + $0xc2c] sm:$0xf0]  ;;  %v9303_v58 = vld [vmem:[#allocation8 + $0x530] sm:$0xf0] }
 0x20b   :  { %v10453_v1 = vld [vmem:[#allocation8 + $0xe10] sm:$0xf]  ;;  %v10198_v13 = vor.u32 %v13897_v0, %v10197_v59  ;;  %4232 = vmatpush.bf16.msrb.mxu1 %v9942_v12  ;;  %v13733_v59 = vld [vmem:[#allocation8 + $0x714] sm:$0xf]  ;;  %v4013_v0 = vpop.f32.mrf.mxu0 }
 0x20c   :  { %v13961_v2 = vld [vmem:[#allocation8 + $0xe2c] sm:$0xf0]  ;;  %4220 = vmatmul.bf16.vlgmr.msrb.gmra.mxu0 %v14385_v37  ;;  %v4014_v6 = vadd.f32 %v4013_v0, %v14433_v31  ;;  %v9562_v8 = vor.u32 %v13733_v59, %v9559_v60  ;;  %v9015_v10 = vld [vmem:[#allocation8 + $0x2f0] sm:$0xf0] }
 0x20d   :  { %v10454_v18 = vor.u32 %v13961_v2, %v10453_v1  ;;  %4245 = vmatpush.bf16.msrb.mxu2 %v10198_v13  ;;  %4264 = vmatpush.bf16.msra.mxu0 %v8890_v19  ;;  %v9050_v1 = vor.u32 %v13605_v54, %v9047_v56  ;;  %v9306_v2 = vor.u32 %v13669_v57, %v9303_v58  ;;  %v13661_v11 = vld [vmem:[#allocation8 + $0x4d4] sm:$0xf] }
 0x20e   :  { %4233 = vmatmul.bf16.vlgmr.msrb.gmra.mxu1 %v14389_v40  ;;  %v9271_v12 = vld [vmem:[#allocation8 + $0x4f0] sm:$0xf0]  ;;  %v4027_v15 = vadd.f32 %v4026_v7, %v4014_v6  ;;  %v9018_v19 = vor.u32 %v13597_v5, %v9015_v10 }
 0x20f   :  { %4258 = vmatpush.bf16.msrb.mxu3 %v10454_v18  ;;  %4277 = vmatpush.bf16.msra.mxu1 %v9146_v20  ;;  %v13725_v13 = vld [vmem:[#allocation8 + $0x6d4] sm:$0xf]  ;;  %v8762_v18 = vor.u32 %v13533_v3, %v8759_v4  ;;  %v9274_v20 = vor.u32 %v13661_v11, %v9271_v12  ;;  %v4054_v4 = vpop.f32.mrf.mxu3 }
 0x210   :  { %4246 = vmatmul.bf16.vlgmr.msrb.gmra.mxu2 %v14383_v34  ;;  %v9527_v14 = vld [vmem:[#allocation8 + $0x6f0] sm:$0xf0]  ;;  %v4040_v27 = vadd.f32 %v4039_v24, %v4027_v15 }
 0x211   :  { %4290 = vmatpush.bf16.msra.mxu2 %v9402_v21  ;;  %4265 = vmatpush.bf16.msra.mxu0 %v8858_v30  ;;  %v13525_v21 = vld [vmem:[#allocation8 + $0x94] sm:$0xf]  ;;  %v9530_v31 = vor.u32 %v13725_v13, %v9527_v14  ;;  %v4028_v46 = vpop.f32.mrf.mxu1 }
 0x212   :  { %4259 = vmatmul.bf16.vlgmr.msrb.gmra.mxu3 %v14387_v38  ;;  %v8727_v22 = vld [vmem:[#allocation8 + $0xb0] sm:$0xf0] }
 0x213   :  { %4303 = vmatpush.bf16.msra.mxu3 %v9658_v25  ;;  %4278 = vmatpush.bf16.msra.mxu1 %v9114_v61  ;;  %v13589_v23 = vld [vmem:[#allocation8 + $0x294] sm:$0xf]  ;;  %v8730_v61 = vor.u32 %v13525_v21, %v8727_v22  ;;  %v4015_v35 = vpop.f32.mrf.mxu0 }
 0x214   :  { %v8983_v25 = vld [vmem:[#allocation8 + $0x2b0] sm:$0xf0] }
 0x215   :  { %4291 = vmatpush.bf16.msra.mxu2 %v9370_v32  ;;  %4266 = vmatpush.bf16.msra.mxu0 %v8826_v49  ;;  %v13653_v36 = vld [vmem:[#allocation8 + $0x494] sm:$0xf]  ;;  %v14440_v32 = vadd.f32 %v4052_v28, %v4040_v27  ;;  %v8986_v39 = vor.u32 %v13589_v23, %v8983_v25 }
 0x216   :  { %v9239_v26 = vld [vmem:[#allocation8 + $0x4b0] sm:$0xf0] }
 0x217   :  { %4304 = vmatpush.bf16.msra.mxu3 %v9626_v42  ;;  %4279 = vmatpush.bf16.msra.mxu1 %v9082_v50  ;;  %v13717_v29 = vld [vmem:[#allocation8 + $0x694] sm:$0xf]  ;;  %v9242_v41 = vor.u32 %v13653_v36, %v9239_v26 }
 0x218   :  { %v9495_v30 = vld [vmem:[#allocation8 + $0x6b0] sm:$0xf0] }
 0x219   :  { %4292 = vmatpush.bf16.msra.mxu2 %v9338_v51  ;;  %4267 = vmatpush.bf16.msra.mxu0 %v8794_v62  ;;  %v13517_v42 = vld [vmem:[#allocation8 + $0x54] sm:$0xf]  ;;  %v9498_v47 = vor.u32 %v13717_v29, %v9495_v30  ;;  %v4041_v62 = vpop.f32.mrf.mxu2 }
 0x21a   :  { %v8695_v44 = vld [vmem:[#allocation8 + $0x70] sm:$0xf0] }
 0x21b   :  { %4305 = vmatpush.bf16.msra.mxu3 %v9594_v55  ;;  %4280 = vmatpush.bf16.msra.mxu1 %v9050_v1  ;;  %v13581_v45 = vld [vmem:[#allocation8 + $0x254] sm:$0xf]  ;;  %v8698_v53 = vor.u32 %v13517_v42, %v8695_v44 }
 0x21c   :  { %v8951_v48 = vld [vmem:[#allocation8 + $0x270] sm:$0xf0] }
 0x21d   :  { %4293 = vmatpush.bf16.msra.mxu2 %v9306_v2  ;;  %4268 = vmatpush.bf16.msra.mxu0 %v8762_v18  ;;  %v13645_v49 = vld [vmem:[#allocation8 + $0x454] sm:$0xf]  ;;  %v8954_v56 = vor.u32 %v13581_v45, %v8951_v48 }
 0x21e   :  { %v9207_v50 = vld [vmem:[#allocation8 + $0x470] sm:$0xf0] }
 0x21f   :  { %4306 = vmatpush.bf16.msra.mxu3 %v9562_v8  ;;  %4281 = vmatpush.bf16.msra.mxu1 %v9018_v19  ;;  %v13709_v51 = vld [vmem:[#allocation8 + $0x654] sm:$0xf]  ;;  %v9210_v57 = vor.u32 %v13645_v49, %v9207_v50 }
 0x220   :  { %v9463_v52 = vld [vmem:[#allocation8 + $0x670] sm:$0xf0] }
 0x221   :  { %4294 = vmatpush.bf16.msra.mxu2 %v9274_v20  ;;  %4269 = vmatpush.bf16.msra.mxu0 %v8730_v61  ;;  %v13509_v54 = vld [vmem:[#allocation8 + $0x14] sm:$0xf]  ;;  %v9466_v0 = vor.u32 %v13709_v51, %v9463_v52 }
 0x222   :  { %v8663_v55 = vld [vmem:[#allocation8 + $0x30] sm:$0xf0] }
 0x223   :  { %4307 = vmatpush.bf16.msra.mxu3 %v9530_v31  ;;  %4282 = vmatpush.bf16.msra.mxu1 %v8986_v39  ;;  %v13573_v58 = vld [vmem:[#allocation8 + $0x214] sm:$0xf]  ;;  %v8666_v8 = vor.u32 %v13509_v54, %v8663_v55 }
 0x224   :  { %v8919_v59 = vld [vmem:[#allocation8 + $0x230] sm:$0xf0] }
 0x225   :  { %4295 = vmatpush.bf16.msra.mxu2 %v9242_v41  ;;  %v13637_v60 = vld [vmem:[#allocation8 + $0x414] sm:$0xf]  ;;  %4270 = vmatpush.bf16.msra.mxu0 %v8698_v53  ;;  %v8922_v13 = vor.u32 %v13573_v58, %v8919_v59 }
 0x226   :  { %v9175_v1 = vld [vmem:[#allocation8 + $0x430] sm:$0xf0] }
 0x227   :  { %4308 = vmatpush.bf16.msra.mxu3 %v9498_v47  ;;  %v13701_v2 = vld [vmem:[#allocation8 + $0x614] sm:$0xf]  ;;  %4283 = vmatpush.bf16.msra.mxu1 %v8954_v56  ;;  %v9178_v14 = vor.u32 %v13637_v60, %v9175_v1  ;;  %v4065_v1 = vpop.f32.mrf.mxu0 }
 0x228   :  { %v9431_v3 = vld [vmem:[#allocation8 + $0x630] sm:$0xf0] }
 0x229   :  { %v13821_v5 = vld [vmem:[#allocation8 + $0x9d4] sm:$0xf]  ;;  %4296 = vmatpush.bf16.msra.mxu2 %v9210_v57  ;;  %v9434_v19 = vor.u32 %v13701_v2, %v9431_v3  ;;  %4271 = vmatpush.bf16.msra.mxu0 %v8666_v8 }
 0x22a   :  { %v9911_v6 = vld [vmem:[#allocation8 + $0x9f0] sm:$0xf0] }
 0x22b   :  { %v13885_v7 = vld [vmem:[#allocation8 + $0xbd4] sm:$0xf]  ;;  %4309 = vmatpush.bf16.msra.mxu3 %v9466_v0  ;;  %v9914_v20 = vor.u32 %v13821_v5, %v9911_v6  ;;  %4284 = vmatpush.bf16.msra.mxu1 %v8922_v13 }
 0x22c   :  { %v10167_v10 = vld [vmem:[#allocation8 + $0xbf0] sm:$0xf0]  ;;  %4272 = vmatmul.bf16.vlgmr.msra.gmra.mxu0 %v14374_v9 }
 0x22d   :  { %v13949_v11 = vld [vmem:[#allocation8 + $0xdd4] sm:$0xf]  ;;  %v10170_v21 = vor.u32 %v13885_v7, %v10167_v10  ;;  %4297 = vmatpush.bf16.msra.mxu2 %v9178_v14  ;;  %4316 = vmatpush.bf16.msrb.mxu0 %v9914_v20  ;;  %v4078_v7 = vpop.f32.mrf.mxu1 }
 0x22e   :  { %v10423_v12 = vld [vmem:[#allocation8 + $0xdf0] sm:$0xf0]  ;;  %4285 = vmatmul.bf16.vlgmr.msra.gmra.mxu1 %v14378_v17  ;;  %v4079_v13 = vadd.f32 %v4078_v7, %v4065_v1  ;;  %v13570_v7 = vld [vmem:[#allocation8 + $0x1f4] sm:$0xf0] }
 0x22f   :  { %v14013_v15 = vld [vmem:[#allocation8 + $0xfd4] sm:$0xf]  ;;  %v10426_v22 = vor.u32 %v13949_v11, %v10423_v12  ;;  %4310 = vmatpush.bf16.msra.mxu3 %v9434_v19  ;;  %4329 = vmatpush.bf16.msrb.mxu1 %v10170_v21 }
 0x230   :  { %v10679_v18 = vld [vmem:[#allocation8 + $0xff0] sm:$0xf0]  ;;  %4298 = vmatmul.bf16.vlgmr.msra.gmra.mxu2 %v14371_v63 }
 0x231   :  { %v13813_v23 = vld [vmem:[#allocation8 + $0x994] sm:$0xf]  ;;  %v10682_v25 = vor.u32 %v14013_v15, %v10679_v18  ;;  %4342 = vmatpush.bf16.msrb.mxu2 %v10426_v22 }
 0x232   :  { %v9879_v24 = vld [vmem:[#allocation8 + $0x9b0] sm:$0xf0]  ;;  %4311 = vmatmul.bf16.vlgmr.msra.gmra.mxu3 %v14376_v16 }
 0x233   :  { %v13877_v31 = vld [vmem:[#allocation8 + $0xb94] sm:$0xf]  ;;  %v9882_v30 = vor.u32 %v13813_v23, %v9879_v24  ;;  %4355 = vmatpush.bf16.msrb.mxu3 %v10682_v25  ;;  %v4091_v24 = vpop.f32.mrf.mxu2 }
 0x234   :  { %v10135_v36 = vld [vmem:[#allocation8 + $0xbb0] sm:$0xf0] }
 0x235   :  { %v13941_v26 = vld [vmem:[#allocation8 + $0xd94] sm:$0xf]  ;;  %v10138_v61 = vor.u32 %v13877_v31, %v10135_v36  ;;  %4317 = vmatpush.bf16.msrb.mxu0 %v9882_v30 }
 0x236   :  { %v10391_v27 = vld [vmem:[#allocation8 + $0xdb0] sm:$0xf0] }
 0x237   :  { %v14005_v28 = vld [vmem:[#allocation8 + $0xf94] sm:$0xf]  ;;  %v10394_v35 = vor.u32 %v13941_v26, %v10391_v27  ;;  %4330 = vmatpush.bf16.msrb.mxu1 %v10138_v61  ;;  %v4092_v27 = vadd.f32 %v4091_v24, %v4079_v13  ;;  %v13698_v13 = vld [vmem:[#allocation8 + $0x5f4] sm:$0xf0] }
 0x238   :  { %v10647_v29 = vld [vmem:[#allocation8 + $0xfb0] sm:$0xf0]  ;;  %v8861_v24 = vld [vmem:[#allocation8 + $0x198] sm:$0xf] }
 0x239   :  { %v13805_v39 = vld [vmem:[#allocation8 + $0x954] sm:$0xf]  ;;  %v10650_v44 = vor.u32 %v14005_v28, %v10647_v29  ;;  %4343 = vmatpush.bf16.msrb.mxu2 %v10394_v35  ;;  %v4104_v28 = vpop.f32.mrf.mxu3 }
 0x23a   :  { %v9847_v41 = vld [vmem:[#allocation8 + $0x970] sm:$0xf0]  ;;  %v14446_v35 = vadd.f32 %v4104_v28, %v4092_v27  ;;  %v9373_v27 = vld [vmem:[#allocation8 + $0x598] sm:$0xf] }
 0x23b   :  { %v13869_v42 = vld [vmem:[#allocation8 + $0xb54] sm:$0xf]  ;;  %v9850_v50 = vor.u32 %v13805_v39, %v9847_v41  ;;  %4356 = vmatpush.bf16.msrb.mxu3 %v10650_v44  ;;  %v4067_v39 = vpop.f32.mrf.mxu0  ;;  %v13690_v28 = vld [vmem:[#allocation8 + $0x5b4] sm:$0xf0] }
 0x23c   :  { %v10103_v45 = vld [vmem:[#allocation8 + $0xb70] sm:$0xf0] }
 0x23d   :  { %v13933_v46 = vld [vmem:[#allocation8 + $0xd54] sm:$0xf]  ;;  %v10106_v51 = vor.u32 %v13869_v42, %v10103_v45  ;;  %4318 = vmatpush.bf16.msrb.mxu0 %v9850_v50 }
 0x23e   :  { %v10359_v47 = vld [vmem:[#allocation8 + $0xd70] sm:$0xf0] }
 0x23f   :  { %v13997_v48 = vld [vmem:[#allocation8 + $0xf54] sm:$0xf]  ;;  %v10362_v52 = vor.u32 %v13933_v46, %v10359_v47  ;;  %4331 = vmatpush.bf16.msrb.mxu1 %v10106_v51  ;;  %v4080_v47 = vpop.f32.mrf.mxu1 }
 0x240   :  { %v10615_v49 = vld [vmem:[#allocation8 + $0xf70] sm:$0xf0]  ;;  %v13618_v47 = vld [vmem:[#allocation8 + $0x374] sm:$0xf0] }
 0x241   :  { %v13797_v53 = vld [vmem:[#allocation8 + $0x914] sm:$0xf]  ;;  %v10618_v56 = vor.u32 %v13997_v48, %v10615_v49  ;;  %4344 = vmatpush.bf16.msrb.mxu2 %v10362_v52 }
 0x242   :  { %v9815_v54 = vld [vmem:[#allocation8 + $0x930] sm:$0xf0] }
 0x243   :  { %v13861_v55 = vld [vmem:[#allocation8 + $0xb14] sm:$0xf]  ;;  %v9818_v0 = vor.u32 %v13797_v53, %v9815_v54  ;;  %4357 = vmatpush.bf16.msrb.mxu3 %v10618_v56 }
 0x244   :  { %v10071_v57 = vld [vmem:[#allocation8 + $0xb30] sm:$0xf0] }
 0x245   :  { %v13925_v58 = vld [vmem:[#allocation8 + $0xd14] sm:$0xf]  ;;  %v10074_v2 = vor.u32 %v13861_v55, %v10071_v57  ;;  %4319 = vmatpush.bf16.msrb.mxu0 %v9818_v0  ;;  %v4093_v0 = vpop.f32.mrf.mxu2 }
 0x246   :  { %v10327_v59 = vld [vmem:[#allocation8 + $0xd30] sm:$0xf0]  ;;  %v9565_v0 = vld [vmem:[#allocation8 + $0x718] sm:$0xf] }
 0x247   :  { %v13989_v60 = vld [vmem:[#allocation8 + $0xf14] sm:$0xf]  ;;  %v10330_v3 = vor.u32 %v13925_v58, %v10327_v59  ;;  %4332 = vmatpush.bf16.msrb.mxu1 %v10074_v2 }
 0x248   :  { %v10583_v62 = vld [vmem:[#allocation8 + $0xf30] sm:$0xf0] }
 0x249   :  { %v13789_v4 = vld [vmem:[#allocation8 + $0x8d4] sm:$0xf]  ;;  %v10586_v8 = vor.u32 %v13989_v60, %v10583_v62  ;;  %4345 = vmatpush.bf16.msrb.mxu2 %v10330_v3 }
 0x24a   :  { %v9783_v5 = vld [vmem:[#allocation8 + $0x8f0] sm:$0xf0] }
 0x24b   :  { %v13853_v6 = vld [vmem:[#allocation8 + $0xad4] sm:$0xf]  ;;  %v9786_v18 = vor.u32 %v13789_v4, %v9783_v5  ;;  %4358 = vmatpush.bf16.msrb.mxu3 %v10586_v8  ;;  %v4106_v5 = vpop.f32.mrf.mxu3  ;;  %v9149_v8 = vld [vmem:[#allocation8 + $0x3d8] sm:$0xf] }
 0x24c   :  { %v10039_v10 = vld [vmem:[#allocation8 + $0xaf0] sm:$0xf0] }
 0x24d   :  { %v13917_v11 = vld [vmem:[#allocation8 + $0xcd4] sm:$0xf]  ;;  %v10042_v19 = vor.u32 %v13853_v6, %v10039_v10  ;;  %4320 = vmatpush.bf16.msrb.mxu0 %v9786_v18  ;;  %v8893_v6 = vld [vmem:[#allocation8 + $0x1d8] sm:$0xf] }
 0x24e   :  { %v10295_v12 = vld [vmem:[#allocation8 + $0xcf0] sm:$0xf0]  ;;  %v9661_v18 = vld [vmem:[#allocation8 + $0x7d8] sm:$0xf] }
 0x24f   :  { %v13981_v14 = vld [vmem:[#allocation8 + $0xed4] sm:$0xf]  ;;  %v10298_v20 = vor.u32 %v13917_v11, %v10295_v12  ;;  %4333 = vmatpush.bf16.msrb.mxu1 %v10042_v19  ;;  %v13634_v11 = vld [vmem:[#allocation8 + $0x3f4] sm:$0xf0] }
 0x250   :  { %v10551_v15 = vld [vmem:[#allocation8 + $0xef0] sm:$0xf0]  ;;  %v9405_v12 = vld [vmem:[#allocation8 + $0x5d8] sm:$0xf] }
 0x251   :  { %v13781_v21 = vld [vmem:[#allocation8 + $0x894] sm:$0xf]  ;;  %v10554_v31 = vor.u32 %v13981_v14, %v10551_v15  ;;  %4346 = vmatpush.bf16.msrb.mxu2 %v10298_v20  ;;  %v13762_v19 = vld [vmem:[#allocation8 + $0x7f4] sm:$0xf0] }
 0x252   :  { %v9751_v22 = vld [vmem:[#allocation8 + $0x8b0] sm:$0xf0] }
 0x253   :  { %v13845_v23 = vld [vmem:[#allocation8 + $0xa94] sm:$0xf]  ;;  %v9754_v61 = vor.u32 %v13781_v21, %v9751_v22  ;;  %4359 = vmatpush.bf16.msrb.mxu3 %v10554_v31  ;;  %v8894_v21 = vor.u32 %v13570_v7, %v8893_v6  ;;  %v9150_v22 = vor.u32 %v13634_v11, %v9149_v8  ;;  %v13562_v31 = vld [vmem:[#allocation8 + $0x1b4] sm:$0xf0]  ;;  %v4130_v11 = vpop.f32.mrf.mxu1 }
 0x254   :  { %v10007_v25 = vld [vmem:[#allocation8 + $0xab0] sm:$0xf0]  ;;  %v8765_v6 = vld [vmem:[#allocation8 + $0xd8] sm:$0xf] }
 0x255   :  { %v13909_v36 = vld [vmem:[#allocation8 + $0xc94] sm:$0xf]  ;;  %v10010_v41 = vor.u32 %v13845_v23, %v10007_v25  ;;  %4321 = vmatpush.bf16.msrb.mxu0 %v9754_v61  ;;  %v9406_v23 = vor.u32 %v13698_v13, %v9405_v12  ;;  %v9117_v25 = vld [vmem:[#allocation8 + $0x398] sm:$0xf]  ;;  %v8862_v61 = vor.u32 %v13562_v31, %v8861_v24 }
 0x256   :  { %v10263_v26 = vld [vmem:[#allocation8 + $0xcb0] sm:$0xf0]  ;;  %v13538_v7 = vld [vmem:[#allocation8 + $0xf4] sm:$0xf0] }
 0x257   :  { %v13973_v29 = vld [vmem:[#allocation8 + $0xe94] sm:$0xf]  ;;  %v10266_v42 = vor.u32 %v13909_v36, %v10263_v26  ;;  %4334 = vmatpush.bf16.msrb.mxu1 %v10010_v41  ;;  %v9662_v36 = vor.u32 %v13762_v19, %v9661_v18  ;;  %v13626_v26 = vld [vmem:[#allocation8 + $0x3b4] sm:$0xf0]  ;;  %v9374_v41 = vor.u32 %v13690_v28, %v9373_v27 }
 0x258   :  { %v10519_v30 = vld [vmem:[#allocation8 + $0xeb0] sm:$0xf0]  ;;  %v9118_v39 = vor.u32 %v13626_v26, %v9117_v25  ;;  %v9021_v8 = vld [vmem:[#allocation8 + $0x2d8] sm:$0xf] }
 0x259   :  { %v13773_v44 = vld [vmem:[#allocation8 + $0x854] sm:$0xf]  ;;  %v10522_v48 = vor.u32 %v13973_v29, %v10519_v30  ;;  %4347 = vmatpush.bf16.msrb.mxu2 %v10266_v42  ;;  %v9629_v29 = vld [vmem:[#allocation8 + $0x798] sm:$0xf] }
 0x25a   :  { %v9719_v45 = vld [vmem:[#allocation8 + $0x870] sm:$0xf0]  ;;  %v13754_v30 = vld [vmem:[#allocation8 + $0x7b4] sm:$0xf0] }
 0x25b   :  { %v13837_v46 = vld [vmem:[#allocation8 + $0xa54] sm:$0xf]  ;;  %v9722_v54 = vor.u32 %v13773_v44, %v9719_v45  ;;  %4360 = vmatpush.bf16.msrb.mxu3 %v10522_v48  ;;  %v8829_v42 = vld [vmem:[#allocation8 + $0x158] sm:$0xf] }
 0x25c   :  { %v9975_v49 = vld [vmem:[#allocation8 + $0xa70] sm:$0xf0]  ;;  %v13554_v44 = vld [vmem:[#allocation8 + $0x174] sm:$0xf0] }
 0x25d   :  { %v13901_v50 = vld [vmem:[#allocation8 + $0xc54] sm:$0xf]  ;;  %v9978_v57 = vor.u32 %v13837_v46, %v9975_v49  ;;  %4322 = vmatpush.bf16.msrb.mxu0 %v9722_v54  ;;  %v9085_v45 = vld [vmem:[#allocation8 + $0x358] sm:$0xf]  ;;  %v9630_v46 = vor.u32 %v13754_v30, %v9629_v29  ;;  %v4156_v30 = vpop.f32.mrf.mxu3 }
 0x25e   :  { %v10231_v51 = vld [vmem:[#allocation8 + $0xc70] sm:$0xf0]  ;;  %v9341_v48 = vld [vmem:[#allocation8 + $0x558] sm:$0xf] }
 0x25f   :  { %v13965_v52 = vld [vmem:[#allocation8 + $0xe54] sm:$0xf]  ;;  %v10234_v58 = vor.u32 %v13901_v50, %v10231_v51  ;;  %4335 = vmatpush.bf16.msrb.mxu1 %v9978_v57  ;;  %v13682_v49 = vld [vmem:[#allocation8 + $0x574] sm:$0xf0] }
 0x260   :  { %v10487_v53 = vld [vmem:[#allocation8 + $0xe70] sm:$0xf0]  ;;  %v9597_v50 = vld [vmem:[#allocation8 + $0x758] sm:$0xf]  ;;  %v9342_v54 = vor.u32 %v13682_v49, %v9341_v48 }
 0x261   :  { %v13765_v55 = vld [vmem:[#allocation8 + $0x814] sm:$0xf]  ;;  %v10490_v1 = vor.u32 %v13965_v52, %v10487_v53  ;;  %4348 = vmatpush.bf16.msrb.mxu2 %v10234_v58  ;;  %v13746_v51 = vld [vmem:[#allocation8 + $0x774] sm:$0xf0]  ;;  %v8830_v52 = vor.u32 %v13554_v44, %v8829_v42  ;;  %v9086_v53 = vor.u32 %v13618_v47, %v9085_v45 }
 0x262   :  { %v9687_v56 = vld [vmem:[#allocation8 + $0x830] sm:$0xf0]  ;;  %v9053_v57 = vld [vmem:[#allocation8 + $0x318] sm:$0xf]  ;;  %v9598_v58 = vor.u32 %v13746_v51, %v9597_v50  ;;  %v4132_v50 = vpop.f32.mrf.mxu1 }
 0x263   :  { %v13829_v59 = vld [vmem:[#allocation8 + $0xa14] sm:$0xf]  ;;  %v9690_v10 = vor.u32 %v13765_v55, %v9687_v56  ;;  %4361 = vmatpush.bf16.msrb.mxu3 %v10490_v1  ;;  %v8797_v55 = vld [vmem:[#allocation8 + $0x118] sm:$0xf] }
 0x264   :  { %v9943_v60 = vld [vmem:[#allocation8 + $0xa30] sm:$0xf0]  ;;  %v13546_v56 = vld [vmem:[#allocation8 + $0x134] sm:$0xf0] }
 0x265   :  { %v13893_v62 = vld [vmem:[#allocation8 + $0xc14] sm:$0xf]  ;;  %v9946_v14 = vor.u32 %v13829_v59, %v9943_v60  ;;  %4323 = vmatpush.bf16.msrb.mxu0 %v9690_v10  ;;  %v13610_v59 = vld [vmem:[#allocation8 + $0x334] sm:$0xf0] }
 0x266   :  { %v10199_v2 = vld [vmem:[#allocation8 + $0xc30] sm:$0xf0]  ;;  %v9309_v60 = vld [vmem:[#allocation8 + $0x518] sm:$0xf] }
 0x267   :  { %v13957_v3 = vld [vmem:[#allocation8 + $0xe14] sm:$0xf]  ;;  %v10202_v15 = vor.u32 %v13893_v62, %v10199_v2  ;;  %4336 = vmatpush.bf16.msrb.mxu1 %v9946_v14  ;;  %v13674_v62 = vld [vmem:[#allocation8 + $0x534] sm:$0xf0]  ;;  %v8798_v2 = vor.u32 %v13546_v56, %v8797_v55 }
 0x268   :  { %v10455_v4 = vld [vmem:[#allocation8 + $0xe30] sm:$0xf0]  ;;  %4324 = vmatmul.bf16.vlgmr.msrb.gmra.mxu0 %v14385_v37  ;;  %v13738_v1 = vld [vmem:[#allocation8 + $0x734] sm:$0xf0]  ;;  %v9310_v5 = vor.u32 %v13674_v62, %v9309_v60 }
 0x269   :  { %v10458_v20 = vor.u32 %v13957_v3, %v10455_v4  ;;  %4349 = vmatpush.bf16.msrb.mxu2 %v10202_v15  ;;  %4368 = vmatpush.bf16.msra.mxu0 %v8894_v21  ;;  %v4117_v3 = vpop.f32.mrf.mxu0  ;;  %v9054_v4 = vor.u32 %v13610_v59, %v9053_v57  ;;  %v9566_v12 = vor.u32 %v13738_v1, %v9565_v0  ;;  %v13602_v13 = vld [vmem:[#allocation8 + $0x2f4] sm:$0xf0] }
 0x26a   :  { %4337 = vmatmul.bf16.vlgmr.msrb.gmra.mxu1 %v14389_v40  ;;  %v4118_v10 = vadd.f32 %v4117_v3, %v14446_v35  ;;  %v9277_v14 = vld [vmem:[#allocation8 + $0x4d8] sm:$0xf]  ;;  %v8766_v21 = vor.u32 %v13538_v7, %v8765_v6 }
 0x26b   :  { %4362 = vmatpush.bf16.msrb.mxu3 %v10458_v20  ;;  %4381 = vmatpush.bf16.msra.mxu1 %v9150_v22  ;;  %v13666_v15 = vld [vmem:[#allocation8 + $0x4f4] sm:$0xf0]  ;;  %v9022_v22 = vor.u32 %v13602_v13, %v9021_v8  ;;  %v4158_v8 = vpop.f32.mrf.mxu3 }
 0x26c   :  { %4350 = vmatmul.bf16.vlgmr.msrb.gmra.mxu2 %v14383_v34  ;;  %v9533_v18 = vld [vmem:[#allocation8 + $0x6d8] sm:$0xf]  ;;  %v4131_v20 = vadd.f32 %v4130_v11, %v4118_v10 }
 0x26d   :  { %4394 = vmatpush.bf16.msra.mxu2 %v9406_v23  ;;  %4369 = vmatpush.bf16.msra.mxu0 %v8862_v61  ;;  %v13730_v19 = vld [vmem:[#allocation8 + $0x6f4] sm:$0xf0]  ;;  %v9278_v23 = vor.u32 %v13666_v15, %v9277_v14 }
 0x26e   :  { %4363 = vmatmul.bf16.vlgmr.msrb.gmra.mxu3 %v14387_v38  ;;  %v8733_v24 = vld [vmem:[#allocation8 + $0x98] sm:$0xf]  ;;  %v9534_v35 = vor.u32 %v13730_v19, %v9533_v18 }
 0x26f   :  { %4407 = vmatpush.bf16.msra.mxu3 %v9662_v36  ;;  %4382 = vmatpush.bf16.msra.mxu1 %v9118_v39  ;;  %v13530_v31 = vld [vmem:[#allocation8 + $0xb4] sm:$0xf0]  ;;  %v4143_v36 = vpop.f32.mrf.mxu2 }
 0x270   :  { %v8989_v25 = vld [vmem:[#allocation8 + $0x298] sm:$0xf]  ;;  %v4144_v29 = vadd.f32 %v4143_v36, %v4131_v20 }
 0x271   :  { %4395 = vmatpush.bf16.msra.mxu2 %v9374_v41  ;;  %4370 = vmatpush.bf16.msra.mxu0 %v8830_v52  ;;  %v13594_v26 = vld [vmem:[#allocation8 + $0x2b4] sm:$0xf0]  ;;  %v8734_v41 = vor.u32 %v13530_v31, %v8733_v24  ;;  %v4119_v44 = vpop.f32.mrf.mxu0 }
 0x272   :  { %v9245_v27 = vld [vmem:[#allocation8 + $0x498] sm:$0xf]  ;;  %v14453_v42 = vadd.f32 %v4156_v30, %v4144_v29  ;;  %v8990_v45 = vor.u32 %v13594_v26, %v8989_v25 }
 0x273   :  { %4408 = vmatpush.bf16.msra.mxu3 %v9630_v46  ;;  %4383 = vmatpush.bf16.msra.mxu1 %v9086_v53  ;;  %v13658_v28 = vld [vmem:[#allocation8 + $0x4b4] sm:$0xf0] }
 0x274   :  { %v9501_v61 = vld [vmem:[#allocation8 + $0x698] sm:$0xf]  ;;  %v9246_v46 = vor.u32 %v13658_v28, %v9245_v27 }
 0x275   :  { %4396 = vmatpush.bf16.msra.mxu2 %v9342_v54  ;;  %4371 = vmatpush.bf16.msra.mxu0 %v8798_v2  ;;  %v13722_v39 = vld [vmem:[#allocation8 + $0x6b4] sm:$0xf0] }
 0x276   :  { %v8701_v47 = vld [vmem:[#allocation8 + $0x58] sm:$0xf]  ;;  %v9502_v51 = vor.u32 %v13722_v39, %v9501_v61 }
 0x277   :  { %4409 = vmatpush.bf16.msra.mxu3 %v9598_v58  ;;  %4384 = vmatpush.bf16.msra.mxu1 %v9054_v4  ;;  %v13522_v48 = vld [vmem:[#allocation8 + $0x74] sm:$0xf0]  ;;  %v4145_v3 = vpop.f32.mrf.mxu2 }
 0x278   :  { %v8957_v49 = vld [vmem:[#allocation8 + $0x258] sm:$0xf]  ;;  %v8702_v57 = vor.u32 %v13522_v48, %v8701_v47 }
 0x279   :  { %4397 = vmatpush.bf16.msra.mxu2 %v9310_v5  ;;  %4372 = vmatpush.bf16.msra.mxu0 %v8766_v21  ;;  %v13586_v52 = vld [vmem:[#allocation8 + $0x274] sm:$0xf0] }
 0x27a   :  { %v9213_v53 = vld [vmem:[#allocation8 + $0x458] sm:$0xf]  ;;  %v8958_v60 = vor.u32 %v13586_v52, %v8957_v49 }
 0x27b   :  { %4410 = vmatpush.bf16.msra.mxu3 %v9566_v12  ;;  %4385 = vmatpush.bf16.msra.mxu1 %v9022_v22  ;;  %v13650_v54 = vld [vmem:[#allocation8 + $0x474] sm:$0xf0] }
 0x27c   :  { %v9469_v55 = vld [vmem:[#allocation8 + $0x658] sm:$0xf]  ;;  %v9214_v62 = vor.u32 %v13650_v54, %v9213_v53 }
 0x27d   :  { %4398 = vmatpush.bf16.msra.mxu2 %v9278_v23  ;;  %v13714_v56 = vld [vmem:[#allocation8 + $0x674] sm:$0xf0]  ;;  %4373 = vmatpush.bf16.msra.mxu0 %v8734_v41 }
 0x27e   :  { %v8669_v58 = vld [vmem:[#allocation8 + $0x18] sm:$0xf]  ;;  %v9470_v4 = vor.u32 %v13714_v56, %v9469_v55 }
 0x27f   :  { %4411 = vmatpush.bf16.msra.mxu3 %v9534_v35  ;;  %v13514_v59 = vld [vmem:[#allocation8 + $0x34] sm:$0xf0]  ;;  %4386 = vmatpush.bf16.msra.mxu1 %v8990_v45 }
 0x280   :  { %v8925_v0 = vld [vmem:[#allocation8 + $0x218] sm:$0xf]  ;;  %v8670_v13 = vor.u32 %v13514_v59, %v8669_v58 }
 0x281   :  { %4399 = vmatpush.bf16.msra.mxu2 %v9246_v46  ;;  %v13578_v1 = vld [vmem:[#allocation8 + $0x234] sm:$0xf0]  ;;  %4374 = vmatpush.bf16.msra.mxu0 %v8702_v57 }
 0x282   :  { %v9181_v2 = vld [vmem:[#allocation8 + $0x418] sm:$0xf]  ;;  %v8926_v19 = vor.u32 %v13578_v1, %v8925_v0 }
 0x283   :  { %4412 = vmatpush.bf16.msra.mxu3 %v9502_v51  ;;  %v13642_v5 = vld [vmem:[#allocation8 + $0x434] sm:$0xf0]  ;;  %4387 = vmatpush.bf16.msra.mxu1 %v8958_v60 }
 0x284   :  { %v9437_v6 = vld [vmem:[#allocation8 + $0x618] sm:$0xf]  ;;  %v9182_v20 = vor.u32 %v13642_v5, %v9181_v2 }
 0x285   :  { %v13706_v7 = vld [vmem:[#allocation8 + $0x634] sm:$0xf0]  ;;  %4400 = vmatpush.bf16.msra.mxu2 %v9214_v62  ;;  %4375 = vmatpush.bf16.msra.mxu0 %v8670_v13  ;;  %v4182_v13 = vpop.f32.mrf.mxu1 }
 0x286   :  { %v9917_v10 = vld [vmem:[#allocation8 + $0x9d8] sm:$0xf]  ;;  %v9438_v23 = vor.u32 %v13706_v7, %v9437_v6  ;;  %v4169_v6 = vpop.f32.mrf.mxu0 }
 0x287   :  { %v13826_v11 = vld [vmem:[#allocation8 + $0x9f4] sm:$0xf0]  ;;  %4413 = vmatpush.bf16.msra.mxu3 %v9470_v4  ;;  %4388 = vmatpush.bf16.msra.mxu1 %v8926_v19 }
 0x288   :  { %v10173_v12 = vld [vmem:[#allocation8 + $0xbd8] sm:$0xf]  ;;  %v9918_v24 = vor.u32 %v13826_v11, %v9917_v10  ;;  %4376 = vmatmul.bf16.vlgmr.msra.gmra.mxu0 %v14374_v9 }
 0x289   :  { %v13890_v14 = vld [vmem:[#allocation8 + $0xbf4] sm:$0xf0]  ;;  %4401 = vmatpush.bf16.msra.mxu2 %v9182_v20  ;;  %v4183_v20 = vadd.f32 %v4182_v13, %v4169_v6  ;;  %v13566_v13 = vld [vmem:[#allocation8 + $0x1dc] sm:$0xf] }
 0x28a   :  { %v10429_v15 = vld [vmem:[#allocation8 + $0xdd8] sm:$0xf]  ;;  %v10174_v31 = vor.u32 %v13890_v14, %v10173_v12  ;;  %4420 = vmatpush.bf16.msrb.mxu0 %v9918_v24  ;;  %4389 = vmatmul.bf16.vlgmr.msra.gmra.mxu1 %v14378_v17 }
 0x28b   :  { %v13954_v18 = vld [vmem:[#allocation8 + $0xdf4] sm:$0xf0]  ;;  %4414 = vmatpush.bf16.msra.mxu3 %v9438_v23 }
 0x28c   :  { %v10685_v21 = vld [vmem:[#allocation8 + $0xfd8] sm:$0xf]  ;;  %v10430_v25 = vor.u32 %v13954_v18, %v10429_v15  ;;  %4433 = vmatpush.bf16.msrb.mxu1 %v10174_v31  ;;  %4402 = vmatmul.bf16.vlgmr.msra.gmra.mxu2 %v14371_v63 }
 0x28d   :  { %v14018_v22 = vld [vmem:[#allocation8 + $0xff4] sm:$0xf0] }
 0x28e   :  { %v9885_v36 = vld [vmem:[#allocation8 + $0x998] sm:$0xf]  ;;  %v10686_v27 = vor.u32 %v14018_v22, %v10685_v21  ;;  %4446 = vmatpush.bf16.msrb.mxu2 %v10430_v25  ;;  %4415 = vmatmul.bf16.vlgmr.msra.gmra.mxu3 %v14376_v16 }
 0x28f   :  { %v13818_v35 = vld [vmem:[#allocation8 + $0x9b4] sm:$0xf0] }
 0x290   :  { %v10141_v26 = vld [vmem:[#allocation8 + $0xb98] sm:$0xf]  ;;  %v9886_v41 = vor.u32 %v13818_v35, %v9885_v36  ;;  %4459 = vmatpush.bf16.msrb.mxu3 %v10686_v27 }
 0x291   :  { %v13882_v28 = vld [vmem:[#allocation8 + $0xbb4] sm:$0xf0] }
 0x292   :  { %v10397_v29 = vld [vmem:[#allocation8 + $0xd98] sm:$0xf]  ;;  %v10142_v44 = vor.u32 %v13882_v28, %v10141_v26  ;;  %4421 = vmatpush.bf16.msrb.mxu0 %v9886_v41  ;;  %v4195_v26 = vpop.f32.mrf.mxu2 }
 0x293   :  { %v13946_v30 = vld [vmem:[#allocation8 + $0xdb4] sm:$0xf0] }
 0x294   :  { %v10653_v61 = vld [vmem:[#allocation8 + $0xf98] sm:$0xf]  ;;  %v10398_v45 = vor.u32 %v13946_v30, %v10397_v29  ;;  %4434 = vmatpush.bf16.msrb.mxu1 %v10142_v44 }
 0x295   :  { %v14010_v39 = vld [vmem:[#allocation8 + $0xfb4] sm:$0xf0] }
 0x296   :  { %v9853_v46 = vld [vmem:[#allocation8 + $0x958] sm:$0xf]  ;;  %v10654_v49 = vor.u32 %v14010_v39, %v10653_v61  ;;  %4447 = vmatpush.bf16.msrb.mxu2 %v10398_v45  ;;  %v4196_v61 = vadd.f32 %v4195_v26, %v4183_v20  ;;  %v4208_v39 = vpop.f32.mrf.mxu3  ;;  %v13694_v20 = vld [vmem:[#allocation8 + $0x5dc] sm:$0xf] }
 0x297   :  { %v13810_v47 = vld [vmem:[#allocation8 + $0x974] sm:$0xf0] }
 0x298   :  { %v10109_v48 = vld [vmem:[#allocation8 + $0xb58] sm:$0xf]  ;;  %v9854_v55 = vor.u32 %v13810_v47, %v9853_v46  ;;  %4460 = vmatpush.bf16.msrb.mxu3 %v10654_v49  ;;  %v14459_v46 = vadd.f32 %v4208_v39, %v4196_v61  ;;  %v4171_v47 = vpop.f32.mrf.mxu0  ;;  %v9119_v61 = vld [vmem:[#allocation8 + $0x3b8] sm:$0xf0] }
 0x299   :  { %v13874_v50 = vld [vmem:[#allocation8 + $0xb74] sm:$0xf0]  ;;  %v13686_v39 = vld [vmem:[#allocation8 + $0x59c] sm:$0xf] }
 0x29a   :  { %v10365_v51 = vld [vmem:[#allocation8 + $0xd58] sm:$0xf]  ;;  %v10110_v56 = vor.u32 %v13874_v50, %v10109_v48  ;;  %4422 = vmatpush.bf16.msrb.mxu0 %v9854_v55  ;;  %v4197_v6 = vpop.f32.mrf.mxu2 }
 0x29b   :  { %v13938_v52 = vld [vmem:[#allocation8 + $0xd74] sm:$0xf0]  ;;  %v9311_v6 = vld [vmem:[#allocation8 + $0x538] sm:$0xf0] }
 0x29c   :  { %v10621_v53 = vld [vmem:[#allocation8 + $0xf58] sm:$0xf]  ;;  %v10366_v57 = vor.u32 %v13938_v52, %v10365_v51  ;;  %4435 = vmatpush.bf16.msrb.mxu1 %v10110_v56 }
 0x29d   :  { %v14002_v54 = vld [vmem:[#allocation8 + $0xf74] sm:$0xf0] }
 0x29e   :  { %v9821_v58 = vld [vmem:[#allocation8 + $0x918] sm:$0xf]  ;;  %v10622_v62 = vor.u32 %v14002_v54, %v10621_v53  ;;  %4448 = vmatpush.bf16.msrb.mxu2 %v10366_v57  ;;  %v4184_v53 = vpop.f32.mrf.mxu1 }
 0x29f   :  { %v13802_v59 = vld [vmem:[#allocation8 + $0x934] sm:$0xf0] }
 0x2a0   :  { %v10077_v60 = vld [vmem:[#allocation8 + $0xb18] sm:$0xf]  ;;  %v9822_v5 = vor.u32 %v13802_v59, %v9821_v58  ;;  %4461 = vmatpush.bf16.msrb.mxu3 %v10622_v62 }
 0x2a1   :  { %v13866_v0 = vld [vmem:[#allocation8 + $0xb34] sm:$0xf0] }
 0x2a2   :  { %v10333_v1 = vld [vmem:[#allocation8 + $0xd18] sm:$0xf]  ;;  %v10078_v7 = vor.u32 %v13866_v0, %v10077_v60  ;;  %4423 = vmatpush.bf16.msrb.mxu0 %v9822_v5 }
 0x2a3   :  { %v13930_v2 = vld [vmem:[#allocation8 + $0xd34] sm:$0xf0] }
 0x2a4   :  { %v10589_v3 = vld [vmem:[#allocation8 + $0xf18] sm:$0xf]  ;;  %v10334_v8 = vor.u32 %v13930_v2, %v10333_v1  ;;  %4436 = vmatpush.bf16.msrb.mxu1 %v10078_v7 }
 0x2a5   :  { %v13994_v4 = vld [vmem:[#allocation8 + $0xf34] sm:$0xf0] }
 0x2a6   :  { %v9789_v10 = vld [vmem:[#allocation8 + $0x8d8] sm:$0xf]  ;;  %v10590_v14 = vor.u32 %v13994_v4, %v10589_v3  ;;  %4449 = vmatpush.bf16.msrb.mxu2 %v10334_v8 }
 0x2a7   :  { %v13794_v11 = vld [vmem:[#allocation8 + $0x8f4] sm:$0xf0] }
 0x2a8   :  { %v10045_v12 = vld [vmem:[#allocation8 + $0xad8] sm:$0xf]  ;;  %v9790_v23 = vor.u32 %v13794_v11, %v9789_v10  ;;  %4462 = vmatpush.bf16.msrb.mxu3 %v10590_v14  ;;  %v8895_v14 = vld [vmem:[#allocation8 + $0x1f8] sm:$0xf0] }
 0x2a9   :  { %v13858_v15 = vld [vmem:[#allocation8 + $0xaf4] sm:$0xf0] }
 0x2aa   :  { %v10301_v18 = vld [vmem:[#allocation8 + $0xcd8] sm:$0xf]  ;;  %v10046_v24 = vor.u32 %v13858_v15, %v10045_v12  ;;  %4424 = vmatpush.bf16.msrb.mxu0 %v9790_v23  ;;  %v4210_v12 = vpop.f32.mrf.mxu3  ;;  %v13630_v15 = vld [vmem:[#allocation8 + $0x3dc] sm:$0xf] }
 0x2ab   :  { %v13922_v19 = vld [vmem:[#allocation8 + $0xcf4] sm:$0xf0] }
 0x2ac   :  { %v10557_v21 = vld [vmem:[#allocation8 + $0xed8] sm:$0xf]  ;;  %v10302_v31 = vor.u32 %v13922_v19, %v10301_v18  ;;  %4437 = vmatpush.bf16.msrb.mxu1 %v10046_v24  ;;  %v9151_v19 = vld [vmem:[#allocation8 + $0x3f8] sm:$0xf0] }
 0x2ad   :  { %v13986_v22 = vld [vmem:[#allocation8 + $0xef4] sm:$0xf0]  ;;  %v13758_v24 = vld [vmem:[#allocation8 + $0x7dc] sm:$0xf] }
 0x2ae   :  { %v9757_v25 = vld [vmem:[#allocation8 + $0x898] sm:$0xf]  ;;  %v10558_v27 = vor.u32 %v13986_v22, %v10557_v21  ;;  %4450 = vmatpush.bf16.msrb.mxu2 %v10302_v31  ;;  %v9407_v21 = vld [vmem:[#allocation8 + $0x5f8] sm:$0xf0] }
 0x2af   :  { %v13786_v36 = vld [vmem:[#allocation8 + $0x8b4] sm:$0xf0]  ;;  %v9663_v31 = vld [vmem:[#allocation8 + $0x7f8] sm:$0xf0]  ;;  %v9410_v26 = vor.u32 %v13694_v20, %v9407_v21  ;;  %v4234_v20 = vpop.f32.mrf.mxu1 }
 0x2b0   :  { %v10013_v35 = vld [vmem:[#allocation8 + $0xa98] sm:$0xf]  ;;  %v9758_v45 = vor.u32 %v13786_v36, %v9757_v25  ;;  %4463 = vmatpush.bf16.msrb.mxu3 %v10558_v27  ;;  %v8898_v36 = vor.u32 %v13566_v13, %v8895_v14  ;;  %v13558_v27 = vld [vmem:[#allocation8 + $0x19c] sm:$0xf] }
 0x2b1   :  { %v13850_v28 = vld [vmem:[#allocation8 + $0xab4] sm:$0xf0]  ;;  %v13534_v14 = vld [vmem:[#allocation8 + $0xdc] sm:$0xf] }
 0x2b2   :  { %v10269_v29 = vld [vmem:[#allocation8 + $0xc98] sm:$0xf]  ;;  %v10014_v48 = vor.u32 %v13850_v28, %v10013_v35  ;;  %4425 = vmatpush.bf16.msrb.mxu0 %v9758_v45  ;;  %v9154_v35 = vor.u32 %v13630_v15, %v9151_v19  ;;  %v8863_v28 = vld [vmem:[#allocation8 + $0x1b8] sm:$0xf0] }
 0x2b3   :  { %v13914_v30 = vld [vmem:[#allocation8 + $0xcb4] sm:$0xf0]  ;;  %v9631_v45 = vld [vmem:[#allocation8 + $0x7b8] sm:$0xf0]  ;;  %v8866_v47 = vor.u32 %v13558_v27, %v8863_v28 }
 0x2b4   :  { %v10525_v41 = vld [vmem:[#allocation8 + $0xe98] sm:$0xf]  ;;  %v10270_v49 = vor.u32 %v13914_v30, %v10269_v29  ;;  %4438 = vmatpush.bf16.msrb.mxu1 %v10014_v48  ;;  %v13622_v29 = vld [vmem:[#allocation8 + $0x39c] sm:$0xf]  ;;  %v9666_v30 = vor.u32 %v13758_v24, %v9663_v31 }
 0x2b5   :  { %v13978_v44 = vld [vmem:[#allocation8 + $0xeb4] sm:$0xf0]  ;;  %v9122_v48 = vor.u32 %v13622_v29, %v9119_v61  ;;  %v8767_v15 = vld [vmem:[#allocation8 + $0xf8] sm:$0xf0]  ;;  %v4247_v61 = vpop.f32.mrf.mxu2 }
 0x2b6   :  { %v9725_v50 = vld [vmem:[#allocation8 + $0x858] sm:$0xf]  ;;  %v10526_v54 = vor.u32 %v13978_v44, %v10525_v41  ;;  %4451 = vmatpush.bf16.msrb.mxu2 %v10270_v49  ;;  %v9375_v41 = vld [vmem:[#allocation8 + $0x5b8] sm:$0xf0] }
 0x2b7   :  { %v13778_v51 = vld [vmem:[#allocation8 + $0x874] sm:$0xf0]  ;;  %v13750_v44 = vld [vmem:[#allocation8 + $0x79c] sm:$0xf]  ;;  %v9378_v49 = vor.u32 %v13686_v39, %v9375_v41 }
 0x2b8   :  { %v9981_v52 = vld [vmem:[#allocation8 + $0xa58] sm:$0xf]  ;;  %v9726_v60 = vor.u32 %v13778_v51, %v9725_v50  ;;  %4464 = vmatpush.bf16.msrb.mxu3 %v10526_v54  ;;  %v13550_v50 = vld [vmem:[#allocation8 + $0x15c] sm:$0xf]  ;;  %v9634_v53 = vor.u32 %v13750_v44, %v9631_v45 }
 0x2b9   :  { %v13842_v55 = vld [vmem:[#allocation8 + $0xa74] sm:$0xf0]  ;;  %v8831_v51 = vld [vmem:[#allocation8 + $0x178] sm:$0xf0] }
 0x2ba   :  { %v10237_v56 = vld [vmem:[#allocation8 + $0xc58] sm:$0xf]  ;;  %v9982_v1 = vor.u32 %v13842_v55, %v9981_v52  ;;  %4426 = vmatpush.bf16.msrb.mxu0 %v9726_v60  ;;  %v13614_v52 = vld [vmem:[#allocation8 + $0x35c] sm:$0xf] }
 0x2bb   :  { %v13906_v57 = vld [vmem:[#allocation8 + $0xc74] sm:$0xf0]  ;;  %v9087_v54 = vld [vmem:[#allocation8 + $0x378] sm:$0xf0] }
 0x2bc   :  { %v10493_v58 = vld [vmem:[#allocation8 + $0xe58] sm:$0xf]  ;;  %v10238_v2 = vor.u32 %v13906_v57, %v10237_v56  ;;  %4439 = vmatpush.bf16.msrb.mxu1 %v9982_v1  ;;  %v13678_v55 = vld [vmem:[#allocation8 + $0x55c] sm:$0xf]  ;;  %v9090_v60 = vor.u32 %v13614_v52, %v9087_v54 }
 0x2bd   :  { %v13970_v59 = vld [vmem:[#allocation8 + $0xe74] sm:$0xf0]  ;;  %v9343_v56 = vld [vmem:[#allocation8 + $0x578] sm:$0xf0] }
 0x2be   :  { %v9693_v62 = vld [vmem:[#allocation8 + $0x818] sm:$0xf]  ;;  %v10494_v7 = vor.u32 %v13970_v59, %v10493_v58  ;;  %4452 = vmatpush.bf16.msrb.mxu2 %v10238_v2  ;;  %v13742_v57 = vld [vmem:[#allocation8 + $0x75c] sm:$0xf]  ;;  %v8834_v59 = vor.u32 %v13550_v50, %v8831_v51 }
 0x2bf   :  { %v13770_v0 = vld [vmem:[#allocation8 + $0x834] sm:$0xf0]  ;;  %v9599_v58 = vld [vmem:[#allocation8 + $0x778] sm:$0xf0] }
 0x2c0   :  { %v9949_v3 = vld [vmem:[#allocation8 + $0xa18] sm:$0xf]  ;;  %v9694_v18 = vor.u32 %v13770_v0, %v9693_v62  ;;  %4465 = vmatpush.bf16.msrb.mxu3 %v10494_v7  ;;  %v9346_v62 = vor.u32 %v13678_v55, %v9343_v56  ;;  %v13542_v0 = vld [vmem:[#allocation8 + $0x11c] sm:$0xf] }
 0x2c1   :  { %v13834_v4 = vld [vmem:[#allocation8 + $0xa34] sm:$0xf0]  ;;  %v8799_v1 = vld [vmem:[#allocation8 + $0x138] sm:$0xf0] }
 0x2c2   :  { %v10205_v5 = vld [vmem:[#allocation8 + $0xc18] sm:$0xf]  ;;  %v9950_v22 = vor.u32 %v13834_v4, %v9949_v3  ;;  %4427 = vmatpush.bf16.msrb.mxu0 %v9694_v18  ;;  %v13606_v2 = vld [vmem:[#allocation8 + $0x31c] sm:$0xf]  ;;  %v9602_v3 = vor.u32 %v13742_v57, %v9599_v58  ;;  %v4236_v58 = vpop.f32.mrf.mxu1 }
 0x2c3   :  { %v13898_v8 = vld [vmem:[#allocation8 + $0xc34] sm:$0xf0]  ;;  %v9055_v4 = vld [vmem:[#allocation8 + $0x338] sm:$0xf0] }
 0x2c4   :  { %v10461_v10 = vld [vmem:[#allocation8 + $0xe18] sm:$0xf]  ;;  %v10206_v23 = vor.u32 %v13898_v8, %v10205_v5  ;;  %4440 = vmatpush.bf16.msrb.mxu1 %v9950_v22  ;;  %v13670_v5 = vld [vmem:[#allocation8 + $0x51c] sm:$0xf]  ;;  %v9058_v12 = vor.u32 %v13606_v2, %v9055_v4 }
 0x2c5   :  { %v13962_v11 = vld [vmem:[#allocation8 + $0xe34] sm:$0xf0]  ;;  %4428 = vmatmul.bf16.vlgmr.msrb.gmra.mxu0 %v14385_v37  ;;  %v13734_v7 = vld [vmem:[#allocation8 + $0x71c] sm:$0xf]  ;;  %v9314_v13 = vor.u32 %v13670_v5, %v9311_v6 }
 0x2c6   :  { %v10462_v25 = vor.u32 %v13962_v11, %v10461_v10  ;;  %4453 = vmatpush.bf16.msrb.mxu2 %v10206_v23  ;;  %4472 = vmatpush.bf16.msra.mxu0 %v8898_v36  ;;  %v9567_v8 = vld [vmem:[#allocation8 + $0x738] sm:$0xf0]  ;;  %v8802_v10 = vor.u32 %v13542_v0, %v8799_v1  ;;  %v4221_v11 = vpop.f32.mrf.mxu0 }
 0x2c7   :  { %4441 = vmatmul.bf16.vlgmr.msrb.gmra.mxu1 %v14389_v40  ;;  %v13598_v18 = vld [vmem:[#allocation8 + $0x2dc] sm:$0xf]  ;;  %v4222_v19 = vadd.f32 %v4221_v11, %v14459_v46  ;;  %v9570_v21 = vor.u32 %v13734_v7, %v9567_v8 }
 0x2c8   :  { %4466 = vmatpush.bf16.msrb.mxu3 %v10462_v25  ;;  %4485 = vmatpush.bf16.msra.mxu1 %v9154_v35  ;;  %v9023_v22 = vld [vmem:[#allocation8 + $0x2f8] sm:$0xf0]  ;;  %v8770_v35 = vor.u32 %v13534_v14, %v8767_v15 }
 0x2c9   :  { %4454 = vmatmul.bf16.vlgmr.msrb.gmra.mxu2 %v14383_v34  ;;  %v13662_v23 = vld [vmem:[#allocation8 + $0x4dc] sm:$0xf]  ;;  %v4235_v36 = vadd.f32 %v4234_v20, %v4222_v19 }
 0x2ca   :  { %4498 = vmatpush.bf16.msra.mxu2 %v9410_v26  ;;  %4473 = vmatpush.bf16.msra.mxu0 %v8866_v47  ;;  %v9279_v24 = vld [vmem:[#allocation8 + $0x4f8] sm:$0xf0]  ;;  %v9026_v26 = vor.u32 %v13598_v18, %v9023_v22  ;;  %v4260_v47 = vpop.f32.mrf.mxu3 }
 0x2cb   :  { %4467 = vmatmul.bf16.vlgmr.msrb.gmra.mxu3 %v14387_v38  ;;  %v13726_v31 = vld [vmem:[#allocation8 + $0x6dc] sm:$0xf]  ;;  %v9282_v27 = vor.u32 %v13662_v23, %v9279_v24  ;;  %v4248_v45 = vadd.f32 %v4247_v61, %v4235_v36 }
 0x2cc   :  { %4511 = vmatpush.bf16.msra.mxu3 %v9666_v30  ;;  %4486 = vmatpush.bf16.msra.mxu1 %v9122_v48  ;;  %v9535_v25 = vld [vmem:[#allocation8 + $0x6f8] sm:$0xf0] }
 0x2cd   :  { %v13526_v28 = vld [vmem:[#allocation8 + $0x9c] sm:$0xf]  ;;  %v9538_v46 = vor.u32 %v13726_v31, %v9535_v25  ;;  %v14466_v51 = vadd.f32 %v4260_v47, %v4248_v45 }
 0x2ce   :  { %4499 = vmatpush.bf16.msra.mxu2 %v9378_v49  ;;  %4474 = vmatpush.bf16.msra.mxu0 %v8834_v59  ;;  %v8735_v29 = vld [vmem:[#allocation8 + $0xb8] sm:$0xf0]  ;;  %v4223_v52 = vpop.f32.mrf.mxu0 }
 0x2cf   :  { %v13590_v30 = vld [vmem:[#allocation8 + $0x29c] sm:$0xf]  ;;  %v8738_v50 = vor.u32 %v13526_v28, %v8735_v29 }
 0x2d0   :  { %4512 = vmatpush.bf16.msra.mxu3 %v9634_v53  ;;  %4487 = vmatpush.bf16.msra.mxu1 %v9090_v60  ;;  %v8991_v39 = vld [vmem:[#allocation8 + $0x2b8] sm:$0xf0] }
 0x2d1   :  { %v13654_v41 = vld [vmem:[#allocation8 + $0x49c] sm:$0xf]  ;;  %v8994_v53 = vor.u32 %v13590_v30, %v8991_v39 }
 0x2d2   :  { %4500 = vmatpush.bf16.msra.mxu2 %v9346_v62  ;;  %4475 = vmatpush.bf16.msra.mxu0 %v8802_v10  ;;  %v9247_v44 = vld [vmem:[#allocation8 + $0x4b8] sm:$0xf0]  ;;  %v4262_v19 = vpop.f32.mrf.mxu3 }
 0x2d3   :  { %v13718_v48 = vld [vmem:[#allocation8 + $0x69c] sm:$0xf]  ;;  %v9250_v54 = vor.u32 %v13654_v41, %v9247_v44 }
 0x2d4   :  { %4513 = vmatpush.bf16.msra.mxu3 %v9602_v3  ;;  %4488 = vmatpush.bf16.msra.mxu1 %v9058_v12  ;;  %v9503_v49 = vld [vmem:[#allocation8 + $0x6b8] sm:$0xf0]  ;;  %v4249_v12 = vpop.f32.mrf.mxu2 }
 0x2d5   :  { %v13518_v55 = vld [vmem:[#allocation8 + $0x5c] sm:$0xf]  ;;  %v9506_v59 = vor.u32 %v13718_v48, %v9503_v49 }
 0x2d6   :  { %4501 = vmatpush.bf16.msra.mxu2 %v9314_v13  ;;  %4476 = vmatpush.bf16.msra.mxu0 %v8770_v35  ;;  %v8703_v56 = vld [vmem:[#allocation8 + $0x78] sm:$0xf0] }
 0x2d7   :  { %v13582_v57 = vld [vmem:[#allocation8 + $0x25c] sm:$0xf]  ;;  %v8706_v3 = vor.u32 %v13518_v55, %v8703_v56 }
 0x2d8   :  { %4514 = vmatpush.bf16.msra.mxu3 %v9570_v21  ;;  %4489 = vmatpush.bf16.msra.mxu1 %v9026_v26  ;;  %v8959_v60 = vld [vmem:[#allocation8 + $0x278] sm:$0xf0] }
 0x2d9   :  { %v13646_v62 = vld [vmem:[#allocation8 + $0x45c] sm:$0xf]  ;;  %v8962_v6 = vor.u32 %v13582_v57, %v8959_v60 }
 0x2da   :  { %4502 = vmatpush.bf16.msra.mxu2 %v9282_v27  ;;  %v9215_v0 = vld [vmem:[#allocation8 + $0x478] sm:$0xf0]  ;;  %4477 = vmatpush.bf16.msra.mxu0 %v8738_v50 }
 0x2db   :  { %v13710_v1 = vld [vmem:[#allocation8 + $0x65c] sm:$0xf]  ;;  %v9218_v7 = vor.u32 %v13646_v62, %v9215_v0 }
 0x2dc   :  { %4515 = vmatpush.bf16.msra.mxu3 %v9538_v46  ;;  %v9471_v2 = vld [vmem:[#allocation8 + $0x678] sm:$0xf0]  ;;  %4490 = vmatpush.bf16.msra.mxu1 %v8994_v53 }
 0x2dd   :  { %v13510_v4 = vld [vmem:[#allocation8 + $0x1c] sm:$0xf]  ;;  %v9474_v13 = vor.u32 %v13710_v1, %v9471_v2 }
 0x2de   :  { %v8671_v5 = vld [vmem:[#allocation8 + $0x38] sm:$0xf0]  ;;  %4503 = vmatpush.bf16.msra.mxu2 %v9250_v54  ;;  %4478 = vmatpush.bf16.msra.mxu0 %v8706_v3 }
 0x2df   :  { %v13574_v8 = vld [vmem:[#allocation8 + $0x21c] sm:$0xf]  ;;  %v8674_v23 = vor.u32 %v13510_v4, %v8671_v5 }
 0x2e0   :  { %v8927_v10 = vld [vmem:[#allocation8 + $0x238] sm:$0xf0]  ;;  %4516 = vmatpush.bf16.msra.mxu3 %v9506_v59  ;;  %4491 = vmatpush.bf16.msra.mxu1 %v8962_v6 }
 0x2e1   :  { %v13638_v11 = vld [vmem:[#allocation8 + $0x41c] sm:$0xf]  ;;  %v8930_v36 = vor.u32 %v13574_v8, %v8927_v10 }
 0x2e2   :  { %v9183_v14 = vld [vmem:[#allocation8 + $0x438] sm:$0xf0]  ;;  %4504 = vmatpush.bf16.msra.mxu2 %v9218_v7  ;;  %4479 = vmatpush.bf16.msra.mxu0 %v8674_v23 }
 0x2e3   :  { %v13702_v15 = vld [vmem:[#allocation8 + $0x61c] sm:$0xf]  ;;  %v9186_v35 = vor.u32 %v13638_v11, %v9183_v14 }
 0x2e4   :  { %v9439_v18 = vld [vmem:[#allocation8 + $0x638] sm:$0xf0]  ;;  %4517 = vmatpush.bf16.msra.mxu3 %v9474_v13  ;;  %4492 = vmatpush.bf16.msra.mxu1 %v8930_v36  ;;  %v4273_v13 = vpop.f32.mrf.mxu0 }
 0x2e5   :  { %v13822_v20 = vld [vmem:[#allocation8 + $0x9dc] sm:$0xf]  ;;  %v9442_v28 = vor.u32 %v13702_v15, %v9439_v18  ;;  %4480 = vmatmul.bf16.vlgmr.msra.gmra.mxu0 %v14374_v9 }
 0x2e6   :  { %v9919_v21 = vld [vmem:[#allocation8 + $0x9f8] sm:$0xf0]  ;;  %4505 = vmatpush.bf16.msra.mxu2 %v9186_v35 }
 0x2e7   :  { %v13886_v22 = vld [vmem:[#allocation8 + $0xbdc] sm:$0xf]  ;;  %v9922_v29 = vor.u32 %v13822_v20, %v9919_v21  ;;  %4493 = vmatmul.bf16.vlgmr.msra.gmra.mxu1 %v14378_v17  ;;  %v4286_v20 = vpop.f32.mrf.mxu1 }
 0x2e8   :  { %v10175_v24 = vld [vmem:[#allocation8 + $0xbf8] sm:$0xf0]  ;;  %4518 = vmatpush.bf16.msra.mxu3 %v9442_v28 }
 0x2e9   :  { %v13950_v31 = vld [vmem:[#allocation8 + $0xddc] sm:$0xf]  ;;  %v10178_v30 = vor.u32 %v13886_v22, %v10175_v24  ;;  %4524 = vmatpush.bf16.msrb.mxu0 %v9922_v29  ;;  %4506 = vmatmul.bf16.vlgmr.msra.gmra.mxu2 %v14371_v63 }
 0x2ea   :  { %v10431_v25 = vld [vmem:[#allocation8 + $0xdf8] sm:$0xf0] }
 0x2eb   :  { %v14014_v26 = vld [vmem:[#allocation8 + $0xfdc] sm:$0xf]  ;;  %v10434_v61 = vor.u32 %v13950_v31, %v10431_v25  ;;  %4537 = vmatpush.bf16.msrb.mxu1 %v10178_v30  ;;  %4519 = vmatmul.bf16.vlgmr.msra.gmra.mxu3 %v14376_v16  ;;  %v4287_v31 = vadd.f32 %v4286_v20, %v4273_v13 }
 0x2ec   :  { %v10687_v27 = vld [vmem:[#allocation8 + $0xff8] sm:$0xf0] }
 0x2ed   :  { %v13814_v46 = vld [vmem:[#allocation8 + $0x99c] sm:$0xf]  ;;  %v10690_v44 = vor.u32 %v14014_v26, %v10687_v27  ;;  %4550 = vmatpush.bf16.msrb.mxu2 %v10434_v61  ;;  %v4299_v61 = vpop.f32.mrf.mxu2 }
 0x2ee   :  { %v9887_v39 = vld [vmem:[#allocation8 + $0x9b8] sm:$0xf0] }
 0x2ef   :  { %v13878_v41 = vld [vmem:[#allocation8 + $0xb9c] sm:$0xf]  ;;  %v9890_v52 = vor.u32 %v13814_v46, %v9887_v39  ;;  %4563 = vmatpush.bf16.msrb.mxu3 %v10690_v44 }
 0x2f0   :  { %v10143_v45 = vld [vmem:[#allocation8 + $0xbb8] sm:$0xf0] }
 0x2f1   :  { %v13942_v47 = vld [vmem:[#allocation8 + $0xd9c] sm:$0xf]  ;;  %v10146_v53 = vor.u32 %v13878_v41, %v10143_v45  ;;  %4525 = vmatpush.bf16.msrb.mxu0 %v9890_v52  ;;  %v4300_v45 = vadd.f32 %v4299_v61, %v4287_v31  ;;  %v11141_v61 = vld [vmem:[#allocation7 + $0x380] sm:$0xf] }
 0x2f2   :  { %v10399_v48 = vld [vmem:[#allocation8 + $0xdb8] sm:$0xf0] }
 0x2f3   :  { %v14006_v49 = vld [vmem:[#allocation8 + $0xf9c] sm:$0xf]  ;;  %v10402_v54 = vor.u32 %v13942_v47, %v10399_v48  ;;  %4538 = vmatpush.bf16.msrb.mxu1 %v10146_v53  ;;  %v4312_v47 = vpop.f32.mrf.mxu3  ;;  %v4275_v53 = vpop.f32.mrf.mxu0 }
 0x2f4   :  { %v10655_v50 = vld [vmem:[#allocation8 + $0xfb8] sm:$0xf0]  ;;  %v14472_v52 = vadd.f32 %v4312_v47, %v4300_v45  ;;  %v11653_v45 = vld [vmem:[#allocation7 + $0x780] sm:$0xf] }
 0x2f5   :  { %v13806_v55 = vld [vmem:[#allocation8 + $0x95c] sm:$0xf]  ;;  %v10658_v58 = vor.u32 %v14006_v49, %v10655_v50  ;;  %4551 = vmatpush.bf16.msrb.mxu2 %v10402_v54  ;;  %v13239_v47 = vld [vmem:[#allocation7 + $0x79c] sm:$0xf0] }
 0x2f6   :  { %v9855_v56 = vld [vmem:[#allocation8 + $0x978] sm:$0xf0]  ;;  %v10853_v53 = vld [vmem:[#allocation7 + $0x140] sm:$0xf] }
 0x2f7   :  { %v13870_v57 = vld [vmem:[#allocation8 + $0xb5c] sm:$0xf]  ;;  %v9858_v2 = vor.u32 %v13806_v55, %v9855_v56  ;;  %4564 = vmatpush.bf16.msrb.mxu3 %v10658_v58 }
 0x2f8   :  { %v10111_v59 = vld [vmem:[#allocation8 + $0xb78] sm:$0xf0] }
 0x2f9   :  { %v13934_v60 = vld [vmem:[#allocation8 + $0xd5c] sm:$0xf]  ;;  %v10114_v3 = vor.u32 %v13870_v57, %v10111_v59  ;;  %4526 = vmatpush.bf16.msrb.mxu0 %v9858_v2  ;;  %v4288_v59 = vpop.f32.mrf.mxu1 }
 0x2fa   :  { %v10367_v62 = vld [vmem:[#allocation8 + $0xd78] sm:$0xf0]  ;;  %v13167_v59 = vld [vmem:[#allocation7 + $0x55c] sm:$0xf0] }
 0x2fb   :  { %v13998_v0 = vld [vmem:[#allocation8 + $0xf5c] sm:$0xf]  ;;  %v10370_v4 = vor.u32 %v13934_v60, %v10367_v62  ;;  %4539 = vmatpush.bf16.msrb.mxu1 %v10114_v3 }
 0x2fc   :  { %v10623_v1 = vld [vmem:[#allocation8 + $0xf78] sm:$0xf0] }
 0x2fd   :  { %v13798_v5 = vld [vmem:[#allocation8 + $0x91c] sm:$0xf]  ;;  %v10626_v8 = vor.u32 %v13998_v0, %v10623_v1  ;;  %4552 = vmatpush.bf16.msrb.mxu2 %v10370_v4 }
 0x2fe   :  { %v9823_v6 = vld [vmem:[#allocation8 + $0x938] sm:$0xf0] }
 0x2ff   :  { %v13862_v7 = vld [vmem:[#allocation8 + $0xb1c] sm:$0xf]  ;;  %v9826_v16 = vor.u32 %v13798_v5, %v9823_v6  ;;  %4565 = vmatpush.bf16.msrb.mxu3 %v10626_v8 }
 0x300   :  { %v10079_v63 = vld [vmem:[#allocation8 + $0xb38] sm:$0xf0] }
 0x301   :  { %v13926_v10 = vld [vmem:[#allocation8 + $0xd1c] sm:$0xf]  ;;  %v10082_v17 = vor.u32 %v13862_v7, %v10079_v63  ;;  %4527 = vmatpush.bf16.msrb.mxu0 %v9826_v16 }
 0x302   :  { %v10335_v11 = vld [vmem:[#allocation8 + $0xd38] sm:$0xf0] }
 0x303   :  { %v13990_v12 = vld [vmem:[#allocation8 + $0xf1c] sm:$0xf]  ;;  %v10338_v14 = vor.u32 %v13926_v10, %v10335_v11  ;;  %4540 = vmatpush.bf16.msrb.mxu1 %v10082_v17 }
 0x304   :  { %v10591_v9 = vld [vmem:[#allocation8 + $0xf38] sm:$0xf0] }
 0x305   :  { %v13790_v15 = vld [vmem:[#allocation8 + $0x8dc] sm:$0xf]  ;;  %v10594_v21 = vor.u32 %v13990_v12, %v10591_v9  ;;  %4553 = vmatpush.bf16.msrb.mxu2 %v10338_v14  ;;  %v4301_v12 = vpop.f32.mrf.mxu2  ;;  %v4314_v14 = vpop.f32.mrf.mxu3 }
 0x306   :  { %v9791_v18 = vld [vmem:[#allocation8 + $0x8f8] sm:$0xf0]  ;;  %v10789_v12 = vld [vmem:[#allocation7 + $0xc0] sm:$0xf] }
 0x307   :  { %v13854_v19 = vld [vmem:[#allocation8 + $0xadc] sm:$0xf]  ;;  %v9794_v35 = vor.u32 %v13790_v15, %v9791_v18  ;;  %4566 = vmatpush.bf16.msrb.mxu3 %v10594_v21  ;;  %v10917_v15 = vld [vmem:[#allocation7 + $0x1c0] sm:$0xf] }
 0x308   :  { %v10047_v22 = vld [vmem:[#allocation8 + $0xaf8] sm:$0xf0]  ;;  %v13055_v18 = vld [vmem:[#allocation7 + $0x1dc] sm:$0xf0] }
 0x309   :  { %v13918_v23 = vld [vmem:[#allocation8 + $0xcdc] sm:$0xf]  ;;  %v10050_v26 = vor.u32 %v13854_v19, %v10047_v22  ;;  %4528 = vmatpush.bf16.msrb.mxu0 %v9794_v35  ;;  %v11173_v19 = vld [vmem:[#allocation7 + $0x3c0] sm:$0xf] }
 0x30a   :  { %v10303_v24 = vld [vmem:[#allocation8 + $0xcf8] sm:$0xf0]  ;;  %v13119_v21 = vld [vmem:[#allocation7 + $0x3dc] sm:$0xf0] }
 0x30b   :  { %v13982_v25 = vld [vmem:[#allocation8 + $0xedc] sm:$0xf]  ;;  %v10306_v27 = vor.u32 %v13918_v23, %v10303_v24  ;;  %4541 = vmatpush.bf16.msrb.mxu1 %v10050_v26  ;;  %v11429_v22 = vld [vmem:[#allocation7 + $0x5c0] sm:$0xf]  ;;  %v10918_v26 = vor.u32 %v13055_v18, %v10917_v15 }
 0x30c   :  { %v10559_v36 = vld [vmem:[#allocation8 + $0xef8] sm:$0xf0]  ;;  %v13183_v23 = vld [vmem:[#allocation7 + $0x5dc] sm:$0xf0] }
 0x30d   :  { %v13782_v28 = vld [vmem:[#allocation8 + $0x89c] sm:$0xf]  ;;  %v10562_v46 = vor.u32 %v13982_v25, %v10559_v36  ;;  %4554 = vmatpush.bf16.msrb.mxu2 %v10306_v27  ;;  %v11685_v25 = vld [vmem:[#allocation7 + $0x7c0] sm:$0xf]  ;;  %v11174_v27 = vor.u32 %v13119_v21, %v11173_v19 }
 0x30e   :  { %v9759_v29 = vld [vmem:[#allocation8 + $0x8b8] sm:$0xf0]  ;;  %v13247_v36 = vld [vmem:[#allocation7 + $0x7dc] sm:$0xf0] }
 0x30f   :  { %v13846_v30 = vld [vmem:[#allocation8 + $0xa9c] sm:$0xf]  ;;  %v9762_v50 = vor.u32 %v13782_v28, %v9759_v29  ;;  %4567 = vmatpush.bf16.msrb.mxu3 %v10562_v46  ;;  %v11430_v28 = vor.u32 %v13183_v23, %v11429_v22  ;;  %v10885_v29 = vld [vmem:[#allocation7 + $0x180] sm:$0xf]  ;;  %v11686_v46 = vor.u32 %v13247_v36, %v11685_v25 }
 0x310   :  { %v10015_v39 = vld [vmem:[#allocation8 + $0xab8] sm:$0xf0]  ;;  %v13087_v15 = vld [vmem:[#allocation7 + $0x2dc] sm:$0xf0] }
 0x311   :  { %v13910_v41 = vld [vmem:[#allocation8 + $0xc9c] sm:$0xf]  ;;  %v10018_v54 = vor.u32 %v13846_v30, %v10015_v39  ;;  %4529 = vmatpush.bf16.msrb.mxu0 %v9762_v50  ;;  %v13047_v30 = vld [vmem:[#allocation7 + $0x19c] sm:$0xf0] }
 0x312   :  { %v10271_v44 = vld [vmem:[#allocation8 + $0xcb8] sm:$0xf0]  ;;  %v13111_v39 = vld [vmem:[#allocation7 + $0x39c] sm:$0xf0] }
 0x313   :  { %v13974_v48 = vld [vmem:[#allocation8 + $0xe9c] sm:$0xf]  ;;  %v10274_v55 = vor.u32 %v13910_v41, %v10271_v44  ;;  %4542 = vmatpush.bf16.msrb.mxu1 %v10018_v54  ;;  %v11397_v41 = vld [vmem:[#allocation7 + $0x580] sm:$0xf] }
 0x314   :  { %v10527_v49 = vld [vmem:[#allocation8 + $0xeb8] sm:$0xf0]  ;;  %v13175_v44 = vld [vmem:[#allocation7 + $0x59c] sm:$0xf0] }
 0x315   :  { %v13774_v56 = vld [vmem:[#allocation8 + $0x85c] sm:$0xf]  ;;  %v10530_v60 = vor.u32 %v13974_v48, %v10527_v49  ;;  %4555 = vmatpush.bf16.msrb.mxu2 %v10274_v55  ;;  %v10886_v48 = vor.u32 %v13047_v30, %v10885_v29  ;;  %v11142_v49 = vor.u32 %v13111_v39, %v11141_v61  ;;  %v11398_v50 = vor.u32 %v13175_v44, %v11397_v41  ;;  %v13039_v54 = vld [vmem:[#allocation7 + $0x15c] sm:$0xf0]  ;;  %v4364_v61 = vpop.f32.mrf.mxu3 }
 0x316   :  { %v9727_v57 = vld [vmem:[#allocation8 + $0x878] sm:$0xf0]  ;;  %v11109_v55 = vld [vmem:[#allocation7 + $0x340] sm:$0xf] }
 0x317   :  { %v13838_v58 = vld [vmem:[#allocation8 + $0xa5c] sm:$0xf]  ;;  %v9730_v4 = vor.u32 %v13774_v56, %v9727_v57  ;;  %4568 = vmatpush.bf16.msrb.mxu3 %v10530_v60  ;;  %v11654_v56 = vor.u32 %v13239_v47, %v11653_v45  ;;  %v13103_v57 = vld [vmem:[#allocation7 + $0x35c] sm:$0xf0] }
 0x318   :  { %v9983_v62 = vld [vmem:[#allocation8 + $0xa78] sm:$0xf0]  ;;  %v11621_v60 = vld [vmem:[#allocation7 + $0x740] sm:$0xf] }
 0x319   :  { %v13902_v0 = vld [vmem:[#allocation8 + $0xc5c] sm:$0xf]  ;;  %v9986_v7 = vor.u32 %v13838_v58, %v9983_v62  ;;  %4530 = vmatpush.bf16.msrb.mxu0 %v9730_v4  ;;  %v11365_v58 = vld [vmem:[#allocation7 + $0x540] sm:$0xf] }
 0x31a   :  { %v10239_v1 = vld [vmem:[#allocation8 + $0xc78] sm:$0xf0]  ;;  %v13231_v62 = vld [vmem:[#allocation7 + $0x75c] sm:$0xf0] }
 0x31b   :  { %v13966_v2 = vld [vmem:[#allocation8 + $0xe5c] sm:$0xf]  ;;  %v10242_v8 = vor.u32 %v13902_v0, %v10239_v1  ;;  %4543 = vmatpush.bf16.msrb.mxu1 %v9986_v7  ;;  %v10854_v0 = vor.u32 %v13039_v54, %v10853_v53  ;;  %v11110_v1 = vor.u32 %v13103_v57, %v11109_v55  ;;  %v13031_v4 = vld [vmem:[#allocation7 + $0x11c] sm:$0xf0] }
 0x31c   :  { %v10495_v3 = vld [vmem:[#allocation8 + $0xe78] sm:$0xf0]  ;;  %v11333_v7 = vld [vmem:[#allocation7 + $0x500] sm:$0xf] }
 0x31d   :  { %v13766_v5 = vld [vmem:[#allocation8 + $0x81c] sm:$0xf]  ;;  %v10498_v9 = vor.u32 %v13966_v2, %v10495_v3  ;;  %4556 = vmatpush.bf16.msrb.mxu2 %v10242_v8  ;;  %v11366_v2 = vor.u32 %v13167_v59, %v11365_v58  ;;  %v10821_v3 = vld [vmem:[#allocation7 + $0x100] sm:$0xf] }
 0x31e   :  { %v9695_v6 = vld [vmem:[#allocation8 + $0x838] sm:$0xf0]  ;;  %v11589_v8 = vld [vmem:[#allocation7 + $0x700] sm:$0xf] }
 0x31f   :  { %v13830_v63 = vld [vmem:[#allocation8 + $0xa1c] sm:$0xf]  ;;  %v9698_v20 = vor.u32 %v13766_v5, %v9695_v6  ;;  %4569 = vmatpush.bf16.msrb.mxu3 %v10498_v9  ;;  %v11622_v5 = vor.u32 %v13231_v62, %v11621_v60  ;;  %v13095_v6 = vld [vmem:[#allocation7 + $0x31c] sm:$0xf0] }
 0x320   :  { %v9951_v10 = vld [vmem:[#allocation8 + $0xa38] sm:$0xf0]  ;;  %v13023_v9 = vld [vmem:[#allocation7 + $0xdc] sm:$0xf0] }
 0x321   :  { %v13894_v11 = vld [vmem:[#allocation8 + $0xc1c] sm:$0xf]  ;;  %v9954_v24 = vor.u32 %v13830_v63, %v9951_v10  ;;  %4531 = vmatpush.bf16.msrb.mxu0 %v9698_v20  ;;  %v10822_v63 = vor.u32 %v13031_v4, %v10821_v3  ;;  %v4325_v10 = vpop.f32.mrf.mxu0  ;;  %v11301_v18 = vld [vmem:[#allocation7 + $0x4c0] sm:$0xf]  ;;  %v10790_v23 = vor.u32 %v13023_v9, %v10789_v12 }
 0x322   :  { %v10207_v16 = vld [vmem:[#allocation8 + $0xc38] sm:$0xf0]  ;;  %v13151_v19 = vld [vmem:[#allocation7 + $0x4dc] sm:$0xf0] }
 0x323   :  { %v13958_v13 = vld [vmem:[#allocation8 + $0xe1c] sm:$0xf]  ;;  %v10210_v31 = vor.u32 %v13894_v11, %v10207_v16  ;;  %4544 = vmatpush.bf16.msrb.mxu1 %v9954_v24  ;;  %v11045_v16 = vld [vmem:[#allocation7 + $0x2c0] sm:$0xf] }
 0x324   :  { %v10463_v17 = vld [vmem:[#allocation8 + $0xe38] sm:$0xf0]  ;;  %4532 = vmatmul.bf16.vlgmr.msrb.gmra.mxu0 %v14385_v37  ;;  %v13159_v37 = vld [vmem:[#allocation7 + $0x51c] sm:$0xf0]  ;;  %v11046_v24 = vor.u32 %v13087_v15, %v11045_v16 }
 0x325   :  { %v10466_v35 = vor.u32 %v13958_v13, %v10463_v17  ;;  %4557 = vmatpush.bf16.msrb.mxu2 %v10210_v31  ;;  %7136 = vmatpush.bf16.msra.mxu0 %v10918_v26  ;;  %v11334_v11 = vor.u32 %v13159_v37, %v11333_v7  ;;  %v4326_v13 = vadd.f32 %v4325_v10, %v14472_v52  ;;  %v4338_v17 = vpop.f32.mrf.mxu1  ;;  %v11557_v20 = vld [vmem:[#allocation7 + $0x6c0] sm:$0xf]  ;;  %v4351_v26 = vpop.f32.mrf.mxu2 }
 0x326   :  { %4545 = vmatmul.bf16.vlgmr.msrb.gmra.mxu1 %v14389_v40  ;;  %v13215_v21 = vld [vmem:[#allocation7 + $0x6dc] sm:$0xf0]  ;;  %v11302_v31 = vor.u32 %v13151_v19, %v11301_v18 }
 0x327   :  { %4570 = vmatpush.bf16.msrb.mxu3 %v10466_v35  ;;  %7149 = vmatpush.bf16.msra.mxu1 %v11174_v27  ;;  %v4339_v22 = vadd.f32 %v4338_v17, %v4326_v13  ;;  %v10757_v25 = vld [vmem:[#allocation7 + $0x80] sm:$0xf]  ;;  %v11558_v52 = vor.u32 %v13215_v21, %v11557_v20 }
 0x328   :  { %4558 = vmatmul.bf16.vlgmr.msrb.gmra.mxu2 %v14383_v34  ;;  %v11077_v34 = vld [vmem:[#allocation7 + $0x300] sm:$0xf] }
 0x329   :  { %7162 = vmatpush.bf16.msra.mxu2 %v11430_v28  ;;  %7137 = vmatpush.bf16.msra.mxu0 %v10886_v48  ;;  %v11078_v40 = vor.u32 %v13095_v6, %v11077_v34  ;;  %v13015_v36 = vld [vmem:[#allocation7 + $0x9c] sm:$0xf0]  ;;  %v4352_v30 = vadd.f32 %v4351_v26, %v4339_v22  ;;  %v4327_v45 = vpop.f32.mrf.mxu0  ;;  %v130_v22 = vld [vmem:[#allocation2 + $0x10] sm:$0xff] }
 0x32a   :  { %4571 = vmatmul.bf16.vlgmr.msrb.gmra.mxu3 %v14387_v38  ;;  %v13223_v38 = vld [vmem:[#allocation7 + $0x71c] sm:$0xf0]  ;;  %v10758_v41 = vor.u32 %v13015_v36, %v10757_v25 }
 0x32b   :  { %7175 = vmatpush.bf16.msra.mxu3 %v11686_v46  ;;  %7150 = vmatpush.bf16.msra.mxu1 %v11142_v49  ;;  %v11590_v14 = vor.u32 %v13223_v38, %v11589_v8  ;;  %v11013_v35 = vld [vmem:[#allocation7 + $0x280] sm:$0xf]  ;;  %v14479_v44 = vadd.f32 %v4364_v61, %v4352_v30  ;;  %v14483_v61 = vpack.c.bf16 %v130_v22, %v130_v22 }
 0x32c   :  { %v13079_v27 = vld [vmem:[#allocation7 + $0x29c] sm:$0xf0] }
 0x32d   :  { %7163 = vmatpush.bf16.msra.mxu2 %v11398_v50  ;;  %7138 = vmatpush.bf16.msra.mxu0 %v10854_v0  ;;  %v11269_v28 = vld [vmem:[#allocation7 + $0x480] sm:$0xf]  ;;  %v11014_v47 = vor.u32 %v13079_v27, %v11013_v35  ;;  %v4340_v54 = vpop.f32.mrf.mxu1  ;;  %v4353_v6 = vpop.f32.mrf.mxu2 }
 0x32e   :  { %v13143_v29 = vld [vmem:[#allocation7 + $0x49c] sm:$0xf0] }
 0x32f   :  { %7176 = vmatpush.bf16.msra.mxu3 %v11654_v56  ;;  %7151 = vmatpush.bf16.msra.mxu1 %v11110_v1  ;;  %v11525_v46 = vld [vmem:[#allocation7 + $0x680] sm:$0xf]  ;;  %v11270_v48 = vor.u32 %v13143_v29, %v11269_v28 }
 0x330   :  { %v13207_v39 = vld [vmem:[#allocation7 + $0x69c] sm:$0xf0] }
 0x331   :  { %7164 = vmatpush.bf16.msra.mxu2 %v11366_v2  ;;  %7139 = vmatpush.bf16.msra.mxu0 %v10822_v63  ;;  %v10725_v49 = vld [vmem:[#allocation7 + $0x40] sm:$0xf]  ;;  %v11526_v55 = vor.u32 %v13207_v39, %v11525_v46  ;;  %v4366_v63 = vpop.f32.mrf.mxu3 }
 0x332   :  { %v13007_v50 = vld [vmem:[#allocation7 + $0x5c] sm:$0xf0]  ;;  %v4377_v63 = vpop.f32.mrf.mxu0 }
 0x333   :  { %7177 = vmatpush.bf16.msra.mxu3 %v11622_v5  ;;  %7152 = vmatpush.bf16.msra.mxu1 %v11078_v40  ;;  %v10981_v53 = vld [vmem:[#allocation7 + $0x240] sm:$0xf]  ;;  %v10726_v62 = vor.u32 %v13007_v50, %v10725_v49 }
 0x334   :  { %v13071_v56 = vld [vmem:[#allocation7 + $0x25c] sm:$0xf0] }
 0x335   :  { %7165 = vmatpush.bf16.msra.mxu2 %v11334_v11  ;;  %7140 = vmatpush.bf16.msra.mxu0 %v10790_v23  ;;  %v11237_v57 = vld [vmem:[#allocation7 + $0x440] sm:$0xf]  ;;  %v10982_v2 = vor.u32 %v13071_v56, %v10981_v53  ;;  %v129_v23 = vld [vmem:[#allocation2 + $0x8] sm:$0xff] }
 0x336   :  { %v13135_v58 = vld [vmem:[#allocation7 + $0x45c] sm:$0xf0]  ;;  %v14485_v46 = vpack.c.bf16 %v129_v23, %v129_v23 }
 0x337   :  { %7178 = vmatpush.bf16.msra.mxu3 %v11590_v14  ;;  %7153 = vmatpush.bf16.msra.mxu1 %v11046_v24  ;;  %v11493_v59 = vld [vmem:[#allocation7 + $0x640] sm:$0xf]  ;;  %v11238_v3 = vor.u32 %v13135_v58, %v11237_v57  ;;  %v131_v24 = vld [vmem:[#allocation2 + $0x18] sm:$0xff] }
 0x338   :  { %v13199_v60 = vld [vmem:[#allocation7 + $0x65c] sm:$0xf0]  ;;  %v14487_v45 = vpack.c.bf16 %v131_v24, %v131_v24 }
 0x339   :  { %7166 = vmatpush.bf16.msra.mxu2 %v11302_v31  ;;  %7141 = vmatpush.bf16.msra.mxu0 %v10758_v41  ;;  %v10693_v0 = vld [vmem:[#allocation7] sm:$0xf]  ;;  %v11494_v7 = vor.u32 %v13199_v60, %v11493_v59 }
 0x33a   :  { %v12999_v1 = vld [vmem:[#allocation7 + $0x1c] sm:$0xf0] }
 0x33b   :  { %7179 = vmatpush.bf16.msra.mxu3 %v11558_v52  ;;  %7154 = vmatpush.bf16.msra.mxu1 %v11014_v47  ;;  %v10949_v4 = vld [vmem:[#allocation7 + $0x200] sm:$0xf]  ;;  %v10694_v12 = vor.u32 %v12999_v1, %v10693_v0 }
 0x33c   :  { %v13063_v34 = vld [vmem:[#allocation7 + $0x21c] sm:$0xf0] }
 0x33d   :  { %7167 = vmatpush.bf16.msra.mxu2 %v11270_v48  ;;  %v11205_v5 = vld [vmem:[#allocation7 + $0x400] sm:$0xf]  ;;  %7142 = vmatpush.bf16.msra.mxu0 %v10726_v62  ;;  %v10950_v17 = vor.u32 %v13063_v34, %v10949_v4 }
 0x33e   :  { %v13127_v37 = vld [vmem:[#allocation7 + $0x41c] sm:$0xf0] }
 0x33f   :  { %7180 = vmatpush.bf16.msra.mxu3 %v11526_v55  ;;  %v11461_v8 = vld [vmem:[#allocation7 + $0x600] sm:$0xf]  ;;  %7155 = vmatpush.bf16.msra.mxu1 %v10982_v2  ;;  %v11206_v14 = vor.u32 %v13127_v37, %v11205_v5 }
 0x340   :  { %v13191_v38 = vld [vmem:[#allocation7 + $0x61c] sm:$0xf0] }
 0x341   :  { %v11941_v10 = vld [vmem:[#allocation7 + $0x9c0] sm:$0xf]  ;;  %7168 = vmatpush.bf16.msra.mxu2 %v11238_v3  ;;  %v11462_v20 = vor.u32 %v13191_v38, %v11461_v8  ;;  %7143 = vmatpush.bf16.msra.mxu0 %v10694_v12 }
 0x342   :  { %v13311_v40 = vld [vmem:[#allocation7 + $0x9dc] sm:$0xf0] }
 0x343   :  { %v12197_v11 = vld [vmem:[#allocation7 + $0xbc0] sm:$0xf]  ;;  %7181 = vmatpush.bf16.msra.mxu3 %v11494_v7  ;;  %v11942_v21 = vor.u32 %v13311_v40, %v11941_v10  ;;  %7156 = vmatpush.bf16.msra.mxu1 %v10950_v17 }
 0x344   :  { %v13375_v9 = vld [vmem:[#allocation7 + $0xbdc] sm:$0xf0] }
 0x345   :  { %v12453_v16 = vld [vmem:[#allocation7 + $0xdc0] sm:$0xf]  ;;  %v12198_v31 = vor.u32 %v13375_v9, %v12197_v11  ;;  %7169 = vmatpush.bf16.msra.mxu2 %v11206_v14  ;;  %7188 = vmatpush.bf16.msrb.mxu0 %v11942_v21 }
 0x346   :  { %v13439_v13 = vld [vmem:[#allocation7 + $0xddc] sm:$0xf0]  ;;  %7157 = vmatmul.bf16.vlgmr.msra.gmra.mxu1 %v14485_v46 }
 0x347   :  { %v12709_v15 = vld [vmem:[#allocation7 + $0xfc0] sm:$0xf]  ;;  %v12454_v25 = vor.u32 %v13439_v13, %v12453_v16  ;;  %7182 = vmatpush.bf16.msra.mxu3 %v11462_v20  ;;  %7201 = vmatpush.bf16.msrb.mxu1 %v12198_v31  ;;  %v4390_v16 = vpop.f32.mrf.mxu1 }
 0x348   :  { %v13503_v18 = vld [vmem:[#allocation7 + $0xfdc] sm:$0xf0]  ;;  %7170 = vmatmul.bf16.vlgmr.msra.gmra.mxu2 %v14483_v61 }
 0x349   :  { %v128_v19 = vld [vmem:[#allocation2] sm:$0xff]  ;;  %v12710_v52 = vor.u32 %v13503_v18, %v12709_v15  ;;  %7214 = vmatpush.bf16.msrb.mxu2 %v12454_v25  ;;  %v4391_v18 = vadd.f32 %v4390_v16, %v4377_v63 }
 0x34a   :  { %v11909_v36 = vld [vmem:[#allocation7 + $0x980] sm:$0xf]  ;;  %v14481_v27 = vpack.c.bf16 %v128_v19, %v128_v19  ;;  %7183 = vmatmul.bf16.vlgmr.msra.gmra.mxu3 %v14487_v45  ;;  %v13115_v16 = vld [vmem:[#allocation7 + $0x3c4] sm:$0xf] }
 0x34b   :  { %v13303_v35 = vld [vmem:[#allocation7 + $0x99c] sm:$0xf0]  ;;  %7227 = vmatpush.bf16.msrb.mxu3 %v12710_v52 }
 0x34c   :  { %v12165_v26 = vld [vmem:[#allocation7 + $0xb80] sm:$0xf]  ;;  %v11910_v47 = vor.u32 %v13303_v35, %v11909_v36  ;;  %7144 = vmatmul.bf16.vlgmr.msra.gmra.mxu0 %v14481_v27  ;;  %v4403_v36 = vpop.f32.mrf.mxu2 }
 0x34d   :  { %v13367_v28 = vld [vmem:[#allocation7 + $0xb9c] sm:$0xf0] }
 0x34e   :  { %v12421_v29 = vld [vmem:[#allocation7 + $0xd80] sm:$0xf]  ;;  %v12166_v48 = vor.u32 %v13367_v28, %v12165_v26  ;;  %7189 = vmatpush.bf16.msrb.mxu0 %v11910_v47 }
 0x34f   :  { %v13431_v30 = vld [vmem:[#allocation7 + $0xd9c] sm:$0xf0] }
 0x350   :  { %v12677_v39 = vld [vmem:[#allocation7 + $0xf80] sm:$0xf]  ;;  %v12422_v49 = vor.u32 %v13431_v30, %v12421_v29  ;;  %7202 = vmatpush.bf16.msrb.mxu1 %v12166_v48  ;;  %v4404_v29 = vadd.f32 %v4403_v36, %v4391_v18  ;;  %v4416_v30 = vpop.f32.mrf.mxu3  ;;  %v135_v36 = vld [vmem:[#allocation2 + $0x38] sm:$0xff] }
 0x351   :  { %v13495_v41 = vld [vmem:[#allocation7 + $0xf9c] sm:$0xf0] }
 0x352   :  { %v11877_v50 = vld [vmem:[#allocation7 + $0x940] sm:$0xf]  ;;  %v12678_v55 = vor.u32 %v13495_v41, %v12677_v39  ;;  %7215 = vmatpush.bf16.msrb.mxu2 %v12422_v49  ;;  %v14493_v48 = vadd.f32 %v4416_v30, %v4404_v29  ;;  %v4379_v49 = vpop.f32.mrf.mxu0  ;;  %v13107_v29 = vld [vmem:[#allocation7 + $0x384] sm:$0xf] }
 0x353   :  { %v13295_v53 = vld [vmem:[#allocation7 + $0x95c] sm:$0xf0]  ;;  %v11399_v49 = vld [vmem:[#allocation7 + $0x5a0] sm:$0xf0] }
 0x354   :  { %v12133_v54 = vld [vmem:[#allocation7 + $0xb40] sm:$0xf]  ;;  %v11878_v62 = vor.u32 %v13295_v53, %v11877_v50  ;;  %7228 = vmatpush.bf16.msrb.mxu3 %v12678_v55 }
 0x355   :  { %v13359_v56 = vld [vmem:[#allocation7 + $0xb5c] sm:$0xf0] }
 0x356   :  { %v12389_v57 = vld [vmem:[#allocation7 + $0xd40] sm:$0xf]  ;;  %v12134_v0 = vor.u32 %v13359_v56, %v12133_v54  ;;  %7190 = vmatpush.bf16.msrb.mxu0 %v11878_v62 }
 0x357   :  { %v13423_v58 = vld [vmem:[#allocation7 + $0xd5c] sm:$0xf0] }
 0x358   :  { %v12645_v59 = vld [vmem:[#allocation7 + $0xf40] sm:$0xf]  ;;  %v12390_v1 = vor.u32 %v13423_v58, %v12389_v57  ;;  %7203 = vmatpush.bf16.msrb.mxu1 %v12134_v0  ;;  %v4392_v57 = vpop.f32.mrf.mxu1 }
 0x359   :  { %v13487_v60 = vld [vmem:[#allocation7 + $0xf5c] sm:$0xf0] }
 0x35a   :  { %v11845_v2 = vld [vmem:[#allocation7 + $0x900] sm:$0xf]  ;;  %v12646_v34 = vor.u32 %v13487_v60, %v12645_v59  ;;  %7216 = vmatpush.bf16.msrb.mxu2 %v12390_v1 }
 0x35b   :  { %v13287_v3 = vld [vmem:[#allocation7 + $0x91c] sm:$0xf0] }
 0x35c   :  { %v12101_v4 = vld [vmem:[#allocation7 + $0xb00] sm:$0xf]  ;;  %v11846_v38 = vor.u32 %v13287_v3, %v11845_v2  ;;  %7229 = vmatpush.bf16.msrb.mxu3 %v12646_v34 }
 0x35d   :  { %v13351_v5 = vld [vmem:[#allocation7 + $0xb1c] sm:$0xf0] }
 0x35e   :  { %v12357_v6 = vld [vmem:[#allocation7 + $0xd00] sm:$0xf]  ;;  %v12102_v10 = vor.u32 %v13351_v5, %v12101_v4  ;;  %7191 = vmatpush.bf16.msrb.mxu0 %v11846_v38 }
 0x35f   :  { %v13415_v7 = vld [vmem:[#allocation7 + $0xd1c] sm:$0xf0] }
 0x360   :  { %v12613_v37 = vld [vmem:[#allocation7 + $0xf00] sm:$0xf]  ;;  %v12358_v40 = vor.u32 %v13415_v7, %v12357_v6  ;;  %7204 = vmatpush.bf16.msrb.mxu1 %v12102_v10 }
 0x361   :  { %v13479_v8 = vld [vmem:[#allocation7 + $0xf1c] sm:$0xf0] }
 0x362   :  { %v11813_v11 = vld [vmem:[#allocation7 + $0x8c0] sm:$0xf]  ;;  %v12614_v13 = vor.u32 %v13479_v8, %v12613_v37  ;;  %7217 = vmatpush.bf16.msrb.mxu2 %v12358_v40  ;;  %v4405_v8 = vpop.f32.mrf.mxu2 }
 0x363   :  { %v13279_v12 = vld [vmem:[#allocation7 + $0x8dc] sm:$0xf0]  ;;  %v13027_v8 = vld [vmem:[#allocation7 + $0x104] sm:$0xf] }
 0x364   :  { %v12069_v9 = vld [vmem:[#allocation7 + $0xac0] sm:$0xf]  ;;  %v11814_v21 = vor.u32 %v13279_v12, %v11813_v11  ;;  %7230 = vmatpush.bf16.msrb.mxu3 %v12614_v13  ;;  %v4418_v11 = vpop.f32.mrf.mxu3  ;;  %v13051_v12 = vld [vmem:[#allocation7 + $0x1c4] sm:$0xf] }
 0x365   :  { %v13343_v17 = vld [vmem:[#allocation7 + $0xadc] sm:$0xf0]  ;;  %v13155_v11 = vld [vmem:[#allocation7 + $0x504] sm:$0xf] }
 0x366   :  { %v12325_v14 = vld [vmem:[#allocation7 + $0xcc0] sm:$0xf]  ;;  %v12070_v22 = vor.u32 %v13343_v17, %v12069_v9  ;;  %7192 = vmatpush.bf16.msrb.mxu0 %v11814_v21  ;;  %v10919_v9 = vld [vmem:[#allocation7 + $0x1e0] sm:$0xf0] }
 0x367   :  { %v13407_v15 = vld [vmem:[#allocation7 + $0xcdc] sm:$0xf0]  ;;  %v11175_v17 = vld [vmem:[#allocation7 + $0x3e0] sm:$0xf0] }
 0x368   :  { %v12581_v19 = vld [vmem:[#allocation7 + $0xec0] sm:$0xf]  ;;  %v12326_v23 = vor.u32 %v13407_v15, %v12325_v14  ;;  %7205 = vmatpush.bf16.msrb.mxu1 %v12070_v22  ;;  %v13179_v14 = vld [vmem:[#allocation7 + $0x5c4] sm:$0xf] }
 0x369   :  { %v13471_v20 = vld [vmem:[#allocation7 + $0xedc] sm:$0xf0]  ;;  %v11431_v15 = vld [vmem:[#allocation7 + $0x5e0] sm:$0xf0] }
 0x36a   :  { %v11781_v24 = vld [vmem:[#allocation7 + $0x880] sm:$0xf]  ;;  %v12582_v35 = vor.u32 %v13471_v20, %v12581_v19  ;;  %7218 = vmatpush.bf16.msrb.mxu2 %v12326_v23  ;;  %v13243_v20 = vld [vmem:[#allocation7 + $0x7c4] sm:$0xf] }
 0x36b   :  { %v13271_v31 = vld [vmem:[#allocation7 + $0x89c] sm:$0xf0]  ;;  %v11687_v21 = vld [vmem:[#allocation7 + $0x7e0] sm:$0xf0] }
 0x36c   :  { %v12037_v25 = vld [vmem:[#allocation7 + $0xa80] sm:$0xf]  ;;  %v11782_v47 = vor.u32 %v13271_v31, %v11781_v24  ;;  %7231 = vmatpush.bf16.msrb.mxu3 %v12582_v35  ;;  %v10922_v24 = vor.u32 %v13051_v12, %v10919_v9  ;;  %v134_v31 = vld [vmem:[#allocation2 + $0x30] sm:$0xff]  ;;  %v11178_v35 = vor.u32 %v13115_v16, %v11175_v17  ;;  %v11690_v30 = vor.u32 %v13243_v20, %v11687_v21  ;;  %v11335_v12 = vld [vmem:[#allocation7 + $0x520] sm:$0xf0]  ;;  %v4429_v17 = vpop.f32.mrf.mxu0 }
 0x36d   :  { %v13335_v26 = vld [vmem:[#allocation7 + $0xa9c] sm:$0xf0]  ;;  %v13219_v9 = vld [vmem:[#allocation7 + $0x704] sm:$0xf]  ;;  %v4430_v21 = vadd.f32 %v4429_v17, %v14493_v48 }
 0x36e   :  { %v12293_v52 = vld [vmem:[#allocation7 + $0xc80] sm:$0xf]  ;;  %v12038_v50 = vor.u32 %v13335_v26, %v12037_v25  ;;  %7193 = vmatpush.bf16.msrb.mxu0 %v11782_v47  ;;  %v133_v25 = vld [vmem:[#allocation2 + $0x28] sm:$0xff]  ;;  %v11434_v26 = vor.u32 %v13179_v14, %v11431_v15  ;;  %v13171_v47 = vld [vmem:[#allocation7 + $0x584] sm:$0xf]  ;;  %v11338_v15 = vor.u32 %v13155_v11, %v11335_v12 }
 0x36f   :  { %v13399_v28 = vld [vmem:[#allocation7 + $0xc9c] sm:$0xf0]  ;;  %v11591_v16 = vld [vmem:[#allocation7 + $0x720] sm:$0xf0] }
 0x370   :  { %v12549_v39 = vld [vmem:[#allocation7 + $0xe80] sm:$0xf]  ;;  %v12294_v53 = vor.u32 %v13399_v28, %v12293_v52  ;;  %7206 = vmatpush.bf16.msrb.mxu1 %v12038_v50  ;;  %v13043_v52 = vld [vmem:[#allocation7 + $0x184] sm:$0xf]  ;;  %v14497_v50 = vpack.c.bf16 %v134_v31, %v134_v31 }
 0x371   :  { %v13463_v41 = vld [vmem:[#allocation7 + $0xe9c] sm:$0xf0]  ;;  %v10887_v28 = vld [vmem:[#allocation7 + $0x1a0] sm:$0xf0] }
 0x372   :  { %v11749_v54 = vld [vmem:[#allocation7 + $0x840] sm:$0xf]  ;;  %v12550_v58 = vor.u32 %v13463_v41, %v12549_v39  ;;  %7219 = vmatpush.bf16.msrb.mxu2 %v12294_v53  ;;  %v11143_v41 = vld [vmem:[#allocation7 + $0x3a0] sm:$0xf0]  ;;  %v14499_v53 = vpack.c.bf16 %v133_v25, %v133_v25  ;;  %v10890_v57 = vor.u32 %v13043_v52, %v10887_v28 }
 0x373   :  { %v13263_v55 = vld [vmem:[#allocation7 + $0x85c] sm:$0xf0]  ;;  %v13083_v20 = vld [vmem:[#allocation7 + $0x2c4] sm:$0xf] }
 0x374   :  { %v12005_v56 = vld [vmem:[#allocation7 + $0xa40] sm:$0xf]  ;;  %v11750_v2 = vor.u32 %v13263_v55, %v11749_v54  ;;  %7232 = vmatpush.bf16.msrb.mxu3 %v12550_v58  ;;  %v13235_v54 = vld [vmem:[#allocation7 + $0x784] sm:$0xf]  ;;  %v11146_v58 = vor.u32 %v13107_v29, %v11143_v41 }
 0x375   :  { %v13327_v59 = vld [vmem:[#allocation7 + $0xa5c] sm:$0xf0]  ;;  %v11655_v55 = vld [vmem:[#allocation7 + $0x7a0] sm:$0xf0] }
 0x376   :  { %v12261_v60 = vld [vmem:[#allocation7 + $0xc40] sm:$0xf]  ;;  %v12006_v34 = vor.u32 %v13327_v59, %v12005_v56  ;;  %7194 = vmatpush.bf16.msrb.mxu0 %v11750_v2  ;;  %v14501_v56 = vpack.c.bf16 %v135_v36, %v135_v36  ;;  %v11402_v59 = vor.u32 %v13171_v47, %v11399_v49  ;;  %v11111_v2 = vld [vmem:[#allocation7 + $0x360] sm:$0xf0]  ;;  %v4455_v49 = vpop.f32.mrf.mxu2 }
 0x377   :  { %v13391_v62 = vld [vmem:[#allocation7 + $0xc5c] sm:$0xf0]  ;;  %v13147_v31 = vld [vmem:[#allocation7 + $0x4c4] sm:$0xf] }
 0x378   :  { %v12517_v0 = vld [vmem:[#allocation7 + $0xe40] sm:$0xf]  ;;  %v12262_v5 = vor.u32 %v13391_v62, %v12261_v60  ;;  %7207 = vmatpush.bf16.msrb.mxu1 %v12006_v34  ;;  %v13035_v60 = vld [vmem:[#allocation7 + $0x144] sm:$0xf] }
 0x379   :  { %v13455_v1 = vld [vmem:[#allocation7 + $0xe5c] sm:$0xf0]  ;;  %v10855_v62 = vld [vmem:[#allocation7 + $0x160] sm:$0xf0] }
 0x37a   :  { %v11717_v3 = vld [vmem:[#allocation7 + $0x800] sm:$0xf]  ;;  %v12518_v38 = vor.u32 %v13455_v1, %v12517_v0  ;;  %7220 = vmatpush.bf16.msrb.mxu2 %v12262_v5  ;;  %v13099_v0 = vld [vmem:[#allocation7 + $0x344] sm:$0xf]  ;;  %v11658_v1 = vor.u32 %v13235_v54, %v11655_v55 }
 0x37b   :  { %v13255_v4 = vld [vmem:[#allocation7 + $0x81c] sm:$0xf0]  ;;  %v13227_v34 = vld [vmem:[#allocation7 + $0x744] sm:$0xf] }
 0x37c   :  { %v11973_v6 = vld [vmem:[#allocation7 + $0xa00] sm:$0xf]  ;;  %v11718_v13 = vor.u32 %v13255_v4, %v11717_v3  ;;  %7233 = vmatpush.bf16.msrb.mxu3 %v12518_v38  ;;  %v13163_v3 = vld [vmem:[#allocation7 + $0x544] sm:$0xf] }
 0x37d   :  { %v13319_v7 = vld [vmem:[#allocation7 + $0xa1c] sm:$0xf0]  ;;  %v11367_v4 = vld [vmem:[#allocation7 + $0x560] sm:$0xf0] }
 0x37e   :  { %v12229_v37 = vld [vmem:[#allocation7 + $0xc00] sm:$0xf]  ;;  %v11974_v18 = vor.u32 %v13319_v7, %v11973_v6  ;;  %7195 = vmatpush.bf16.msrb.mxu0 %v11718_v13  ;;  %v11623_v5 = vld [vmem:[#allocation7 + $0x760] sm:$0xf0]  ;;  %v10858_v6 = vor.u32 %v13035_v60, %v10855_v62  ;;  %v11114_v7 = vor.u32 %v13099_v0, %v11111_v2  ;;  %v4431_v2 = vpop.f32.mrf.mxu0 }
 0x37f   :  { %v13383_v63 = vld [vmem:[#allocation7 + $0xc1c] sm:$0xf0]  ;;  %v10823_v38 = vld [vmem:[#allocation7 + $0x120] sm:$0xf0] }
 0x380   :  { %v12485_v10 = vld [vmem:[#allocation7 + $0xe00] sm:$0xf]  ;;  %v12230_v19 = vor.u32 %v13383_v63, %v12229_v37  ;;  %7208 = vmatpush.bf16.msrb.mxu1 %v11974_v18  ;;  %v11370_v37 = vor.u32 %v13163_v3, %v11367_v4  ;;  %v13091_v63 = vld [vmem:[#allocation7 + $0x304] sm:$0xf]  ;;  %v10826_v13 = vor.u32 %v13027_v8, %v10823_v38 }
 0x381   :  { %v13447_v40 = vld [vmem:[#allocation7 + $0xe1c] sm:$0xf0]  ;;  %v13019_v18 = vld [vmem:[#allocation7 + $0xc4] sm:$0xf] }
 0x382   :  { %v132_v22 = vld [vmem:[#allocation2 + $0x20] sm:$0xff]  ;;  %v12486_v23 = vor.u32 %v13447_v40, %v12485_v10  ;;  %7221 = vmatpush.bf16.msrb.mxu2 %v12230_v19  ;;  %7240 = vmatpush.bf16.msra.mxu0 %v10922_v24  ;;  %v11626_v10 = vor.u32 %v13227_v34, %v11623_v5 }
 0x383   :  { %v14495_v39 = vpack.c.bf16 %v132_v22, %v132_v22  ;;  %7209 = vmatmul.bf16.vlgmr.msrb.gmra.mxu1 %v14499_v53  ;;  %v11079_v40 = vld [vmem:[#allocation7 + $0x320] sm:$0xf0]  ;;  %v4442_v22 = vpop.f32.mrf.mxu1 }
 0x384   :  { %7234 = vmatpush.bf16.msrb.mxu3 %v12486_v23  ;;  %7253 = vmatpush.bf16.msra.mxu1 %v11178_v35  ;;  %v11082_v14 = vor.u32 %v13091_v63, %v11079_v40  ;;  %v10791_v19 = vld [vmem:[#allocation7 + $0xe0] sm:$0xf0]  ;;  %v11594_v23 = vor.u32 %v13219_v9, %v11591_v16 }
 0x385   :  { %7196 = vmatmul.bf16.vlgmr.msrb.gmra.mxu0 %v14495_v39  ;;  %7222 = vmatmul.bf16.vlgmr.msrb.gmra.mxu2 %v14497_v50  ;;  %v11047_v24 = vld [vmem:[#allocation7 + $0x2e0] sm:$0xf0]  ;;  %v10794_v52 = vor.u32 %v13019_v18, %v10791_v19  ;;  %v4457_v18 = vpop.f32.mrf.mxu2 }
 0x386   :  { %7266 = vmatpush.bf16.msra.mxu2 %v11434_v26  ;;  %7241 = vmatpush.bf16.msra.mxu0 %v10890_v57  ;;  %v11303_v25 = vld [vmem:[#allocation7 + $0x4e0] sm:$0xf0]  ;;  %v4443_v26 = vadd.f32 %v4442_v22, %v4430_v21  ;;  %v11050_v28 = vor.u32 %v13083_v20, %v11047_v24 }
 0x387   :  { %7235 = vmatmul.bf16.vlgmr.msrb.gmra.mxu3 %v14501_v56  ;;  %v13211_v36 = vld [vmem:[#allocation7 + $0x6c4] sm:$0xf]  ;;  %v11306_v29 = vor.u32 %v13147_v31, %v11303_v25 }
 0x388   :  { %7279 = vmatpush.bf16.msra.mxu3 %v11690_v30  ;;  %7254 = vmatpush.bf16.msra.mxu1 %v11146_v58  ;;  %v11559_v35 = vld [vmem:[#allocation7 + $0x6e0] sm:$0xf0]  ;;  %v4456_v58 = vadd.f32 %v4455_v49, %v4443_v26 }
 0x389   :  { %v13011_v30 = vld [vmem:[#allocation7 + $0x84] sm:$0xf]  ;;  %v11562_v48 = vor.u32 %v13211_v36, %v11559_v35 }
 0x38a   :  { %7267 = vmatpush.bf16.msra.mxu2 %v11402_v59  ;;  %7242 = vmatpush.bf16.msra.mxu0 %v10858_v6  ;;  %v10759_v41 = vld [vmem:[#allocation7 + $0xa0] sm:$0xf0]  ;;  %v4468_v59 = vpop.f32.mrf.mxu3 }
 0x38b   :  { %v13075_v47 = vld [vmem:[#allocation7 + $0x284] sm:$0xf]  ;;  %v10762_v0 = vor.u32 %v13011_v30, %v10759_v41 }
 0x38c   :  { %7280 = vmatpush.bf16.msra.mxu3 %v11658_v1  ;;  %7255 = vmatpush.bf16.msra.mxu1 %v11114_v7  ;;  %v11015_v54 = vld [vmem:[#allocation7 + $0x2a0] sm:$0xf0]  ;;  %v14508_v1 = vadd.f32 %v4468_v59, %v4456_v58  ;;  %v4444_v7 = vpop.f32.mrf.mxu1 }
 0x38d   :  { %v13139_v55 = vld [vmem:[#allocation7 + $0x484] sm:$0xf]  ;;  %v11018_v3 = vor.u32 %v13075_v47, %v11015_v54 }
 0x38e   :  { %7268 = vmatpush.bf16.msra.mxu2 %v11370_v37  ;;  %7243 = vmatpush.bf16.msra.mxu0 %v10826_v13  ;;  %v11271_v57 = vld [vmem:[#allocation7 + $0x4a0] sm:$0xf0] }
 0x38f   :  { %v13203_v60 = vld [vmem:[#allocation7 + $0x684] sm:$0xf]  ;;  %v11274_v4 = vor.u32 %v13139_v55, %v11271_v57 }
 0x390   :  { %7281 = vmatpush.bf16.msra.mxu3 %v11626_v10  ;;  %7256 = vmatpush.bf16.msra.mxu1 %v11082_v14  ;;  %v11527_v62 = vld [vmem:[#allocation7 + $0x6a0] sm:$0xf0] }
 0x391   :  { %v13003_v34 = vld [vmem:[#allocation7 + $0x44] sm:$0xf]  ;;  %v11530_v37 = vor.u32 %v13203_v60, %v11527_v62 }
 0x392   :  { %7269 = vmatpush.bf16.msra.mxu2 %v11338_v15  ;;  %7244 = vmatpush.bf16.msra.mxu0 %v10794_v52  ;;  %v10727_v5 = vld [vmem:[#allocation7 + $0x60] sm:$0xf0] }
 0x393   :  { %v13067_v6 = vld [vmem:[#allocation7 + $0x244] sm:$0xf]  ;;  %v10730_v11 = vor.u32 %v13003_v34, %v10727_v5 }
 0x394   :  { %7282 = vmatpush.bf16.msra.mxu3 %v11594_v23  ;;  %7257 = vmatpush.bf16.msra.mxu1 %v11050_v28  ;;  %v10983_v8 = vld [vmem:[#allocation7 + $0x260] sm:$0xf0]  ;;  %v4470_v23 = vpop.f32.mrf.mxu3 }
 0x395   :  { %v13131_v38 = vld [vmem:[#allocation7 + $0x444] sm:$0xf]  ;;  %v10986_v16 = vor.u32 %v13067_v6, %v10983_v8 }
 0x396   :  { %7270 = vmatpush.bf16.msra.mxu2 %v11306_v29  ;;  %v11239_v63 = vld [vmem:[#allocation7 + $0x460] sm:$0xf0]  ;;  %7245 = vmatpush.bf16.msra.mxu0 %v10762_v0 }
 0x397   :  { %v13195_v10 = vld [vmem:[#allocation7 + $0x644] sm:$0xf]  ;;  %v11242_v13 = vor.u32 %v13131_v38, %v11239_v63 }
 0x398   :  { %7283 = vmatpush.bf16.msra.mxu3 %v11562_v48  ;;  %v11495_v40 = vld [vmem:[#allocation7 + $0x660] sm:$0xf0]  ;;  %7258 = vmatpush.bf16.msra.mxu1 %v11018_v3 }
 0x399   :  { %v12995_v12 = vld [vmem:[#allocation7 + $0x4] sm:$0xf]  ;;  %v11498_v19 = vor.u32 %v13195_v10, %v11495_v40 }
 0x39a   :  { %v10695_v9 = vld [vmem:[#allocation7 + $0x20] sm:$0xf0]  ;;  %7271 = vmatpush.bf16.msra.mxu2 %v11274_v4  ;;  %7246 = vmatpush.bf16.msra.mxu0 %v10730_v11 }
 0x39b   :  { %v13059_v17 = vld [vmem:[#allocation7 + $0x204] sm:$0xf]  ;;  %v10698_v36 = vor.u32 %v12995_v12, %v10695_v9 }
 0x39c   :  { %v10951_v14 = vld [vmem:[#allocation7 + $0x220] sm:$0xf0]  ;;  %7284 = vmatpush.bf16.msra.mxu3 %v11530_v37  ;;  %7259 = vmatpush.bf16.msra.mxu1 %v10986_v16 }
 0x39d   :  { %v13123_v15 = vld [vmem:[#allocation7 + $0x404] sm:$0xf]  ;;  %v10954_v28 = vor.u32 %v13059_v17, %v10951_v14 }
 0x39e   :  { %v11207_v20 = vld [vmem:[#allocation7 + $0x420] sm:$0xf0]  ;;  %7272 = vmatpush.bf16.msra.mxu2 %v11242_v13  ;;  %7247 = vmatpush.bf16.msra.mxu0 %v10698_v36 }
 0x39f   :  { %v13187_v21 = vld [vmem:[#allocation7 + $0x604] sm:$0xf]  ;;  %v11210_v29 = vor.u32 %v13123_v15, %v11207_v20 }
 0x3a0   :  { %v11463_v22 = vld [vmem:[#allocation7 + $0x620] sm:$0xf0]  ;;  %7285 = vmatpush.bf16.msra.mxu3 %v11498_v19  ;;  %7260 = vmatpush.bf16.msra.mxu1 %v10954_v28 }
 0x3a1   :  { %v13307_v24 = vld [vmem:[#allocation7 + $0x9c4] sm:$0xf]  ;;  %v11466_v47 = vor.u32 %v13187_v21, %v11463_v22  ;;  %7248 = vmatmul.bf16.vlgmr.msra.gmra.mxu0 %v14481_v27 }
 0x3a2   :  { %v11943_v31 = vld [vmem:[#allocation7 + $0x9e0] sm:$0xf0]  ;;  %7273 = vmatpush.bf16.msra.mxu2 %v11210_v29 }
 0x3a3   :  { %v13371_v25 = vld [vmem:[#allocation7 + $0xbc4] sm:$0xf]  ;;  %v11946_v49 = vor.u32 %v13307_v24, %v11943_v31  ;;  %7261 = vmatmul.bf16.vlgmr.msra.gmra.mxu1 %v14485_v46  ;;  %v4481_v24 = vpop.f32.mrf.mxu0 }
 0x3a4   :  { %v12199_v35 = vld [vmem:[#allocation7 + $0xbe0] sm:$0xf0]  ;;  %7286 = vmatpush.bf16.msra.mxu3 %v11466_v47 }
 0x3a5   :  { %v13435_v26 = vld [vmem:[#allocation7 + $0xdc4] sm:$0xf]  ;;  %v12202_v48 = vor.u32 %v13371_v25, %v12199_v35  ;;  %7292 = vmatpush.bf16.msrb.mxu0 %v11946_v49  ;;  %7274 = vmatmul.bf16.vlgmr.msra.gmra.mxu2 %v14483_v61 }
 0x3a6   :  { %v12455_v52 = vld [vmem:[#allocation7 + $0xde0] sm:$0xf0] }
 0x3a7   :  { %v13499_v30 = vld [vmem:[#allocation7 + $0xfc4] sm:$0xf]  ;;  %v12458_v54 = vor.u32 %v13435_v26, %v12455_v52  ;;  %7305 = vmatpush.bf16.msrb.mxu1 %v12202_v48  ;;  %7287 = vmatmul.bf16.vlgmr.msra.gmra.mxu3 %v14487_v45  ;;  %v4494_v52 = vpop.f32.mrf.mxu1 }
 0x3a8   :  { %v12711_v41 = vld [vmem:[#allocation7 + $0xfe0] sm:$0xf0]  ;;  %v4495_v47 = vadd.f32 %v4494_v52, %v4481_v24 }
 0x3a9   :  { %v13299_v55 = vld [vmem:[#allocation7 + $0x984] sm:$0xf]  ;;  %v12714_v59 = vor.u32 %v13499_v30, %v12711_v41  ;;  %7318 = vmatpush.bf16.msrb.mxu2 %v12458_v54 }
 0x3aa   :  { %v11911_v57 = vld [vmem:[#allocation7 + $0x9a0] sm:$0xf0] }
 0x3ab   :  { %v13363_v58 = vld [vmem:[#allocation7 + $0xb84] sm:$0xf]  ;;  %v11914_v4 = vor.u32 %v13299_v55, %v11911_v57  ;;  %7331 = vmatpush.bf16.msrb.mxu3 %v12714_v59 }
 0x3ac   :  { %v12167_v60 = vld [vmem:[#allocation7 + $0xba0] sm:$0xf0] }
 0x3ad   :  { %v13427_v62 = vld [vmem:[#allocation7 + $0xd84] sm:$0xf]  ;;  %v12170_v34 = vor.u32 %v13363_v58, %v12167_v60  ;;  %7293 = vmatpush.bf16.msrb.mxu0 %v11914_v4 }
 0x3ae   :  { %v12423_v0 = vld [vmem:[#allocation7 + $0xda0] sm:$0xf0] }
 0x3af   :  { %v13491_v2 = vld [vmem:[#allocation7 + $0xf84] sm:$0xf]  ;;  %v12426_v5 = vor.u32 %v13427_v62, %v12423_v0  ;;  %7306 = vmatpush.bf16.msrb.mxu1 %v12170_v34  ;;  %v4507_v62 = vpop.f32.mrf.mxu2 }
 0x3b0   :  { %v12679_v3 = vld [vmem:[#allocation7 + $0xfa0] sm:$0xf0]  ;;  %v4508_v34 = vadd.f32 %v4507_v62, %v4495_v47  ;;  %v11181_v47 = vld [vmem:[#allocation7 + $0x3c8] sm:$0xf] }
 0x3b1   :  { %v13291_v6 = vld [vmem:[#allocation7 + $0x944] sm:$0xf]  ;;  %v12682_v8 = vor.u32 %v13491_v2, %v12679_v3  ;;  %7319 = vmatpush.bf16.msrb.mxu2 %v12426_v5  ;;  %v4520_v5 = vpop.f32.mrf.mxu3 }
 0x3b2   :  { %v11879_v7 = vld [vmem:[#allocation7 + $0x960] sm:$0xf0] }
 0x3b3   :  { %v13355_v37 = vld [vmem:[#allocation7 + $0xb44] sm:$0xf]  ;;  %v11882_v12 = vor.u32 %v13291_v6, %v11879_v7  ;;  %7332 = vmatpush.bf16.msrb.mxu3 %v12682_v8  ;;  %v14514_v8 = vadd.f32 %v4520_v5, %v4508_v34  ;;  %v13048_v34 = vld [vmem:[#allocation7 + $0x1a4] sm:$0xf0] }
 0x3b4   :  { %v12135_v38 = vld [vmem:[#allocation7 + $0xb60] sm:$0xf0]  ;;  %v11149_v5 = vld [vmem:[#allocation7 + $0x388] sm:$0xf] }
 0x3b5   :  { %v13419_v63 = vld [vmem:[#allocation7 + $0xd44] sm:$0xf]  ;;  %v12138_v9 = vor.u32 %v13355_v37, %v12135_v38  ;;  %7294 = vmatpush.bf16.msrb.mxu0 %v11882_v12  ;;  %v4483_v38 = vpop.f32.mrf.mxu0 }
 0x3b6   :  { %v12391_v10 = vld [vmem:[#allocation7 + $0xd60] sm:$0xf0]  ;;  %v13176_v38 = vld [vmem:[#allocation7 + $0x5a4] sm:$0xf0] }
 0x3b7   :  { %v13483_v40 = vld [vmem:[#allocation7 + $0xf44] sm:$0xf]  ;;  %v12394_v16 = vor.u32 %v13419_v63, %v12391_v10  ;;  %7307 = vmatpush.bf16.msrb.mxu1 %v12138_v9  ;;  %v4496_v9 = vpop.f32.mrf.mxu1 }
 0x3b8   :  { %v12647_v11 = vld [vmem:[#allocation7 + $0xf60] sm:$0xf0]  ;;  %v10861_v9 = vld [vmem:[#allocation7 + $0x148] sm:$0xf] }
 0x3b9   :  { %v13283_v13 = vld [vmem:[#allocation7 + $0x904] sm:$0xf]  ;;  %v12650_v15 = vor.u32 %v13483_v40, %v12647_v11  ;;  %7320 = vmatpush.bf16.msrb.mxu2 %v12394_v16 }
 0x3ba   :  { %v11847_v17 = vld [vmem:[#allocation7 + $0x920] sm:$0xf0] }
 0x3bb   :  { %v13347_v14 = vld [vmem:[#allocation7 + $0xb04] sm:$0xf]  ;;  %v11850_v23 = vor.u32 %v13283_v13, %v11847_v17  ;;  %7333 = vmatpush.bf16.msrb.mxu3 %v12650_v15 }
 0x3bc   :  { %v12103_v18 = vld [vmem:[#allocation7 + $0xb20] sm:$0xf0] }
 0x3bd   :  { %v13411_v19 = vld [vmem:[#allocation7 + $0xd04] sm:$0xf]  ;;  %v12106_v31 = vor.u32 %v13347_v14, %v12103_v18  ;;  %7295 = vmatpush.bf16.msrb.mxu0 %v11850_v23 }
 0x3be   :  { %v12359_v20 = vld [vmem:[#allocation7 + $0xd20] sm:$0xf0] }
 0x3bf   :  { %v13475_v21 = vld [vmem:[#allocation7 + $0xf04] sm:$0xf]  ;;  %v12362_v25 = vor.u32 %v13411_v19, %v12359_v20  ;;  %7308 = vmatpush.bf16.msrb.mxu1 %v12106_v31 }
 0x3c0   :  { %v12615_v22 = vld [vmem:[#allocation7 + $0xf20] sm:$0xf0] }
 0x3c1   :  { %v13275_v36 = vld [vmem:[#allocation7 + $0x8c4] sm:$0xf]  ;;  %v12618_v28 = vor.u32 %v13475_v21, %v12615_v22  ;;  %7321 = vmatpush.bf16.msrb.mxu2 %v12362_v25 }
 0x3c2   :  { %v11815_v35 = vld [vmem:[#allocation7 + $0x8e0] sm:$0xf0] }
 0x3c3   :  { %v13339_v26 = vld [vmem:[#allocation7 + $0xac4] sm:$0xf]  ;;  %v11818_v54 = vor.u32 %v13275_v36, %v11815_v35  ;;  %7334 = vmatpush.bf16.msrb.mxu3 %v12618_v28  ;;  %v4509_v36 = vpop.f32.mrf.mxu2 }
 0x3c4   :  { %v12071_v29 = vld [vmem:[#allocation7 + $0xae0] sm:$0xf0] }
 0x3c5   :  { %v13403_v30 = vld [vmem:[#allocation7 + $0xcc4] sm:$0xf]  ;;  %v12074_v55 = vor.u32 %v13339_v26, %v12071_v29  ;;  %7296 = vmatpush.bf16.msrb.mxu0 %v11818_v54  ;;  %v4522_v29 = vpop.f32.mrf.mxu3  ;;  %v11437_v54 = vld [vmem:[#allocation7 + $0x5c8] sm:$0xf] }
 0x3c6   :  { %v12327_v41 = vld [vmem:[#allocation7 + $0xce0] sm:$0xf0]  ;;  %v13224_v29 = vld [vmem:[#allocation7 + $0x724] sm:$0xf0] }
 0x3c7   :  { %v13467_v49 = vld [vmem:[#allocation7 + $0xec4] sm:$0xf]  ;;  %v12330_v57 = vor.u32 %v13403_v30, %v12327_v41  ;;  %7309 = vmatpush.bf16.msrb.mxu1 %v12074_v55  ;;  %v10925_v30 = vld [vmem:[#allocation7 + $0x1c8] sm:$0xf] }
 0x3c8   :  { %v12583_v48 = vld [vmem:[#allocation7 + $0xee0] sm:$0xf0]  ;;  %v13056_v41 = vld [vmem:[#allocation7 + $0x1e4] sm:$0xf0] }
 0x3c9   :  { %v13267_v58 = vld [vmem:[#allocation7 + $0x884] sm:$0xf]  ;;  %v12586_v0 = vor.u32 %v13467_v49, %v12583_v48  ;;  %7322 = vmatpush.bf16.msrb.mxu2 %v12330_v57  ;;  %v13120_v48 = vld [vmem:[#allocation7 + $0x3e4] sm:$0xf0] }
 0x3ca   :  { %v11783_v59 = vld [vmem:[#allocation7 + $0x8a0] sm:$0xf0]  ;;  %v13184_v55 = vld [vmem:[#allocation7 + $0x5e4] sm:$0xf0] }
 0x3cb   :  { %v13331_v60 = vld [vmem:[#allocation7 + $0xa84] sm:$0xf]  ;;  %v11786_v37 = vor.u32 %v13267_v58, %v11783_v59  ;;  %7335 = vmatpush.bf16.msrb.mxu3 %v12586_v0  ;;  %v11693_v59 = vld [vmem:[#allocation7 + $0x7c8] sm:$0xf]  ;;  %v10926_v0 = vor.u32 %v13056_v41, %v10925_v30  ;;  %v4533_v41 = vpop.f32.mrf.mxu0 }
 0x3cc   :  { %v12039_v2 = vld [vmem:[#allocation7 + $0xaa0] sm:$0xf0] }
 0x3cd   :  { %v13395_v3 = vld [vmem:[#allocation7 + $0xc84] sm:$0xf]  ;;  %v12042_v63 = vor.u32 %v13331_v60, %v12039_v2  ;;  %7297 = vmatpush.bf16.msrb.mxu0 %v11786_v37  ;;  %v13248_v60 = vld [vmem:[#allocation7 + $0x7e4] sm:$0xf0]  ;;  %v11182_v2 = vor.u32 %v13120_v48, %v11181_v47 }
 0x3ce   :  { %v12295_v4 = vld [vmem:[#allocation7 + $0xca0] sm:$0xf0]  ;;  %v11405_v37 = vld [vmem:[#allocation7 + $0x588] sm:$0xf] }
 0x3cf   :  { %v13459_v6 = vld [vmem:[#allocation7 + $0xe84] sm:$0xf]  ;;  %v12298_v10 = vor.u32 %v13395_v3, %v12295_v4  ;;  %7310 = vmatpush.bf16.msrb.mxu1 %v12042_v63  ;;  %v11438_v3 = vor.u32 %v13184_v55, %v11437_v54  ;;  %v10893_v4 = vld [vmem:[#allocation7 + $0x188] sm:$0xf] }
 0x3d0   :  { %v12551_v7 = vld [vmem:[#allocation7 + $0xea0] sm:$0xf0]  ;;  %v11661_v63 = vld [vmem:[#allocation7 + $0x788] sm:$0xf] }
 0x3d1   :  { %v13259_v40 = vld [vmem:[#allocation7 + $0x844] sm:$0xf]  ;;  %v12554_v16 = vor.u32 %v13459_v6, %v12551_v7  ;;  %7323 = vmatpush.bf16.msrb.mxu2 %v12298_v10  ;;  %v11694_v6 = vor.u32 %v13248_v60, %v11693_v59  ;;  %v13112_v7 = vld [vmem:[#allocation7 + $0x3a4] sm:$0xf0] }
 0x3d2   :  { %v11751_v11 = vld [vmem:[#allocation7 + $0x860] sm:$0xf0]  ;;  %v13240_v10 = vld [vmem:[#allocation7 + $0x7a4] sm:$0xf0] }
 0x3d3   :  { %v13323_v12 = vld [vmem:[#allocation7 + $0xa44] sm:$0xf]  ;;  %v11754_v19 = vor.u32 %v13259_v40, %v11751_v11  ;;  %7336 = vmatpush.bf16.msrb.mxu3 %v12554_v16  ;;  %v10894_v40 = vor.u32 %v13048_v34, %v10893_v4  ;;  %v11150_v11 = vor.u32 %v13112_v7, %v11149_v5  ;;  %v13040_v16 = vld [vmem:[#allocation7 + $0x164] sm:$0xf0] }
 0x3d4   :  { %v12007_v13 = vld [vmem:[#allocation7 + $0xa60] sm:$0xf0]  ;;  %v10797_v48 = vld [vmem:[#allocation7 + $0xc8] sm:$0xf] }
 0x3d5   :  { %v13387_v17 = vld [vmem:[#allocation7 + $0xc44] sm:$0xf]  ;;  %v12010_v22 = vor.u32 %v13323_v12, %v12007_v13  ;;  %7298 = vmatpush.bf16.msrb.mxu0 %v11754_v19  ;;  %v11406_v12 = vor.u32 %v13176_v38, %v11405_v37  ;;  %v11117_v13 = vld [vmem:[#allocation7 + $0x348] sm:$0xf] }
 0x3d6   :  { %v12263_v14 = vld [vmem:[#allocation7 + $0xc60] sm:$0xf0]  ;;  %v11629_v19 = vld [vmem:[#allocation7 + $0x748] sm:$0xf] }
 0x3d7   :  { %v13451_v15 = vld [vmem:[#allocation7 + $0xe44] sm:$0xf]  ;;  %v12266_v23 = vor.u32 %v13387_v17, %v12263_v14  ;;  %7311 = vmatpush.bf16.msrb.mxu1 %v12010_v22  ;;  %v11662_v17 = vor.u32 %v13240_v10, %v11661_v63  ;;  %v13104_v14 = vld [vmem:[#allocation7 + $0x364] sm:$0xf0]  ;;  %v4559_v63 = vpop.f32.mrf.mxu2 }
 0x3d8   :  { %v12519_v18 = vld [vmem:[#allocation7 + $0xe60] sm:$0xf0]  ;;  %v11118_v22 = vor.u32 %v13104_v14, %v11117_v13  ;;  %v13024_v54 = vld [vmem:[#allocation7 + $0xe4] sm:$0xf0] }
 0x3d9   :  { %v13251_v20 = vld [vmem:[#allocation7 + $0x804] sm:$0xf]  ;;  %v12522_v35 = vor.u32 %v13451_v15, %v12519_v18  ;;  %7324 = vmatpush.bf16.msrb.mxu2 %v12266_v23  ;;  %v11373_v15 = vld [vmem:[#allocation7 + $0x548] sm:$0xf]  ;;  %v10798_v34 = vor.u32 %v13024_v54, %v10797_v48 }
 0x3da   :  { %v11719_v21 = vld [vmem:[#allocation7 + $0x820] sm:$0xf0]  ;;  %v13168_v18 = vld [vmem:[#allocation7 + $0x564] sm:$0xf0] }
 0x3db   :  { %v13315_v24 = vld [vmem:[#allocation7 + $0xa04] sm:$0xf]  ;;  %v11722_v49 = vor.u32 %v13251_v20, %v11719_v21  ;;  %7337 = vmatpush.bf16.msrb.mxu3 %v12522_v35  ;;  %v13232_v20 = vld [vmem:[#allocation7 + $0x764] sm:$0xf0]  ;;  %v10862_v21 = vor.u32 %v13040_v16, %v10861_v9  ;;  %v11374_v23 = vor.u32 %v13168_v18, %v11373_v15  ;;  %v4572_v9 = vpop.f32.mrf.mxu3  ;;  %v4535_v15 = vpop.f32.mrf.mxu0 }
 0x3dc   :  { %v11975_v31 = vld [vmem:[#allocation7 + $0xa20] sm:$0xf0]  ;;  %v11630_v36 = vor.u32 %v13232_v20, %v11629_v19  ;;  %v13096_v35 = vld [vmem:[#allocation7 + $0x324] sm:$0xf0] }
 0x3dd   :  { %v13379_v25 = vld [vmem:[#allocation7 + $0xc04] sm:$0xf]  ;;  %v11978_v57 = vor.u32 %v13315_v24, %v11975_v31  ;;  %7299 = vmatpush.bf16.msrb.mxu0 %v11722_v49  ;;  %v10829_v24 = vld [vmem:[#allocation7 + $0x108] sm:$0xf] }
 0x3de   :  { %v12231_v26 = vld [vmem:[#allocation7 + $0xc20] sm:$0xf0]  ;;  %v13032_v31 = vld [vmem:[#allocation7 + $0x124] sm:$0xf0] }
 0x3df   :  { %v13443_v52 = vld [vmem:[#allocation7 + $0xe04] sm:$0xf]  ;;  %v12234_v58 = vor.u32 %v13379_v25, %v12231_v26  ;;  %7312 = vmatpush.bf16.msrb.mxu1 %v11978_v57  ;;  %v11085_v25 = vld [vmem:[#allocation7 + $0x308] sm:$0xf]  ;;  %v10830_v30 = vor.u32 %v13032_v31, %v10829_v24  ;;  %v4534_v57 = vadd.f32 %v4533_v41, %v14514_v8  ;;  %v4561_v54 = vpop.f32.mrf.mxu2 }
 0x3e0   :  { %v12487_v28 = vld [vmem:[#allocation7 + $0xe20] sm:$0xf0]  ;;  %7300 = vmatmul.bf16.vlgmr.msrb.gmra.mxu0 %v14495_v39  ;;  %v11341_v26 = vld [vmem:[#allocation7 + $0x508] sm:$0xf]  ;;  %v11086_v47 = vor.u32 %v13096_v35, %v11085_v25 }
 0x3e1   :  { %v12490_v62 = vor.u32 %v13443_v52, %v12487_v28  ;;  %7325 = vmatpush.bf16.msrb.mxu2 %v12234_v58  ;;  %7344 = vmatpush.bf16.msra.mxu0 %v10926_v0  ;;  %v13160_v52 = vld [vmem:[#allocation7 + $0x524] sm:$0xf0]  ;;  %v4546_v58 = vpop.f32.mrf.mxu1 }
 0x3e2   :  { %7313 = vmatmul.bf16.vlgmr.msrb.gmra.mxu1 %v14499_v53  ;;  %v11597_v28 = vld [vmem:[#allocation7 + $0x708] sm:$0xf]  ;;  %v11342_v49 = vor.u32 %v13160_v52, %v11341_v26  ;;  %v4547_v4 = vadd.f32 %v4546_v58, %v4534_v57 }
 0x3e3   :  { %7338 = vmatpush.bf16.msrb.mxu3 %v12490_v62  ;;  %7357 = vmatpush.bf16.msra.mxu1 %v11182_v2  ;;  %v11053_v55 = vld [vmem:[#allocation7 + $0x2c8] sm:$0xf]  ;;  %v11598_v59 = vor.u32 %v13224_v29, %v11597_v28 }
 0x3e4   :  { %7326 = vmatmul.bf16.vlgmr.msrb.gmra.mxu2 %v14497_v50  ;;  %v13088_v60 = vld [vmem:[#allocation7 + $0x2e4] sm:$0xf0] }
 0x3e5   :  { %7370 = vmatpush.bf16.msra.mxu2 %v11438_v3  ;;  %7345 = vmatpush.bf16.msra.mxu0 %v10894_v40  ;;  %v11309_v62 = vld [vmem:[#allocation7 + $0x4c8] sm:$0xf]  ;;  %v11054_v5 = vor.u32 %v13088_v60, %v11053_v55  ;;  %v4574_v60 = vpop.f32.mrf.mxu3 }
 0x3e6   :  { %7339 = vmatmul.bf16.vlgmr.msrb.gmra.mxu3 %v14501_v56  ;;  %v13152_v0 = vld [vmem:[#allocation7 + $0x4e4] sm:$0xf0] }
 0x3e7   :  { %7383 = vmatpush.bf16.msra.mxu3 %v11694_v6  ;;  %7358 = vmatpush.bf16.msra.mxu1 %v11150_v11  ;;  %v11565_v2 = vld [vmem:[#allocation7 + $0x6c8] sm:$0xf]  ;;  %v11310_v6 = vor.u32 %v13152_v0, %v11309_v62 }
 0x3e8   :  { %v13216_v3 = vld [vmem:[#allocation7 + $0x6e4] sm:$0xf0] }
 0x3e9   :  { %7371 = vmatpush.bf16.msra.mxu2 %v11406_v12  ;;  %7346 = vmatpush.bf16.msra.mxu0 %v10862_v21  ;;  %v10765_v7 = vld [vmem:[#allocation7 + $0x88] sm:$0xf]  ;;  %v11566_v8 = vor.u32 %v13216_v3, %v11565_v2  ;;  %v4560_v12 = vadd.f32 %v4559_v63, %v4547_v4 }
 0x3ea   :  { %v13016_v37 = vld [vmem:[#allocation7 + $0xa4] sm:$0xf0] }
 0x3eb   :  { %7384 = vmatpush.bf16.msra.mxu3 %v11662_v17  ;;  %7359 = vmatpush.bf16.msra.mxu1 %v11118_v22  ;;  %v11021_v38 = vld [vmem:[#allocation7 + $0x288] sm:$0xf]  ;;  %v10766_v17 = vor.u32 %v13016_v37, %v10765_v7  ;;  %v14521_v14 = vadd.f32 %v4572_v9, %v4560_v12 }
 0x3ec   :  { %v13080_v10 = vld [vmem:[#allocation7 + $0x2a4] sm:$0xf0] }
 0x3ed   :  { %7372 = vmatpush.bf16.msra.mxu2 %v11374_v23  ;;  %7347 = vmatpush.bf16.msra.mxu0 %v10830_v30  ;;  %v11277_v40 = vld [vmem:[#allocation7 + $0x488] sm:$0xf]  ;;  %v11022_v18 = vor.u32 %v13080_v10, %v11021_v38  ;;  %v4548_v23 = vpop.f32.mrf.mxu1 }
 0x3ee   :  { %v13144_v11 = vld [vmem:[#allocation7 + $0x4a4] sm:$0xf0] }
 0x3ef   :  { %7385 = vmatpush.bf16.msra.mxu3 %v11630_v36  ;;  %7360 = vmatpush.bf16.msra.mxu1 %v11086_v47  ;;  %v11533_v16 = vld [vmem:[#allocation7 + $0x688] sm:$0xf]  ;;  %v11278_v19 = vor.u32 %v13144_v11, %v11277_v40 }
 0x3f0   :  { %v13208_v13 = vld [vmem:[#allocation7 + $0x6a4] sm:$0xf0] }
 0x3f1   :  { %7373 = vmatpush.bf16.msra.mxu2 %v11342_v49  ;;  %7348 = vmatpush.bf16.msra.mxu0 %v10798_v34  ;;  %v10733_v20 = vld [vmem:[#allocation7 + $0x48] sm:$0xf]  ;;  %v11534_v24 = vor.u32 %v13208_v13, %v11533_v16 }
 0x3f2   :  { %v13008_v21 = vld [vmem:[#allocation7 + $0x64] sm:$0xf0] }
 0x3f3   :  { %7386 = vmatpush.bf16.msra.mxu3 %v11598_v59  ;;  %7361 = vmatpush.bf16.msra.mxu1 %v11054_v5  ;;  %v10989_v22 = vld [vmem:[#allocation7 + $0x248] sm:$0xf]  ;;  %v10734_v52 = vor.u32 %v13008_v21, %v10733_v20 }
 0x3f4   :  { %v13072_v31 = vld [vmem:[#allocation7 + $0x264] sm:$0xf0] }
 0x3f5   :  { %7374 = vmatpush.bf16.msra.mxu2 %v11310_v6  ;;  %v11245_v25 = vld [vmem:[#allocation7 + $0x448] sm:$0xf]  ;;  %7349 = vmatpush.bf16.msra.mxu0 %v10766_v17  ;;  %v10990_v30 = vor.u32 %v13072_v31, %v10989_v22 }
 0x3f6   :  { %v13136_v36 = vld [vmem:[#allocation7 + $0x464] sm:$0xf0] }
 0x3f7   :  { %7387 = vmatpush.bf16.msra.mxu3 %v11566_v8  ;;  %v11501_v35 = vld [vmem:[#allocation7 + $0x648] sm:$0xf]  ;;  %7362 = vmatpush.bf16.msra.mxu1 %v11022_v18  ;;  %v11246_v41 = vor.u32 %v13136_v36, %v11245_v25 }
 0x3f8   :  { %v13200_v26 = vld [vmem:[#allocation7 + $0x664] sm:$0xf0] }
 0x3f9   :  { %v10701_v28 = vld [vmem:[#allocation7 + $0x8] sm:$0xf]  ;;  %7375 = vmatpush.bf16.msra.mxu2 %v11278_v19  ;;  %v11502_v55 = vor.u32 %v13200_v26, %v11501_v35  ;;  %7350 = vmatpush.bf16.msra.mxu0 %v10734_v52 }
 0x3fa   :  { %v13000_v29 = vld [vmem:[#allocation7 + $0x24] sm:$0xf0] }
 0x3fb   :  { %v10957_v47 = vld [vmem:[#allocation7 + $0x208] sm:$0xf]  ;;  %7388 = vmatpush.bf16.msra.mxu3 %v11534_v24  ;;  %v10702_v3 = vor.u32 %v13000_v29, %v10701_v28  ;;  %7363 = vmatpush.bf16.msra.mxu1 %v10990_v30 }
 0x3fc   :  { %v13064_v49 = vld [vmem:[#allocation7 + $0x224] sm:$0xf0] }
 0x3fd   :  { %v11213_v48 = vld [vmem:[#allocation7 + $0x408] sm:$0xf]  ;;  %7376 = vmatpush.bf16.msra.mxu2 %v11246_v41  ;;  %v10958_v6 = vor.u32 %v13064_v49, %v10957_v47  ;;  %7351 = vmatpush.bf16.msra.mxu0 %v10702_v3  ;;  %v7158_v3 = vpop.f32.mrf.mxu1 }
 0x3fe   :  { %v13128_v57 = vld [vmem:[#allocation7 + $0x424] sm:$0xf0] }
 0x3ff   :  { %v11469_v58 = vld [vmem:[#allocation7 + $0x608] sm:$0xf]  ;;  %v11214_v7 = vor.u32 %v13128_v57, %v11213_v48  ;;  %7389 = vmatpush.bf16.msra.mxu3 %v11502_v55  ;;  %7364 = vmatpush.bf16.msra.mxu1 %v10958_v6 }
 0x400   :  { %v13192_v59 = vld [vmem:[#allocation7 + $0x624] sm:$0xf0]  ;;  %7352 = vmatmul.bf16.vlgmr.msra.gmra.mxu0 %v14481_v27 }
 0x401   :  { %v11949_v62 = vld [vmem:[#allocation7 + $0x9c8] sm:$0xf]  ;;  %v11470_v63 = vor.u32 %v13192_v59, %v11469_v58  ;;  %7377 = vmatpush.bf16.msra.mxu2 %v11214_v7  ;;  %v7145_v59 = vpop.f32.mrf.mxu0 }
 0x402   :  { %v13312_v0 = vld [vmem:[#allocation7 + $0x9e4] sm:$0xf0]  ;;  %7365 = vmatmul.bf16.vlgmr.msra.gmra.mxu1 %v14485_v46 }
 0x403   :  { %v12205_v2 = vld [vmem:[#allocation7 + $0xbc8] sm:$0xf]  ;;  %v11950_v8 = vor.u32 %v13312_v0, %v11949_v62  ;;  %7390 = vmatpush.bf16.msra.mxu3 %v11470_v63  ;;  %v7146_v0 = vadd.f32 %v7145_v59, %v14414_v43 }
 0x404   :  { %v13376_v4 = vld [vmem:[#allocation7 + $0xbe4] sm:$0xf0]  ;;  %7378 = vmatmul.bf16.vlgmr.msra.gmra.mxu2 %v14483_v61 }
 0x405   :  { %v12461_v34 = vld [vmem:[#allocation7 + $0xdc8] sm:$0xf]  ;;  %v12206_v10 = vor.u32 %v13376_v4, %v12205_v2  ;;  %7396 = vmatpush.bf16.msrb.mxu0 %v11950_v8 }
 0x406   :  { %v13440_v5 = vld [vmem:[#allocation7 + $0xde4] sm:$0xf0]  ;;  %7391 = vmatmul.bf16.vlgmr.msra.gmra.mxu3 %v14487_v45 }
 0x407   :  { %v12717_v37 = vld [vmem:[#allocation7 + $0xfc8] sm:$0xf]  ;;  %v12462_v40 = vor.u32 %v13440_v5, %v12461_v34  ;;  %7409 = vmatpush.bf16.msrb.mxu1 %v12206_v10 }
 0x408   :  { %v13504_v38 = vld [vmem:[#allocation7 + $0xfe4] sm:$0xf0] }
 0x409   :  { %v11917_v11 = vld [vmem:[#allocation7 + $0x988] sm:$0xf]  ;;  %v12718_v16 = vor.u32 %v13504_v38, %v12717_v37  ;;  %7422 = vmatpush.bf16.msrb.mxu2 %v12462_v40  ;;  %v7159_v38 = vadd.f32 %v7158_v3, %v7146_v0 }
 0x40a   :  { %v13304_v12 = vld [vmem:[#allocation7 + $0x9a4] sm:$0xf0] }
 0x40b   :  { %v12173_v9 = vld [vmem:[#allocation7 + $0xb88] sm:$0xf]  ;;  %v11918_v20 = vor.u32 %v13304_v12, %v11917_v11  ;;  %7435 = vmatpush.bf16.msrb.mxu3 %v12718_v16 }
 0x40c   :  { %v13368_v13 = vld [vmem:[#allocation7 + $0xba4] sm:$0xf0] }
 0x40d   :  { %v12429_v17 = vld [vmem:[#allocation7 + $0xd88] sm:$0xf]  ;;  %v12174_v21 = vor.u32 %v13368_v13, %v12173_v9  ;;  %7397 = vmatpush.bf16.msrb.mxu0 %v11918_v20 }
 0x40e   :  { %v13432_v15 = vld [vmem:[#allocation7 + $0xda4] sm:$0xf0] }
 0x40f   :  { %v12685_v18 = vld [vmem:[#allocation7 + $0xf88] sm:$0xf]  ;;  %v12430_v22 = vor.u32 %v13432_v15, %v12429_v17  ;;  %7410 = vmatpush.bf16.msrb.mxu1 %v12174_v21 }
 0x410   :  { %v13496_v19 = vld [vmem:[#allocation7 + $0xfa4] sm:$0xf0] }
 0x411   :  { %v11885_v23 = vld [vmem:[#allocation7 + $0x948] sm:$0xf]  ;;  %v12686_v25 = vor.u32 %v13496_v19, %v12685_v18  ;;  %7423 = vmatpush.bf16.msrb.mxu2 %v12430_v22  ;;  %v7171_v18 = vpop.f32.mrf.mxu2 }
 0x412   :  { %v13296_v24 = vld [vmem:[#allocation7 + $0x964] sm:$0xf0]  ;;  %v7172_v22 = vadd.f32 %v7171_v18, %v7159_v38  ;;  %v13052_v38 = vld [vmem:[#allocation7 + $0x1cc] sm:$0xf] }
 0x413   :  { %v12141_v31 = vld [vmem:[#allocation7 + $0xb48] sm:$0xf]  ;;  %v11886_v29 = vor.u32 %v13296_v24, %v11885_v23  ;;  %7436 = vmatpush.bf16.msrb.mxu3 %v12686_v25  ;;  %v7184_v23 = vpop.f32.mrf.mxu3  ;;  %v7147_v25 = vpop.f32.mrf.mxu0 }
 0x414   :  { %v13360_v36 = vld [vmem:[#allocation7 + $0xb64] sm:$0xf0]  ;;  %v13172_v25 = vld [vmem:[#allocation7 + $0x58c] sm:$0xf] }
 0x415   :  { %v12397_v35 = vld [vmem:[#allocation7 + $0xd48] sm:$0xf]  ;;  %v12142_v30 = vor.u32 %v13360_v36, %v12141_v31  ;;  %7398 = vmatpush.bf16.msrb.mxu0 %v11886_v29 }
 0x416   :  { %v13424_v26 = vld [vmem:[#allocation7 + $0xd64] sm:$0xf0] }
 0x417   :  { %v12653_v52 = vld [vmem:[#allocation7 + $0xf48] sm:$0xf]  ;;  %v12398_v41 = vor.u32 %v13424_v26, %v12397_v35  ;;  %7411 = vmatpush.bf16.msrb.mxu1 %v12142_v30  ;;  %v7160_v35 = vpop.f32.mrf.mxu1  ;;  %v14528_v26 = vadd.f32 %v7184_v23, %v7172_v22  ;;  %v10895_v22 = vld [vmem:[#allocation7 + $0x1a8] sm:$0xf0] }
 0x418   :  { %v13488_v28 = vld [vmem:[#allocation7 + $0xf64] sm:$0xf0]  ;;  %v13108_v23 = vld [vmem:[#allocation7 + $0x38c] sm:$0xf] }
 0x419   :  { %v11853_v47 = vld [vmem:[#allocation7 + $0x908] sm:$0xf]  ;;  %v12654_v54 = vor.u32 %v13488_v28, %v12653_v52  ;;  %7424 = vmatpush.bf16.msrb.mxu2 %v12398_v41  ;;  %v13236_v35 = vld [vmem:[#allocation7 + $0x78c] sm:$0xf] }
 0x41a   :  { %v13288_v49 = vld [vmem:[#allocation7 + $0x924] sm:$0xf0] }
 0x41b   :  { %v12109_v48 = vld [vmem:[#allocation7 + $0xb08] sm:$0xf]  ;;  %v11854_v2 = vor.u32 %v13288_v49, %v11853_v47  ;;  %7437 = vmatpush.bf16.msrb.mxu3 %v12654_v54 }
 0x41c   :  { %v13352_v55 = vld [vmem:[#allocation7 + $0xb24] sm:$0xf0] }
 0x41d   :  { %v12365_v57 = vld [vmem:[#allocation7 + $0xd08] sm:$0xf]  ;;  %v12110_v4 = vor.u32 %v13352_v55, %v12109_v48  ;;  %7399 = vmatpush.bf16.msrb.mxu0 %v11854_v2 }
 0x41e   :  { %v13416_v58 = vld [vmem:[#allocation7 + $0xd24] sm:$0xf0] }
 0x41f   :  { %v12621_v60 = vld [vmem:[#allocation7 + $0xf08] sm:$0xf]  ;;  %v12366_v34 = vor.u32 %v13416_v58, %v12365_v57  ;;  %7412 = vmatpush.bf16.msrb.mxu1 %v12110_v4 }
 0x420   :  { %v13480_v62 = vld [vmem:[#allocation7 + $0xf24] sm:$0xf0] }
 0x421   :  { %v11821_v5 = vld [vmem:[#allocation7 + $0x8c8] sm:$0xf]  ;;  %v12622_v37 = vor.u32 %v13480_v62, %v12621_v60  ;;  %7425 = vmatpush.bf16.msrb.mxu2 %v12366_v34 }
 0x422   :  { %v13280_v6 = vld [vmem:[#allocation7 + $0x8e4] sm:$0xf0] }
 0x423   :  { %v12077_v7 = vld [vmem:[#allocation7 + $0xac8] sm:$0xf]  ;;  %v11822_v12 = vor.u32 %v13280_v6, %v11821_v5  ;;  %7438 = vmatpush.bf16.msrb.mxu3 %v12622_v37  ;;  %v7173_v37 = vpop.f32.mrf.mxu2 }
 0x424   :  { %v13344_v63 = vld [vmem:[#allocation7 + $0xae4] sm:$0xf0]  ;;  %v7197_v37 = vpop.f32.mrf.mxu0 }
 0x425   :  { %v12333_v8 = vld [vmem:[#allocation7 + $0xcc8] sm:$0xf]  ;;  %v12078_v43 = vor.u32 %v13344_v63, %v12077_v7  ;;  %7400 = vmatpush.bf16.msrb.mxu0 %v11822_v12  ;;  %v10927_v63 = vld [vmem:[#allocation7 + $0x1e8] sm:$0xf0] }
 0x426   :  { %v13408_v10 = vld [vmem:[#allocation7 + $0xce4] sm:$0xf0]  ;;  %v13180_v12 = vld [vmem:[#allocation7 + $0x5cc] sm:$0xf]  ;;  %v10930_v18 = vor.u32 %v13052_v38, %v10927_v63 }
 0x427   :  { %v12589_v40 = vld [vmem:[#allocation7 + $0xec8] sm:$0xf]  ;;  %v12334_v9 = vor.u32 %v13408_v10, %v12333_v8  ;;  %7413 = vmatpush.bf16.msrb.mxu1 %v12078_v43  ;;  %v13116_v8 = vld [vmem:[#allocation7 + $0x3cc] sm:$0xf]  ;;  %v7186_v10 = vpop.f32.mrf.mxu3 }
 0x428   :  { %v13472_v11 = vld [vmem:[#allocation7 + $0xee4] sm:$0xf0]  ;;  %v11439_v43 = vld [vmem:[#allocation7 + $0x5e8] sm:$0xf0] }
 0x429   :  { %v11789_v16 = vld [vmem:[#allocation7 + $0x888] sm:$0xf]  ;;  %v12590_v15 = vor.u32 %v13472_v11, %v12589_v40  ;;  %7426 = vmatpush.bf16.msrb.mxu2 %v12334_v9  ;;  %v11183_v11 = vld [vmem:[#allocation7 + $0x3e8] sm:$0xf0] }
 0x42a   :  { %v13272_v13 = vld [vmem:[#allocation7 + $0x8a4] sm:$0xf0]  ;;  %v13220_v38 = vld [vmem:[#allocation7 + $0x70c] sm:$0xf] }
 0x42b   :  { %v12045_v17 = vld [vmem:[#allocation7 + $0xa88] sm:$0xf]  ;;  %v11790_v36 = vor.u32 %v13272_v13, %v11789_v16  ;;  %7439 = vmatpush.bf16.msrb.mxu3 %v12590_v15  ;;  %v13244_v13 = vld [vmem:[#allocation7 + $0x7cc] sm:$0xf] }
 0x42c   :  { %v13336_v19 = vld [vmem:[#allocation7 + $0xaa4] sm:$0xf0]  ;;  %v11599_v63 = vld [vmem:[#allocation7 + $0x728] sm:$0xf0] }
 0x42d   :  { %v12301_v20 = vld [vmem:[#allocation7 + $0xc88] sm:$0xf]  ;;  %v12046_v52 = vor.u32 %v13336_v19, %v12045_v17  ;;  %7401 = vmatpush.bf16.msrb.mxu0 %v11790_v36  ;;  %v11695_v17 = vld [vmem:[#allocation7 + $0x7e8] sm:$0xf0]  ;;  %v11186_v19 = vor.u32 %v13116_v8, %v11183_v11  ;;  %v7198_v8 = vadd.f32 %v7197_v37, %v14528_v26 }
 0x42e   :  { %v13400_v21 = vld [vmem:[#allocation7 + $0xca4] sm:$0xf0]  ;;  %v11407_v36 = vld [vmem:[#allocation7 + $0x5a8] sm:$0xf0] }
 0x42f   :  { %v12557_v24 = vld [vmem:[#allocation7 + $0xe88] sm:$0xf]  ;;  %v12302_v28 = vor.u32 %v13400_v21, %v12301_v20  ;;  %7414 = vmatpush.bf16.msrb.mxu1 %v12046_v52  ;;  %v11442_v20 = vor.u32 %v13180_v12, %v11439_v43  ;;  %v13044_v21 = vld [vmem:[#allocation7 + $0x18c] sm:$0xf] }
 0x430   :  { %v13464_v31 = vld [vmem:[#allocation7 + $0xea4] sm:$0xf0]  ;;  %v11663_v52 = vld [vmem:[#allocation7 + $0x7a8] sm:$0xf0] }
 0x431   :  { %v11757_v29 = vld [vmem:[#allocation7 + $0x848] sm:$0xf]  ;;  %v12558_v47 = vor.u32 %v13464_v31, %v12557_v24  ;;  %7427 = vmatpush.bf16.msrb.mxu2 %v12302_v28  ;;  %v11698_v24 = vor.u32 %v13244_v13, %v11695_v17  ;;  %v11151_v31 = vld [vmem:[#allocation7 + $0x3a8] sm:$0xf0]  ;;  %v10898_v28 = vor.u32 %v13044_v21, %v10895_v22  ;;  %v11602_v13 = vor.u32 %v13220_v38, %v11599_v63 }
 0x432   :  { %v13264_v30 = vld [vmem:[#allocation7 + $0x864] sm:$0xf0]  ;;  %v13020_v43 = vld [vmem:[#allocation7 + $0xcc] sm:$0xf] }
 0x433   :  { %v12013_v41 = vld [vmem:[#allocation7 + $0xa48] sm:$0xf]  ;;  %v11758_v58 = vor.u32 %v13264_v30, %v11757_v29  ;;  %7440 = vmatpush.bf16.msrb.mxu3 %v12558_v47  ;;  %v11154_v29 = vor.u32 %v13108_v23, %v11151_v31  ;;  %v11410_v30 = vor.u32 %v13172_v25, %v11407_v36  ;;  %v10863_v47 = vld [vmem:[#allocation7 + $0x168] sm:$0xf0] }
 0x434   :  { %v13328_v49 = vld [vmem:[#allocation7 + $0xa64] sm:$0xf0]  ;;  %v11567_v21 = vld [vmem:[#allocation7 + $0x6e8] sm:$0xf0] }
 0x435   :  { %v12269_v48 = vld [vmem:[#allocation7 + $0xc48] sm:$0xf]  ;;  %v12014_v62 = vor.u32 %v13328_v49, %v12013_v41  ;;  %7402 = vmatpush.bf16.msrb.mxu0 %v11758_v58  ;;  %v13036_v41 = vld [vmem:[#allocation7 + $0x14c] sm:$0xf] }
 0x436   :  { %v13392_v54 = vld [vmem:[#allocation7 + $0xc64] sm:$0xf0]  ;;  %v13100_v49 = vld [vmem:[#allocation7 + $0x34c] sm:$0xf] }
 0x437   :  { %v12525_v55 = vld [vmem:[#allocation7 + $0xe48] sm:$0xf]  ;;  %v12270_v0 = vor.u32 %v13392_v54, %v12269_v48  ;;  %7415 = vmatpush.bf16.msrb.mxu1 %v12014_v62  ;;  %v11666_v48 = vor.u32 %v13236_v35, %v11663_v52  ;;  %v11119_v54 = vld [vmem:[#allocation7 + $0x368] sm:$0xf0]  ;;  %v7223_v35 = vpop.f32.mrf.mxu2 }
 0x438   :  { %v13456_v57 = vld [vmem:[#allocation7 + $0xe64] sm:$0xf0]  ;;  %v13228_v58 = vld [vmem:[#allocation7 + $0x74c] sm:$0xf]  ;;  %v11122_v62 = vor.u32 %v13100_v49, %v11119_v54 }
 0x439   :  { %v11725_v59 = vld [vmem:[#allocation7 + $0x808] sm:$0xf]  ;;  %v12526_v34 = vor.u32 %v13456_v57, %v12525_v55  ;;  %7428 = vmatpush.bf16.msrb.mxu2 %v12270_v0  ;;  %v13164_v55 = vld [vmem:[#allocation7 + $0x54c] sm:$0xf] }
 0x43a   :  { %v13256_v60 = vld [vmem:[#allocation7 + $0x824] sm:$0xf0]  ;;  %v11375_v57 = vld [vmem:[#allocation7 + $0x568] sm:$0xf0] }
 0x43b   :  { %v11981_v2 = vld [vmem:[#allocation7 + $0xa08] sm:$0xf]  ;;  %v11726_v40 = vor.u32 %v13256_v60, %v11725_v59  ;;  %7441 = vmatpush.bf16.msrb.mxu3 %v12526_v34  ;;  %v11631_v59 = vld [vmem:[#allocation7 + $0x768] sm:$0xf0]  ;;  %v10866_v60 = vor.u32 %v13036_v41, %v10863_v47  ;;  %v11378_v0 = vor.u32 %v13164_v55, %v11375_v57  ;;  %v7236_v41 = vpop.f32.mrf.mxu3 }
 0x43c   :  { %v13320_v3 = vld [vmem:[#allocation7 + $0xa24] sm:$0xf0]  ;;  %v11634_v34 = vor.u32 %v13228_v58, %v11631_v59  ;;  %v10767_v31 = vld [vmem:[#allocation7 + $0xa8] sm:$0xf0] }
 0x43d   :  { %v12237_v4 = vld [vmem:[#allocation7 + $0xc08] sm:$0xf]  ;;  %v11982_v9 = vor.u32 %v13320_v3, %v11981_v2  ;;  %7403 = vmatpush.bf16.msrb.mxu0 %v11726_v40  ;;  %v13028_v2 = vld [vmem:[#allocation7 + $0x10c] sm:$0xf]  ;;  %v7210_v40 = vpop.f32.mrf.mxu1 }
 0x43e   :  { %v13384_v5 = vld [vmem:[#allocation7 + $0xc24] sm:$0xf0]  ;;  %v10831_v3 = vld [vmem:[#allocation7 + $0x128] sm:$0xf0]  ;;  %v7211_v17 = vadd.f32 %v7210_v40, %v7198_v8 }
 0x43f   :  { %v12493_v6 = vld [vmem:[#allocation7 + $0xe08] sm:$0xf]  ;;  %v12238_v16 = vor.u32 %v13384_v5, %v12237_v4  ;;  %7416 = vmatpush.bf16.msrb.mxu1 %v11982_v9  ;;  %v13092_v4 = vld [vmem:[#allocation7 + $0x30c] sm:$0xf]  ;;  %v10834_v10 = vor.u32 %v13028_v2, %v10831_v3 }
 0x440   :  { %v13448_v7 = vld [vmem:[#allocation7 + $0xe24] sm:$0xf0]  ;;  %7404 = vmatmul.bf16.vlgmr.msrb.gmra.mxu0 %v14495_v39  ;;  %v11087_v5 = vld [vmem:[#allocation7 + $0x328] sm:$0xf0] }
 0x441   :  { %v12494_v15 = vor.u32 %v13448_v7, %v12493_v6  ;;  %7429 = vmatpush.bf16.msrb.mxu2 %v12238_v16  ;;  %7448 = vmatpush.bf16.msra.mxu0 %v10930_v18  ;;  %v13156_v6 = vld [vmem:[#allocation7 + $0x50c] sm:$0xf]  ;;  %v11090_v11 = vor.u32 %v13092_v4, %v11087_v5 }
 0x442   :  { %7417 = vmatmul.bf16.vlgmr.msrb.gmra.mxu1 %v14499_v53  ;;  %v11343_v7 = vld [vmem:[#allocation7 + $0x528] sm:$0xf0] }
 0x443   :  { %7442 = vmatpush.bf16.msrb.mxu3 %v12494_v15  ;;  %7461 = vmatpush.bf16.msra.mxu1 %v11186_v19  ;;  %v11346_v12 = vor.u32 %v13156_v6, %v11343_v7  ;;  %v10799_v9 = vld [vmem:[#allocation7 + $0xe8] sm:$0xf0] }
 0x444   :  { %7430 = vmatmul.bf16.vlgmr.msrb.gmra.mxu2 %v14497_v50  ;;  %v13084_v16 = vld [vmem:[#allocation7 + $0x2cc] sm:$0xf]  ;;  %v10802_v22 = vor.u32 %v13020_v43, %v10799_v9 }
 0x445   :  { %7474 = vmatpush.bf16.msra.mxu2 %v11442_v20  ;;  %7449 = vmatpush.bf16.msra.mxu0 %v10898_v28  ;;  %v11055_v15 = vld [vmem:[#allocation7 + $0x2e8] sm:$0xf0]  ;;  %v7212_v55 = vpop.f32.mrf.mxu1 }
 0x446   :  { %7443 = vmatmul.bf16.vlgmr.msrb.gmra.mxu3 %v14501_v56  ;;  %v13148_v18 = vld [vmem:[#allocation7 + $0x4cc] sm:$0xf]  ;;  %v11058_v26 = vor.u32 %v13084_v16, %v11055_v15 }
 0x447   :  { %7487 = vmatpush.bf16.msra.mxu3 %v11698_v24  ;;  %7462 = vmatpush.bf16.msra.mxu1 %v11154_v29  ;;  %v11311_v19 = vld [vmem:[#allocation7 + $0x4e8] sm:$0xf0] }
 0x448   :  { %v13212_v20 = vld [vmem:[#allocation7 + $0x6cc] sm:$0xf]  ;;  %v11314_v23 = vor.u32 %v13148_v18, %v11311_v19  ;;  %v7238_v19 = vpop.f32.mrf.mxu3 }
 0x449   :  { %7475 = vmatpush.bf16.msra.mxu2 %v11410_v30  ;;  %7450 = vmatpush.bf16.msra.mxu0 %v10866_v60  ;;  %v13012_v24 = vld [vmem:[#allocation7 + $0x8c] sm:$0xf]  ;;  %v11570_v36 = vor.u32 %v13212_v20, %v11567_v21  ;;  %v7224_v30 = vadd.f32 %v7223_v35, %v7211_v17 }
 0x44a   :  { %v13076_v25 = vld [vmem:[#allocation7 + $0x28c] sm:$0xf]  ;;  %v10770_v54 = vor.u32 %v13012_v24, %v10767_v31 }
 0x44b   :  { %7488 = vmatpush.bf16.msra.mxu3 %v11666_v48  ;;  %7463 = vmatpush.bf16.msra.mxu1 %v11122_v62  ;;  %v11023_v52 = vld [vmem:[#allocation7 + $0x2a8] sm:$0xf0]  ;;  %v7199_v48 = vpop.f32.mrf.mxu0  ;;  %v14535_v57 = vadd.f32 %v7236_v41, %v7224_v30 }
 0x44c   :  { %v13140_v28 = vld [vmem:[#allocation7 + $0x48c] sm:$0xf]  ;;  %v11026_v58 = vor.u32 %v13076_v25, %v11023_v52 }
 0x44d   :  { %7476 = vmatpush.bf16.msra.mxu2 %v11378_v0  ;;  %7451 = vmatpush.bf16.msra.mxu0 %v10834_v10  ;;  %v11279_v29 = vld [vmem:[#allocation7 + $0x4a8] sm:$0xf0] }
 0x44e   :  { %v13204_v47 = vld [vmem:[#allocation7 + $0x68c] sm:$0xf]  ;;  %v11282_v59 = vor.u32 %v13140_v28, %v11279_v29 }
 0x44f   :  { %7489 = vmatpush.bf16.msra.mxu3 %v11634_v34  ;;  %7464 = vmatpush.bf16.msra.mxu1 %v11090_v11  ;;  %v11535_v49 = vld [vmem:[#allocation7 + $0x6a8] sm:$0xf0] }
 0x450   :  { %v13004_v60 = vld [vmem:[#allocation7 + $0x4c] sm:$0xf]  ;;  %v11538_v2 = vor.u32 %v13204_v47, %v11535_v49 }
 0x451   :  { %7477 = vmatpush.bf16.msra.mxu2 %v11346_v12  ;;  %7452 = vmatpush.bf16.msra.mxu0 %v10802_v22  ;;  %v10735_v62 = vld [vmem:[#allocation7 + $0x68] sm:$0xf0] }
 0x452   :  { %v13068_v0 = vld [vmem:[#allocation7 + $0x24c] sm:$0xf]  ;;  %v10738_v7 = vor.u32 %v13004_v60, %v10735_v62 }
 0x453   :  { %7490 = vmatpush.bf16.msra.mxu3 %v11602_v13  ;;  %7465 = vmatpush.bf16.msra.mxu1 %v11058_v26  ;;  %v10991_v3 = vld [vmem:[#allocation7 + $0x268] sm:$0xf0]  ;;  %v7225_v13 = vpop.f32.mrf.mxu2 }
 0x454   :  { %v13132_v4 = vld [vmem:[#allocation7 + $0x44c] sm:$0xf]  ;;  %v10994_v63 = vor.u32 %v13068_v0, %v10991_v3  ;;  %v7249_v13 = vpop.f32.mrf.mxu0 }
 0x455   :  { %7478 = vmatpush.bf16.msra.mxu2 %v11314_v23  ;;  %v11247_v34 = vld [vmem:[#allocation7 + $0x468] sm:$0xf0]  ;;  %7453 = vmatpush.bf16.msra.mxu0 %v10770_v54 }
 0x456   :  { %v13196_v5 = vld [vmem:[#allocation7 + $0x64c] sm:$0xf]  ;;  %v11250_v8 = vor.u32 %v13132_v4, %v11247_v34 }
 0x457   :  { %7491 = vmatpush.bf16.msra.mxu3 %v11570_v36  ;;  %v11503_v6 = vld [vmem:[#allocation7 + $0x668] sm:$0xf0]  ;;  %7466 = vmatpush.bf16.msra.mxu1 %v11026_v58 }
 0x458   :  { %v12996_v37 = vld [vmem:[#allocation7 + $0xc] sm:$0xf]  ;;  %v11506_v12 = vor.u32 %v13196_v5, %v11503_v6 }
 0x459   :  { %v10703_v38 = vld [vmem:[#allocation7 + $0x28] sm:$0xf0]  ;;  %7479 = vmatpush.bf16.msra.mxu2 %v11282_v59  ;;  %7454 = vmatpush.bf16.msra.mxu0 %v10738_v7 }
 0x45a   :  { %v13060_v10 = vld [vmem:[#allocation7 + $0x20c] sm:$0xf]  ;;  %v10706_v20 = vor.u32 %v12996_v37, %v10703_v38 }
 0x45b   :  { %v10959_v40 = vld [vmem:[#allocation7 + $0x228] sm:$0xf0]  ;;  %7492 = vmatpush.bf16.msra.mxu3 %v11538_v2  ;;  %7467 = vmatpush.bf16.msra.mxu1 %v10994_v63 }
 0x45c   :  { %v13124_v11 = vld [vmem:[#allocation7 + $0x40c] sm:$0xf]  ;;  %v10962_v23 = vor.u32 %v13060_v10, %v10959_v40 }
 0x45d   :  { %v11215_v43 = vld [vmem:[#allocation7 + $0x428] sm:$0xf0]  ;;  %7480 = vmatpush.bf16.msra.mxu2 %v11250_v8  ;;  %7455 = vmatpush.bf16.msra.mxu0 %v10706_v20  ;;  %v7262_v20 = vpop.f32.mrf.mxu1 }
 0x45e   :  { %v13188_v9 = vld [vmem:[#allocation7 + $0x60c] sm:$0xf]  ;;  %v11218_v24 = vor.u32 %v13124_v11, %v11215_v43 }
 0x45f   :  { %v11471_v16 = vld [vmem:[#allocation7 + $0x628] sm:$0xf0]  ;;  %7493 = vmatpush.bf16.msra.mxu3 %v11506_v12  ;;  %7468 = vmatpush.bf16.msra.mxu1 %v10962_v23 }
 0x460   :  { %v13308_v17 = vld [vmem:[#allocation7 + $0x9cc] sm:$0xf]  ;;  %v11474_v36 = vor.u32 %v13188_v9, %v11471_v16  ;;  %7456 = vmatmul.bf16.vlgmr.msra.gmra.mxu0 %v14481_v27 }
 0x461   :  { %v11951_v15 = vld [vmem:[#allocation7 + $0x9e8] sm:$0xf0]  ;;  %7481 = vmatpush.bf16.msra.mxu2 %v11218_v24 }
 0x462   :  { %v13372_v18 = vld [vmem:[#allocation7 + $0xbcc] sm:$0xf]  ;;  %v11954_v35 = vor.u32 %v13308_v17, %v11951_v15  ;;  %7469 = vmatmul.bf16.vlgmr.msra.gmra.mxu1 %v14485_v46 }
 0x463   :  { %v12207_v21 = vld [vmem:[#allocation7 + $0xbe8] sm:$0xf0]  ;;  %7494 = vmatpush.bf16.msra.mxu3 %v11474_v36 }
 0x464   :  { %v13436_v22 = vld [vmem:[#allocation7 + $0xdcc] sm:$0xf]  ;;  %v12210_v52 = vor.u32 %v13372_v18, %v12207_v21  ;;  %7500 = vmatpush.bf16.msrb.mxu0 %v11954_v35  ;;  %7482 = vmatmul.bf16.vlgmr.msra.gmra.mxu2 %v14483_v61  ;;  %v7250_v18 = vadd.f32 %v7249_v13, %v14427_v33 }
 0x465   :  { %v12463_v26 = vld [vmem:[#allocation7 + $0xde8] sm:$0xf0] }
 0x466   :  { %v13500_v31 = vld [vmem:[#allocation7 + $0xfcc] sm:$0xf]  ;;  %v12466_v28 = vor.u32 %v13436_v22, %v12463_v26  ;;  %7513 = vmatpush.bf16.msrb.mxu1 %v12210_v52  ;;  %7495 = vmatmul.bf16.vlgmr.msra.gmra.mxu3 %v14487_v45 }
 0x467   :  { %v12719_v25 = vld [vmem:[#allocation7 + $0xfe8] sm:$0xf0] }
 0x468   :  { %v13300_v29 = vld [vmem:[#allocation7 + $0x98c] sm:$0xf]  ;;  %v12722_v47 = vor.u32 %v13500_v31, %v12719_v25  ;;  %7526 = vmatpush.bf16.msrb.mxu2 %v12466_v28  ;;  %v7263_v25 = vadd.f32 %v7262_v20, %v7250_v18 }
 0x469   :  { %v11919_v30 = vld [vmem:[#allocation7 + $0x9a8] sm:$0xf0] }
 0x46a   :  { %v13364_v41 = vld [vmem:[#allocation7 + $0xb8c] sm:$0xf]  ;;  %v11922_v59 = vor.u32 %v13300_v29, %v11919_v30  ;;  %7539 = vmatpush.bf16.msrb.mxu3 %v12722_v47 }
 0x46b   :  { %v12175_v49 = vld [vmem:[#allocation7 + $0xba8] sm:$0xf0] }
 0x46c   :  { %v13428_v48 = vld [vmem:[#allocation7 + $0xd8c] sm:$0xf]  ;;  %v12178_v60 = vor.u32 %v13364_v41, %v12175_v49  ;;  %7501 = vmatpush.bf16.msrb.mxu0 %v11922_v59 }
 0x46d   :  { %v12431_v54 = vld [vmem:[#allocation7 + $0xda8] sm:$0xf0] }
 0x46e   :  { %v13492_v55 = vld [vmem:[#allocation7 + $0xf8c] sm:$0xf]  ;;  %v12434_v62 = vor.u32 %v13428_v48, %v12431_v54  ;;  %7514 = vmatpush.bf16.msrb.mxu1 %v12178_v60 }
 0x46f   :  { %v12687_v58 = vld [vmem:[#allocation7 + $0xfa8] sm:$0xf0] }
 0x470   :  { %v13292_v0 = vld [vmem:[#allocation7 + $0x94c] sm:$0xf]  ;;  %v12690_v4 = vor.u32 %v13492_v55, %v12687_v58  ;;  %7527 = vmatpush.bf16.msrb.mxu2 %v12434_v62  ;;  %v7275_v55 = vpop.f32.mrf.mxu2 }
 0x471   :  { %v11887_v2 = vld [vmem:[#allocation7 + $0x968] sm:$0xf0]  ;;  %v7276_v62 = vadd.f32 %v7275_v55, %v7263_v25  ;;  %v10933_v25 = vld [vmem:[#allocation7 + $0x1d0] sm:$0xf] }
 0x472   :  { %v13356_v3 = vld [vmem:[#allocation7 + $0xb4c] sm:$0xf]  ;;  %v11890_v38 = vor.u32 %v13292_v0, %v11887_v2  ;;  %7540 = vmatpush.bf16.msrb.mxu3 %v12690_v4  ;;  %v7288_v0 = vpop.f32.mrf.mxu3  ;;  %v7251_v4 = vpop.f32.mrf.mxu0 }
 0x473   :  { %v12143_v34 = vld [vmem:[#allocation7 + $0xb68] sm:$0xf0]  ;;  %v11413_v4 = vld [vmem:[#allocation7 + $0x590] sm:$0xf] }
 0x474   :  { %v13420_v5 = vld [vmem:[#allocation7 + $0xd4c] sm:$0xf]  ;;  %v12146_v63 = vor.u32 %v13356_v3, %v12143_v34  ;;  %7502 = vmatpush.bf16.msrb.mxu0 %v11890_v38 }
 0x475   :  { %v12399_v6 = vld [vmem:[#allocation7 + $0xd68] sm:$0xf0] }
 0x476   :  { %v13484_v7 = vld [vmem:[#allocation7 + $0xf4c] sm:$0xf]  ;;  %v12402_v8 = vor.u32 %v13420_v5, %v12399_v6  ;;  %7515 = vmatpush.bf16.msrb.mxu1 %v12146_v63  ;;  %v7264_v5 = vpop.f32.mrf.mxu1  ;;  %v14542_v6 = vadd.f32 %v7288_v0, %v7276_v62  ;;  %v13049_v62 = vld [vmem:[#allocation7 + $0x1ac] sm:$0xf0] }
 0x477   :  { %v12655_v37 = vld [vmem:[#allocation7 + $0xf68] sm:$0xf0]  ;;  %v11157_v0 = vld [vmem:[#allocation7 + $0x390] sm:$0xf] }
 0x478   :  { %v13284_v10 = vld [vmem:[#allocation7 + $0x90c] sm:$0xf]  ;;  %v12658_v12 = vor.u32 %v13484_v7, %v12655_v37  ;;  %7528 = vmatpush.bf16.msrb.mxu2 %v12402_v8  ;;  %v11669_v5 = vld [vmem:[#allocation7 + $0x790] sm:$0xf] }
 0x479   :  { %v11855_v40 = vld [vmem:[#allocation7 + $0x928] sm:$0xf0] }
 0x47a   :  { %v13348_v11 = vld [vmem:[#allocation7 + $0xb0c] sm:$0xf]  ;;  %v11858_v19 = vor.u32 %v13284_v10, %v11855_v40  ;;  %7541 = vmatpush.bf16.msrb.mxu3 %v12658_v12 }
 0x47b   :  { %v12111_v43 = vld [vmem:[#allocation7 + $0xb28] sm:$0xf0] }
 0x47c   :  { %v13412_v9 = vld [vmem:[#allocation7 + $0xd0c] sm:$0xf]  ;;  %v12114_v21 = vor.u32 %v13348_v11, %v12111_v43  ;;  %7503 = vmatpush.bf16.msrb.mxu0 %v11858_v19 }
 0x47d   :  { %v12367_v16 = vld [vmem:[#allocation7 + $0xd28] sm:$0xf0] }
 0x47e   :  { %v13476_v17 = vld [vmem:[#allocation7 + $0xf0c] sm:$0xf]  ;;  %v12370_v22 = vor.u32 %v13412_v9, %v12367_v16  ;;  %7516 = vmatpush.bf16.msrb.mxu1 %v12114_v21 }
 0x47f   :  { %v12623_v15 = vld [vmem:[#allocation7 + $0xf28] sm:$0xf0] }
 0x480   :  { %v13276_v26 = vld [vmem:[#allocation7 + $0x8cc] sm:$0xf]  ;;  %v12626_v31 = vor.u32 %v13476_v17, %v12623_v15  ;;  %7529 = vmatpush.bf16.msrb.mxu2 %v12370_v22 }
 0x481   :  { %v11823_v23 = vld [vmem:[#allocation7 + $0x8e8] sm:$0xf0] }
 0x482   :  { %v13340_v24 = vld [vmem:[#allocation7 + $0xacc] sm:$0xf]  ;;  %v11826_v30 = vor.u32 %v13276_v26, %v11823_v23  ;;  %7542 = vmatpush.bf16.msrb.mxu3 %v12626_v31  ;;  %v7277_v31 = vpop.f32.mrf.mxu2 }
 0x483   :  { %v12079_v36 = vld [vmem:[#allocation7 + $0xae8] sm:$0xf0]  ;;  %v7301_v31 = vpop.f32.mrf.mxu0 }
 0x484   :  { %v13404_v35 = vld [vmem:[#allocation7 + $0xccc] sm:$0xf]  ;;  %v12082_v33 = vor.u32 %v13340_v24, %v12079_v36  ;;  %7504 = vmatpush.bf16.msrb.mxu0 %v11826_v30  ;;  %v13057_v36 = vld [vmem:[#allocation7 + $0x1ec] sm:$0xf0] }
 0x485   :  { %v12335_v52 = vld [vmem:[#allocation7 + $0xce8] sm:$0xf0]  ;;  %v11445_v30 = vld [vmem:[#allocation7 + $0x5d0] sm:$0xf]  ;;  %v10934_v55 = vor.u32 %v13057_v36, %v10933_v25 }
 0x486   :  { %v13468_v28 = vld [vmem:[#allocation7 + $0xecc] sm:$0xf]  ;;  %v12338_v41 = vor.u32 %v13404_v35, %v12335_v52  ;;  %7517 = vmatpush.bf16.msrb.mxu1 %v12082_v33  ;;  %v11189_v35 = vld [vmem:[#allocation7 + $0x3d0] sm:$0xf]  ;;  %v7290_v52 = vpop.f32.mrf.mxu3 }
 0x487   :  { %v12591_v29 = vld [vmem:[#allocation7 + $0xee8] sm:$0xf0]  ;;  %v13185_v33 = vld [vmem:[#allocation7 + $0x5ec] sm:$0xf0] }
 0x488   :  { %v13268_v47 = vld [vmem:[#allocation7 + $0x88c] sm:$0xf]  ;;  %v12594_v54 = vor.u32 %v13468_v28, %v12591_v29  ;;  %7530 = vmatpush.bf16.msrb.mxu2 %v12338_v41  ;;  %v13121_v29 = vld [vmem:[#allocation7 + $0x3ec] sm:$0xf0] }
 0x489   :  { %v11791_v49 = vld [vmem:[#allocation7 + $0x8a8] sm:$0xf0]  ;;  %v11605_v25 = vld [vmem:[#allocation7 + $0x710] sm:$0xf] }
 0x48a   :  { %v13332_v48 = vld [vmem:[#allocation7 + $0xa8c] sm:$0xf]  ;;  %v11794_v34 = vor.u32 %v13268_v47, %v11791_v49  ;;  %7543 = vmatpush.bf16.msrb.mxu3 %v12594_v54  ;;  %v11701_v49 = vld [vmem:[#allocation7 + $0x7d0] sm:$0xf] }
 0x48b   :  { %v12047_v58 = vld [vmem:[#allocation7 + $0xaa8] sm:$0xf0]  ;;  %v13225_v36 = vld [vmem:[#allocation7 + $0x72c] sm:$0xf0] }
 0x48c   :  { %v13396_v59 = vld [vmem:[#allocation7 + $0xc8c] sm:$0xf]  ;;  %v12050_v7 = vor.u32 %v13332_v48, %v12047_v58  ;;  %7505 = vmatpush.bf16.msrb.mxu0 %v11794_v34  ;;  %v13249_v48 = vld [vmem:[#allocation7 + $0x7ec] sm:$0xf0]  ;;  %v11190_v58 = vor.u32 %v13121_v29, %v11189_v35  ;;  %v7302_v35 = vadd.f32 %v7301_v31, %v14542_v6 }
 0x48d   :  { %v12303_v60 = vld [vmem:[#allocation7 + $0xca8] sm:$0xf0]  ;;  %v13177_v34 = vld [vmem:[#allocation7 + $0x5ac] sm:$0xf0] }
 0x48e   :  { %v13460_v2 = vld [vmem:[#allocation7 + $0xe8c] sm:$0xf]  ;;  %v12306_v37 = vor.u32 %v13396_v59, %v12303_v60  ;;  %7518 = vmatpush.bf16.msrb.mxu1 %v12050_v7  ;;  %v11446_v59 = vor.u32 %v13185_v33, %v11445_v30  ;;  %v10901_v60 = vld [vmem:[#allocation7 + $0x190] sm:$0xf] }
 0x48f   :  { %v12559_v3 = vld [vmem:[#allocation7 + $0xea8] sm:$0xf0]  ;;  %v13241_v7 = vld [vmem:[#allocation7 + $0x7ac] sm:$0xf0] }
 0x490   :  { %v13260_v38 = vld [vmem:[#allocation7 + $0x84c] sm:$0xf]  ;;  %v12562_v10 = vor.u32 %v13460_v2, %v12559_v3  ;;  %7531 = vmatpush.bf16.msrb.mxu2 %v12306_v37  ;;  %v11702_v2 = vor.u32 %v13249_v48, %v11701_v49  ;;  %v13113_v3 = vld [vmem:[#allocation7 + $0x3ac] sm:$0xf0]  ;;  %v10902_v37 = vor.u32 %v13049_v62, %v10901_v60  ;;  %v11606_v49 = vor.u32 %v13225_v36, %v11605_v25 }
 0x491   :  { %v11759_v63 = vld [vmem:[#allocation7 + $0x868] sm:$0xf0]  ;;  %v10805_v33 = vld [vmem:[#allocation7 + $0xd0] sm:$0xf] }
 0x492   :  { %v13324_v8 = vld [vmem:[#allocation7 + $0xa4c] sm:$0xf]  ;;  %v11762_v16 = vor.u32 %v13260_v38, %v11759_v63  ;;  %7544 = vmatpush.bf16.msrb.mxu3 %v12562_v10  ;;  %v11158_v38 = vor.u32 %v13113_v3, %v11157_v0  ;;  %v11414_v63 = vor.u32 %v13177_v34, %v11413_v4  ;;  %v13041_v10 = vld [vmem:[#allocation7 + $0x16c] sm:$0xf0] }
 0x493   :  { %v12015_v40 = vld [vmem:[#allocation7 + $0xa68] sm:$0xf0]  ;;  %v13217_v60 = vld [vmem:[#allocation7 + $0x6ec] sm:$0xf0] }
 0x494   :  { %v13388_v11 = vld [vmem:[#allocation7 + $0xc4c] sm:$0xf]  ;;  %v12018_v15 = vor.u32 %v13324_v8, %v12015_v40  ;;  %7506 = vmatpush.bf16.msrb.mxu0 %v11762_v16  ;;  %v10869_v8 = vld [vmem:[#allocation7 + $0x150] sm:$0xf] }
 0x495   :  { %v12271_v12 = vld [vmem:[#allocation7 + $0xc68] sm:$0xf0]  ;;  %v11125_v40 = vld [vmem:[#allocation7 + $0x350] sm:$0xf] }
 0x496   :  { %v13452_v43 = vld [vmem:[#allocation7 + $0xe4c] sm:$0xf]  ;;  %v12274_v18 = vor.u32 %v13388_v11, %v12271_v12  ;;  %7519 = vmatpush.bf16.msrb.mxu1 %v12018_v15  ;;  %v11670_v11 = vor.u32 %v13241_v7, %v11669_v5  ;;  %v13105_v12 = vld [vmem:[#allocation7 + $0x36c] sm:$0xf0]  ;;  %v7327_v5 = vpop.f32.mrf.mxu2 }
 0x497   :  { %v12527_v9 = vld [vmem:[#allocation7 + $0xe68] sm:$0xf0]  ;;  %v11637_v16 = vld [vmem:[#allocation7 + $0x750] sm:$0xf]  ;;  %v11126_v15 = vor.u32 %v13105_v12, %v11125_v40 }
 0x498   :  { %v13252_v13 = vld [vmem:[#allocation7 + $0x80c] sm:$0xf]  ;;  %v12530_v22 = vor.u32 %v13452_v43, %v12527_v9  ;;  %7532 = vmatpush.bf16.msrb.mxu2 %v12274_v18  ;;  %v11381_v43 = vld [vmem:[#allocation7 + $0x550] sm:$0xf] }
 0x499   :  { %v11727_v17 = vld [vmem:[#allocation7 + $0x828] sm:$0xf0]  ;;  %v13169_v9 = vld [vmem:[#allocation7 + $0x56c] sm:$0xf0] }
 0x49a   :  { %v13316_v19 = vld [vmem:[#allocation7 + $0xa0c] sm:$0xf]  ;;  %v11730_v28 = vor.u32 %v13252_v13, %v11727_v17  ;;  %7545 = vmatpush.bf16.msrb.mxu3 %v12530_v22  ;;  %v13233_v13 = vld [vmem:[#allocation7 + $0x76c] sm:$0xf0]  ;;  %v10870_v17 = vor.u32 %v13041_v10, %v10869_v8  ;;  %v11382_v18 = vor.u32 %v13169_v9, %v11381_v43  ;;  %v7340_v8 = vpop.f32.mrf.mxu3 }
 0x49b   :  { %v11983_v20 = vld [vmem:[#allocation7 + $0xa28] sm:$0xf0]  ;;  %v11638_v22 = vor.u32 %v13233_v13, %v11637_v16  ;;  %v13017_v3 = vld [vmem:[#allocation7 + $0xac] sm:$0xf0] }
 0x49c   :  { %v13380_v21 = vld [vmem:[#allocation7 + $0xc0c] sm:$0xf]  ;;  %v11986_v41 = vor.u32 %v13316_v19, %v11983_v20  ;;  %7507 = vmatpush.bf16.msrb.mxu0 %v11730_v28  ;;  %v10837_v19 = vld [vmem:[#allocation7 + $0x110] sm:$0xf]  ;;  %v7314_v28 = vpop.f32.mrf.mxu1 }
 0x49d   :  { %v12239_v26 = vld [vmem:[#allocation7 + $0xc28] sm:$0xf0]  ;;  %v13033_v20 = vld [vmem:[#allocation7 + $0x12c] sm:$0xf0]  ;;  %v7315_v48 = vadd.f32 %v7314_v28, %v7302_v35 }
 0x49e   :  { %v13444_v23 = vld [vmem:[#allocation7 + $0xe0c] sm:$0xf]  ;;  %v12242_v47 = vor.u32 %v13380_v21, %v12239_v26  ;;  %7520 = vmatpush.bf16.msrb.mxu1 %v11986_v41  ;;  %v11093_v21 = vld [vmem:[#allocation7 + $0x310] sm:$0xf]  ;;  %v10838_v52 = vor.u32 %v13033_v20, %v10837_v19 }
 0x49f   :  { %v12495_v24 = vld [vmem:[#allocation7 + $0xe28] sm:$0xf0]  ;;  %7508 = vmatmul.bf16.vlgmr.msrb.gmra.mxu0 %v14495_v39  ;;  %v13097_v26 = vld [vmem:[#allocation7 + $0x32c] sm:$0xf0] }
 0x4a0   :  { %v12498_v54 = vor.u32 %v13444_v23, %v12495_v24  ;;  %7533 = vmatpush.bf16.msrb.mxu2 %v12242_v47  ;;  %7552 = vmatpush.bf16.msra.mxu0 %v10934_v55  ;;  %v11349_v23 = vld [vmem:[#allocation7 + $0x510] sm:$0xf]  ;;  %v11094_v29 = vor.u32 %v13097_v26, %v11093_v21 }
 0x4a1   :  { %7521 = vmatmul.bf16.vlgmr.msrb.gmra.mxu1 %v14499_v53  ;;  %v13161_v24 = vld [vmem:[#allocation7 + $0x52c] sm:$0xf0] }
 0x4a2   :  { %7546 = vmatpush.bf16.msrb.mxu3 %v12498_v54  ;;  %7565 = vmatpush.bf16.msra.mxu1 %v11190_v58  ;;  %v11350_v30 = vor.u32 %v13161_v24, %v11349_v23  ;;  %v13025_v41 = vld [vmem:[#allocation7 + $0xec] sm:$0xf0] }
 0x4a3   :  { %7534 = vmatmul.bf16.vlgmr.msrb.gmra.mxu2 %v14497_v50  ;;  %v11061_v47 = vld [vmem:[#allocation7 + $0x2d0] sm:$0xf]  ;;  %v10806_v62 = vor.u32 %v13025_v41, %v10805_v33 }
 0x4a4   :  { %7578 = vmatpush.bf16.msra.mxu2 %v11446_v59  ;;  %7553 = vmatpush.bf16.msra.mxu0 %v10902_v37  ;;  %v13089_v54 = vld [vmem:[#allocation7 + $0x2ec] sm:$0xf0]  ;;  %v7316_v43 = vpop.f32.mrf.mxu1 }
 0x4a5   :  { %7547 = vmatmul.bf16.vlgmr.msrb.gmra.mxu3 %v14501_v56  ;;  %v11317_v55 = vld [vmem:[#allocation7 + $0x4d0] sm:$0xf]  ;;  %v11062_v6 = vor.u32 %v13089_v54, %v11061_v47 }
 0x4a6   :  { %7591 = vmatpush.bf16.msra.mxu3 %v11702_v2  ;;  %7566 = vmatpush.bf16.msra.mxu1 %v11158_v38  ;;  %v13153_v58 = vld [vmem:[#allocation7 + $0x4ec] sm:$0xf0] }
 0x4a7   :  { %v11573_v59 = vld [vmem:[#allocation7 + $0x6d0] sm:$0xf]  ;;  %v11318_v0 = vor.u32 %v13153_v58, %v11317_v55  ;;  %v7342_v58 = vpop.f32.mrf.mxu3 }
 0x4a8   :  { %7579 = vmatpush.bf16.msra.mxu2 %v11414_v63  ;;  %7554 = vmatpush.bf16.msra.mxu0 %v10870_v17  ;;  %v10773_v2 = vld [vmem:[#allocation7 + $0x90] sm:$0xf]  ;;  %v11574_v34 = vor.u32 %v13217_v60, %v11573_v59  ;;  %v7328_v63 = vadd.f32 %v7327_v5, %v7315_v48 }
 0x4a9   :  { %v11029_v4 = vld [vmem:[#allocation7 + $0x290] sm:$0xf]  ;;  %v10774_v12 = vor.u32 %v13017_v3, %v10773_v2 }
 0x4aa   :  { %7592 = vmatpush.bf16.msra.mxu3 %v11670_v11  ;;  %7567 = vmatpush.bf16.msra.mxu1 %v11126_v15  ;;  %v13081_v7 = vld [vmem:[#allocation7 + $0x2ac] sm:$0xf0]  ;;  %v7303_v11 = vpop.f32.mrf.mxu0  ;;  %v14549_v9 = vadd.f32 %v7340_v8, %v7328_v63 }
 0x4ab   :  { %v11285_v37 = vld [vmem:[#allocation7 + $0x490] sm:$0xf]  ;;  %v11030_v16 = vor.u32 %v13081_v7, %v11029_v4 }
 0x4ac   :  { %7580 = vmatpush.bf16.msra.mxu2 %v11382_v18  ;;  %7555 = vmatpush.bf16.msra.mxu0 %v10838_v52  ;;  %v13145_v38 = vld [vmem:[#allocation7 + $0x4ac] sm:$0xf0] }
 0x4ad   :  { %v11541_v10 = vld [vmem:[#allocation7 + $0x690] sm:$0xf]  ;;  %v11286_v13 = vor.u32 %v13145_v38, %v11285_v37 }
 0x4ae   :  { %7593 = vmatpush.bf16.msra.mxu3 %v11638_v22  ;;  %7568 = vmatpush.bf16.msra.mxu1 %v11094_v29  ;;  %v13209_v40 = vld [vmem:[#allocation7 + $0x6ac] sm:$0xf0] }
 0x4af   :  { %v10741_v17 = vld [vmem:[#allocation7 + $0x50] sm:$0xf]  ;;  %v11542_v19 = vor.u32 %v13209_v40, %v11541_v10 }
 0x4b0   :  { %7581 = vmatpush.bf16.msra.mxu2 %v11350_v30  ;;  %7556 = vmatpush.bf16.msra.mxu0 %v10806_v62  ;;  %v13009_v15 = vld [vmem:[#allocation7 + $0x6c] sm:$0xf0] }
 0x4b1   :  { %v10997_v18 = vld [vmem:[#allocation7 + $0x250] sm:$0xf]  ;;  %v10742_v24 = vor.u32 %v13009_v15, %v10741_v17 }
 0x4b2   :  { %7594 = vmatpush.bf16.msra.mxu3 %v11606_v49  ;;  %7569 = vmatpush.bf16.msra.mxu1 %v11062_v6  ;;  %v13073_v20 = vld [vmem:[#allocation7 + $0x26c] sm:$0xf0]  ;;  %v7329_v49 = vpop.f32.mrf.mxu2 }
 0x4b3   :  { %v11253_v21 = vld [vmem:[#allocation7 + $0x450] sm:$0xf]  ;;  %v10998_v36 = vor.u32 %v13073_v20, %v10997_v18  ;;  %v7353_v49 = vpop.f32.mrf.mxu0 }
 0x4b4   :  { %7582 = vmatpush.bf16.msra.mxu2 %v11318_v0  ;;  %v13137_v22 = vld [vmem:[#allocation7 + $0x46c] sm:$0xf0]  ;;  %7557 = vmatpush.bf16.msra.mxu0 %v10774_v12 }
 0x4b5   :  { %v11509_v26 = vld [vmem:[#allocation7 + $0x650] sm:$0xf]  ;;  %v11254_v35 = vor.u32 %v13137_v22, %v11253_v21 }
 0x4b6   :  { %7595 = vmatpush.bf16.msra.mxu3 %v11574_v34  ;;  %v13201_v23 = vld [vmem:[#allocation7 + $0x66c] sm:$0xf0]  ;;  %7570 = vmatpush.bf16.msra.mxu1 %v11030_v16 }
 0x4b7   :  { %v10709_v31 = vld [vmem:[#allocation7 + $0x10] sm:$0xf]  ;;  %v11510_v30 = vor.u32 %v13201_v23, %v11509_v26 }
 0x4b8   :  { %v13001_v25 = vld [vmem:[#allocation7 + $0x2c] sm:$0xf0]  ;;  %7583 = vmatpush.bf16.msra.mxu2 %v11286_v13  ;;  %7558 = vmatpush.bf16.msra.mxu0 %v10742_v24 }
 0x4b9   :  { %v10965_v52 = vld [vmem:[#allocation7 + $0x210] sm:$0xf]  ;;  %v10710_v59 = vor.u32 %v13001_v25, %v10709_v31 }
 0x4ba   :  { %v13065_v28 = vld [vmem:[#allocation7 + $0x22c] sm:$0xf0]  ;;  %7596 = vmatpush.bf16.msra.mxu3 %v11542_v19  ;;  %7571 = vmatpush.bf16.msra.mxu1 %v10998_v36 }
 0x4bb   :  { %v11221_v29 = vld [vmem:[#allocation7 + $0x410] sm:$0xf]  ;;  %v10966_v0 = vor.u32 %v13065_v28, %v10965_v52 }
 0x4bc   :  { %v13129_v33 = vld [vmem:[#allocation7 + $0x42c] sm:$0xf0]  ;;  %7584 = vmatpush.bf16.msra.mxu2 %v11254_v35  ;;  %7559 = vmatpush.bf16.msra.mxu0 %v10710_v59  ;;  %v7366_v59 = vpop.f32.mrf.mxu1 }
 0x4bd   :  { %v11477_v41 = vld [vmem:[#allocation7 + $0x610] sm:$0xf]  ;;  %v11222_v2 = vor.u32 %v13129_v33, %v11221_v29 }
 0x4be   :  { %v13193_v47 = vld [vmem:[#allocation7 + $0x62c] sm:$0xf0]  ;;  %7597 = vmatpush.bf16.msra.mxu3 %v11510_v30  ;;  %7572 = vmatpush.bf16.msra.mxu1 %v10966_v0 }
 0x4bf   :  { %v11957_v48 = vld [vmem:[#allocation7 + $0x9d0] sm:$0xf]  ;;  %v11478_v34 = vor.u32 %v13193_v47, %v11477_v41  ;;  %7560 = vmatmul.bf16.vlgmr.msra.gmra.mxu0 %v14481_v27 }
 0x4c0   :  { %v13313_v54 = vld [vmem:[#allocation7 + $0x9ec] sm:$0xf0]  ;;  %7585 = vmatpush.bf16.msra.mxu2 %v11222_v2 }
 0x4c1   :  { %v12213_v55 = vld [vmem:[#allocation7 + $0xbd0] sm:$0xf]  ;;  %v11958_v5 = vor.u32 %v13313_v54, %v11957_v48  ;;  %7573 = vmatmul.bf16.vlgmr.msra.gmra.mxu1 %v14485_v46 }
 0x4c2   :  { %v13377_v60 = vld [vmem:[#allocation7 + $0xbec] sm:$0xf0]  ;;  %7598 = vmatpush.bf16.msra.mxu3 %v11478_v34 }
 0x4c3   :  { %v12469_v62 = vld [vmem:[#allocation7 + $0xdd0] sm:$0xf]  ;;  %v12214_v7 = vor.u32 %v13377_v60, %v12213_v55  ;;  %7604 = vmatpush.bf16.msrb.mxu0 %v11958_v5  ;;  %7586 = vmatmul.bf16.vlgmr.msra.gmra.mxu2 %v14483_v61  ;;  %v7354_v55 = vadd.f32 %v7353_v49, %v14440_v32 }
 0x4c4   :  { %v13441_v6 = vld [vmem:[#allocation7 + $0xdec] sm:$0xf0] }
 0x4c5   :  { %v12725_v3 = vld [vmem:[#allocation7 + $0xfd0] sm:$0xf]  ;;  %v12470_v37 = vor.u32 %v13441_v6, %v12469_v62  ;;  %7617 = vmatpush.bf16.msrb.mxu1 %v12214_v7  ;;  %7599 = vmatmul.bf16.vlgmr.msra.gmra.mxu3 %v14487_v45 }
 0x4c6   :  { %v13505_v4 = vld [vmem:[#allocation7 + $0xfec] sm:$0xf0] }
 0x4c7   :  { %v11925_v38 = vld [vmem:[#allocation7 + $0x990] sm:$0xf]  ;;  %v12726_v10 = vor.u32 %v13505_v4, %v12725_v3  ;;  %7630 = vmatpush.bf16.msrb.mxu2 %v12470_v37  ;;  %v7367_v4 = vadd.f32 %v7366_v59, %v7354_v55 }
 0x4c8   :  { %v13305_v63 = vld [vmem:[#allocation7 + $0x9ac] sm:$0xf0] }
 0x4c9   :  { %v12181_v8 = vld [vmem:[#allocation7 + $0xb90] sm:$0xf]  ;;  %v11926_v13 = vor.u32 %v13305_v63, %v11925_v38  ;;  %7643 = vmatpush.bf16.msrb.mxu3 %v12726_v10 }
 0x4ca   :  { %v13369_v40 = vld [vmem:[#allocation7 + $0xbac] sm:$0xf0] }
 0x4cb   :  { %v12437_v11 = vld [vmem:[#allocation7 + $0xd90] sm:$0xf]  ;;  %v12182_v17 = vor.u32 %v13369_v40, %v12181_v8  ;;  %7605 = vmatpush.bf16.msrb.mxu0 %v11926_v13 }
 0x4cc   :  { %v13433_v12 = vld [vmem:[#allocation7 + $0xdac] sm:$0xf0] }
 0x4cd   :  { %v12693_v43 = vld [vmem:[#allocation7 + $0xf90] sm:$0xf]  ;;  %v12438_v15 = vor.u32 %v13433_v12, %v12437_v11  ;;  %7618 = vmatpush.bf16.msrb.mxu1 %v12182_v17 }
 0x4ce   :  { %v13497_v16 = vld [vmem:[#allocation7 + $0xfac] sm:$0xf0] }
 0x4cf   :  { %v11893_v18 = vld [vmem:[#allocation7 + $0x950] sm:$0xf]  ;;  %v12694_v21 = vor.u32 %v13497_v16, %v12693_v43  ;;  %7631 = vmatpush.bf16.msrb.mxu2 %v12438_v15  ;;  %v7379_v43 = vpop.f32.mrf.mxu2 }
 0x4d0   :  { %v13297_v19 = vld [vmem:[#allocation7 + $0x96c] sm:$0xf0]  ;;  %v7380_v15 = vadd.f32 %v7379_v43, %v7367_v4  ;;  %v13053_v4 = vld [vmem:[#allocation7 + $0x1d4] sm:$0xf] }
 0x4d1   :  { %v12149_v20 = vld [vmem:[#allocation7 + $0xb50] sm:$0xf]  ;;  %v11894_v25 = vor.u32 %v13297_v19, %v11893_v18  ;;  %7644 = vmatpush.bf16.msrb.mxu3 %v12694_v21  ;;  %v7392_v18 = vpop.f32.mrf.mxu3  ;;  %v7355_v21 = vpop.f32.mrf.mxu0 }
 0x4d2   :  { %v13361_v22 = vld [vmem:[#allocation7 + $0xb6c] sm:$0xf0]  ;;  %v13173_v21 = vld [vmem:[#allocation7 + $0x594] sm:$0xf] }
 0x4d3   :  { %v12405_v26 = vld [vmem:[#allocation7 + $0xd50] sm:$0xf]  ;;  %v12150_v36 = vor.u32 %v13361_v22, %v12149_v20  ;;  %7606 = vmatpush.bf16.msrb.mxu0 %v11894_v25 }
 0x4d4   :  { %v13425_v23 = vld [vmem:[#allocation7 + $0xd6c] sm:$0xf0] }
 0x4d5   :  { %v12661_v24 = vld [vmem:[#allocation7 + $0xf50] sm:$0xf]  ;;  %v12406_v35 = vor.u32 %v13425_v23, %v12405_v26  ;;  %7619 = vmatpush.bf16.msrb.mxu1 %v12150_v36  ;;  %v7368_v26 = vpop.f32.mrf.mxu1  ;;  %v14556_v23 = vadd.f32 %v7392_v18, %v7380_v15  ;;  %v10903_v15 = vld [vmem:[#allocation7 + $0x1b0] sm:$0xf0] }
 0x4d6   :  { %v13489_v31 = vld [vmem:[#allocation7 + $0xf6c] sm:$0xf0]  ;;  %v13109_v18 = vld [vmem:[#allocation7 + $0x394] sm:$0xf] }
 0x4d7   :  { %v11861_v52 = vld [vmem:[#allocation7 + $0x910] sm:$0xf]  ;;  %v12662_v30 = vor.u32 %v13489_v31, %v12661_v24  ;;  %7632 = vmatpush.bf16.msrb.mxu2 %v12406_v35  ;;  %v13237_v26 = vld [vmem:[#allocation7 + $0x794] sm:$0xf] }
 0x4d8   :  { %v13289_v28 = vld [vmem:[#allocation7 + $0x92c] sm:$0xf0] }
 0x4d9   :  { %v12117_v29 = vld [vmem:[#allocation7 + $0xb10] sm:$0xf]  ;;  %v11862_v58 = vor.u32 %v13289_v28, %v11861_v52  ;;  %7645 = vmatpush.bf16.msrb.mxu3 %v12662_v30 }
 0x4da   :  { %v13353_v33 = vld [vmem:[#allocation7 + $0xb2c] sm:$0xf0] }
 0x4db   :  { %v12373_v41 = vld [vmem:[#allocation7 + $0xd10] sm:$0xf]  ;;  %v12118_v60 = vor.u32 %v13353_v33, %v12117_v29  ;;  %7607 = vmatpush.bf16.msrb.mxu0 %v11862_v58 }
 0x4dc   :  { %v13417_v47 = vld [vmem:[#allocation7 + $0xd2c] sm:$0xf0] }
 0x4dd   :  { %v12629_v48 = vld [vmem:[#allocation7 + $0xf10] sm:$0xf]  ;;  %v12374_v62 = vor.u32 %v13417_v47, %v12373_v41  ;;  %7620 = vmatpush.bf16.msrb.mxu1 %v12118_v60 }
 0x4de   :  { %v13481_v54 = vld [vmem:[#allocation7 + $0xf2c] sm:$0xf0] }
 0x4df   :  { %v11829_v6 = vld [vmem:[#allocation7 + $0x8d0] sm:$0xf]  ;;  %v12630_v3 = vor.u32 %v13481_v54, %v12629_v48  ;;  %7633 = vmatpush.bf16.msrb.mxu2 %v12374_v62 }
 0x4e0   :  { %v13281_v0 = vld [vmem:[#allocation7 + $0x8ec] sm:$0xf0] }
 0x4e1   :  { %v12085_v2 = vld [vmem:[#allocation7 + $0xad0] sm:$0xf]  ;;  %v11830_v63 = vor.u32 %v13281_v0, %v11829_v6  ;;  %7646 = vmatpush.bf16.msrb.mxu3 %v12630_v3  ;;  %v7381_v3 = vpop.f32.mrf.mxu2 }
 0x4e2   :  { %v13345_v34 = vld [vmem:[#allocation7 + $0xaec] sm:$0xf0]  ;;  %v7405_v3 = vpop.f32.mrf.mxu0 }
 0x4e3   :  { %v12341_v5 = vld [vmem:[#allocation7 + $0xcd0] sm:$0xf]  ;;  %v12086_v32 = vor.u32 %v13345_v34, %v12085_v2  ;;  %7608 = vmatpush.bf16.msrb.mxu0 %v11830_v63  ;;  %v10935_v34 = vld [vmem:[#allocation7 + $0x1f0] sm:$0xf0] }
 0x4e4   :  { %v13409_v7 = vld [vmem:[#allocation7 + $0xcec] sm:$0xf0]  ;;  %v13181_v63 = vld [vmem:[#allocation7 + $0x5d4] sm:$0xf]  ;;  %v10938_v43 = vor.u32 %v13053_v4, %v10935_v34 }
 0x4e5   :  { %v12597_v37 = vld [vmem:[#allocation7 + $0xed0] sm:$0xf]  ;;  %v12342_v8 = vor.u32 %v13409_v7, %v12341_v5  ;;  %7621 = vmatpush.bf16.msrb.mxu1 %v12086_v32  ;;  %v13117_v5 = vld [vmem:[#allocation7 + $0x3d4] sm:$0xf]  ;;  %v7394_v7 = vpop.f32.mrf.mxu3 }
 0x4e6   :  { %v13473_v38 = vld [vmem:[#allocation7 + $0xeec] sm:$0xf0]  ;;  %v11447_v32 = vld [vmem:[#allocation7 + $0x5f0] sm:$0xf0] }
 0x4e7   :  { %v11797_v10 = vld [vmem:[#allocation7 + $0x890] sm:$0xf]  ;;  %v12598_v12 = vor.u32 %v13473_v38, %v12597_v37  ;;  %7634 = vmatpush.bf16.msrb.mxu2 %v12342_v8  ;;  %v11191_v38 = vld [vmem:[#allocation7 + $0x3f0] sm:$0xf0] }
 0x4e8   :  { %v13273_v40 = vld [vmem:[#allocation7 + $0x8ac] sm:$0xf0]  ;;  %v13221_v4 = vld [vmem:[#allocation7 + $0x714] sm:$0xf] }
 0x4e9   :  { %v12053_v11 = vld [vmem:[#allocation7 + $0xa90] sm:$0xf]  ;;  %v11798_v22 = vor.u32 %v13273_v40, %v11797_v10  ;;  %7647 = vmatpush.bf16.msrb.mxu3 %v12598_v12  ;;  %v13245_v40 = vld [vmem:[#allocation7 + $0x7d4] sm:$0xf] }
 0x4ea   :  { %v13337_v16 = vld [vmem:[#allocation7 + $0xaac] sm:$0xf0]  ;;  %v11607_v34 = vld [vmem:[#allocation7 + $0x730] sm:$0xf0] }
 0x4eb   :  { %v12309_v13 = vld [vmem:[#allocation7 + $0xc90] sm:$0xf]  ;;  %v12054_v24 = vor.u32 %v13337_v16, %v12053_v11  ;;  %7609 = vmatpush.bf16.msrb.mxu0 %v11798_v22  ;;  %v11703_v11 = vld [vmem:[#allocation7 + $0x7f0] sm:$0xf0]  ;;  %v11194_v16 = vor.u32 %v13117_v5, %v11191_v38  ;;  %v7406_v5 = vadd.f32 %v7405_v3, %v14556_v23 }
 0x4ec   :  { %v13401_v17 = vld [vmem:[#allocation7 + $0xcac] sm:$0xf0]  ;;  %v11415_v22 = vld [vmem:[#allocation7 + $0x5b0] sm:$0xf0] }
 0x4ed   :  { %v12565_v19 = vld [vmem:[#allocation7 + $0xe90] sm:$0xf]  ;;  %v12310_v31 = vor.u32 %v13401_v17, %v12309_v13  ;;  %7622 = vmatpush.bf16.msrb.mxu1 %v12054_v24  ;;  %v11450_v13 = vor.u32 %v13181_v63, %v11447_v32  ;;  %v13045_v17 = vld [vmem:[#allocation7 + $0x194] sm:$0xf] }
 0x4ee   :  { %v13465_v20 = vld [vmem:[#allocation7 + $0xeac] sm:$0xf0]  ;;  %v11671_v24 = vld [vmem:[#allocation7 + $0x7b0] sm:$0xf0] }
 0x4ef   :  { %v11765_v25 = vld [vmem:[#allocation7 + $0x850] sm:$0xf]  ;;  %v12566_v52 = vor.u32 %v13465_v20, %v12565_v19  ;;  %7635 = vmatpush.bf16.msrb.mxu2 %v12310_v31  ;;  %v11706_v19 = vor.u32 %v13245_v40, %v11703_v11  ;;  %v11159_v20 = vld [vmem:[#allocation7 + $0x3b0] sm:$0xf0]  ;;  %v10906_v31 = vor.u32 %v13045_v17, %v10903_v15  ;;  %v11610_v40 = vor.u32 %v13221_v4, %v11607_v34 }
 0x4f0   :  { %v13265_v36 = vld [vmem:[#allocation7 + $0x86c] sm:$0xf0]  ;;  %v13021_v32 = vld [vmem:[#allocation7 + $0xd4] sm:$0xf] }
 0x4f1   :  { %v12021_v35 = vld [vmem:[#allocation7 + $0xa50] sm:$0xf]  ;;  %v11766_v47 = vor.u32 %v13265_v36, %v11765_v25  ;;  %7648 = vmatpush.bf16.msrb.mxu3 %v12566_v52  ;;  %v11162_v25 = vor.u32 %v13109_v18, %v11159_v20  ;;  %v11418_v36 = vor.u32 %v13173_v21, %v11415_v22  ;;  %v10871_v52 = vld [vmem:[#allocation7 + $0x170] sm:$0xf0] }
 0x4f2   :  { %v13329_v28 = vld [vmem:[#allocation7 + $0xa6c] sm:$0xf0]  ;;  %v11575_v17 = vld [vmem:[#allocation7 + $0x6f0] sm:$0xf0] }
 0x4f3   :  { %v12277_v29 = vld [vmem:[#allocation7 + $0xc50] sm:$0xf]  ;;  %v12022_v54 = vor.u32 %v13329_v28, %v12021_v35  ;;  %7610 = vmatpush.bf16.msrb.mxu0 %v11766_v47  ;;  %v13037_v35 = vld [vmem:[#allocation7 + $0x154] sm:$0xf] }
 0x4f4   :  { %v13393_v30 = vld [vmem:[#allocation7 + $0xc6c] sm:$0xf0]  ;;  %v13101_v28 = vld [vmem:[#allocation7 + $0x354] sm:$0xf] }
 0x4f5   :  { %v12533_v33 = vld [vmem:[#allocation7 + $0xe50] sm:$0xf]  ;;  %v12278_v55 = vor.u32 %v13393_v30, %v12277_v29  ;;  %7623 = vmatpush.bf16.msrb.mxu1 %v12022_v54  ;;  %v11674_v29 = vor.u32 %v13237_v26, %v11671_v24  ;;  %v11127_v30 = vld [vmem:[#allocation7 + $0x370] sm:$0xf0]  ;;  %v7431_v26 = vpop.f32.mrf.mxu2 }
 0x4f6   :  { %v13457_v41 = vld [vmem:[#allocation7 + $0xe6c] sm:$0xf0]  ;;  %v13229_v47 = vld [vmem:[#allocation7 + $0x754] sm:$0xf]  ;;  %v11130_v54 = vor.u32 %v13101_v28, %v11127_v30 }
 0x4f7   :  { %v11733_v49 = vld [vmem:[#allocation7 + $0x810] sm:$0xf]  ;;  %v12534_v62 = vor.u32 %v13457_v41, %v12533_v33  ;;  %7636 = vmatpush.bf16.msrb.mxu2 %v12278_v55  ;;  %v13165_v33 = vld [vmem:[#allocation7 + $0x554] sm:$0xf] }
 0x4f8   :  { %v13257_v48 = vld [vmem:[#allocation7 + $0x82c] sm:$0xf0]  ;;  %v11383_v41 = vld [vmem:[#allocation7 + $0x570] sm:$0xf0] }
 0x4f9   :  { %v11989_v58 = vld [vmem:[#allocation7 + $0xa10] sm:$0xf]  ;;  %v11734_v37 = vor.u32 %v13257_v48, %v11733_v49  ;;  %7649 = vmatpush.bf16.msrb.mxu3 %v12534_v62  ;;  %v11639_v49 = vld [vmem:[#allocation7 + $0x770] sm:$0xf0]  ;;  %v10874_v48 = vor.u32 %v13037_v35, %v10871_v52  ;;  %v11386_v55 = vor.u32 %v13165_v33, %v11383_v41  ;;  %v7444_v35 = vpop.f32.mrf.mxu3 }
 0x4fa   :  { %v13321_v59 = vld [vmem:[#allocation7 + $0xa2c] sm:$0xf0]  ;;  %v11642_v62 = vor.u32 %v13229_v47, %v11639_v49  ;;  %v10775_v20 = vld [vmem:[#allocation7 + $0xb0] sm:$0xf0] }
 0x4fb   :  { %v12245_v60 = vld [vmem:[#allocation7 + $0xc10] sm:$0xf]  ;;  %v11990_v8 = vor.u32 %v13321_v59, %v11989_v58  ;;  %7611 = vmatpush.bf16.msrb.mxu0 %v11734_v37  ;;  %v13029_v58 = vld [vmem:[#allocation7 + $0x114] sm:$0xf]  ;;  %v7418_v37 = vpop.f32.mrf.mxu1 }
 0x4fc   :  { %v13385_v6 = vld [vmem:[#allocation7 + $0xc2c] sm:$0xf0]  ;;  %v10839_v59 = vld [vmem:[#allocation7 + $0x130] sm:$0xf0]  ;;  %v7419_v11 = vadd.f32 %v7418_v37, %v7406_v5 }
 0x4fd   :  { %v12501_v0 = vld [vmem:[#allocation7 + $0xe10] sm:$0xf]  ;;  %v12246_v10 = vor.u32 %v13385_v6, %v12245_v60  ;;  %7624 = vmatpush.bf16.msrb.mxu1 %v11990_v8  ;;  %v13093_v60 = vld [vmem:[#allocation7 + $0x314] sm:$0xf]  ;;  %v10842_v7 = vor.u32 %v13029_v58, %v10839_v59 }
 0x4fe   :  { %v13449_v2 = vld [vmem:[#allocation7 + $0xe2c] sm:$0xf0]  ;;  %7612 = vmatmul.bf16.vlgmr.msrb.gmra.mxu0 %v14495_v39  ;;  %v11095_v6 = vld [vmem:[#allocation7 + $0x330] sm:$0xf0] }
 0x4ff   :  { %v12502_v12 = vor.u32 %v13449_v2, %v12501_v0  ;;  %7637 = vmatpush.bf16.msrb.mxu2 %v12246_v10  ;;  %7656 = vmatpush.bf16.msra.mxu0 %v10938_v43  ;;  %v13157_v0 = vld [vmem:[#allocation7 + $0x514] sm:$0xf]  ;;  %v11098_v38 = vor.u32 %v13093_v60, %v11095_v6 }
 0x500   :  { %7625 = vmatmul.bf16.vlgmr.msrb.gmra.mxu1 %v14499_v53  ;;  %v11351_v2 = vld [vmem:[#allocation7 + $0x530] sm:$0xf0] }
 0x501   :  { %7650 = vmatpush.bf16.msrb.mxu3 %v12502_v12  ;;  %7669 = vmatpush.bf16.msra.mxu1 %v11194_v16  ;;  %v11354_v63 = vor.u32 %v13157_v0, %v11351_v2  ;;  %v10807_v8 = vld [vmem:[#allocation7 + $0xf0] sm:$0xf0] }
 0x502   :  { %7638 = vmatmul.bf16.vlgmr.msrb.gmra.mxu2 %v14497_v50  ;;  %v13085_v10 = vld [vmem:[#allocation7 + $0x2d4] sm:$0xf]  ;;  %v10810_v15 = vor.u32 %v13021_v32, %v10807_v8 }
 0x503   :  { %7682 = vmatpush.bf16.msra.mxu2 %v11450_v13  ;;  %7657 = vmatpush.bf16.msra.mxu0 %v10906_v31  ;;  %v11063_v12 = vld [vmem:[#allocation7 + $0x2f0] sm:$0xf0]  ;;  %v7420_v33 = vpop.f32.mrf.mxu1 }
 0x504   :  { %7651 = vmatmul.bf16.vlgmr.msrb.gmra.mxu3 %v14501_v56  ;;  %v13149_v43 = vld [vmem:[#allocation7 + $0x4d4] sm:$0xf]  ;;  %v11066_v23 = vor.u32 %v13085_v10, %v11063_v12 }
 0x505   :  { %7695 = vmatpush.bf16.msra.mxu3 %v11706_v19  ;;  %7670 = vmatpush.bf16.msra.mxu1 %v11162_v25  ;;  %v11319_v16 = vld [vmem:[#allocation7 + $0x4f0] sm:$0xf0] }
 0x506   :  { %v13213_v13 = vld [vmem:[#allocation7 + $0x6d4] sm:$0xf]  ;;  %v11322_v18 = vor.u32 %v13149_v43, %v11319_v16  ;;  %v7446_v16 = vpop.f32.mrf.mxu3 }
 0x507   :  { %7683 = vmatpush.bf16.msra.mxu2 %v11418_v36  ;;  %7658 = vmatpush.bf16.msra.mxu0 %v10874_v48  ;;  %v13013_v19 = vld [vmem:[#allocation7 + $0x94] sm:$0xf]  ;;  %v11578_v22 = vor.u32 %v13213_v13, %v11575_v17  ;;  %v7432_v36 = vadd.f32 %v7431_v26, %v7419_v11 }
 0x508   :  { %v13077_v21 = vld [vmem:[#allocation7 + $0x294] sm:$0xf]  ;;  %v10778_v30 = vor.u32 %v13013_v19, %v10775_v20 }
 0x509   :  { %7696 = vmatpush.bf16.msra.mxu3 %v11674_v29  ;;  %7671 = vmatpush.bf16.msra.mxu1 %v11130_v54  ;;  %v11031_v24 = vld [vmem:[#allocation7 + $0x2b0] sm:$0xf0]  ;;  %v7407_v29 = vpop.f32.mrf.mxu0  ;;  %v14563_v41 = vadd.f32 %v7444_v35, %v7432_v36 }
 0x50a   :  { %v13141_v31 = vld [vmem:[#allocation7 + $0x494] sm:$0xf]  ;;  %v11034_v47 = vor.u32 %v13077_v21, %v11031_v24 }
 0x50b   :  { %7684 = vmatpush.bf16.msra.mxu2 %v11386_v55  ;;  %7659 = vmatpush.bf16.msra.mxu0 %v10842_v7  ;;  %v11287_v25 = vld [vmem:[#allocation7 + $0x4b0] sm:$0xf0] }
 0x50c   :  { %v13205_v52 = vld [vmem:[#allocation7 + $0x694] sm:$0xf]  ;;  %v11290_v49 = vor.u32 %v13141_v31, %v11287_v25 }
 0x50d   :  { %7697 = vmatpush.bf16.msra.mxu3 %v11642_v62  ;;  %7672 = vmatpush.bf16.msra.mxu1 %v11098_v38  ;;  %v11543_v28 = vld [vmem:[#allocation7 + $0x6b0] sm:$0xf0] }
 0x50e   :  { %v13005_v48 = vld [vmem:[#allocation7 + $0x54] sm:$0xf]  ;;  %v11546_v58 = vor.u32 %v13205_v52, %v11543_v28 }
 0x50f   :  { %7685 = vmatpush.bf16.msra.mxu2 %v11354_v63  ;;  %7660 = vmatpush.bf16.msra.mxu0 %v10810_v15  ;;  %v10743_v54 = vld [vmem:[#allocation7 + $0x70] sm:$0xf0] }
 0x510   :  { %v13069_v55 = vld [vmem:[#allocation7 + $0x254] sm:$0xf]  ;;  %v10746_v2 = vor.u32 %v13005_v48, %v10743_v54 }
 0x511   :  { %7698 = vmatpush.bf16.msra.mxu3 %v11610_v40  ;;  %7673 = vmatpush.bf16.msra.mxu1 %v11066_v23  ;;  %v10999_v59 = vld [vmem:[#allocation7 + $0x270] sm:$0xf0]  ;;  %v7433_v40 = vpop.f32.mrf.mxu2 }
 0x512   :  { %v13133_v60 = vld [vmem:[#allocation7 + $0x454] sm:$0xf]  ;;  %v11002_v34 = vor.u32 %v13069_v55, %v10999_v59  ;;  %v7457_v40 = vpop.f32.mrf.mxu0 }
 0x513   :  { %7686 = vmatpush.bf16.msra.mxu2 %v11322_v18  ;;  %v11255_v62 = vld [vmem:[#allocation7 + $0x470] sm:$0xf0]  ;;  %7661 = vmatpush.bf16.msra.mxu0 %v10778_v30 }
 0x514   :  { %v13197_v6 = vld [vmem:[#allocation7 + $0x654] sm:$0xf]  ;;  %v11258_v5 = vor.u32 %v13133_v60, %v11255_v62 }
 0x515   :  { %7699 = vmatpush.bf16.msra.mxu3 %v11578_v22  ;;  %v11511_v0 = vld [vmem:[#allocation7 + $0x670] sm:$0xf0]  ;;  %7674 = vmatpush.bf16.msra.mxu1 %v11034_v47 }
 0x516   :  { %v12997_v3 = vld [vmem:[#allocation7 + $0x14] sm:$0xf]  ;;  %v11514_v63 = vor.u32 %v13197_v6, %v11511_v0 }
 0x517   :  { %v10711_v4 = vld [vmem:[#allocation7 + $0x30] sm:$0xf0]  ;;  %7687 = vmatpush.bf16.msra.mxu2 %v11290_v49  ;;  %7662 = vmatpush.bf16.msra.mxu0 %v10746_v2 }
 0x518   :  { %v13061_v7 = vld [vmem:[#allocation7 + $0x214] sm:$0xf]  ;;  %v10714_v13 = vor.u32 %v12997_v3, %v10711_v4 }
 0x519   :  { %v10967_v37 = vld [vmem:[#allocation7 + $0x230] sm:$0xf0]  ;;  %7700 = vmatpush.bf16.msra.mxu3 %v11546_v58  ;;  %7675 = vmatpush.bf16.msra.mxu1 %v11002_v34 }
 0x51a   :  { %v13125_v38 = vld [vmem:[#allocation7 + $0x414] sm:$0xf]  ;;  %v10970_v18 = vor.u32 %v13061_v7, %v10967_v37 }
 0x51b   :  { %v11223_v32 = vld [vmem:[#allocation7 + $0x430] sm:$0xf0]  ;;  %7688 = vmatpush.bf16.msra.mxu2 %v11258_v5  ;;  %7663 = vmatpush.bf16.msra.mxu0 %v10714_v13  ;;  %v7470_v13 = vpop.f32.mrf.mxu1 }
 0x51c   :  { %v13189_v8 = vld [vmem:[#allocation7 + $0x614] sm:$0xf]  ;;  %v11226_v19 = vor.u32 %v13125_v38, %v11223_v32 }
 0x51d   :  { %v11479_v10 = vld [vmem:[#allocation7 + $0x630] sm:$0xf0]  ;;  %7701 = vmatpush.bf16.msra.mxu3 %v11514_v63  ;;  %7676 = vmatpush.bf16.msra.mxu1 %v10970_v18 }
 0x51e   :  { %v13309_v11 = vld [vmem:[#allocation7 + $0x9d4] sm:$0xf]  ;;  %v11482_v22 = vor.u32 %v13189_v8, %v11479_v10  ;;  %7664 = vmatmul.bf16.vlgmr.msra.gmra.mxu0 %v14481_v27 }
 0x51f   :  { %v11959_v12 = vld [vmem:[#allocation7 + $0x9f0] sm:$0xf0]  ;;  %7689 = vmatpush.bf16.msra.mxu2 %v11226_v19 }
 0x520   :  { %v13373_v43 = vld [vmem:[#allocation7 + $0xbd4] sm:$0xf]  ;;  %v11962_v26 = vor.u32 %v13309_v11, %v11959_v12  ;;  %7677 = vmatmul.bf16.vlgmr.msra.gmra.mxu1 %v14485_v46 }
 0x521   :  { %v12215_v17 = vld [vmem:[#allocation7 + $0xbf0] sm:$0xf0]  ;;  %7702 = vmatpush.bf16.msra.mxu3 %v11482_v22 }
 0x522   :  { %v13437_v15 = vld [vmem:[#allocation7 + $0xdd4] sm:$0xf]  ;;  %v12218_v24 = vor.u32 %v13373_v43, %v12215_v17  ;;  %7708 = vmatpush.bf16.msrb.mxu0 %v11962_v26  ;;  %7690 = vmatmul.bf16.vlgmr.msra.gmra.mxu2 %v14483_v61  ;;  %v7458_v43 = vadd.f32 %v7457_v40, %v14453_v42 }
 0x523   :  { %v12471_v23 = vld [vmem:[#allocation7 + $0xdf0] sm:$0xf0] }
 0x524   :  { %v13501_v20 = vld [vmem:[#allocation7 + $0xfd4] sm:$0xf]  ;;  %v12474_v31 = vor.u32 %v13437_v15, %v12471_v23  ;;  %7721 = vmatpush.bf16.msrb.mxu1 %v12218_v24  ;;  %7703 = vmatmul.bf16.vlgmr.msra.gmra.mxu3 %v14487_v45 }
 0x525   :  { %v12727_v21 = vld [vmem:[#allocation7 + $0xff0] sm:$0xf0] }
 0x526   :  { %v13301_v25 = vld [vmem:[#allocation7 + $0x994] sm:$0xf]  ;;  %v12730_v52 = vor.u32 %v13501_v20, %v12727_v21  ;;  %7734 = vmatpush.bf16.msrb.mxu2 %v12474_v31  ;;  %v7471_v21 = vadd.f32 %v7470_v13, %v7458_v43 }
 0x527   :  { %v11927_v36 = vld [vmem:[#allocation7 + $0x9b0] sm:$0xf0] }
 0x528   :  { %v13365_v35 = vld [vmem:[#allocation7 + $0xb94] sm:$0xf]  ;;  %v11930_v49 = vor.u32 %v13301_v25, %v11927_v36  ;;  %7747 = vmatpush.bf16.msrb.mxu3 %v12730_v52 }
 0x529   :  { %v12183_v28 = vld [vmem:[#allocation7 + $0xbb0] sm:$0xf0] }
 0x52a   :  { %v13429_v29 = vld [vmem:[#allocation7 + $0xd94] sm:$0xf]  ;;  %v12186_v48 = vor.u32 %v13365_v35, %v12183_v28  ;;  %7709 = vmatpush.bf16.msrb.mxu0 %v11930_v49 }
 0x52b   :  { %v12439_v30 = vld [vmem:[#allocation7 + $0xdb0] sm:$0xf0] }
 0x52c   :  { %v13493_v33 = vld [vmem:[#allocation7 + $0xf94] sm:$0xf]  ;;  %v12442_v54 = vor.u32 %v13429_v29, %v12439_v30  ;;  %7722 = vmatpush.bf16.msrb.mxu1 %v12186_v48 }
 0x52d   :  { %v12695_v47 = vld [vmem:[#allocation7 + $0xfb0] sm:$0xf0] }
 0x52e   :  { %v13293_v55 = vld [vmem:[#allocation7 + $0x954] sm:$0xf]  ;;  %v12698_v60 = vor.u32 %v13493_v33, %v12695_v47  ;;  %7735 = vmatpush.bf16.msrb.mxu2 %v12442_v54  ;;  %v7483_v33 = vpop.f32.mrf.mxu2 }
 0x52f   :  { %v11895_v58 = vld [vmem:[#allocation7 + $0x970] sm:$0xf0]  ;;  %v7484_v54 = vadd.f32 %v7483_v33, %v7471_v21  ;;  %v10941_v21 = vld [vmem:[#allocation7 + $0x1d8] sm:$0xf] }
 0x530   :  { %v13357_v59 = vld [vmem:[#allocation7 + $0xb54] sm:$0xf]  ;;  %v11898_v4 = vor.u32 %v13293_v55, %v11895_v58  ;;  %7748 = vmatpush.bf16.msrb.mxu3 %v12698_v60  ;;  %v7496_v55 = vpop.f32.mrf.mxu3  ;;  %v7459_v60 = vpop.f32.mrf.mxu0 }
 0x531   :  { %v12151_v62 = vld [vmem:[#allocation7 + $0xb70] sm:$0xf0]  ;;  %v11421_v60 = vld [vmem:[#allocation7 + $0x598] sm:$0xf] }
 0x532   :  { %v13421_v6 = vld [vmem:[#allocation7 + $0xd54] sm:$0xf]  ;;  %v12154_v34 = vor.u32 %v13357_v59, %v12151_v62  ;;  %7710 = vmatpush.bf16.msrb.mxu0 %v11898_v4 }
 0x533   :  { %v12407_v0 = vld [vmem:[#allocation7 + $0xd70] sm:$0xf0] }
 0x534   :  { %v13485_v2 = vld [vmem:[#allocation7 + $0xf54] sm:$0xf]  ;;  %v12410_v5 = vor.u32 %v13421_v6, %v12407_v0  ;;  %7723 = vmatpush.bf16.msrb.mxu1 %v12154_v34  ;;  %v7472_v6 = vpop.f32.mrf.mxu1  ;;  %v14570_v0 = vadd.f32 %v7496_v55, %v7484_v54  ;;  %v13050_v54 = vld [vmem:[#allocation7 + $0x1b4] sm:$0xf0] }
 0x535   :  { %v12663_v3 = vld [vmem:[#allocation7 + $0xf70] sm:$0xf0]  ;;  %v11165_v55 = vld [vmem:[#allocation7 + $0x398] sm:$0xf] }
 0x536   :  { %v13285_v7 = vld [vmem:[#allocation7 + $0x914] sm:$0xf]  ;;  %v12666_v63 = vor.u32 %v13485_v2, %v12663_v3  ;;  %7736 = vmatpush.bf16.msrb.mxu2 %v12410_v5  ;;  %v11677_v6 = vld [vmem:[#allocation7 + $0x798] sm:$0xf] }
 0x537   :  { %v11863_v37 = vld [vmem:[#allocation7 + $0x930] sm:$0xf0] }
 0x538   :  { %v13349_v38 = vld [vmem:[#allocation7 + $0xb14] sm:$0xf]  ;;  %v11866_v16 = vor.u32 %v13285_v7, %v11863_v37  ;;  %7749 = vmatpush.bf16.msrb.mxu3 %v12666_v63 }
 0x539   :  { %v12119_v32 = vld [vmem:[#allocation7 + $0xb30] sm:$0xf0] }
 0x53a   :  { %v13413_v8 = vld [vmem:[#allocation7 + $0xd14] sm:$0xf]  ;;  %v12122_v17 = vor.u32 %v13349_v38, %v12119_v32  ;;  %7711 = vmatpush.bf16.msrb.mxu0 %v11866_v16 }
 0x53b   :  { %v12375_v10 = vld [vmem:[#allocation7 + $0xd30] sm:$0xf0] }
 0x53c   :  { %v13477_v11 = vld [vmem:[#allocation7 + $0xf14] sm:$0xf]  ;;  %v12378_v15 = vor.u32 %v13413_v8, %v12375_v10  ;;  %7724 = vmatpush.bf16.msrb.mxu1 %v12122_v17 }
 0x53d   :  { %v12631_v12 = vld [vmem:[#allocation7 + $0xf30] sm:$0xf0] }
 0x53e   :  { %v13277_v23 = vld [vmem:[#allocation7 + $0x8d4] sm:$0xf]  ;;  %v12634_v20 = vor.u32 %v13477_v11, %v12631_v12  ;;  %7737 = vmatpush.bf16.msrb.mxu2 %v12378_v15 }
 0x53f   :  { %v11831_v18 = vld [vmem:[#allocation7 + $0x8f0] sm:$0xf0] }
 0x540   :  { %v13341_v19 = vld [vmem:[#allocation7 + $0xad4] sm:$0xf]  ;;  %v11834_v36 = vor.u32 %v13277_v23, %v11831_v18  ;;  %7750 = vmatpush.bf16.msrb.mxu3 %v12634_v20  ;;  %v7485_v20 = vpop.f32.mrf.mxu2 }
 0x541   :  { %v12087_v22 = vld [vmem:[#allocation7 + $0xaf0] sm:$0xf0]  ;;  %v7509_v20 = vpop.f32.mrf.mxu0 }
 0x542   :  { %v13405_v26 = vld [vmem:[#allocation7 + $0xcd4] sm:$0xf]  ;;  %v12090_v42 = vor.u32 %v13341_v19, %v12087_v22  ;;  %7712 = vmatpush.bf16.msrb.mxu0 %v11834_v36  ;;  %v13058_v22 = vld [vmem:[#allocation7 + $0x1f4] sm:$0xf0] }
 0x543   :  { %v12343_v24 = vld [vmem:[#allocation7 + $0xcf0] sm:$0xf0]  ;;  %v11453_v36 = vld [vmem:[#allocation7 + $0x5d8] sm:$0xf]  ;;  %v10942_v33 = vor.u32 %v13058_v22, %v10941_v21 }
 0x544   :  { %v13469_v31 = vld [vmem:[#allocation7 + $0xed4] sm:$0xf]  ;;  %v12346_v35 = vor.u32 %v13405_v26, %v12343_v24  ;;  %7725 = vmatpush.bf16.msrb.mxu1 %v12090_v42  ;;  %v11197_v26 = vld [vmem:[#allocation7 + $0x3d8] sm:$0xf]  ;;  %v7498_v24 = vpop.f32.mrf.mxu3 }
 0x545   :  { %v12599_v25 = vld [vmem:[#allocation7 + $0xef0] sm:$0xf0]  ;;  %v13186_v42 = vld [vmem:[#allocation7 + $0x5f4] sm:$0xf0] }
 0x546   :  { %v13269_v52 = vld [vmem:[#allocation7 + $0x894] sm:$0xf]  ;;  %v12602_v30 = vor.u32 %v13469_v31, %v12599_v25  ;;  %7738 = vmatpush.bf16.msrb.mxu2 %v12346_v35  ;;  %v13122_v25 = vld [vmem:[#allocation7 + $0x3f4] sm:$0xf0] }
 0x547   :  { %v11799_v28 = vld [vmem:[#allocation7 + $0x8b0] sm:$0xf0]  ;;  %v11613_v21 = vld [vmem:[#allocation7 + $0x718] sm:$0xf] }
 0x548   :  { %v13333_v29 = vld [vmem:[#allocation7 + $0xa94] sm:$0xf]  ;;  %v11802_v62 = vor.u32 %v13269_v52, %v11799_v28  ;;  %7751 = vmatpush.bf16.msrb.mxu3 %v12602_v30  ;;  %v11709_v28 = vld [vmem:[#allocation7 + $0x7d8] sm:$0xf] }
 0x549   :  { %v12055_v47 = vld [vmem:[#allocation7 + $0xab0] sm:$0xf0]  ;;  %v13226_v22 = vld [vmem:[#allocation7 + $0x734] sm:$0xf0] }
 0x54a   :  { %v13397_v49 = vld [vmem:[#allocation7 + $0xc94] sm:$0xf]  ;;  %v12058_v2 = vor.u32 %v13333_v29, %v12055_v47  ;;  %7713 = vmatpush.bf16.msrb.mxu0 %v11802_v62  ;;  %v13250_v29 = vld [vmem:[#allocation7 + $0x7f4] sm:$0xf0]  ;;  %v11198_v47 = vor.u32 %v13122_v25, %v11197_v26  ;;  %v7510_v26 = vadd.f32 %v7509_v20, %v14570_v0 }
 0x54b   :  { %v12311_v48 = vld [vmem:[#allocation7 + $0xcb0] sm:$0xf0]  ;;  %v13178_v62 = vld [vmem:[#allocation7 + $0x5b4] sm:$0xf0] }
 0x54c   :  { %v13461_v58 = vld [vmem:[#allocation7 + $0xe94] sm:$0xf]  ;;  %v12314_v3 = vor.u32 %v13397_v49, %v12311_v48  ;;  %7726 = vmatpush.bf16.msrb.mxu1 %v12058_v2  ;;  %v11454_v49 = vor.u32 %v13186_v42, %v11453_v36  ;;  %v10909_v48 = vld [vmem:[#allocation7 + $0x198] sm:$0xf] }
 0x54d   :  { %v12567_v59 = vld [vmem:[#allocation7 + $0xeb0] sm:$0xf0]  ;;  %v13242_v2 = vld [vmem:[#allocation7 + $0x7b4] sm:$0xf0] }
 0x54e   :  { %v13261_v4 = vld [vmem:[#allocation7 + $0x854] sm:$0xf]  ;;  %v12570_v7 = vor.u32 %v13461_v58, %v12567_v59  ;;  %7739 = vmatpush.bf16.msrb.mxu2 %v12314_v3  ;;  %v11710_v58 = vor.u32 %v13250_v29, %v11709_v28  ;;  %v13114_v59 = vld [vmem:[#allocation7 + $0x3b4] sm:$0xf0]  ;;  %v10910_v3 = vor.u32 %v13050_v54, %v10909_v48  ;;  %v11614_v28 = vor.u32 %v13226_v22, %v11613_v21 }
 0x54f   :  { %v11767_v34 = vld [vmem:[#allocation7 + $0x870] sm:$0xf0]  ;;  %v10813_v42 = vld [vmem:[#allocation7 + $0xd8] sm:$0xf] }
 0x550   :  { %v13325_v5 = vld [vmem:[#allocation7 + $0xa54] sm:$0xf]  ;;  %v11770_v10 = vor.u32 %v13261_v4, %v11767_v34  ;;  %7752 = vmatpush.bf16.msrb.mxu3 %v12570_v7  ;;  %v11166_v4 = vor.u32 %v13114_v59, %v11165_v55  ;;  %v11422_v34 = vor.u32 %v13178_v62, %v11421_v60  ;;  %v13042_v7 = vld [vmem:[#allocation7 + $0x174] sm:$0xf0] }
 0x551   :  { %v12023_v37 = vld [vmem:[#allocation7 + $0xa70] sm:$0xf0]  ;;  %v13218_v48 = vld [vmem:[#allocation7 + $0x6f4] sm:$0xf0] }
 0x552   :  { %v13389_v38 = vld [vmem:[#allocation7 + $0xc54] sm:$0xf]  ;;  %v12026_v12 = vor.u32 %v13325_v5, %v12023_v37  ;;  %7714 = vmatpush.bf16.msrb.mxu0 %v11770_v10  ;;  %v10877_v5 = vld [vmem:[#allocation7 + $0x158] sm:$0xf] }
 0x553   :  { %v12279_v63 = vld [vmem:[#allocation7 + $0xc70] sm:$0xf0]  ;;  %v11133_v37 = vld [vmem:[#allocation7 + $0x358] sm:$0xf] }
 0x554   :  { %v13453_v32 = vld [vmem:[#allocation7 + $0xe54] sm:$0xf]  ;;  %v12282_v43 = vor.u32 %v13389_v38, %v12279_v63  ;;  %7727 = vmatpush.bf16.msrb.mxu1 %v12026_v12  ;;  %v11678_v38 = vor.u32 %v13242_v2, %v11677_v6  ;;  %v13106_v63 = vld [vmem:[#allocation7 + $0x374] sm:$0xf0]  ;;  %v7535_v6 = vpop.f32.mrf.mxu2 }
 0x555   :  { %v12535_v8 = vld [vmem:[#allocation7 + $0xe70] sm:$0xf0]  ;;  %v11645_v10 = vld [vmem:[#allocation7 + $0x758] sm:$0xf]  ;;  %v11134_v12 = vor.u32 %v13106_v63, %v11133_v37 }
 0x556   :  { %v13253_v40 = vld [vmem:[#allocation7 + $0x814] sm:$0xf]  ;;  %v12538_v15 = vor.u32 %v13453_v32, %v12535_v8  ;;  %7740 = vmatpush.bf16.msrb.mxu2 %v12282_v43  ;;  %v11389_v32 = vld [vmem:[#allocation7 + $0x558] sm:$0xf] }
 0x557   :  { %v11735_v11 = vld [vmem:[#allocation7 + $0x830] sm:$0xf0]  ;;  %v13170_v8 = vld [vmem:[#allocation7 + $0x574] sm:$0xf0] }
 0x558   :  { %v13317_v16 = vld [vmem:[#allocation7 + $0xa14] sm:$0xf]  ;;  %v11738_v31 = vor.u32 %v13253_v40, %v11735_v11  ;;  %7753 = vmatpush.bf16.msrb.mxu3 %v12538_v15  ;;  %v13234_v40 = vld [vmem:[#allocation7 + $0x774] sm:$0xf0]  ;;  %v10878_v11 = vor.u32 %v13042_v7, %v10877_v5  ;;  %v11390_v43 = vor.u32 %v13170_v8, %v11389_v32  ;;  %v7548_v5 = vpop.f32.mrf.mxu3 }
 0x559   :  { %v11991_v13 = vld [vmem:[#allocation7 + $0xa30] sm:$0xf0]  ;;  %v11646_v15 = vor.u32 %v13234_v40, %v11645_v10  ;;  %v13018_v59 = vld [vmem:[#allocation7 + $0xb4] sm:$0xf0] }
 0x55a   :  { %v13381_v17 = vld [vmem:[#allocation7 + $0xc14] sm:$0xf]  ;;  %v11994_v35 = vor.u32 %v13317_v16, %v11991_v13  ;;  %7715 = vmatpush.bf16.msrb.mxu0 %v11738_v31  ;;  %v10845_v16 = vld [vmem:[#allocation7 + $0x118] sm:$0xf]  ;;  %v7522_v31 = vpop.f32.mrf.mxu1 }
 0x55b   :  { %v12247_v23 = vld [vmem:[#allocation7 + $0xc30] sm:$0xf0]  ;;  %v13034_v13 = vld [vmem:[#allocation7 + $0x134] sm:$0xf0]  ;;  %v7523_v29 = vadd.f32 %v7522_v31, %v7510_v26 }
 0x55c   :  { %v13445_v18 = vld [vmem:[#allocation7 + $0xe14] sm:$0xf]  ;;  %v12250_v52 = vor.u32 %v13381_v17, %v12247_v23  ;;  %7728 = vmatpush.bf16.msrb.mxu1 %v11994_v35  ;;  %v11101_v17 = vld [vmem:[#allocation7 + $0x318] sm:$0xf]  ;;  %v10846_v24 = vor.u32 %v13034_v13, %v10845_v16 }
 0x55d   :  { %v12503_v19 = vld [vmem:[#allocation7 + $0xe30] sm:$0xf0]  ;;  %7716 = vmatmul.bf16.vlgmr.msrb.gmra.mxu0 %v14495_v39  ;;  %v13098_v23 = vld [vmem:[#allocation7 + $0x334] sm:$0xf0] }
 0x55e   :  { %v12506_v30 = vor.u32 %v13445_v18, %v12503_v19  ;;  %7741 = vmatpush.bf16.msrb.mxu2 %v12250_v52  ;;  %7760 = vmatpush.bf16.msra.mxu0 %v10942_v33  ;;  %v11357_v18 = vld [vmem:[#allocation7 + $0x518] sm:$0xf]  ;;  %v11102_v25 = vor.u32 %v13098_v23, %v11101_v17 }
 0x55f   :  { %7729 = vmatmul.bf16.vlgmr.msrb.gmra.mxu1 %v14499_v53  ;;  %v13162_v19 = vld [vmem:[#allocation7 + $0x534] sm:$0xf0] }
 0x560   :  { %7754 = vmatpush.bf16.msrb.mxu3 %v12506_v30  ;;  %7773 = vmatpush.bf16.msra.mxu1 %v11198_v47  ;;  %v11358_v36 = vor.u32 %v13162_v19, %v11357_v18  ;;  %v13026_v35 = vld [vmem:[#allocation7 + $0xf4] sm:$0xf0] }
 0x561   :  { %7742 = vmatmul.bf16.vlgmr.msrb.gmra.mxu2 %v14497_v50  ;;  %v11069_v52 = vld [vmem:[#allocation7 + $0x2d8] sm:$0xf]  ;;  %v10814_v54 = vor.u32 %v13026_v35, %v10813_v42 }
 0x562   :  { %7786 = vmatpush.bf16.msra.mxu2 %v11454_v49  ;;  %7761 = vmatpush.bf16.msra.mxu0 %v10910_v3  ;;  %v13090_v30 = vld [vmem:[#allocation7 + $0x2f4] sm:$0xf0]  ;;  %v7524_v32 = vpop.f32.mrf.mxu1 }
 0x563   :  { %7755 = vmatmul.bf16.vlgmr.msrb.gmra.mxu3 %v14501_v56  ;;  %v11325_v33 = vld [vmem:[#allocation7 + $0x4d8] sm:$0xf]  ;;  %v11070_v0 = vor.u32 %v13090_v30, %v11069_v52 }
 0x564   :  { %7799 = vmatpush.bf16.msra.mxu3 %v11710_v58  ;;  %7774 = vmatpush.bf16.msra.mxu1 %v11166_v4  ;;  %v13154_v47 = vld [vmem:[#allocation7 + $0x4f4] sm:$0xf0] }
 0x565   :  { %v11581_v49 = vld [vmem:[#allocation7 + $0x6d8] sm:$0xf]  ;;  %v11326_v55 = vor.u32 %v13154_v47, %v11325_v33  ;;  %v7550_v47 = vpop.f32.mrf.mxu3 }
 0x566   :  { %7787 = vmatpush.bf16.msra.mxu2 %v11422_v34  ;;  %7762 = vmatpush.bf16.msra.mxu0 %v10878_v11  ;;  %v10781_v58 = vld [vmem:[#allocation7 + $0x98] sm:$0xf]  ;;  %v11582_v62 = vor.u32 %v13218_v48, %v11581_v49  ;;  %v7536_v34 = vadd.f32 %v7535_v6, %v7523_v29 }
 0x567   :  { %v11037_v60 = vld [vmem:[#allocation7 + $0x298] sm:$0xf]  ;;  %v10782_v63 = vor.u32 %v13018_v59, %v10781_v58 }
 0x568   :  { %7800 = vmatpush.bf16.msra.mxu3 %v11678_v38  ;;  %7775 = vmatpush.bf16.msra.mxu1 %v11134_v12  ;;  %v13082_v2 = vld [vmem:[#allocation7 + $0x2b4] sm:$0xf0]  ;;  %v7511_v38 = vpop.f32.mrf.mxu0  ;;  %v14577_v8 = vadd.f32 %v7548_v5, %v7536_v34 }
 0x569   :  { %v11293_v3 = vld [vmem:[#allocation7 + $0x498] sm:$0xf]  ;;  %v11038_v10 = vor.u32 %v13082_v2, %v11037_v60 }
 0x56a   :  { %7788 = vmatpush.bf16.msra.mxu2 %v11390_v43  ;;  %7763 = vmatpush.bf16.msra.mxu0 %v10846_v24  ;;  %v13146_v4 = vld [vmem:[#allocation7 + $0x4b4] sm:$0xf0] }
 0x56b   :  { %v11549_v7 = vld [vmem:[#allocation7 + $0x698] sm:$0xf]  ;;  %v11294_v40 = vor.u32 %v13146_v4, %v11293_v3 }
 0x56c   :  { %7801 = vmatpush.bf16.msra.mxu3 %v11646_v15  ;;  %7776 = vmatpush.bf16.msra.mxu1 %v11102_v25  ;;  %v13210_v37 = vld [vmem:[#allocation7 + $0x6b4] sm:$0xf0] }
 0x56d   :  { %v10749_v11 = vld [vmem:[#allocation7 + $0x58] sm:$0xf]  ;;  %v11550_v16 = vor.u32 %v13210_v37, %v11549_v7 }
 0x56e   :  { %7789 = vmatpush.bf16.msra.mxu2 %v11358_v36  ;;  %7764 = vmatpush.bf16.msra.mxu0 %v10814_v54  ;;  %v13010_v12 = vld [vmem:[#allocation7 + $0x74] sm:$0xf0] }
 0x56f   :  { %v11005_v43 = vld [vmem:[#allocation7 + $0x258] sm:$0xf]  ;;  %v10750_v19 = vor.u32 %v13010_v12, %v10749_v11 }
 0x570   :  { %7802 = vmatpush.bf16.msra.mxu3 %v11614_v28  ;;  %7777 = vmatpush.bf16.msra.mxu1 %v11070_v0  ;;  %v13074_v13 = vld [vmem:[#allocation7 + $0x274] sm:$0xf0]  ;;  %v7537_v28 = vpop.f32.mrf.mxu2 }
 0x571   :  { %v11261_v17 = vld [vmem:[#allocation7 + $0x458] sm:$0xf]  ;;  %v11006_v22 = vor.u32 %v13074_v13, %v11005_v43  ;;  %v7561_v28 = vpop.f32.mrf.mxu0 }
 0x572   :  { %7790 = vmatpush.bf16.msra.mxu2 %v11326_v55  ;;  %v13138_v15 = vld [vmem:[#allocation7 + $0x474] sm:$0xf0]  ;;  %7765 = vmatpush.bf16.msra.mxu0 %v10782_v63 }
 0x573   :  { %v11517_v23 = vld [vmem:[#allocation7 + $0x658] sm:$0xf]  ;;  %v11262_v26 = vor.u32 %v13138_v15, %v11261_v17 }
 0x574   :  { %7803 = vmatpush.bf16.msra.mxu3 %v11582_v62  ;;  %v13202_v18 = vld [vmem:[#allocation7 + $0x674] sm:$0xf0]  ;;  %7778 = vmatpush.bf16.msra.mxu1 %v11038_v10 }
 0x575   :  { %v10717_v20 = vld [vmem:[#allocation7 + $0x18] sm:$0xf]  ;;  %v11518_v36 = vor.u32 %v13202_v18, %v11517_v23 }
 0x576   :  { %v13002_v21 = vld [vmem:[#allocation7 + $0x34] sm:$0xf0]  ;;  %7791 = vmatpush.bf16.msra.mxu2 %v11294_v40  ;;  %7766 = vmatpush.bf16.msra.mxu0 %v10750_v19 }
 0x577   :  { %v10973_v24 = vld [vmem:[#allocation7 + $0x218] sm:$0xf]  ;;  %v10718_v49 = vor.u32 %v13002_v21, %v10717_v20 }
 0x578   :  { %v13066_v31 = vld [vmem:[#allocation7 + $0x234] sm:$0xf0]  ;;  %7804 = vmatpush.bf16.msra.mxu3 %v11550_v16  ;;  %7779 = vmatpush.bf16.msra.mxu1 %v11006_v22 }
 0x579   :  { %v11229_v25 = vld [vmem:[#allocation7 + $0x418] sm:$0xf]  ;;  %v10974_v55 = vor.u32 %v13066_v31, %v10973_v24 }
 0x57a   :  { %v13130_v42 = vld [vmem:[#allocation7 + $0x434] sm:$0xf0]  ;;  %7792 = vmatpush.bf16.msra.mxu2 %v11262_v26  ;;  %7767 = vmatpush.bf16.msra.mxu0 %v10718_v49  ;;  %v7574_v49 = vpop.f32.mrf.mxu1 }
 0x57b   :  { %v11485_v35 = vld [vmem:[#allocation7 + $0x618] sm:$0xf]  ;;  %v11230_v58 = vor.u32 %v13130_v42, %v11229_v25 }
 0x57c   :  { %v13194_v52 = vld [vmem:[#allocation7 + $0x634] sm:$0xf0]  ;;  %7805 = vmatpush.bf16.msra.mxu3 %v11518_v36  ;;  %7780 = vmatpush.bf16.msra.mxu1 %v10974_v55 }
 0x57d   :  { %v11965_v29 = vld [vmem:[#allocation7 + $0x9d8] sm:$0xf]  ;;  %v11486_v62 = vor.u32 %v13194_v52, %v11485_v35  ;;  %7768 = vmatmul.bf16.vlgmr.msra.gmra.mxu0 %v14481_v27 }
 0x57e   :  { %v13314_v30 = vld [vmem:[#allocation7 + $0x9f4] sm:$0xf0]  ;;  %7793 = vmatpush.bf16.msra.mxu2 %v11230_v58 }
 0x57f   :  { %v12221_v33 = vld [vmem:[#allocation7 + $0xbd8] sm:$0xf]  ;;  %v11966_v6 = vor.u32 %v13314_v30, %v11965_v29  ;;  %7781 = vmatmul.bf16.vlgmr.msra.gmra.mxu1 %v14485_v46 }
 0x580   :  { %v13378_v48 = vld [vmem:[#allocation7 + $0xbf4] sm:$0xf0]  ;;  %7806 = vmatpush.bf16.msra.mxu3 %v11486_v62 }
 0x581   :  { %v12477_v54 = vld [vmem:[#allocation7 + $0xdd8] sm:$0xf]  ;;  %v12222_v2 = vor.u32 %v13378_v48, %v12221_v33  ;;  %7812 = vmatpush.bf16.msrb.mxu0 %v11966_v6  ;;  %7794 = vmatmul.bf16.vlgmr.msra.gmra.mxu2 %v14483_v61  ;;  %v7562_v33 = vadd.f32 %v7561_v28, %v14466_v51 }
 0x582   :  { %v13442_v0 = vld [vmem:[#allocation7 + $0xdf4] sm:$0xf0] }
 0x583   :  { %v12733_v59 = vld [vmem:[#allocation7 + $0xfd8] sm:$0xf]  ;;  %v12478_v3 = vor.u32 %v13442_v0, %v12477_v54  ;;  %7825 = vmatpush.bf16.msrb.mxu1 %v12222_v2  ;;  %7807 = vmatmul.bf16.vlgmr.msra.gmra.mxu3 %v14487_v45 }
 0x584   :  { %v13506_v60 = vld [vmem:[#allocation7 + $0xff4] sm:$0xf0] }
 0x585   :  { %v11933_v4 = vld [vmem:[#allocation7 + $0x998] sm:$0xf]  ;;  %v12734_v7 = vor.u32 %v13506_v60, %v12733_v59  ;;  %7838 = vmatpush.bf16.msrb.mxu2 %v12478_v3  ;;  %v7575_v60 = vadd.f32 %v7574_v49, %v7562_v33 }
 0x586   :  { %v13306_v34 = vld [vmem:[#allocation7 + $0x9b4] sm:$0xf0] }
 0x587   :  { %v12189_v5 = vld [vmem:[#allocation7 + $0xb98] sm:$0xf]  ;;  %v11934_v40 = vor.u32 %v13306_v34, %v11933_v4  ;;  %7851 = vmatpush.bf16.msrb.mxu3 %v12734_v7 }
 0x588   :  { %v13370_v37 = vld [vmem:[#allocation7 + $0xbb4] sm:$0xf0] }
 0x589   :  { %v12445_v38 = vld [vmem:[#allocation7 + $0xd98] sm:$0xf]  ;;  %v12190_v11 = vor.u32 %v13370_v37, %v12189_v5  ;;  %7813 = vmatpush.bf16.msrb.mxu0 %v11934_v40 }
 0x58a   :  { %v13434_v63 = vld [vmem:[#allocation7 + $0xdb4] sm:$0xf0] }
 0x58b   :  { %v12701_v32 = vld [vmem:[#allocation7 + $0xf98] sm:$0xf]  ;;  %v12446_v12 = vor.u32 %v13434_v63, %v12445_v38  ;;  %7826 = vmatpush.bf16.msrb.mxu1 %v12190_v11 }
 0x58c   :  { %v13498_v10 = vld [vmem:[#allocation7 + $0xfb4] sm:$0xf0] }
 0x58d   :  { %v11901_v43 = vld [vmem:[#allocation7 + $0x958] sm:$0xf]  ;;  %v12702_v17 = vor.u32 %v13498_v10, %v12701_v32  ;;  %7839 = vmatpush.bf16.msrb.mxu2 %v12446_v12  ;;  %v7587_v32 = vpop.f32.mrf.mxu2 }
 0x58e   :  { %v13298_v16 = vld [vmem:[#allocation7 + $0x974] sm:$0xf0]  ;;  %v7588_v12 = vadd.f32 %v7587_v32, %v7575_v60  ;;  %v13054_v60 = vld [vmem:[#allocation7 + $0x1dc] sm:$0xf] }
 0x58f   :  { %v12157_v13 = vld [vmem:[#allocation7 + $0xb58] sm:$0xf]  ;;  %v11902_v21 = vor.u32 %v13298_v16, %v11901_v43  ;;  %7852 = vmatpush.bf16.msrb.mxu3 %v12702_v17  ;;  %v7600_v43 = vpop.f32.mrf.mxu3  ;;  %v7563_v17 = vpop.f32.mrf.mxu0 }
 0x590   :  { %v13362_v15 = vld [vmem:[#allocation7 + $0xb74] sm:$0xf0]  ;;  %v13174_v17 = vld [vmem:[#allocation7 + $0x59c] sm:$0xf] }
 0x591   :  { %v12413_v23 = vld [vmem:[#allocation7 + $0xd58] sm:$0xf]  ;;  %v12158_v22 = vor.u32 %v13362_v15, %v12157_v13  ;;  %7814 = vmatpush.bf16.msrb.mxu0 %v11902_v21 }
 0x592   :  { %v13426_v18 = vld [vmem:[#allocation7 + $0xd74] sm:$0xf0] }
 0x593   :  { %v12669_v19 = vld [vmem:[#allocation7 + $0xf58] sm:$0xf]  ;;  %v12414_v26 = vor.u32 %v13426_v18, %v12413_v23  ;;  %7827 = vmatpush.bf16.msrb.mxu1 %v12158_v22  ;;  %v7576_v23 = vpop.f32.mrf.mxu1  ;;  %v14584_v18 = vadd.f32 %v7600_v43, %v7588_v12  ;;  %v10911_v12 = vld [vmem:[#allocation7 + $0x1b8] sm:$0xf0] }
 0x594   :  { %v13490_v20 = vld [vmem:[#allocation7 + $0xf74] sm:$0xf0]  ;;  %v13110_v43 = vld [vmem:[#allocation7 + $0x39c] sm:$0xf] }
 0x595   :  { %v11869_v24 = vld [vmem:[#allocation7 + $0x918] sm:$0xf]  ;;  %v12670_v36 = vor.u32 %v13490_v20, %v12669_v19  ;;  %7840 = vmatpush.bf16.msrb.mxu2 %v12414_v26  ;;  %v13238_v23 = vld [vmem:[#allocation7 + $0x79c] sm:$0xf] }
 0x596   :  { %v13290_v31 = vld [vmem:[#allocation7 + $0x934] sm:$0xf0] }
 0x597   :  { %v12125_v25 = vld [vmem:[#allocation7 + $0xb18] sm:$0xf]  ;;  %v11870_v47 = vor.u32 %v13290_v31, %v11869_v24  ;;  %7853 = vmatpush.bf16.msrb.mxu3 %v12670_v36 }
 0x598   :  { %v13354_v42 = vld [vmem:[#allocation7 + $0xb34] sm:$0xf0] }
 0x599   :  { %v12381_v35 = vld [vmem:[#allocation7 + $0xd18] sm:$0xf]  ;;  %v12126_v48 = vor.u32 %v13354_v42, %v12125_v25  ;;  %7815 = vmatpush.bf16.msrb.mxu0 %v11870_v47 }
 0x59a   :  { %v13418_v52 = vld [vmem:[#allocation7 + $0xd34] sm:$0xf0] }
 0x59b   :  { %v12637_v29 = vld [vmem:[#allocation7 + $0xf18] sm:$0xf]  ;;  %v12382_v54 = vor.u32 %v13418_v52, %v12381_v35  ;;  %7828 = vmatpush.bf16.msrb.mxu1 %v12126_v48 }
 0x59c   :  { %v13482_v30 = vld [vmem:[#allocation7 + $0xf34] sm:$0xf0] }
 0x59d   :  { %v11837_v0 = vld [vmem:[#allocation7 + $0x8d8] sm:$0xf]  ;;  %v12638_v59 = vor.u32 %v13482_v30, %v12637_v29  ;;  %7841 = vmatpush.bf16.msrb.mxu2 %v12382_v54 }
 0x59e   :  { %v13282_v55 = vld [vmem:[#allocation7 + $0x8f4] sm:$0xf0] }
 0x59f   :  { %v12093_v58 = vld [vmem:[#allocation7 + $0xad8] sm:$0xf]  ;;  %v11838_v34 = vor.u32 %v13282_v55, %v11837_v0  ;;  %7854 = vmatpush.bf16.msrb.mxu3 %v12638_v59  ;;  %v7589_v59 = vpop.f32.mrf.mxu2 }
 0x5a0   :  { %v13346_v62 = vld [vmem:[#allocation7 + $0xaf4] sm:$0xf0]  ;;  %v7613_v59 = vpop.f32.mrf.mxu0 }
 0x5a1   :  { %v12349_v6 = vld [vmem:[#allocation7 + $0xcd8] sm:$0xf]  ;;  %v12094_v51 = vor.u32 %v13346_v62, %v12093_v58  ;;  %7816 = vmatpush.bf16.msrb.mxu0 %v11838_v34  ;;  %v10943_v62 = vld [vmem:[#allocation7 + $0x1f8] sm:$0xf0] }
 0x5a2   :  { %v13410_v2 = vld [vmem:[#allocation7 + $0xcf4] sm:$0xf0]  ;;  %v13182_v34 = vld [vmem:[#allocation7 + $0x5dc] sm:$0xf]  ;;  %v10946_v32 = vor.u32 %v13054_v60, %v10943_v62 }
 0x5a3   :  { %v12605_v3 = vld [vmem:[#allocation7 + $0xed8] sm:$0xf]  ;;  %v12350_v5 = vor.u32 %v13410_v2, %v12349_v6  ;;  %7829 = vmatpush.bf16.msrb.mxu1 %v12094_v51  ;;  %v13118_v6 = vld [vmem:[#allocation7 + $0x3dc] sm:$0xf]  ;;  %v7602_v2 = vpop.f32.mrf.mxu3 }
 0x5a4   :  { %v13474_v4 = vld [vmem:[#allocation7 + $0xef4] sm:$0xf0]  ;;  %v11455_v51 = vld [vmem:[#allocation7 + $0x5f8] sm:$0xf0] }
 0x5a5   :  { %v11805_v7 = vld [vmem:[#allocation7 + $0x898] sm:$0xf]  ;;  %v12606_v63 = vor.u32 %v13474_v4, %v12605_v3  ;;  %7842 = vmatpush.bf16.msrb.mxu2 %v12350_v5  ;;  %v11199_v4 = vld [vmem:[#allocation7 + $0x3f8] sm:$0xf0] }
 0x5a6   :  { %v13274_v37 = vld [vmem:[#allocation7 + $0x8b4] sm:$0xf0]  ;;  %v13222_v60 = vld [vmem:[#allocation7 + $0x71c] sm:$0xf] }
 0x5a7   :  { %v12061_v38 = vld [vmem:[#allocation7 + $0xa98] sm:$0xf]  ;;  %v11806_v15 = vor.u32 %v13274_v37, %v11805_v7  ;;  %7855 = vmatpush.bf16.msrb.mxu3 %v12606_v63  ;;  %v13246_v37 = vld [vmem:[#allocation7 + $0x7dc] sm:$0xf] }
 0x5a8   :  { %v13338_v10 = vld [vmem:[#allocation7 + $0xab4] sm:$0xf0]  ;;  %v11615_v62 = vld [vmem:[#allocation7 + $0x738] sm:$0xf0] }
 0x5a9   :  { %v12317_v40 = vld [vmem:[#allocation7 + $0xc98] sm:$0xf]  ;;  %v12062_v19 = vor.u32 %v13338_v10, %v12061_v38  ;;  %7817 = vmatpush.bf16.msrb.mxu0 %v11806_v15  ;;  %v11711_v38 = vld [vmem:[#allocation7 + $0x7f8] sm:$0xf0]  ;;  %v11202_v10 = vor.u32 %v13118_v6, %v11199_v4  ;;  %v7614_v6 = vadd.f32 %v7613_v59, %v14584_v18 }
 0x5aa   :  { %v13402_v11 = vld [vmem:[#allocation7 + $0xcb4] sm:$0xf0]  ;;  %v11423_v15 = vld [vmem:[#allocation7 + $0x5b8] sm:$0xf0] }
 0x5ab   :  { %v12573_v16 = vld [vmem:[#allocation7 + $0xe98] sm:$0xf]  ;;  %v12318_v20 = vor.u32 %v13402_v11, %v12317_v40  ;;  %7830 = vmatpush.bf16.msrb.mxu1 %v12062_v19  ;;  %v11458_v40 = vor.u32 %v13182_v34, %v11455_v51  ;;  %v13046_v11 = vld [vmem:[#allocation7 + $0x19c] sm:$0xf] }
 0x5ac   :  { %v13466_v13 = vld [vmem:[#allocation7 + $0xeb4] sm:$0xf0]  ;;  %v11679_v19 = vld [vmem:[#allocation7 + $0x7b8] sm:$0xf0] }
 0x5ad   :  { %v11773_v21 = vld [vmem:[#allocation7 + $0x858] sm:$0xf]  ;;  %v12574_v24 = vor.u32 %v13466_v13, %v12573_v16  ;;  %7843 = vmatpush.bf16.msrb.mxu2 %v12318_v20  ;;  %v11714_v16 = vor.u32 %v13246_v37, %v11711_v38  ;;  %v11167_v13 = vld [vmem:[#allocation7 + $0x3b8] sm:$0xf0]  ;;  %v10914_v20 = vor.u32 %v13046_v11, %v10911_v12  ;;  %v11618_v37 = vor.u32 %v13222_v60, %v11615_v62 }
 0x5ae   :  { %v13266_v22 = vld [vmem:[#allocation7 + $0x874] sm:$0xf0]  ;;  %v13022_v51 = vld [vmem:[#allocation7 + $0xdc] sm:$0xf] }
 0x5af   :  { %v12029_v26 = vld [vmem:[#allocation7 + $0xa58] sm:$0xf]  ;;  %v11774_v52 = vor.u32 %v13266_v22, %v11773_v21  ;;  %7856 = vmatpush.bf16.msrb.mxu3 %v12574_v24  ;;  %v11170_v21 = vor.u32 %v13110_v43, %v11167_v13  ;;  %v11426_v22 = vor.u32 %v13174_v17, %v11423_v15  ;;  %v10879_v24 = vld [vmem:[#allocation7 + $0x178] sm:$0xf0] }
 0x5b0   :  { %v13330_v31 = vld [vmem:[#allocation7 + $0xa74] sm:$0xf0]  ;;  %v11583_v11 = vld [vmem:[#allocation7 + $0x6f8] sm:$0xf0] }
 0x5b1   :  { %v12285_v25 = vld [vmem:[#allocation7 + $0xc58] sm:$0xf]  ;;  %v12030_v30 = vor.u32 %v13330_v31, %v12029_v26  ;;  %7818 = vmatpush.bf16.msrb.mxu0 %v11774_v52  ;;  %v13038_v26 = vld [vmem:[#allocation7 + $0x15c] sm:$0xf] }
 0x5b2   :  { %v13394_v36 = vld [vmem:[#allocation7 + $0xc74] sm:$0xf0]  ;;  %v13102_v31 = vld [vmem:[#allocation7 + $0x35c] sm:$0xf] }
 0x5b3   :  { %v12541_v42 = vld [vmem:[#allocation7 + $0xe58] sm:$0xf]  ;;  %v12286_v33 = vor.u32 %v13394_v36, %v12285_v25  ;;  %7831 = vmatpush.bf16.msrb.mxu1 %v12030_v30  ;;  %v11682_v25 = vor.u32 %v13238_v23, %v11679_v19  ;;  %v11135_v36 = vld [vmem:[#allocation7 + $0x378] sm:$0xf0]  ;;  %v7639_v23 = vpop.f32.mrf.mxu2 }
 0x5b4   :  { %v13458_v35 = vld [vmem:[#allocation7 + $0xe74] sm:$0xf0]  ;;  %v13230_v52 = vld [vmem:[#allocation7 + $0x75c] sm:$0xf]  ;;  %v11138_v30 = vor.u32 %v13102_v31, %v11135_v36 }
 0x5b5   :  { %v11741_v28 = vld [vmem:[#allocation7 + $0x818] sm:$0xf]  ;;  %v12542_v54 = vor.u32 %v13458_v35, %v12541_v42  ;;  %7844 = vmatpush.bf16.msrb.mxu2 %v12286_v33  ;;  %v13166_v42 = vld [vmem:[#allocation7 + $0x55c] sm:$0xf] }
 0x5b6   :  { %v13258_v29 = vld [vmem:[#allocation7 + $0x834] sm:$0xf0]  ;;  %v11391_v35 = vld [vmem:[#allocation7 + $0x578] sm:$0xf0] }
 0x5b7   :  { %v11997_v47 = vld [vmem:[#allocation7 + $0xa18] sm:$0xf]  ;;  %v11742_v3 = vor.u32 %v13258_v29, %v11741_v28  ;;  %7857 = vmatpush.bf16.msrb.mxu3 %v12542_v54  ;;  %v11647_v28 = vld [vmem:[#allocation7 + $0x778] sm:$0xf0]  ;;  %v10882_v29 = vor.u32 %v13038_v26, %v10879_v24  ;;  %v11394_v33 = vor.u32 %v13166_v42, %v11391_v35  ;;  %v7652_v26 = vpop.f32.mrf.mxu3 }
 0x5b8   :  { %v13322_v49 = vld [vmem:[#allocation7 + $0xa34] sm:$0xf0]  ;;  %v11650_v54 = vor.u32 %v13230_v52, %v11647_v28  ;;  %v10783_v13 = vld [vmem:[#allocation7 + $0xb8] sm:$0xf0] }
 0x5b9   :  { %v12253_v48 = vld [vmem:[#allocation7 + $0xc18] sm:$0xf]  ;;  %v11998_v5 = vor.u32 %v13322_v49, %v11997_v47  ;;  %7819 = vmatpush.bf16.msrb.mxu0 %v11742_v3  ;;  %v13030_v47 = vld [vmem:[#allocation7 + $0x11c] sm:$0xf]  ;;  %v7626_v3 = vpop.f32.mrf.mxu1 }
 0x5ba   :  { %v13386_v0 = vld [vmem:[#allocation7 + $0xc34] sm:$0xf0]  ;;  %v10847_v49 = vld [vmem:[#allocation7 + $0x138] sm:$0xf0]  ;;  %v7627_v38 = vadd.f32 %v7626_v3, %v7614_v6 }
 0x5bb   :  { %v12509_v55 = vld [vmem:[#allocation7 + $0xe18] sm:$0xf]  ;;  %v12254_v7 = vor.u32 %v13386_v0, %v12253_v48  ;;  %7832 = vmatpush.bf16.msrb.mxu1 %v11998_v5  ;;  %v13094_v48 = vld [vmem:[#allocation7 + $0x31c] sm:$0xf]  ;;  %v10850_v2 = vor.u32 %v13030_v47, %v10847_v49 }
 0x5bc   :  { %v13450_v58 = vld [vmem:[#allocation7 + $0xe34] sm:$0xf0]  ;;  %7820 = vmatmul.bf16.vlgmr.msrb.gmra.mxu0 %v14495_v39  ;;  %v11103_v0 = vld [vmem:[#allocation7 + $0x338] sm:$0xf0] }
 0x5bd   :  { %v12510_v63 = vor.u32 %v13450_v58, %v12509_v55  ;;  %7845 = vmatpush.bf16.msrb.mxu2 %v12254_v7  ;;  %7864 = vmatpush.bf16.msra.mxu0 %v10946_v32  ;;  %v13158_v55 = vld [vmem:[#allocation7 + $0x51c] sm:$0xf]  ;;  %v11106_v4 = vor.u32 %v13094_v48, %v11103_v0 }
 0x5be   :  { %7833 = vmatmul.bf16.vlgmr.msrb.gmra.mxu1 %v14499_v53  ;;  %v11359_v58 = vld [vmem:[#allocation7 + $0x538] sm:$0xf0] }
 0x5bf   :  { %7858 = vmatpush.bf16.msrb.mxu3 %v12510_v63  ;;  %7877 = vmatpush.bf16.msra.mxu1 %v11202_v10  ;;  %v11362_v34 = vor.u32 %v13158_v55, %v11359_v58  ;;  %v10815_v5 = vld [vmem:[#allocation7 + $0xf8] sm:$0xf0] }
 0x5c0   :  { %7846 = vmatmul.bf16.vlgmr.msrb.gmra.mxu2 %v14497_v50  ;;  %v13086_v7 = vld [vmem:[#allocation7 + $0x2dc] sm:$0xf]  ;;  %v10818_v12 = vor.u32 %v13022_v51, %v10815_v5 }
 0x5c1   :  { %7890 = vmatpush.bf16.msra.mxu2 %v11458_v40  ;;  %7865 = vmatpush.bf16.msra.mxu0 %v10914_v20  ;;  %v11071_v63 = vld [vmem:[#allocation7 + $0x2f8] sm:$0xf0]  ;;  %v7628_v42 = vpop.f32.mrf.mxu1 }
 0x5c2   :  { %7859 = vmatmul.bf16.vlgmr.msrb.gmra.mxu3 %v14501_v56  ;;  %v13150_v32 = vld [vmem:[#allocation7 + $0x4dc] sm:$0xf]  ;;  %v11074_v18 = vor.u32 %v13086_v7, %v11071_v63 }
 0x5c3   :  { %7903 = vmatpush.bf16.msra.mxu3 %v11714_v16  ;;  %7878 = vmatpush.bf16.msra.mxu1 %v11170_v21  ;;  %v11327_v10 = vld [vmem:[#allocation7 + $0x4f8] sm:$0xf0] }
 0x5c4   :  { %v13214_v40 = vld [vmem:[#allocation7 + $0x6dc] sm:$0xf]  ;;  %v11330_v43 = vor.u32 %v13150_v32, %v11327_v10  ;;  %v7654_v10 = vpop.f32.mrf.mxu3 }
 0x5c5   :  { %7891 = vmatpush.bf16.msra.mxu2 %v11426_v22  ;;  %7866 = vmatpush.bf16.msra.mxu0 %v10882_v29  ;;  %v13014_v16 = vld [vmem:[#allocation7 + $0x9c] sm:$0xf]  ;;  %v11586_v15 = vor.u32 %v13214_v40, %v11583_v11  ;;  %v7640_v22 = vadd.f32 %v7639_v23, %v7627_v38 }
 0x5c6   :  { %v13078_v17 = vld [vmem:[#allocation7 + $0x29c] sm:$0xf]  ;;  %v10786_v36 = vor.u32 %v13014_v16, %v10783_v13 }
 0x5c7   :  { %7904 = vmatpush.bf16.msra.mxu3 %v11682_v25  ;;  %7879 = vmatpush.bf16.msra.mxu1 %v11138_v30  ;;  %v11039_v19 = vld [vmem:[#allocation7 + $0x2b8] sm:$0xf0]  ;;  %v7615_v25 = vpop.f32.mrf.mxu0  ;;  %v14591_v35 = vadd.f32 %v7652_v26, %v7640_v22 }
 0x5c8   :  { %v13142_v20 = vld [vmem:[#allocation7 + $0x49c] sm:$0xf]  ;;  %v11042_v52 = vor.u32 %v13078_v17, %v11039_v19 }
 0x5c9   :  { %7892 = vmatpush.bf16.msra.mxu2 %v11394_v33  ;;  %7867 = vmatpush.bf16.msra.mxu0 %v10850_v2  ;;  %v11295_v21 = vld [vmem:[#allocation7 + $0x4b8] sm:$0xf0] }
 0x5ca   :  { %v13206_v24 = vld [vmem:[#allocation7 + $0x69c] sm:$0xf]  ;;  %v11298_v28 = vor.u32 %v13142_v20, %v11295_v21 }
 0x5cb   :  { %7905 = vmatpush.bf16.msra.mxu3 %v11650_v54  ;;  %7880 = vmatpush.bf16.msra.mxu1 %v11106_v4  ;;  %v11551_v31 = vld [vmem:[#allocation7 + $0x6b8] sm:$0xf0] }
 0x5cc   :  { %v13006_v29 = vld [vmem:[#allocation7 + $0x5c] sm:$0xf]  ;;  %v11554_v47 = vor.u32 %v13206_v24, %v11551_v31 }
 0x5cd   :  { %7893 = vmatpush.bf16.msra.mxu2 %v11362_v34  ;;  %7868 = vmatpush.bf16.msra.mxu0 %v10818_v12  ;;  %v10751_v30 = vld [vmem:[#allocation7 + $0x78] sm:$0xf0] }
 0x5ce   :  { %v13070_v33 = vld [vmem:[#allocation7 + $0x25c] sm:$0xf]  ;;  %v10754_v58 = vor.u32 %v13006_v29, %v10751_v30 }
 0x5cf   :  { %7906 = vmatpush.bf16.msra.mxu3 %v11618_v37  ;;  %7881 = vmatpush.bf16.msra.mxu1 %v11074_v18  ;;  %v11007_v49 = vld [vmem:[#allocation7 + $0x278] sm:$0xf0]  ;;  %v7641_v37 = vpop.f32.mrf.mxu2 }
 0x5d0   :  { %v13134_v48 = vld [vmem:[#allocation7 + $0x45c] sm:$0xf]  ;;  %v11010_v62 = vor.u32 %v13070_v33, %v11007_v49 }
 0x5d1   :  { %7894 = vmatpush.bf16.msra.mxu2 %v11330_v43  ;;  %v11263_v54 = vld [vmem:[#allocation7 + $0x478] sm:$0xf0]  ;;  %7869 = vmatpush.bf16.msra.mxu0 %v10786_v36 }
 0x5d2   :  { %v13198_v0 = vld [vmem:[#allocation7 + $0x65c] sm:$0xf]  ;;  %v11266_v6 = vor.u32 %v13134_v48, %v11263_v54 }
 0x5d3   :  { %7907 = vmatpush.bf16.msra.mxu3 %v11586_v15  ;;  %v11519_v55 = vld [vmem:[#allocation7 + $0x678] sm:$0xf0]  ;;  %7882 = vmatpush.bf16.msra.mxu1 %v11042_v52 }
 0x5d4   :  { %v12998_v59 = vld [vmem:[#allocation7 + $0x1c] sm:$0xf]  ;;  %v11522_v34 = vor.u32 %v13198_v0, %v11519_v55 }
 0x5d5   :  { %v10719_v60 = vld [vmem:[#allocation7 + $0x38] sm:$0xf0]  ;;  %7895 = vmatpush.bf16.msra.mxu2 %v11298_v28  ;;  %7870 = vmatpush.bf16.msra.mxu0 %v10754_v58 }
 0x5d6   :  { %v13062_v2 = vld [vmem:[#allocation7 + $0x21c] sm:$0xf]  ;;  %v10722_v40 = vor.u32 %v12998_v59, %v10719_v60 }
 0x5d7   :  { %v10975_v3 = vld [vmem:[#allocation7 + $0x238] sm:$0xf0]  ;;  %7908 = vmatpush.bf16.msra.mxu3 %v11554_v47  ;;  %7883 = vmatpush.bf16.msra.mxu1 %v11010_v62 }
 0x5d8   :  { %v13126_v4 = vld [vmem:[#allocation7 + $0x41c] sm:$0xf]  ;;  %v10978_v43 = vor.u32 %v13062_v2, %v10975_v3 }
 0x5d9   :  { %v11231_v51 = vld [vmem:[#allocation7 + $0x438] sm:$0xf0]  ;;  %7896 = vmatpush.bf16.msra.mxu2 %v11266_v6  ;;  %7871 = vmatpush.bf16.msra.mxu0 %v10722_v40 }
 0x5da   :  { %v13190_v5 = vld [vmem:[#allocation7 + $0x61c] sm:$0xf]  ;;  %v11234_v16 = vor.u32 %v13126_v4, %v11231_v51 }
 0x5db   :  { %v11487_v7 = vld [vmem:[#allocation7 + $0x638] sm:$0xf0]  ;;  %7909 = vmatpush.bf16.msra.mxu3 %v11522_v34  ;;  %7884 = vmatpush.bf16.msra.mxu1 %v10978_v43 }
 0x5dc   :  { %v13310_v38 = vld [vmem:[#allocation7 + $0x9dc] sm:$0xf]  ;;  %v11490_v15 = vor.u32 %v13190_v5, %v11487_v7  ;;  %7872 = vmatmul.bf16.vlgmr.msra.gmra.mxu0 %v14481_v27  ;;  %v7665_v5 = vpop.f32.mrf.mxu0 }
 0x5dd   :  { %v11967_v63 = vld [vmem:[#allocation7 + $0x9f8] sm:$0xf0]  ;;  %7897 = vmatpush.bf16.msra.mxu2 %v11234_v16 }
 0x5de   :  { %v13374_v32 = vld [vmem:[#allocation7 + $0xbdc] sm:$0xf]  ;;  %v11970_v23 = vor.u32 %v13310_v38, %v11967_v63  ;;  %7885 = vmatmul.bf16.vlgmr.msra.gmra.mxu1 %v14485_v46  ;;  %v7678_v38 = vpop.f32.mrf.mxu1 }
 0x5df   :  { %v12223_v11 = vld [vmem:[#allocation7 + $0xbf8] sm:$0xf0]  ;;  %7910 = vmatpush.bf16.msra.mxu3 %v11490_v15 }
 0x5e0   :  { %v13438_v12 = vld [vmem:[#allocation7 + $0xddc] sm:$0xf]  ;;  %v12226_v19 = vor.u32 %v13374_v32, %v12223_v11  ;;  %7916 = vmatpush.bf16.msrb.mxu0 %v11970_v23  ;;  %7898 = vmatmul.bf16.vlgmr.msra.gmra.mxu2 %v14483_v61 }
 0x5e1   :  { %v12479_v18 = vld [vmem:[#allocation7 + $0xdf8] sm:$0xf0] }
 0x5e2   :  { %v13502_v13 = vld [vmem:[#allocation7 + $0xfdc] sm:$0xf]  ;;  %v12482_v20 = vor.u32 %v13438_v12, %v12479_v18  ;;  %7929 = vmatpush.bf16.msrb.mxu1 %v12226_v19  ;;  %7911 = vmatmul.bf16.vlgmr.msra.gmra.mxu3 %v14487_v45  ;;  %v7666_v45 = vadd.f32 %v7665_v5, %v14479_v44 }
 0x5e3   :  { %v12735_v17 = vld [vmem:[#allocation7 + $0xff8] sm:$0xf0] }
 0x5e4   :  { %v13302_v21 = vld [vmem:[#allocation7 + $0x99c] sm:$0xf]  ;;  %v12738_v24 = vor.u32 %v13502_v13, %v12735_v17  ;;  %7942 = vmatpush.bf16.msrb.mxu2 %v12482_v20  ;;  %v14598_v18 = vadd.f32 %v7678_v38, %v7666_v45 }
 0x5e5   :  { %v11935_v22 = vld [vmem:[#allocation7 + $0x9b8] sm:$0xf0] }
 0x5e6   :  { %v13366_v26 = vld [vmem:[#allocation7 + $0xb9c] sm:$0xf]  ;;  %v11938_v28 = vor.u32 %v13302_v21, %v11935_v22  ;;  %7955 = vmatpush.bf16.msrb.mxu3 %v12738_v24  ;;  %v14600_v24 = vpop.f32.mrf.mxu2 }
 0x5e7   :  { %v12191_v31 = vld [vmem:[#allocation7 + $0xbb8] sm:$0xf0] }
 0x5e8   :  { %v13430_v25 = vld [vmem:[#allocation7 + $0xd9c] sm:$0xf]  ;;  %v12194_v29 = vor.u32 %v13366_v26, %v12191_v31  ;;  %7917 = vmatpush.bf16.msrb.mxu0 %v11938_v28 }
 0x5e9   :  { %v12447_v36 = vld [vmem:[#allocation7 + $0xdb8] sm:$0xf0] }
 0x5ea   :  { %v13494_v42 = vld [vmem:[#allocation7 + $0xf9c] sm:$0xf]  ;;  %v12450_v30 = vor.u32 %v13430_v25, %v12447_v36  ;;  %7930 = vmatpush.bf16.msrb.mxu1 %v12194_v29  ;;  %v7667_v29 = vpop.f32.mrf.mxu0 }
 0x5eb   :  { %v12703_v52 = vld [vmem:[#allocation7 + $0xfb8] sm:$0xf0] }
 0x5ec   :  { %v13294_v33 = vld [vmem:[#allocation7 + $0x95c] sm:$0xf]  ;;  %v12706_v48 = vor.u32 %v13494_v42, %v12703_v52  ;;  %7943 = vmatpush.bf16.msrb.mxu2 %v12450_v30  ;;  %v14602_v42 = vpop.f32.mrf.mxu3 }
 0x5ed   :  { %v11903_v47 = vld [vmem:[#allocation7 + $0x978] sm:$0xf0] }
 0x5ee   :  { %v13358_v49 = vld [vmem:[#allocation7 + $0xb5c] sm:$0xf]  ;;  %v11906_v60 = vor.u32 %v13294_v33, %v11903_v47  ;;  %7956 = vmatpush.bf16.msrb.mxu3 %v12706_v48  ;;  %v7680_v33 = vpop.f32.mrf.mxu1  ;;  %v7693_v45 = vpop.f32.mrf.mxu2 }
 0x5ef   :  { %v12159_v54 = vld [vmem:[#allocation7 + $0xb78] sm:$0xf0] }
 0x5f0   :  { %v13422_v0 = vld [vmem:[#allocation7 + $0xd5c] sm:$0xf]  ;;  %v12162_v62 = vor.u32 %v13358_v49, %v12159_v54  ;;  %7918 = vmatpush.bf16.msrb.mxu0 %v11906_v60 }
 0x5f1   :  { %v12415_v55 = vld [vmem:[#allocation7 + $0xd78] sm:$0xf0] }
 0x5f2   :  { %v13486_v58 = vld [vmem:[#allocation7 + $0xf5c] sm:$0xf]  ;;  %v12418_v6 = vor.u32 %v13422_v0, %v12415_v55  ;;  %7931 = vmatpush.bf16.msrb.mxu1 %v12162_v62 }
 0x5f3   :  { %v12671_v59 = vld [vmem:[#allocation7 + $0xf78] sm:$0xf0] }
 0x5f4   :  { %v13286_v2 = vld [vmem:[#allocation7 + $0x91c] sm:$0xf]  ;;  %v12674_v4 = vor.u32 %v13486_v58, %v12671_v59  ;;  %7944 = vmatpush.bf16.msrb.mxu2 %v12418_v6 }
 0x5f5   :  { %v11871_v27 = vld [vmem:[#allocation7 + $0x938] sm:$0xf0] }
 0x5f6   :  { %v13350_v3 = vld [vmem:[#allocation7 + $0xb1c] sm:$0xf]  ;;  %v11874_v37 = vor.u32 %v13286_v2, %v11871_v27  ;;  %7957 = vmatpush.bf16.msrb.mxu3 %v12674_v4  ;;  %v14612_v29 = vpop.f32.mrf.mxu2 }
 0x5f7   :  { %v12127_v34 = vld [vmem:[#allocation7 + $0xb38] sm:$0xf0] }
 0x5f8   :  { %v13414_v51 = vld [vmem:[#allocation7 + $0xd1c] sm:$0xf]  ;;  %v12130_v63 = vor.u32 %v13350_v3, %v12127_v34  ;;  %7919 = vmatpush.bf16.msrb.mxu0 %v11874_v37 }
 0x5f9   :  { %v12383_v61 = vld [vmem:[#allocation7 + $0xd38] sm:$0xf0] }
 0x5fa   :  { %v13478_v46 = vld [vmem:[#allocation7 + $0xf1c] sm:$0xf]  ;;  %v12386_v32 = vor.u32 %v13414_v51, %v12383_v61  ;;  %7932 = vmatpush.bf16.msrb.mxu1 %v12130_v63  ;;  %v7706_v63 = vpop.f32.mrf.mxu3 }
 0x5fb   :  { %v12639_v7 = vld [vmem:[#allocation7 + $0xf38] sm:$0xf0] }
 0x5fc   :  { %v13278_v10 = vld [vmem:[#allocation7 + $0x8dc] sm:$0xf]  ;;  %v12642_v12 = vor.u32 %v13478_v46, %v12639_v7  ;;  %7945 = vmatpush.bf16.msrb.mxu2 %v12386_v32 }
 0x5fd   :  { %v11839_v40 = vld [vmem:[#allocation7 + $0x8f8] sm:$0xf0] }
 0x5fe   :  { %v13342_v11 = vld [vmem:[#allocation7 + $0xadc] sm:$0xf]  ;;  %v11842_v44 = vor.u32 %v13278_v10, %v11839_v40  ;;  %7958 = vmatpush.bf16.msrb.mxu3 %v12642_v12  ;;  %v14026_v12 = vld [vmem:[#allocation11 + $0x38] sm:$0xff] }
 0x5ff   :  { %v12095_v43 = vld [vmem:[#allocation7 + $0xaf8] sm:$0xf0] }
 0x600   :  { %v13406_v16 = vld [vmem:[#allocation7 + $0xcdc] sm:$0xf]  ;;  %v12098_v23 = vor.u32 %v13342_v11, %v12095_v43  ;;  %7920 = vmatpush.bf16.msrb.mxu0 %v11842_v44  ;;  %v14034_v43 = vld [vmem:[#allocation11 + $0x78] sm:$0xff] }
 0x601   :  { %v12351_v13 = vld [vmem:[#allocation7 + $0xcf8] sm:$0xf0] }
 0x602   :  { %v13470_v17 = vld [vmem:[#allocation7 + $0xedc] sm:$0xf]  ;;  %v12354_v19 = vor.u32 %v13406_v16, %v12351_v13  ;;  %7933 = vmatpush.bf16.msrb.mxu1 %v12098_v23  ;;  %v14042_v16 = vld [vmem:[#allocation11 + $0xb8] sm:$0xff] }
 0x603   :  { %v12607_v15 = vld [vmem:[#allocation7 + $0xef8] sm:$0xf0]  ;;  %v14050_v13 = vld [vmem:[#allocation11 + $0xf8] sm:$0xff] }
 0x604   :  { %v13270_v20 = vld [vmem:[#allocation7 + $0x89c] sm:$0xf]  ;;  %v12610_v26 = vor.u32 %v13470_v17, %v12607_v15  ;;  %7946 = vmatpush.bf16.msrb.mxu2 %v12354_v19  ;;  %v14024_v19 = vld [vmem:[#allocation11 + $0x28] sm:$0xff] }
 0x605   :  { %v11807_v21 = vld [vmem:[#allocation7 + $0x8b8] sm:$0xf0] }
 0x606   :  { %v13334_v22 = vld [vmem:[#allocation7 + $0xa9c] sm:$0xf]  ;;  %v11810_v30 = vor.u32 %v13270_v20, %v11807_v21  ;;  %7959 = vmatpush.bf16.msrb.mxu3 %v12610_v26  ;;  %v14032_v20 = vld [vmem:[#allocation11 + $0x68] sm:$0xff]  ;;  %v14608_v26 = vpop.f32.mrf.mxu0 }
 0x607   :  { %v12063_v31 = vld [vmem:[#allocation7 + $0xab8] sm:$0xf0]  ;;  %v14040_v21 = vld [vmem:[#allocation11 + $0xa8] sm:$0xff] }
 0x608   :  { %v13398_v25 = vld [vmem:[#allocation7 + $0xc9c] sm:$0xf]  ;;  %v12066_v47 = vor.u32 %v13334_v22, %v12063_v31  ;;  %7921 = vmatpush.bf16.msrb.mxu0 %v11810_v30  ;;  %v14048_v22 = vld [vmem:[#allocation11 + $0xe8] sm:$0xff]  ;;  %v14023_v31 = vld [vmem:[#allocation11 + $0x20] sm:$0xff]  ;;  %v14614_v30 = vpop.f32.mrf.mxu3 }
 0x609   :  { %v12319_v36 = vld [vmem:[#allocation7 + $0xcb8] sm:$0xf0] }
 0x60a   :  { %v13462_v52 = vld [vmem:[#allocation7 + $0xe9c] sm:$0xf]  ;;  %v12322_v49 = vor.u32 %v13398_v25, %v12319_v36  ;;  %7934 = vmatpush.bf16.msrb.mxu1 %v12066_v47  ;;  %v14022_v25 = vld [vmem:[#allocation11 + $0x18] sm:$0xff] }
 0x60b   :  { %v12575_v28 = vld [vmem:[#allocation7 + $0xeb8] sm:$0xf0]  ;;  %v14030_v36 = vld [vmem:[#allocation11 + $0x58] sm:$0xff] }
 0x60c   :  { %v13262_v48 = vld [vmem:[#allocation7 + $0x85c] sm:$0xf]  ;;  %v12578_v55 = vor.u32 %v13462_v52, %v12575_v28  ;;  %7947 = vmatpush.bf16.msrb.mxu2 %v12322_v49  ;;  %v14038_v52 = vld [vmem:[#allocation11 + $0x98] sm:$0xff] }
 0x60d   :  { %v11775_v54 = vld [vmem:[#allocation7 + $0x878] sm:$0xf0]  ;;  %v14046_v28 = vld [vmem:[#allocation11 + $0xd8] sm:$0xff] }
 0x60e   :  { %v13326_v0 = vld [vmem:[#allocation7 + $0xa5c] sm:$0xf]  ;;  %v11778_v2 = vor.u32 %v13262_v48, %v11775_v54  ;;  %7960 = vmatpush.bf16.msrb.mxu3 %v12578_v55  ;;  %v7719_v33 = vpop.f32.mrf.mxu0 }
 0x60f   :  { %v12031_v58 = vld [vmem:[#allocation7 + $0xa78] sm:$0xf0]  ;;  %v14052_v33 = vld [vmem:[#allocation11 + $0x108] sm:$0xff] }
 0x610   :  { %v13390_v59 = vld [vmem:[#allocation7 + $0xc5c] sm:$0xf]  ;;  %v12034_v27 = vor.u32 %v13326_v0, %v12031_v58  ;;  %7922 = vmatpush.bf16.msrb.mxu0 %v11778_v2  ;;  %v14616_v0 = vld [vmem:[#allocation10] sm:$0xff]  ;;  %v14020_v58 = vld [vmem:[#allocation11 + $0x8] sm:$0xff] }
 0x611   :  { %v12287_v60 = vld [vmem:[#allocation7 + $0xc78] sm:$0xf0]  ;;  %v7972_v2 = vperm.slane %v14616_v0, 2 }
 0x612   :  { %v13454_v62 = vld [vmem:[#allocation7 + $0xe5c] sm:$0xf]  ;;  %v12290_v3 = vor.u32 %v13390_v59, %v12287_v60  ;;  %7935 = vmatpush.bf16.msrb.mxu1 %v12034_v27  ;;  %v7970_v59 = vperm.slane %v14616_v0, 0  ;;  %v14028_v60 = vld [vmem:[#allocation11 + $0x48] sm:$0xff] }
 0x613   :  { %v12543_v6 = vld [vmem:[#allocation7 + $0xe78] sm:$0xf0]  ;;  %v14044_v27 = vld [vmem:[#allocation11 + $0xc8] sm:$0xff]  ;;  %v7988_v45 = vadd.f32 %v7972_v2, %v14563_v41  ;;  %v14067_v2 = vld [vmem:[#allocation11 + $0x180] sm:$0xff] }
 0x614   :  { %v13254_v4 = vld [vmem:[#allocation7 + $0x81c] sm:$0xf]  ;;  %v12546_v61 = vor.u32 %v13454_v62, %v12543_v6  ;;  %7948 = vmatpush.bf16.msrb.mxu2 %v12290_v3  ;;  %v14036_v62 = vld [vmem:[#allocation11 + $0x88] sm:$0xff]  ;;  %v7971_v6 = vperm.slane %v14616_v0, 1  ;;  %v7745_v3 = vpop.f32.mrf.mxu2 }
 0x615   :  { %v11743_v34 = vld [vmem:[#allocation7 + $0x838] sm:$0xf0] }
 0x616   :  { %v13318_v51 = vld [vmem:[#allocation7 + $0xa1c] sm:$0xf]  ;;  %v11746_v32 = vor.u32 %v13254_v4, %v11743_v34  ;;  %7961 = vmatpush.bf16.msrb.mxu3 %v12546_v61  ;;  %v7973_v4 = vperm.slane %v14616_v0, 3  ;;  %v7758_v34 = vpop.f32.mrf.mxu3  ;;  %v7986_v61 = vadd.f32 %v7970_v59, %v14535_v57  ;;  %v14051_v59 = vld [vmem:[#allocation11 + $0x100] sm:$0xff] }
 0x617   :  { %v11999_v5 = vld [vmem:[#allocation7 + $0xa38] sm:$0xf0] }
 0x618   :  { %v13382_v46 = vld [vmem:[#allocation7 + $0xc1c] sm:$0xf]  ;;  %v12002_v10 = vor.u32 %v13318_v51, %v11999_v5  ;;  %7923 = vmatpush.bf16.msrb.mxu0 %v11746_v32  ;;  %v14019_v51 = vld [vmem:[#allocation11] sm:$0xff]  ;;  %v7989_v63 = vadd.f32 %v7973_v4, %v14577_v8  ;;  %v14066_v32 = vld [vmem:[#allocation11 + $0x178] sm:$0xff] }
 0x619   :  { %v12255_v7 = vld [vmem:[#allocation7 + $0xc38] sm:$0xf0]  ;;  %v14027_v5 = vld [vmem:[#allocation11 + $0x40] sm:$0xff]  ;;  %v14056_v8 = vld [vmem:[#allocation11 + $0x128] sm:$0xff] }
 0x61a   :  { %v13446_v37 = vld [vmem:[#allocation7 + $0xe1c] sm:$0xf]  ;;  %v12258_v40 = vor.u32 %v13382_v46, %v12255_v7  ;;  %7936 = vmatpush.bf16.msrb.mxu1 %v12002_v10  ;;  %v14035_v46 = vld [vmem:[#allocation11 + $0x80] sm:$0xff]  ;;  %v7987_v7 = vadd.f32 %v7971_v6, %v14549_v9  ;;  %v7994_v10 = vpack.c.bf16 %v7986_v61, %v7986_v61 }
 0x61b   :  { %v12511_v38 = vld [vmem:[#allocation7 + $0xe38] sm:$0xf0]  ;;  %7924 = vmatmul.bf16.vlgmr.msrb.gmra.mxu0 %v14495_v39  ;;  %v14610_v39 = vpop.f32.mrf.mxu1 }
 0x61c   :  { %v12514_v11 = vor.u32 %v13446_v37, %v12511_v38  ;;  %7949 = vmatpush.bf16.msrb.mxu2 %v12258_v40  ;;  %8518 = vmatpush.bf16.msra.mxu0 %v14026_v12  ;;  %v14025_v17 = vld [vmem:[#allocation11 + $0x30] sm:$0xff]  ;;  %v14043_v37 = vld [vmem:[#allocation11 + $0xc0] sm:$0xff]  ;;  %v14058_v38 = vld [vmem:[#allocation11 + $0x138] sm:$0xff]  ;;  %v7995_v57 = vpack.c.bf16 %v7987_v7, %v7987_v7 }
 0x61d   :  { %v14033_v15 = vld [vmem:[#allocation11 + $0x70] sm:$0xff]  ;;  %7937 = vmatmul.bf16.vlgmr.msrb.gmra.mxu1 %v14499_v53  ;;  %v14031_v53 = vld [vmem:[#allocation11 + $0x60] sm:$0xff]  ;;  %v14074_v40 = vld [vmem:[#allocation11 + $0x1b8] sm:$0xff] }
 0x61e   :  { %7962 = vmatpush.bf16.msrb.mxu3 %v12514_v11  ;;  %8531 = vmatpush.bf16.msra.mxu1 %v14034_v43  ;;  %v14041_v44 = vld [vmem:[#allocation11 + $0xb0] sm:$0xff]  ;;  %v7996_v11 = vpack.c.bf16 %v7988_v45, %v7988_v45  ;;  %v7997_v43 = vpack.c.bf16 %v7989_v63, %v7989_v63 }
 0x61f   :  { %v14049_v23 = vld [vmem:[#allocation11 + $0xf0] sm:$0xff]  ;;  %7950 = vmatmul.bf16.vlgmr.msrb.gmra.mxu2 %v14497_v50  ;;  %v14039_v50 = vld [vmem:[#allocation11 + $0xa0] sm:$0xff] }
 0x620   :  { %8544 = vmatpush.bf16.msra.mxu2 %v14042_v16  ;;  %8519 = vmatpush.bf16.msra.mxu0 %v14025_v17  ;;  %v14021_v47 = vld [vmem:[#allocation11 + $0x10] sm:$0xff]  ;;  %v14064_v16 = vld [vmem:[#allocation11 + $0x168] sm:$0xff]  ;;  %v7769_v17 = vpop.f32.mrf.mxu0 }
 0x621   :  { %7963 = vmatmul.bf16.vlgmr.msrb.gmra.mxu3 %v14501_v56  ;;  %v14047_v56 = vld [vmem:[#allocation11 + $0xe0] sm:$0xff]  ;;  %v14029_v48 = vld [vmem:[#allocation11 + $0x50] sm:$0xff]  ;;  %v7770_v6 = vadd.f32 %v7769_v17, %v14508_v1  ;;  %v7976_v1 = vperm.slane %v14616_v0, 6  ;;  %v14076_v17 = vld [vmem:[#allocation11 + $0x1c8] sm:$0xff] }
 0x622   :  { %8557 = vmatpush.bf16.msra.mxu3 %v14050_v13  ;;  %8532 = vmatpush.bf16.msra.mxu1 %v14033_v15  ;;  %v14037_v54 = vld [vmem:[#allocation11 + $0x90] sm:$0xff]  ;;  %v7692_v13 = vadd.f32 %v14600_v24, %v14598_v18  ;;  %v14072_v15 = vld [vmem:[#allocation11 + $0x1a8] sm:$0xff]  ;;  %v7808_v18 = vpop.f32.mrf.mxu3 }
 0x623   :  { %v7732_v49 = vpop.f32.mrf.mxu1  ;;  %v14045_v55 = vld [vmem:[#allocation11 + $0xd0] sm:$0xff] }
 0x624   :  { %8545 = vmatpush.bf16.msra.mxu2 %v14041_v44  ;;  %8520 = vmatpush.bf16.msra.mxu0 %v14024_v19  ;;  %v14057_v12 = vld [vmem:[#allocation11 + $0x130] sm:$0xff]  ;;  %v14055_v44 = vld [vmem:[#allocation11 + $0x120] sm:$0xff]  ;;  %v14060_v49 = vld [vmem:[#allocation11 + $0x148] sm:$0xff] }
 0x625   :  { %v14065_v9 = vld [vmem:[#allocation11 + $0x170] sm:$0xff]  ;;  %v14063_v19 = vld [vmem:[#allocation11 + $0x160] sm:$0xff] }
 0x626   :  { %8558 = vmatpush.bf16.msra.mxu3 %v14049_v23  ;;  %8533 = vmatpush.bf16.msra.mxu1 %v14032_v20  ;;  %v14073_v41 = vld [vmem:[#allocation11 + $0x1b0] sm:$0xff]  ;;  %v7705_v20 = vadd.f32 %v14602_v42, %v7692_v13 }
 0x627   :  { %v14061_v42 = vld [vmem:[#allocation11 + $0x150] sm:$0xff] }
 0x628   :  { %8546 = vmatpush.bf16.msra.mxu2 %v14040_v21  ;;  %8521 = vmatpush.bf16.msra.mxu0 %v14023_v31  ;;  %v14071_v21 = vld [vmem:[#allocation11 + $0x1a0] sm:$0xff]  ;;  %v14054_v31 = vld [vmem:[#allocation11 + $0x118] sm:$0xff]  ;;  %v7771_v24 = vpop.f32.mrf.mxu0  ;;  %v14077_v13 = vld [vmem:[#allocation11 + $0x1d0] sm:$0xff] }
 0x62a   :  { %8559 = vmatpush.bf16.msra.mxu3 %v14048_v22  ;;  %8534 = vmatpush.bf16.msra.mxu1 %v14031_v53  ;;  %v7718_v22 = vadd.f32 %v14608_v26, %v7705_v20  ;;  %v14062_v53 = vld [vmem:[#allocation11 + $0x158] sm:$0xff]  ;;  %v14069_v26 = vld [vmem:[#allocation11 + $0x190] sm:$0xff]  ;;  %v14075_v20 = vld [vmem:[#allocation11 + $0x1c0] sm:$0xff] }
 0x62b   :  { %v7782_v23 = vpop.f32.mrf.mxu1 }
 0x62c   :  { %8547 = vmatpush.bf16.msra.mxu2 %v14039_v50  ;;  %8522 = vmatpush.bf16.msra.mxu0 %v14022_v25  ;;  %v7795_v50 = vpop.f32.mrf.mxu2  ;;  %v7731_v25 = vadd.f32 %v14610_v39, %v7718_v22  ;;  %v7783_v3 = vadd.f32 %v7782_v23, %v7770_v6 }
 0x62e   :  { %8560 = vmatpush.bf16.msra.mxu3 %v14047_v56  ;;  %8535 = vmatpush.bf16.msra.mxu1 %v14030_v36  ;;  %v14070_v56 = vld [vmem:[#allocation11 + $0x198] sm:$0xff]  ;;  %v14053_v36 = vld [vmem:[#allocation11 + $0x110] sm:$0xff]  ;;  %v7796_v4 = vadd.f32 %v7795_v50, %v7783_v3 }
 0x630   :  { %8548 = vmatpush.bf16.msra.mxu2 %v14038_v52  ;;  %8523 = vmatpush.bf16.msra.mxu0 %v14021_v47  ;;  %v7974_v47 = vperm.slane %v14616_v0, 4  ;;  %v7809_v34 = vadd.f32 %v7808_v18, %v7796_v4 }
 0x632   :  { %8561 = vmatpush.bf16.msra.mxu3 %v14046_v28  ;;  %8536 = vmatpush.bf16.msra.mxu1 %v14029_v48  ;;  %v7744_v28 = vadd.f32 %v14612_v29, %v7731_v25  ;;  %v7990_v29 = vadd.f32 %v7974_v47, %v14591_v35 }
 0x633   :  { %v7784_v52 = vpop.f32.mrf.mxu1 }
 0x634   :  { %8549 = vmatpush.bf16.msra.mxu2 %v14037_v54  ;;  %8524 = vmatpush.bf16.msra.mxu0 %v14020_v58  ;;  %v7757_v48 = vadd.f32 %v14614_v30, %v7744_v28  ;;  %v7975_v54 = vperm.slane %v14616_v0, 5  ;;  %v7797_v39 = vpop.f32.mrf.mxu2  ;;  %v14068_v58 = vld [vmem:[#allocation11 + $0x188] sm:$0xff] }
 0x636   :  { %8562 = vmatpush.bf16.msra.mxu3 %v14045_v55  ;;  %8537 = vmatpush.bf16.msra.mxu1 %v14028_v60  ;;  %v7810_v55 = vpop.f32.mrf.mxu3  ;;  %v14059_v60 = vld [vmem:[#allocation11 + $0x140] sm:$0xff] }
 0x638   :  { %8550 = vmatpush.bf16.msra.mxu2 %v14036_v62  ;;  %8525 = vmatpush.bf16.msra.mxu0 %v14019_v51  ;;  %v7991_v62 = vadd.f32 %v7975_v54, %v7757_v48 }
 0x639   :  { %v7821_v51 = vpop.f32.mrf.mxu0 }
 0x63a   :  { %8563 = vmatpush.bf16.msra.mxu3 %v14044_v27  ;;  %8538 = vmatpush.bf16.msra.mxu1 %v14027_v5  ;;  %v7998_v27 = vpack.c.bf16 %v7990_v29, %v7990_v29  ;;  %v7999_v30 = vpack.c.bf16 %v7991_v62, %v7991_v62  ;;  %v7822_v35 = vadd.f32 %v7821_v51, %v7809_v34 }
 0x63b   :  { %8526 = vmatmul.bf16.vlgmr.msra.gmra.mxu0 %v7994_v10  ;;  %v7834_v61 = vpop.f32.mrf.mxu1  ;;  %v14081_v10 = vld [vmem:[#allocation11 + $0x1f0] sm:$0xff] }
 0x63c   :  { %8551 = vmatpush.bf16.msra.mxu2 %v14035_v46  ;;  %8570 = vmatpush.bf16.msrb.mxu0 %v14058_v38  ;;  %v7835_v5 = vadd.f32 %v7834_v61, %v7822_v35  ;;  %v14082_v38 = vld [vmem:[#allocation11 + $0x1f8] sm:$0xff] }
 0x63d   :  { %8539 = vmatmul.bf16.vlgmr.msra.gmra.mxu1 %v7995_v57 }
 0x63e   :  { %8564 = vmatpush.bf16.msra.mxu3 %v14043_v37  ;;  %8583 = vmatpush.bf16.msrb.mxu1 %v14066_v32 }
 0x63f   :  { %8552 = vmatmul.bf16.vlgmr.msra.gmra.mxu2 %v7996_v11  ;;  %v14080_v11 = vld [vmem:[#allocation11 + $0x1e8] sm:$0xff] }
 0x640   :  { %8596 = vmatpush.bf16.msrb.mxu2 %v14074_v40  ;;  %8571 = vmatpush.bf16.msrb.mxu0 %v14057_v12 }
 0x641   :  { %8565 = vmatmul.bf16.vlgmr.msra.gmra.mxu3 %v7997_v43  ;;  %v7823_v37 = vpop.f32.mrf.mxu0 }
 0x642   :  { %8584 = vmatpush.bf16.msrb.mxu1 %v14065_v9  ;;  %8609 = vmatpush.bf16.msrb.mxu3 %v14082_v38  ;;  %v14079_v9 = vld [vmem:[#allocation11 + $0x1e0] sm:$0xff] }
 0x643   :  { %v7847_v46 = vpop.f32.mrf.mxu2  ;;  %v7836_v63 = vpop.f32.mrf.mxu1 }
 0x644   :  { %8597 = vmatpush.bf16.msrb.mxu2 %v14073_v41  ;;  %8572 = vmatpush.bf16.msrb.mxu0 %v14056_v8  ;;  %v7848_v7 = vadd.f32 %v7847_v46, %v7835_v5  ;;  %v14078_v41 = vld [vmem:[#allocation11 + $0x1d8] sm:$0xff] }
 0x645   :  { %v7860_v45 = vpop.f32.mrf.mxu3 }
 0x646   :  { %8585 = vmatpush.bf16.msrb.mxu1 %v14064_v16  ;;  %v7861_v32 = vadd.f32 %v7860_v45, %v7848_v7  ;;  %8610 = vmatpush.bf16.msrb.mxu3 %v14081_v10 }
 0x648   :  { %8598 = vmatpush.bf16.msrb.mxu2 %v14072_v15  ;;  %8573 = vmatpush.bf16.msrb.mxu0 %v14055_v44  ;;  %v7992_v40 = vadd.f32 %v7976_v1, %v7861_v32 }
 0x64a   :  { %8586 = vmatpush.bf16.msrb.mxu1 %v14063_v19  ;;  %v8000_v57 = vpack.c.bf16 %v7992_v40, %v7992_v40  ;;  %8611 = vmatpush.bf16.msrb.mxu3 %v14080_v11 }
 0x64b   :  { %v7849_v12 = vpop.f32.mrf.mxu2 }
 0x64c   :  { %8599 = vmatpush.bf16.msrb.mxu2 %v14071_v21  ;;  %8574 = vmatpush.bf16.msrb.mxu0 %v14054_v31 }
 0x64d   :  { %v7862_v43 = vpop.f32.mrf.mxu3 }
 0x64e   :  { %8587 = vmatpush.bf16.msrb.mxu1 %v14062_v53  ;;  %8612 = vmatpush.bf16.msrb.mxu3 %v14079_v9 }
 0x650   :  { %8600 = vmatpush.bf16.msrb.mxu2 %v14070_v56  ;;  %8575 = vmatpush.bf16.msrb.mxu0 %v14053_v36 }
 0x652   :  { %8588 = vmatpush.bf16.msrb.mxu1 %v14061_v42  ;;  %8613 = vmatpush.bf16.msrb.mxu3 %v14078_v41 }
 0x654   :  { %8601 = vmatpush.bf16.msrb.mxu2 %v14069_v26  ;;  %8576 = vmatpush.bf16.msrb.mxu0 %v14052_v33  ;;  %v7977_v26 = vperm.slane %v14616_v0, 7 }
 0x656   :  { %8589 = vmatpush.bf16.msrb.mxu1 %v14060_v49  ;;  %8614 = vmatpush.bf16.msrb.mxu3 %v14077_v13 }
 0x658   :  { %8602 = vmatpush.bf16.msrb.mxu2 %v14068_v58  ;;  %8577 = vmatpush.bf16.msrb.mxu0 %v14051_v59 }
 0x659   :  { %v7873_v8 = vpop.f32.mrf.mxu0 }
 0x65a   :  { %8590 = vmatpush.bf16.msrb.mxu1 %v14059_v60  ;;  %8615 = vmatpush.bf16.msrb.mxu3 %v14076_v17  ;;  %v7874_v31 = vadd.f32 %v7873_v8, %v14521_v14  ;;  %v14095_v14 = vld [vmem:[#allocation13] ss:$0 sm:$0xff] }
 0x65b   :  { %8578 = vmatmul.bf16.vlgmr.msrb.gmra.mxu0 %v7998_v27  ;;  %v7886_v16 = vpop.f32.mrf.mxu1 }
 0x65c   :  { %8603 = vmatpush.bf16.msrb.mxu2 %v14067_v2  ;;  %v7887_v53 = vadd.f32 %v7886_v16, %v7874_v31 }
 0x65d   :  { %8591 = vmatmul.bf16.vlgmr.msrb.gmra.mxu1 %v7999_v30 }
 0x65e   :  { %8616 = vmatpush.bf16.msrb.mxu3 %v14075_v20 }
 0x65f   :  { %8604 = vmatmul.bf16.vlgmr.msrb.gmra.mxu2 %v8000_v57 }
 0x661   :  { %v7875_v23 = vpop.f32.mrf.mxu0 }
 0x663   :  { %v7899_v15 = vpop.f32.mrf.mxu2  ;;  %v7888_v19 = vpop.f32.mrf.mxu1 }
 0x664   :  { %v7900_v50 = vadd.f32 %v7899_v15, %v7887_v53 }
 0x665   :  { %v7912_v44 = vpop.f32.mrf.mxu3 }
 0x666   :  { %v7913_v18 = vadd.f32 %v7912_v44, %v7900_v50 }
 0x66b   :  { %v7901_v21 = vpop.f32.mrf.mxu2 }
 0x66d   :  { %v7914_v22 = vpop.f32.mrf.mxu3 }
 0x698   :  { %v7925_v24 = vpop.f32.mrf.mxu0 }
 0x699   :  { %v7926_v25 = vadd.f32 %v7925_v24, %v7913_v18 }
 0x69a   :  { %v7938_v56 = vpop.f32.mrf.mxu1 }
 0x69b   :  { %v7939_v36 = vadd.f32 %v7938_v56, %v7926_v25 }
 0x6a0   :  { %v7927_v33 = vpop.f32.mrf.mxu0 }
 0x6a2   :  { %v7951_v52 = vpop.f32.mrf.mxu2  ;;  %v7940_v47 = vpop.f32.mrf.mxu1 }
 0x6a3   :  { %v7952_v42 = vadd.f32 %v7951_v52, %v7939_v36 }
 0x6a4   :  { %v7964_v28 = vpop.f32.mrf.mxu3 }
 0x6a5   :  { %v7965_v49 = vadd.f32 %v7964_v28, %v7952_v42 }
 0x6a7   :  { %v7993_v48 = vadd.f32 %v7977_v26, %v7965_v49 }
 0x6a9   :  { %v8001_v54 = vpack.c.bf16 %v7993_v48, %v7993_v48 }
 0x6aa   :  { %v7953_v39 = vpop.f32.mrf.mxu2 }
 0x6ab   :  { %8617 = vmatmul.bf16.vlgmr.msrb.gmra.mxu3 %v8001_v54 }
 0x6ac   :  { %v7966_v55 = vpop.f32.mrf.mxu3 }
 0x6b8   :  { %v8527_v58 = vpop.f32.mrf.mxu0 }
 0x6b9   :  { %v8528_v59 = vadd.f32 %v14095_v14, %v8527_v58 }
 0x6ba   :  { %v8540_v29 = vpop.f32.mrf.mxu1 }
 0x6bb   :  { %v8541_v60 = vadd.f32 %v8540_v29, %v8528_v59 }
 0x6c0   :  { %v8529_v27 = vpop.f32.mrf.mxu0 }
 0x6c2   :  { %v8553_v62 = vpop.f32.mrf.mxu2  ;;  %v8542_v30 = vpop.f32.mrf.mxu1 }
 0x6c3   :  { %v8554_v6 = vadd.f32 %v8553_v62, %v8541_v60 }
 0x6c4   :  { %v8566_v2 = vpop.f32.mrf.mxu3 }
 0x6c5   :  { %v8567_v3 = vadd.f32 %v8566_v2, %v8554_v6 }
 0x6ca   :  { %v8555_v0 = vpop.f32.mrf.mxu2 }
 0x6cc   :  { %v8568_v4 = vpop.f32.mrf.mxu3 }
 0x6d8   :  { %v8579_v34 = vpop.f32.mrf.mxu0 }
 0x6d9   :  { %v8580_v51 = vadd.f32 %v8579_v34, %v8567_v3 }
 0x6da   :  { %v8592_v61 = vpop.f32.mrf.mxu1 }
 0x6db   :  { %v8593_v35 = vadd.f32 %v8592_v61, %v8580_v51 }
 0x6e0   :  { %v8581_v5 = vpop.f32.mrf.mxu0 }
 0x6e2   :  { %v8594_v46 = vpop.f32.mrf.mxu1  ;;  %v8605_v7 = vpop.f32.mrf.mxu2 }
 0x6e3   :  { %v8606_v1 = vadd.f32 %v8605_v7, %v8593_v35 }
 0x6ea   :  { %v8607_v45 = vpop.f32.mrf.mxu2 }
 0x72e   :  { %v8618_v37 = vpop.f32.mrf.mxu3 }
 0x72f   :  { %v8619_v38 = vadd.f32 %v8618_v37, %v8606_v1 }
 0x731   :  { %8622 = vst [vmem:[#allocation14] sm:$0xff] %v8619_v38 }
 0x732   :  { %8633 = dma.vmem_to_hbm [thread:$0]  %s8629_s6, 128, %s8631_s1, [#allocation4]  }
 0x736   :  { %v8620_v63 = vpop.f32.mrf.mxu3 }
 0x737   :  { %14296 = dma.done.wait [#allocation4], 128  }
 0x738   :  { %14297 = vsyncadd [#allocation4], 4294967168 }
 0x739   :  { %8638 = vsyncpa [#allocation3], 1 }
 0x73a   :  { %8639 = vsyncpa [#allocation6], 1 }
 0x73b   :  { %8640 = vsyncpa [#allocation9], 1 }
 0x73c   :  { %8641 = vsyncpa [#allocation12], 1 }
 0x73d   :  { %8642 = vsyncpa [#allocation4], 1 }

</bundles_post_ra>
